<compile_context>
chip_gen: v6e
topology: v6e:2x2x1
jax: 0.10.0
libtpu: 0.0.40
codegen_flags: <defaults>
</compile_context>

<pallas_src>
import functools

import jax
import jax.numpy as jnp
from jax.experimental import pallas as pl
from jax.experimental.pallas import tpu as pltpu

NUM_CLASS = 3
BN_EPS = 1e-5


# ----------------------------------------------------------------------------------
# Pallas kernels
# ----------------------------------------------------------------------------------
def _matmul_single_kernel(*refs, relu, has_residual):
    """Single-k-step matmul: dot -> + bias [+ residual] [ReLU] -> store. No scratch."""
    if has_residual:
        a_ref, b_ref, bias_ref, res_ref, o_ref = refs
    else:
        a_ref, b_ref, bias_ref, o_ref = refs
        res_ref = None
    r = jnp.dot(a_ref[...], b_ref[...], preferred_element_type=jnp.float32)
    r = r + bias_ref[...]                                   # (tm, tn) + (1, tn)
    if res_ref is not None:
        r = r + res_ref[...].astype(jnp.float32)            # fused residual add
    if relu:
        r = jnp.maximum(r, 0.0)
    o_ref[...] = r.astype(o_ref.dtype)


def _matmul_acc_kernel(*refs, relu, has_residual):
    """Multi-k-step matmul with f32 VMEM accumulator and fused epilogue on last k."""
    if has_residual:
        a_ref, b_ref, bias_ref, res_ref, o_ref, acc_ref = refs
    else:
        a_ref, b_ref, bias_ref, o_ref, acc_ref = refs
        res_ref = None

    @pl.when(pl.program_id(2) == 0)
    def _():
        acc_ref[...] = jnp.zeros_like(acc_ref)

    acc_ref[...] += jnp.dot(a_ref[...], b_ref[...], preferred_element_type=jnp.float32)

    @pl.when(pl.program_id(2) == pl.num_programs(2) - 1)
    def _():
        r = acc_ref[...] + bias_ref[...]
        if res_ref is not None:
            r = r + res_ref[...].astype(jnp.float32)
        if relu:
            r = jnp.maximum(r, 0.0)
        o_ref[...] = r.astype(o_ref.dtype)


def _maxpool_kernel(v0_ref, v1_ref, v2_ref, o_ref, *, ho_count, stride, win):
    """3x3/2 max pool. v*_ref: (Hp, N, Wo*C), already W-shifted+strided; pool H window here."""
    for ho in range(ho_count):                              # static unroll (Ho small)
        m = None
        for ref in (v0_ref, v1_ref, v2_ref):
            for dh in range(win):
                row = ref[ho * stride + dh]                 # (N, Wo*C) lane-dense
                m = row if m is None else jnp.maximum(m, row)
        o_ref[ho] = m


def _avgpool_fc_kernel(x_ref, w_ref, b_ref, o_ref):
    """Global avg pool over spatial axis fused with the fc head (padded to 128 lanes)."""
    feat = jnp.mean(x_ref[...].astype(jnp.float32), axis=1)          # (N, C)
    o_ref[...] = (jnp.dot(feat, w_ref[...], preferred_element_type=jnp.float32)
                  + b_ref[...])


# ----------------------------------------------------------------------------------
# Pallas wrappers
# ----------------------------------------------------------------------------------
def _round_up(x, m):
    return (x + m - 1) // m * m


def _choose_tk(kp):
    if kp <= 1024:
        return kp
    for tk in (1024, 768, 512, 384, 256, 128):
        if kp % tk == 0:
            return tk
    return 128


def matmul_bias(a, b_p, bias_p, *, relu, n_valid, residual=None, out_dtype=jnp.bfloat16):
    """(M,K) @ pre-padded (Kp,Np) weights + bias[1,Np]; optional fused residual + ReLU."""
    M, K = a.shape
    Kp, Np = b_p.shape

    tm = 128 if M > 128 else _round_up(M, 8)     # right-size tm for tiny deep-layer M
    Mp = _round_up(M, tm)
    tn = 256 if Np % 256 == 0 else 128           # 256-wide N tiles for wide layers
    tk = _choose_tk(Kp)
    kt = Kp // tk

    a_p = a.astype(jnp.bfloat16)
    if (Mp, Kp) != (M, K):
        a_p = jnp.pad(a_p, ((0, Mp - M), (0, Kp - K)))

    has_res = residual is not None
    if has_res:
        r_p = residual.astype(jnp.bfloat16)
        if r_p.shape != (Mp, Np):
            r_p = jnp.pad(r_p, ((0, Mp - r_p.shape[0]), (0, Np - r_p.shape[1])))

    if kt == 1:
        # Fast path: whole K fits one tile -> scratch-free kernel, 2-D parallel grid.
        in_specs = [
            pl.BlockSpec((tm, tk), lambda i, j: (i, 0)),
            pl.BlockSpec((tk, tn), lambda i, j: (0, j)),
            pl.BlockSpec((1, tn), lambda i, j: (0, j)),
        ]
        inputs = [a_p, b_p, bias_p]
        if has_res:
            in_specs.append(pl.BlockSpec((tm, tn), lambda i, j: (i, j)))
            inputs.append(r_p)
        out = pl.pallas_call(
            functools.partial(_matmul_single_kernel, relu=relu, has_residual=has_res),
            out_shape=jax.ShapeDtypeStruct((Mp, Np), out_dtype),
            grid_spec=pltpu.PrefetchScalarGridSpec(
                num_scalar_prefetch=0,
                grid=(Mp // tm, Np // tn),
                in_specs=in_specs,
                out_specs=pl.BlockSpec((tm, tn), lambda i, j: (i, j)),
            ),
            compiler_params=pltpu.CompilerParams(
                dimension_semantics=("parallel", "parallel")
            ),
        )(*inputs)
    else:
        in_specs = [
            pl.BlockSpec((tm, tk), lambda i, j, k: (i, k)),
            pl.BlockSpec((tk, tn), lambda i, j, k: (k, j)),
            pl.BlockSpec((1, tn), lambda i, j, k: (0, j)),
        ]
        inputs = [a_p, b_p, bias_p]
        if has_res:
            in_specs.append(pl.BlockSpec((tm, tn), lambda i, j, k: (i, j)))
            inputs.append(r_p)
        out = pl.pallas_call(
            functools.partial(_matmul_acc_kernel, relu=relu, has_residual=has_res),
            out_shape=jax.ShapeDtypeStruct((Mp, Np), out_dtype),
            grid_spec=pltpu.PrefetchScalarGridSpec(
                num_scalar_prefetch=0,
                grid=(Mp // tm, Np // tn, kt),
                in_specs=in_specs,
                out_specs=pl.BlockSpec((tm, tn), lambda i, j, k: (i, j)),
                scratch_shapes=[pltpu.VMEM((tm, tn), jnp.float32)],
            ),
            compiler_params=pltpu.CompilerParams(
                dimension_semantics=("parallel", "parallel", "arbitrary")
            ),
        )(*inputs)

    if (M, n_valid) != (Mp, Np):
        out = out[:M, :n_valid]
    return out


def maxpool_3x3_s2(x):
    """3x3 stride-2 pad-1 max pool on NHWC, matching nn.MaxPool2d(3, 2, 1)."""
    N, H, W, C = x.shape
    k, s, pad = 3, 2, 1
    Ho = (H + 2 * pad - k) // s + 1
    Wo = (W + 2 * pad - k) // s + 1
    Hp = H + 2 * pad
    neg = jnp.finfo(x.dtype).min
    xp = jnp.pad(x, ((0, 0), (pad, pad), (pad, pad), (0, 0)), constant_values=neg)
    xp = jnp.transpose(xp, (1, 0, 2, 3))                         # (Hp, N, Wp, C)
    # Three W-shifted, W-strided views (~1.3x activation traffic total); H window in-kernel.
    views = [xp[:, :, dw:dw + s * Wo:s, :].reshape(Hp, N, Wo * C) for dw in range(k)]
    out = pl.pallas_call(
        functools.partial(_maxpool_kernel, ho_count=Ho, stride=s, win=k),
        out_shape=jax.ShapeDtypeStruct((Ho, N, Wo * C), x.dtype),
    )(*views)
    return jnp.transpose(out.reshape(Ho, N, Wo, C), (1, 0, 2, 3))  # (N, Ho, Wo, C)


def avgpool_fc(x_nhwc, fc_w, fc_b):
    """AdaptiveAvgPool2d((1,1)) fused with the fc head. Returns (N, NUM_CLASS) f32."""
    N, H, W, C = x_nhwc.shape
    out = pl.pallas_call(
        _avgpool_fc_kernel,
        out_shape=jax.ShapeDtypeStruct((N, fc_w.shape[1]), jnp.float32),
    )(x_nhwc.reshape(N, H * W, C), fc_w, fc_b)
    return out[:, :NUM_CLASS]


# ----------------------------------------------------------------------------------
# Conv-as-im2col glue (XLA side, bf16)
# ----------------------------------------------------------------------------------
def _im2col(x, kh, kw, stride, pad):
    N, H, W, C = x.shape
    Ho = (H + 2 * pad - kh) // stride + 1
    Wo = (W + 2 * pad - kw) // stride + 1
    xp = jnp.pad(x, ((0, 0), (pad, pad), (pad, pad), (0, 0))) if pad else x
    cols = []
    for dh in range(kh):
        for dw in range(kw):
            cols.append(xp[:, dh:dh + stride * Ho:stride, dw:dw + stride * Wo:stride, :])
    patches = jnp.concatenate(cols, axis=-1)                 # (N, Ho, Wo, kh*kw*C), bf16
    return patches.reshape(N * Ho * Wo, kh * kw * C), Ho, Wo


def conv_bn(x, p, kh, kw, cout, stride, pad, relu, residual=None):
    """Conv2d (bias=False) + folded BN, optional fused residual-add + ReLU."""
    cols, Ho, Wo = _im2col(x, kh, kw, stride, pad)
    M = cols.shape[0]
    res2d = None if residual is None else residual.reshape(M, cout)
    out = matmul_bias(cols, p["w"], p["b"], relu=relu, n_valid=cout,
                      residual=res2d, out_dtype=jnp.bfloat16)
    return out.reshape(x.shape[0], Ho, Wo, cout)


def basic_block(x, bp, cout, stride):
    out = conv_bn(x, bp["conv1"], 3, 3, cout, stride, 1, relu=True)
    if "downsample" in bp:
        identity = conv_bn(x, bp["downsample"], 1, 1, cout, stride, 0, relu=False)
    else:
        identity = x
    # conv2 with the residual add + ReLU fused into its matmul epilogue.
    return conv_bn(out, bp["conv2"], 3, 3, cout, 1, 1, relu=True, residual=identity)


def resnet18_forward(image_nchw, params):
    x = jnp.transpose(image_nchw, (0, 2, 3, 1)).astype(jnp.bfloat16)   # NCHW -> NHWC bf16
    x = conv_bn(x, params["conv1"], 7, 7, 64, 2, 3, relu=True)
    x = maxpool_3x3_s2(x)
    widths = (64, 128, 256, 512)
    for li in range(1, 5):
        blocks = params[f"layer{li}"]
        cout = widths[li - 1]
        stride = 1 if li == 1 else 2
        x = basic_block(x, blocks[0], cout, stride)
        x = basic_block(x, blocks[1], cout, 1)
    return avgpool_fc(x, params["fc"]["w"], params["fc"]["b"])          # (N, NUM_CLASS)


# ----------------------------------------------------------------------------------
# Parameter construction: synthetic ResNet-18 weights, BN folded + matmul layout hoisted
# ----------------------------------------------------------------------------------
def _prep_conv(w_folded, b_folded):
    """(Cout,Cin,kh,kw) folded weight -> padded bf16 (Kp, Np) + padded f32 bias (1, Np)."""
    cout, cin, kh, kw = w_folded.shape
    K = kh * kw * cin
    Kp, Np = _round_up(K, 128), _round_up(cout, 128)
    w2 = jnp.transpose(w_folded, (2, 3, 1, 0)).reshape(K, cout)     # (dh, dw, cin) major->minor
    w2 = jnp.pad(w2, ((0, Kp - K), (0, Np - cout))).astype(jnp.bfloat16)
    b2 = jnp.pad(b_folded.reshape(1, cout), ((0, 0), (0, Np - cout))).astype(jnp.float32)
    return {"w": w2, "b": b2}


def build_params(key):
    keys = iter(jax.random.split(key, 128))

    def conv_bn_params(cin, cout, k):
        w = jax.random.normal(next(keys), (cout, cin, k, k), jnp.float32) * jnp.sqrt(
            2.0 / (cin * k * k)
        )
        gamma = 1.0 + 0.1 * jax.random.normal(next(keys), (cout,), jnp.float32)
        beta = 0.1 * jax.random.normal(next(keys), (cout,), jnp.float32)
        mean = 0.1 * jax.random.normal(next(keys), (cout,), jnp.float32)
        var = 1.0 + 0.1 * jnp.abs(jax.random.normal(next(keys), (cout,), jnp.float32))
        scale = gamma / jnp.sqrt(var + BN_EPS)                   # exact inference folding
        return _prep_conv(w * scale[:, None, None, None], beta - mean * scale)

    params = {"conv1": conv_bn_params(3, 64, 7)}
    cfg = [(64, 64, 1), (64, 128, 2), (128, 256, 2), (256, 512, 2)]
    for li, (cin, cout, stride) in enumerate(cfg, start=1):
        b0 = {"conv1": conv_bn_params(cin, cout, 3), "conv2": conv_bn_params(cout, cout, 3)}
        if stride != 1 or cin != cout:
            b0["downsample"] = conv_bn_params(cin, cout, 1)
        b1 = {"conv1": conv_bn_params(cout, cout, 3), "conv2": conv_bn_params(cout, cout, 3)}
        params[f"layer{li}"] = [b0, b1]

    w_fc = jax.random.normal(next(keys), (NUM_CLASS, 512), jnp.float32) * jnp.sqrt(1.0 / 512)
    b_fc = 0.01 * jax.random.normal(next(keys), (NUM_CLASS,), jnp.float32)
    Np = _round_up(NUM_CLASS, 128)
    params["fc"] = {
        "w": jnp.pad(w_fc.T, ((0, 0), (0, Np - NUM_CLASS))),     # (512, 128) f32
        "b": jnp.pad(b_fc.reshape(1, NUM_CLASS), ((0, 0), (0, Np - NUM_CLASS))),
    }
    return params


# ----------------------------------------------------------------------------------
if __name__ == "__main__":
    key = jax.random.PRNGKey(0)
    pkey, xkey = jax.random.split(key)
    params = build_params(pkey)
    # Small input consistent with ResNet-18 downsampling (factor 32): (N=2, C=3, 32, 32)
    image = jax.random.normal(xkey, (2, 3, 32, 32), jnp.float32)

    fwd = jax.jit(resnet18_forward)
    logits = jax.block_until_ready(fwd(image, params))

    assert logits.shape == (2, NUM_CLASS), logits.shape
    assert logits.dtype == jnp.float32
    assert bool(jnp.all(jnp.isfinite(logits)))
    print("KERNEL_OK")
</pallas_src>

<mosaic_0001>
module attributes {stable_mosaic.version = 11 : i64} {
  func.func @_matmul_single_kernel(%arg0: i32, %arg1: i32, %arg2: memref<128x256xbf16, #tpu.memory_space<vmem>>, %arg3: memref<256x128xbf16, #tpu.memory_space<vmem>>, %arg4: memref<1x128xf32, #tpu.memory_space<vmem>>, %arg5: memref<128x128xbf16, #tpu.memory_space<vmem>>) attributes {dimension_semantics = [#tpu.dimension_semantics<parallel>, #tpu.dimension_semantics<parallel>], iteration_bounds = array<i64: 4, 1>, scalar_prefetch = 0 : i64, scratch_operands = 0 : i64, tpu.core_type = #tpu.core_type<tc>, window_params = [{transform_indices = @transform_0, window_bounds = array<i64: 128, 256>}, {transform_indices = @transform_1, window_bounds = array<i64: 256, 128>}, {transform_indices = @transform_2, window_bounds = array<i64: 1, 128>}, {transform_indices = @transform_3, window_bounds = array<i64: 128, 128>}]} {
    %c0 = arith.constant 0 : index
    %c0_0 = arith.constant 0 : index
    %0 = vector.load %arg2[%c0, %c0_0] : memref<128x256xbf16, #tpu.memory_space<vmem>>, vector<128x256xbf16>
    %c0_1 = arith.constant 0 : index
    %c0_2 = arith.constant 0 : index
    %1 = vector.load %arg3[%c0_1, %c0_2] : memref<256x128xbf16, #tpu.memory_space<vmem>>, vector<256x128xbf16>
    %cst = arith.constant dense<0.000000e+00> : vector<128x128xf32>
    %2 = tpu.matmul %0, %1, %cst {dimension_numbers = #tpu.dot_dimension_numbers<[1], [0], [0], [1], [0, 0, 1, 1], [], []>} : vector<128x256xbf16>, vector<256x128xbf16>, vector<128x128xf32> -> vector<128x128xf32>
    %c0_3 = arith.constant 0 : index
    %c0_4 = arith.constant 0 : index
    %3 = vector.load %arg4[%c0_3, %c0_4] : memref<1x128xf32, #tpu.memory_space<vmem>>, vector<1x128xf32>
    %4 = vector.broadcast %3 : vector<1x128xf32> to vector<128x128xf32>
    %5 = arith.addf %2, %4 : vector<128x128xf32>
    %cst_5 = arith.constant 0.000000e+00 : f32
    %6 = vector.broadcast %cst_5 : f32 to vector<128x128xf32>
    %7 = arith.maximumf %5, %6 : vector<128x128xf32>
    %8 = arith.truncf %7 : vector<128x128xf32> to vector<128x128xbf16>
    %c0_6 = arith.constant 0 : index
    %c0_7 = arith.constant 0 : index
    %9 = vector.load %arg5[%c0_6, %c0_7] : memref<128x128xbf16, #tpu.memory_space<vmem>>, vector<128x128xbf16>
    tpu.vector_store %arg5[%c0_6, %c0_7], %8 {strides = array<i32>} : memref<128x128xbf16, #tpu.memory_space<vmem>>, vector<128x128xbf16>,
    return
  }
  func.func @transform_0(%arg0: i32, %arg1: i32) -> (i32, i32) {
    %c0_i32 = arith.constant 0 : i32
    %c0_i32_0 = arith.constant 0 : i32
    return %arg0, %c0_i32 : i32, i32
  }
  func.func @transform_1(%arg0: i32, %arg1: i32) -> (i32, i32) {
    %c0_i32 = arith.constant 0 : i32
    %c0_i32_0 = arith.constant 0 : i32
    return %c0_i32, %arg1 : i32, i32
  }
  func.func @transform_2(%arg0: i32, %arg1: i32) -> (i32, i32) {
    %c0_i32 = arith.constant 0 : i32
    %c0_i32_0 = arith.constant 0 : i32
    return %c0_i32, %arg1 : i32, i32
  }
  func.func @transform_3(%arg0: i32, %arg1: i32) -> (i32, i32) {
    %c0_i32 = arith.constant 0 : i32
    return %arg0, %arg1 : i32, i32
  }
}

module attributes {stable_mosaic.version = 11 : i64} {
  func.func @_maxpool_kernel(%arg0: memref<18x2x512xbf16, #tpu.memory_space<vmem>>, %arg1: memref<18x2x512xbf16, #tpu.memory_space<vmem>>, %arg2: memref<18x2x512xbf16, #tpu.memory_space<vmem>>, %arg3: memref<8x2x512xbf16, #tpu.memory_space<vmem>>) attributes {dimension_semantics = [], scalar_prefetch = 0 : i64, scratch_operands = 0 : i64, tpu.core_type = #tpu.core_type<tc>} {
    %c0 = arith.constant 0 : index
    %c0_0 = arith.constant 0 : index
    %c0_1 = arith.constant 0 : index
    %0 = vector.load %arg0[%c0, %c0_0, %c0_1] : memref<18x2x512xbf16, #tpu.memory_space<vmem>>, vector<1x2x512xbf16>
    %1 = vector.shape_cast %0 : vector<1x2x512xbf16> to vector<2x512xbf16>
    %c1 = arith.constant 1 : index
    %c0_2 = arith.constant 0 : index
    %c0_3 = arith.constant 0 : index
    %2 = vector.load %arg0[%c1, %c0_2, %c0_3] : memref<18x2x512xbf16, #tpu.memory_space<vmem>>, vector<1x2x512xbf16>
    %3 = vector.shape_cast %2 : vector<1x2x512xbf16> to vector<2x512xbf16>
    %4 = arith.maximumf %1, %3 : vector<2x512xbf16>
    %c2 = arith.constant 2 : index
    %c0_4 = arith.constant 0 : index
    %c0_5 = arith.constant 0 : index
    %5 = vector.load %arg0[%c2, %c0_4, %c0_5] : memref<18x2x512xbf16, #tpu.memory_space<vmem>>, vector<1x2x512xbf16>
    %6 = vector.shape_cast %5 : vector<1x2x512xbf16> to vector<2x512xbf16>
    %7 = arith.maximumf %4, %6 : vector<2x512xbf16>
    %c0_6 = arith.constant 0 : index
    %c0_7 = arith.constant 0 : index
    %c0_8 = arith.constant 0 : index
    %8 = vector.load %arg1[%c0_6, %c0_7, %c0_8] : memref<18x2x512xbf16, #tpu.memory_space<vmem>>, vector<1x2x512xbf16>
    %9 = vector.shape_cast %8 : vector<1x2x512xbf16> to vector<2x512xbf16>
    %10 = arith.maximumf %7, %9 : vector<2x512xbf16>
    %c1_9 = arith.constant 1 : index
    %c0_10 = arith.constant 0 : index
    %c0_11 = arith.constant 0 : index
    %11 = vector.load %arg1[%c1_9, %c0_10, %c0_11] : memref<18x2x512xbf16, #tpu.memory_space<vmem>>, vector<1x2x512xbf16>
    %12 = vector.shape_cast %11 : vector<1x2x512xbf16> to vector<2x512xbf16>
    %13 = arith.maximumf %10, %12 : vector<2x512xbf16>
    %c2_12 = arith.constant 2 : index
    %c0_13 = arith.constant 0 : index
    %c0_14 = arith.constant 0 : index
    %14 = vector.load %arg1[%c2_12, %c0_13, %c0_14] : memref<18x2x512xbf16, #tpu.memory_space<vmem>>, vector<1x2x512xbf16>
    %15 = vector.shape_cast %14 : vector<1x2x512xbf16> to vector<2x512xbf16>
    %16 = arith.maximumf %13, %15 : vector<2x512xbf16>
    %c0_15 = arith.constant 0 : index
    %c0_16 = arith.constant 0 : index
    %c0_17 = arith.constant 0 : index
    %17 = vector.load %arg2[%c0_15, %c0_16, %c0_17] : memref<18x2x512xbf16, #tpu.memory_space<vmem>>, vector<1x2x512xbf16>
    %18 = vector.shape_cast %17 : vector<1x2x512xbf16> to vector<2x512xbf16>
    %19 = arith.maximumf %16, %18 : vector<2x512xbf16>
    %c1_18 = arith.constant 1 : index
    %c0_19 = arith.constant 0 : index
    %c0_20 = arith.constant 0 : index
    %20 = vector.load %arg2[%c1_18, %c0_19, %c0_20] : memref<18x2x512xbf16, #tpu.memory_space<vmem>>, vector<1x2x512xbf16>
    %21 = vector.shape_cast %20 : vector<1x2x512xbf16> to vector<2x512xbf16>
    %22 = arith.maximumf %19, %21 : vector<2x512xbf16>
    %c2_21 = arith.constant 2 : index
    %c0_22 = arith.constant 0 : index
    %c0_23 = arith.constant 0 : index
    %23 = vector.load %arg2[%c2_21, %c0_22, %c0_23] : memref<18x2x512xbf16, #tpu.memory_space<vmem>>, vector<1x2x512xbf16>
    %24 = vector.shape_cast %23 : vector<1x2x512xbf16> to vector<2x512xbf16>
    %25 = arith.maximumf %22, %24 : vector<2x512xbf16>
    %c0_24 = arith.constant 0 : index
    %c0_25 = arith.constant 0 : index
    %c0_26 = arith.constant 0 : index
    %26 = vector.load %arg3[%c0_24, %c0_25, %c0_26] : memref<8x2x512xbf16, #tpu.memory_space<vmem>>, vector<1x2x512xbf16>
    %27 = vector.shape_cast %26 : vector<1x2x512xbf16> to vector<2x512xbf16>
    %28 = vector.shape_cast %25 : vector<2x512xbf16> to vector<1x2x512xbf16>
    tpu.vector_store %arg3[%c0_24, %c0_25, %c0_26], %28 {strides = array<i32>} : memref<8x2x512xbf16, #tpu.memory_space<vmem>>, vector<1x2x512xbf16>,
    %c2_27 = arith.constant 2 : index
    %c0_28 = arith.constant 0 : index
    %c0_29 = arith.constant 0 : index
    %29 = vector.load %arg0[%c2_27, %c0_28, %c0_29] : memref<18x2x512xbf16, #tpu.memory_space<vmem>>, vector<1x2x512xbf16>
    %30 = vector.shape_cast %29 : vector<1x2x512xbf16> to vector<2x512xbf16>
    %c3 = arith.constant 3 : index
    %c0_30 = arith.constant 0 : index
    %c0_31 = arith.constant 0 : index
    %31 = vector.load %arg0[%c3, %c0_30, %c0_31] : memref<18x2x512xbf16, #tpu.memory_space<vmem>>, vector<1x2x512xbf16>
    %32 = vector.shape_cast %31 : vector<1x2x512xbf16> to vector<2x512xbf16>
    %33 = arith.maximumf %30, %32 : vector<2x512xbf16>
    %c4 = arith.constant 4 : index
    %c0_32 = arith.constant 0 : index
    %c0_33 = arith.constant 0 : index
    %34 = vector.load %arg0[%c4, %c0_32, %c0_33] : memref<18x2x512xbf16, #tpu.memory_space<vmem>>, vector<1x2x512xbf16>
    %35 = vector.shape_cast %34 : vector<1x2x512xbf16> to vector<2x512xbf16>
    %36 = arith.maximumf %33, %35 : vector<2x512xbf16>
    %c2_34 = arith.constant 2 : index
    %c0_35 = arith.constant 0 : index
    %c0_36 = arith.constant 0 : index
    %37 = vector.load %arg1[%c2_34, %c0_35, %c0_36] : memref<18x2x512xbf16, #tpu.memory_space<vmem>>, vector<1x2x512xbf16>
    %38 = vector.shape_cast %37 : vector<1x2x512xbf16> to vector<2x512xbf16>
    %39 = arith.maximumf %36, %38 : vector<2x512xbf16>
    %c3_37 = arith.constant 3 : index
    %c0_38 = arith.constant 0 : index
    %c0_39 = arith.constant 0 : index
    %40 = vector.load %arg1[%c3_37, %c0_38, %c0_39] : memref<18x2x512xbf16, #tpu.memory_space<vmem>>, vector<1x2x512xbf16>
    %41 = vector.shape_cast %40 : vector<1x2x512xbf16> to vector<2x512xbf16>
    %42 = arith.maximumf %39, %41 : vector<2x512xbf16>
    %c4_40 = arith.constant 4 : index
    %c0_41 = arith.constant 0 : index
    %c0_42 = arith.constant 0 : index
    %43 = vector.load %arg1[%c4_40, %c0_41, %c0_42] : memref<18x2x512xbf16, #tpu.memory_space<vmem>>, vector<1x2x512xbf16>
    %44 = vector.shape_cast %43 : vector<1x2x512xbf16> to vector<2x512xbf16>
    %45 = arith.maximumf %42, %44 : vector<2x512xbf16>
    %c2_43 = arith.constant 2 : index
    %c0_44 = arith.constant 0 : index
    %c0_45 = arith.constant 0 : index
    %46 = vector.load %arg2[%c2_43, %c0_44, %c0_45] : memref<18x2x512xbf16, #tpu.memory_space<vmem>>, vector<1x2x512xbf16>
    %47 = vector.shape_cast %46 : vector<1x2x512xbf16> to vector<2x512xbf16>
    %48 = arith.maximumf %45, %47 : vector<2x512xbf16>
    %c3_46 = arith.constant 3 : index
    %c0_47 = arith.constant 0 : index
    %c0_48 = arith.constant 0 : index
    %49 = vector.load %arg2[%c3_46, %c0_47, %c0_48] : memref<18x2x512xbf16, #tpu.memory_space<vmem>>, vector<1x2x512xbf16>
    %50 = vector.shape_cast %49 : vector<1x2x512xbf16> to vector<2x512xbf16>
    %51 = arith.maximumf %48, %50 : vector<2x512xbf16>
    %c4_49 = arith.constant 4 : index
    %c0_50 = arith.constant 0 : index
    %c0_51 = arith.constant 0 : index
    %52 = vector.load %arg2[%c4_49, %c0_50, %c0_51] : memref<18x2x512xbf16, #tpu.memory_space<vmem>>, vector<1x2x512xbf16>
    %53 = vector.shape_cast %52 : vector<1x2x512xbf16> to vector<2x512xbf16>
    %54 = arith.maximumf %51, %53 : vector<2x512xbf16>
    %c1_52 = arith.constant 1 : index
    %c0_53 = arith.constant 0 : index
    %c0_54 = arith.constant 0 : index
    %55 = vector.load %arg3[%c1_52, %c0_53, %c0_54] : memref<8x2x512xbf16, #tpu.memory_space<vmem>>, vector<1x2x512xbf16>
    %56 = vector.shape_cast %55 : vector<1x2x512xbf16> to vector<2x512xbf16>
    %57 = vector.shape_cast %54 : vector<2x512xbf16> to vector<1x2x512xbf16>
    tpu.vector_store %arg3[%c1_52, %c0_53, %c0_54], %57 {strides = array<i32>} : memref<8x2x512xbf16, #tpu.memory_space<vmem>>, vector<1x2x512xbf16>,
    %c4_55 = arith.constant 4 : index
    %c0_56 = arith.constant 0 : index
    %c0_57 = arith.constant 0 : index
    %58 = vector.load %arg0[%c4_55, %c0_56, %c0_57] : memref<18x2x512xbf16, #tpu.memory_space<vmem>>, vector<1x2x512xbf16>
    %59 = vector.shape_cast %58 : vector<1x2x512xbf16> to vector<2x512xbf16>
    %c5 = arith.constant 5 : index
    %c0_58 = arith.constant 0 : index
    %c0_59 = arith.constant 0 : index
    %60 = vector.load %arg0[%c5, %c0_58, %c0_59] : memref<18x2x512xbf16, #tpu.memory_space<vmem>>, vector<1x2x512xbf16>
    %61 = vector.shape_cast %60 : vector<1x2x512xbf16> to vector<2x512xbf16>
    %62 = arith.maximumf %59, %61 : vector<2x512xbf16>
    %c6 = arith.constant 6 : index
    %c0_60 = arith.constant 0 : index
    %c0_61 = arith.constant 0 : index
    %63 = vector.load %arg0[%c6, %c0_60, %c0_61] : memref<18x2x512xbf16, #tpu.memory_space<vmem>>, vector<1x2x512xbf16>
    %64 = vector.shape_cast %63 : vector<1x2x512xbf16> to vector<2x512xbf16>
    %65 = arith.maximumf %62, %64 : vector<2x512xbf16>
    %c4_62 = arith.constant 4 : index
    %c0_63 = arith.constant 0 : index
    %c0_64 = arith.constant 0 : index
    %66 = vector.load %arg1[%c4_62, %c0_63, %c0_64] : memref<18x2x512xbf16, #tpu.memory_space<vmem>>, vector<1x2x512xbf16>
    %67 = vector.shape_cast %66 : vector<1x2x512xbf16> to vector<2x512xbf16>
    %68 = arith.maximumf %65, %67 : vector<2x512xbf16>
    %c5_65 = arith.constant 5 : index
    %c0_66 = arith.constant 0 : index
    %c0_67 = arith.constant 0 : index
    %69 = vector.load %arg1[%c5_65, %c0_66, %c0_67] : memref<18x2x512xbf16, #tpu.memory_space<vmem>>, vector<1x2x512xbf16>
    %70 = vector.shape_cast %69 : vector<1x2x512xbf16> to vector<2x512xbf16>
    %71 = arith.maximumf %68, %70 : vector<2x512xbf16>
    %c6_68 = arith.constant 6 : index
    %c0_69 = arith.constant 0 : index
    %c0_70 = arith.constant 0 : index
    %72 = vector.load %arg1[%c6_68, %c0_69, %c0_70] : memref<18x2x512xbf16, #tpu.memory_space<vmem>>, vector<1x2x512xbf16>
    %73 = vector.shape_cast %72 : vector<1x2x512xbf16> to vector<2x512xbf16>
    %74 = arith.maximumf %71, %73 : vector<2x512xbf16>
    %c4_71 = arith.constant 4 : index
    %c0_72 = arith.constant 0 : index
    %c0_73 = arith.constant 0 : index
    %75 = vector.load %arg2[%c4_71, %c0_72, %c0_73] : memref<18x2x512xbf16, #tpu.memory_space<vmem>>, vector<1x2x512xbf16>
    %76 = vector.shape_cast %75 : vector<1x2x512xbf16> to vector<2x512xbf16>
    %77 = arith.maximumf %74, %76 : vector<2x512xbf16>
    %c5_74 = arith.constant 5 : index
    %c0_75 = arith.constant 0 : index
    %c0_76 = arith.constant 0 : index
    %78 = vector.load %arg2[%c5_74, %c0_75, %c0_76] : memref<18x2x512xbf16, #tpu.memory_space<vmem>>, vector<1x2x512xbf16>
    %79 = vector.shape_cast %78 : vector<1x2x512xbf16> to vector<2x512xbf16>
    %80 = arith.maximumf %77, %79 : vector<2x512xbf16>
    %c6_77 = arith.constant 6 : index
    %c0_78 = arith.constant 0 : index
    %c0_79 = arith.constant 0 : index
    %81 = vector.load %arg2[%c6_77, %c0_78, %c0_79] : memref<18x2x512xbf16, #tpu.memory_space<vmem>>, vector<1x2x512xbf16>
    %82 = vector.shape_cast %81 : vector<1x2x512xbf16> to vector<2x512xbf16>
    %83 = arith.maximumf %80, %82 : vector<2x512xbf16>
    %c2_80 = arith.constant 2 : index
    %c0_81 = arith.constant 0 : index
    %c0_82 = arith.constant 0 : index
    %84 = vector.load %arg3[%c2_80, %c0_81, %c0_82] : memref<8x2x512xbf16, #tpu.memory_space<vmem>>, vector<1x2x512xbf16>
    %85 = vector.shape_cast %84 : vector<1x2x512xbf16> to vector<2x512xbf16>
    %86 = vector.shape_cast %83 : vector<2x512xbf16> to vector<1x2x512xbf16>
    tpu.vector_store %arg3[%c2_80, %c0_81, %c0_82], %86 {strides = array<i32>} : memref<8x2x512xbf16, #tpu.memory_space<vmem>>, vector<1x2x512xbf16>,
    %c6_83 = arith.constant 6 : index
    %c0_84 = arith.constant 0 : index
    %c0_85 = arith.constant 0 : index
    %87 = vector.load %arg0[%c6_83, %c0_84, %c0_85] : memref<18x2x512xbf16, #tpu.memory_space<vmem>>, vector<1x2x512xbf16>
    %88 = vector.shape_cast %87 : vector<1x2x512xbf16> to vector<2x512xbf16>
    %c7 = arith.constant 7 : index
    %c0_86 = arith.constant 0 : index
    %c0_87 = arith.constant 0 : index
    %89 = vector.load %arg0[%c7, %c0_86, %c0_87] : memref<18x2x512xbf16, #tpu.memory_space<vmem>>, vector<1x2x512xbf16>
    %90 = vector.shape_cast %89 : vector<1x2x512xbf16> to vector<2x512xbf16>
    %91 = arith.maximumf %88, %90 : vector<2x512xbf16>
    %c8 = arith.constant 8 : index
    %c0_88 = arith.constant 0 : index
    %c0_89 = arith.constant 0 : index
    %92 = vector.load %arg0[%c8, %c0_88, %c0_89] : memref<18x2x512xbf16, #tpu.memory_space<vmem>>, vector<1x2x512xbf16>
    %93 = vector.shape_cast %92 : vector<1x2x512xbf16> to vector<2x512xbf16>
    %94 = arith.maximumf %91, %93 : vector<2x512xbf16>
    %c6_90 = arith.constant 6 : index
    %c0_91 = arith.constant 0 : index
    %c0_92 = arith.constant 0 : index
    %95 = vector.load %arg1[%c6_90, %c0_91, %c0_92] : memref<18x2x512xbf16, #tpu.memory_space<vmem>>, vector<1x2x512xbf16>
    %96 = vector.shape_cast %95 : vector<1x2x512xbf16> to vector<2x512xbf16>
    %97 = arith.maximumf %94, %96 : vector<2x512xbf16>
    %c7_93 = arith.constant 7 : index
    %c0_94 = arith.constant 0 : index
    %c0_95 = arith.constant 0 : index
    %98 = vector.load %arg1[%c7_93, %c0_94, %c0_95] : memref<18x2x512xbf16, #tpu.memory_space<vmem>>, vector<1x2x512xbf16>
    %99 = vector.shape_cast %98 : vector<1x2x512xbf16> to vector<2x512xbf16>
    %100 = arith.maximumf %97, %99 : vector<2x512xbf16>
    %c8_96 = arith.constant 8 : index
    %c0_97 = arith.constant 0 : index
    %c0_98 = arith.constant 0 : index
    %101 = vector.load %arg1[%c8_96, %c0_97, %c0_98] : memref<18x2x512xbf16, #tpu.memory_space<vmem>>, vector<1x2x512xbf16>
    %102 = vector.shape_cast %101 : vector<1x2x512xbf16> to vector<2x512xbf16>
    %103 = arith.maximumf %100, %102 : vector<2x512xbf16>
    %c6_99 = arith.constant 6 : index
    %c0_100 = arith.constant 0 : index
    %c0_101 = arith.constant 0 : index
    %104 = vector.load %arg2[%c6_99, %c0_100, %c0_101] : memref<18x2x512xbf16, #tpu.memory_space<vmem>>, vector<1x2x512xbf16>
    %105 = vector.shape_cast %104 : vector<1x2x512xbf16> to vector<2x512xbf16>
    %106 = arith.maximumf %103, %105 : vector<2x512xbf16>
    %c7_102 = arith.constant 7 : index
    %c0_103 = arith.constant 0 : index
    %c0_104 = arith.constant 0 : index
    %107 = vector.load %arg2[%c7_102, %c0_103, %c0_104] : memref<18x2x512xbf16, #tpu.memory_space<vmem>>, vector<1x2x512xbf16>
    %108 = vector.shape_cast %107 : vector<1x2x512xbf16> to vector<2x512xbf16>
    %109 = arith.maximumf %106, %108 : vector<2x512xbf16>
    %c8_105 = arith.constant 8 : index
    %c0_106 = arith.constant 0 : index
    %c0_107 = arith.constant 0 : index
    %110 = vector.load %arg2[%c8_105, %c0_106, %c0_107] : memref<18x2x512xbf16, #tpu.memory_space<vmem>>, vector<1x2x512xbf16>
    %111 = vector.shape_cast %110 : vector<1x2x512xbf16> to vector<2x512xbf16>
    %112 = arith.maximumf %109, %111 : vector<2x512xbf16>
    %c3_108 = arith.constant 3 : index
    %c0_109 = arith.constant 0 : index
    %c0_110 = arith.constant 0 : index
    %113 = vector.load %arg3[%c3_108, %c0_109, %c0_110] : memref<8x2x512xbf16, #tpu.memory_space<vmem>>, vector<1x2x512xbf16>
    %114 = vector.shape_cast %113 : vector<1x2x512xbf16> to vector<2x512xbf16>
    %115 = vector.shape_cast %112 : vector<2x512xbf16> to vector<1x2x512xbf16>
    tpu.vector_store %arg3[%c3_108, %c0_109, %c0_110], %115 {strides = array<i32>} : memref<8x2x512xbf16, #tpu.memory_space<vmem>>, vector<1x2x512xbf16>,
    %c8_111 = arith.constant 8 : index
    %c0_112 = arith.constant 0 : index
    %c0_113 = arith.constant 0 : index
    %116 = vector.load %arg0[%c8_111, %c0_112, %c0_113] : memref<18x2x512xbf16, #tpu.memory_space<vmem>>, vector<1x2x512xbf16>
    %117 = vector.shape_cast %116 : vector<1x2x512xbf16> to vector<2x512xbf16>
    %c9 = arith.constant 9 : index
    %c0_114 = arith.constant 0 : index
    %c0_115 = arith.constant 0 : index
    %118 = vector.load %arg0[%c9, %c0_114, %c0_115] : memref<18x2x512xbf16, #tpu.memory_space<vmem>>, vector<1x2x512xbf16>
    %119 = vector.shape_cast %118 : vector<1x2x512xbf16> to vector<2x512xbf16>
    %120 = arith.maximumf %117, %119 : vector<2x512xbf16>
    %c10 = arith.constant 10 : index
    %c0_116 = arith.constant 0 : index
    %c0_117 = arith.constant 0 : index
    %121 = vector.load %arg0[%c10, %c0_116, %c0_117] : memref<18x2x512xbf16, #tpu.memory_space<vmem>>, vector<1x2x512xbf16>
    %122 = vector.shape_cast %121 : vector<1x2x512xbf16> to vector<2x512xbf16>
    %123 = arith.maximumf %120, %122 : vector<2x512xbf16>
    %c8_118 = arith.constant 8 : index
    %c0_119 = arith.constant 0 : index
    %c0_120 = arith.constant 0 : index
    %124 = vector.load %arg1[%c8_118, %c0_119, %c0_120] : memref<18x2x512xbf16, #tpu.memory_space<vmem>>, vector<1x2x512xbf16>
    %125 = vector.shape_cast %124 : vector<1x2x512xbf16> to vector<2x512xbf16>
    %126 = arith.maximumf %123, %125 : vector<2x512xbf16>
    %c9_121 = arith.constant 9 : index
    %c0_122 = arith.constant 0 : index
    %c0_123 = arith.constant 0 : index
    %127 = vector.load %arg1[%c9_121, %c0_122, %c0_123] : memref<18x2x512xbf16, #tpu.memory_space<vmem>>, vector<1x2x512xbf16>
    %128 = vector.shape_cast %127 : vector<1x2x512xbf16> to vector<2x512xbf16>
    %129 = arith.maximumf %126, %128 : vector<2x512xbf16>
    %c10_124 = arith.constant 10 : index
    %c0_125 = arith.constant 0 : index
    %c0_126 = arith.constant 0 : index
    %130 = vector.load %arg1[%c10_124, %c0_125, %c0_126] : memref<18x2x512xbf16, #tpu.memory_space<vmem>>, vector<1x2x512xbf16>
    %131 = vector.shape_cast %130 : vector<1x2x512xbf16> to vector<2x512xbf16>
    %132 = arith.maximumf %129, %131 : vector<2x512xbf16>
    %c8_127 = arith.constant 8 : index
    %c0_128 = arith.constant 0 : index
    %c0_129 = arith.constant 0 : index
    %133 = vector.load %arg2[%c8_127, %c0_128, %c0_129] : memref<18x2x512xbf16, #tpu.memory_space<vmem>>, vector<1x2x512xbf16>
    %134 = vector.shape_cast %133 : vector<1x2x512xbf16> to vector<2x512xbf16>
    %135 = arith.maximumf %132, %134 : vector<2x512xbf16>
    %c9_130 = arith.constant 9 : index
    %c0_131 = arith.constant 0 : index
    %c0_132 = arith.constant 0 : index
    %136 = vector.load %arg2[%c9_130, %c0_131, %c0_132] : memref<18x2x512xbf16, #tpu.memory_space<vmem>>, vector<1x2x512xbf16>
    %137 = vector.shape_cast %136 : vector<1x2x512xbf16> to vector<2x512xbf16>
    %138 = arith.maximumf %135, %137 : vector<2x512xbf16>
    %c10_133 = arith.constant 10 : index
    %c0_134 = arith.constant 0 : index
    %c0_135 = arith.constant 0 : index
    %139 = vector.load %arg2[%c10_133, %c0_134, %c0_135] : memref<18x2x512xbf16, #tpu.memory_space<vmem>>, vector<1x2x512xbf16>
    %140 = vector.shape_cast %139 : vector<1x2x512xbf16> to vector<2x512xbf16>
    %141 = arith.maximumf %138, %140 : vector<2x512xbf16>
    %c4_136 = arith.constant 4 : index
    %c0_137 = arith.constant 0 : index
    %c0_138 = arith.constant 0 : index
    %142 = vector.load %arg3[%c4_136, %c0_137, %c0_138] : memref<8x2x512xbf16, #tpu.memory_space<vmem>>, vector<1x2x512xbf16>
    %143 = vector.shape_cast %142 : vector<1x2x512xbf16> to vector<2x512xbf16>
    %144 = vector.shape_cast %141 : vector<2x512xbf16> to vector<1x2x512xbf16>
    tpu.vector_store %arg3[%c4_136, %c0_137, %c0_138], %144 {strides = array<i32>} : memref<8x2x512xbf16, #tpu.memory_space<vmem>>, vector<1x2x512xbf16>,
    %c10_139 = arith.constant 10 : index
    %c0_140 = arith.constant 0 : index
    %c0_141 = arith.constant 0 : index
    %145 = vector.load %arg0[%c10_139, %c0_140, %c0_141] : memref<18x2x512xbf16, #tpu.memory_space<vmem>>, vector<1x2x512xbf16>
    %146 = vector.shape_cast %145 : vector<1x2x512xbf16> to vector<2x512xbf16>
    %c11 = arith.constant 11 : index
    %c0_142 = arith.constant 0 : index
    %c0_143 = arith.constant 0 : index
    %147 = vector.load %arg0[%c11, %c0_142, %c0_143] : memref<18x2x512xbf16, #tpu.memory_space<vmem>>, vector<1x2x512xbf16>
    %148 = vector.shape_cast %147 : vector<1x2x512xbf16> to vector<2x512xbf16>
    %149 = arith.maximumf %146, %148 : vector<2x512xbf16>
    %c12 = arith.constant 12 : index
    %c0_144 = arith.constant 0 : index
    %c0_145 = arith.constant 0 : index
    %150 = vector.load %arg0[%c12, %c0_144, %c0_145] : memref<18x2x512xbf16, #tpu.memory_space<vmem>>, vector<1x2x512xbf16>
    %151 = vector.shape_cast %150 : vector<1x2x512xbf16> to vector<2x512xbf16>
    %152 = arith.maximumf %149, %151 : vector<2x512xbf16>
    %c10_146 = arith.constant 10 : index
    %c0_147 = arith.constant 0 : index
    %c0_148 = arith.constant 0 : index
    %153 = vector.load %arg1[%c10_146, %c0_147, %c0_148] : memref<18x2x512xbf16, #tpu.memory_space<vmem>>, vector<1x2x512xbf16>
    %154 = vector.shape_cast %153 : vector<1x2x512xbf16> to vector<2x512xbf16>
    %155 = arith.maximumf %152, %154 : vector<2x512xbf16>
    %c11_149 = arith.constant 11 : index
    %c0_150 = arith.constant 0 : index
    %c0_151 = arith.constant 0 : index
    %156 = vector.load %arg1[%c11_149, %c0_150, %c0_151] : memref<18x2x512xbf16, #tpu.memory_space<vmem>>, vector<1x2x512xbf16>
    %157 = vector.shape_cast %156 : vector<1x2x512xbf16> to vector<2x512xbf16>
    %158 = arith.maximumf %155, %157 : vector<2x512xbf16>
    %c12_152 = arith.constant 12 : index
    %c0_153 = arith.constant 0 : index
    %c0_154 = arith.constant 0 : index
    %159 = vector.load %arg1[%c12_152, %c0_153, %c0_154] : memref<18x2x512xbf16, #tpu.memory_space<vmem>>, vector<1x2x512xbf16>
    %160 = vector.shape_cast %159 : vector<1x2x512xbf16> to vector<2x512xbf16>
    %161 = arith.maximumf %158, %160 : vector<2x512xbf16>
    %c10_155 = arith.constant 10 : index
    %c0_156 = arith.constant 0 : index
    %c0_157 = arith.constant 0 : index
    %162 = vector.load %arg2[%c10_155, %c0_156, %c0_157] : memref<18x2x512xbf16, #tpu.memory_space<vmem>>, vector<1x2x512xbf16>
    %163 = vector.shape_cast %162 : vector<1x2x512xbf16> to vector<2x512xbf16>
    %164 = arith.maximumf %161, %163 : vector<2x512xbf16>
    %c11_158 = arith.constant 11 : index
    %c0_159 = arith.constant 0 : index
    %c0_160 = arith.constant 0 : index
    %165 = vector.load %arg2[%c11_158, %c0_159, %c0_160] : memref<18x2x512xbf16, #tpu.memory_space<vmem>>, vector<1x2x512xbf16>
    %166 = vector.shape_cast %165 : vector<1x2x512xbf16> to vector<2x512xbf16>
    %167 = arith.maximumf %164, %166 : vector<2x512xbf16>
    %c12_161 = arith.constant 12 : index
    %c0_162 = arith.constant 0 : index
    %c0_163 = arith.constant 0 : index
    %168 = vector.load %arg2[%c12_161, %c0_162, %c0_163] : memref<18x2x512xbf16, #tpu.memory_space<vmem>>, vector<1x2x512xbf16>
    %169 = vector.shape_cast %168 : vector<1x2x512xbf16> to vector<2x512xbf16>
    %170 = arith.maximumf %167, %169 : vector<2x512xbf16>
    %c5_164 = arith.constant 5 : index
    %c0_165 = arith.constant 0 : index
    %c0_166 = arith.constant 0 : index
    %171 = vector.load %arg3[%c5_164, %c0_165, %c0_166] : memref<8x2x512xbf16, #tpu.memory_space<vmem>>, vector<1x2x512xbf16>
    %172 = vector.shape_cast %171 : vector<1x2x512xbf16> to vector<2x512xbf16>
    %173 = vector.shape_cast %170 : vector<2x512xbf16> to vector<1x2x512xbf16>
    tpu.vector_store %arg3[%c5_164, %c0_165, %c0_166], %173 {strides = array<i32>} : memref<8x2x512xbf16, #tpu.memory_space<vmem>>, vector<1x2x512xbf16>,
    %c12_167 = arith.constant 12 : index
    %c0_168 = arith.constant 0 : index
    %c0_169 = arith.constant 0 : index
    %174 = vector.load %arg0[%c12_167, %c0_168, %c0_169] : memref<18x2x512xbf16, #tpu.memory_space<vmem>>, vector<1x2x512xbf16>
    %175 = vector.shape_cast %174 : vector<1x2x512xbf16> to vector<2x512xbf16>
    %c13 = arith.constant 13 : index
    %c0_170 = arith.constant 0 : index
    %c0_171 = arith.constant 0 : index
    %176 = vector.load %arg0[%c13, %c0_170, %c0_171] : memref<18x2x512xbf16, #tpu.memory_space<vmem>>, vector<1x2x512xbf16>
    %177 = vector.shape_cast %176 : vector<1x2x512xbf16> to vector<2x512xbf16>
    %178 = arith.maximumf %175, %177 : vector<2x512xbf16>
    %c14 = arith.constant 14 : index
    %c0_172 = arith.constant 0 : index
    %c0_173 = arith.constant 0 : index
    %179 = vector.load %arg0[%c14, %c0_172, %c0_173] : memref<18x2x512xbf16, #tpu.memory_space<vmem>>, vector<1x2x512xbf16>
    %180 = vector.shape_cast %179 : vector<1x2x512xbf16> to vector<2x512xbf16>
    %181 = arith.maximumf %178, %180 : vector<2x512xbf16>
    %c12_174 = arith.constant 12 : index
    %c0_175 = arith.constant 0 : index
    %c0_176 = arith.constant 0 : index
    %182 = vector.load %arg1[%c12_174, %c0_175, %c0_176] : memref<18x2x512xbf16, #tpu.memory_space<vmem>>, vector<1x2x512xbf16>
    %183 = vector.shape_cast %182 : vector<1x2x512xbf16> to vector<2x512xbf16>
    %184 = arith.maximumf %181, %183 : vector<2x512xbf16>
    %c13_177 = arith.constant 13 : index
    %c0_178 = arith.constant 0 : index
    %c0_179 = arith.constant 0 : index
    %185 = vector.load %arg1[%c13_177, %c0_178, %c0_179] : memref<18x2x512xbf16, #tpu.memory_space<vmem>>, vector<1x2x512xbf16>
    %186 = vector.shape_cast %185 : vector<1x2x512xbf16> to vector<2x512xbf16>
    %187 = arith.maximumf %184, %186 : vector<2x512xbf16>
    %c14_180 = arith.constant 14 : index
    %c0_181 = arith.constant 0 : index
    %c0_182 = arith.constant 0 : index
    %188 = vector.load %arg1[%c14_180, %c0_181, %c0_182] : memref<18x2x512xbf16, #tpu.memory_space<vmem>>, vector<1x2x512xbf16>
    %189 = vector.shape_cast %188 : vector<1x2x512xbf16> to vector<2x512xbf16>
    %190 = arith.maximumf %187, %189 : vector<2x512xbf16>
    %c12_183 = arith.constant 12 : index
    %c0_184 = arith.constant 0 : index
    %c0_185 = arith.constant 0 : index
    %191 = vector.load %arg2[%c12_183, %c0_184, %c0_185] : memref<18x2x512xbf16, #tpu.memory_space<vmem>>, vector<1x2x512xbf16>
    %192 = vector.shape_cast %191 : vector<1x2x512xbf16> to vector<2x512xbf16>
    %193 = arith.maximumf %190, %192 : vector<2x512xbf16>
    %c13_186 = arith.constant 13 : index
    %c0_187 = arith.constant 0 : index
    %c0_188 = arith.constant 0 : index
    %194 = vector.load %arg2[%c13_186, %c0_187, %c0_188] : memref<18x2x512xbf16, #tpu.memory_space<vmem>>, vector<1x2x512xbf16>
    %195 = vector.shape_cast %194 : vector<1x2x512xbf16> to vector<2x512xbf16>
    %196 = arith.maximumf %193, %195 : vector<2x512xbf16>
    %c14_189 = arith.constant 14 : index
    %c0_190 = arith.constant 0 : index
    %c0_191 = arith.constant 0 : index
    %197 = vector.load %arg2[%c14_189, %c0_190, %c0_191] : memref<18x2x512xbf16, #tpu.memory_space<vmem>>, vector<1x2x512xbf16>
    %198 = vector.shape_cast %197 : vector<1x2x512xbf16> to vector<2x512xbf16>
    %199 = arith.maximumf %196, %198 : vector<2x512xbf16>
    %c6_192 = arith.constant 6 : index
    %c0_193 = arith.constant 0 : index
    %c0_194 = arith.constant 0 : index
    %200 = vector.load %arg3[%c6_192, %c0_193, %c0_194] : memref<8x2x512xbf16, #tpu.memory_space<vmem>>, vector<1x2x512xbf16>
    %201 = vector.shape_cast %200 : vector<1x2x512xbf16> to vector<2x512xbf16>
    %202 = vector.shape_cast %199 : vector<2x512xbf16> to vector<1x2x512xbf16>
    tpu.vector_store %arg3[%c6_192, %c0_193, %c0_194], %202 {strides = array<i32>} : memref<8x2x512xbf16, #tpu.memory_space<vmem>>, vector<1x2x512xbf16>,
    %c14_195 = arith.constant 14 : index
    %c0_196 = arith.constant 0 : index
    %c0_197 = arith.constant 0 : index
    %203 = vector.load %arg0[%c14_195, %c0_196, %c0_197] : memref<18x2x512xbf16, #tpu.memory_space<vmem>>, vector<1x2x512xbf16>
    %204 = vector.shape_cast %203 : vector<1x2x512xbf16> to vector<2x512xbf16>
    %c15 = arith.constant 15 : index
    %c0_198 = arith.constant 0 : index
    %c0_199 = arith.constant 0 : index
    %205 = vector.load %arg0[%c15, %c0_198, %c0_199] : memref<18x2x512xbf16, #tpu.memory_space<vmem>>, vector<1x2x512xbf16>
    %206 = vector.shape_cast %205 : vector<1x2x512xbf16> to vector<2x512xbf16>
    %207 = arith.maximumf %204, %206 : vector<2x512xbf16>
    %c16 = arith.constant 16 : index
    %c0_200 = arith.constant 0 : index
    %c0_201 = arith.constant 0 : index
    %208 = vector.load %arg0[%c16, %c0_200, %c0_201] : memref<18x2x512xbf16, #tpu.memory_space<vmem>>, vector<1x2x512xbf16>
    %209 = vector.shape_cast %208 : vector<1x2x512xbf16> to vector<2x512xbf16>
    %210 = arith.maximumf %207, %209 : vector<2x512xbf16>
    %c14_202 = arith.constant 14 : index
    %c0_203 = arith.constant 0 : index
    %c0_204 = arith.constant 0 : index
    %211 = vector.load %arg1[%c14_202, %c0_203, %c0_204] : memref<18x2x512xbf16, #tpu.memory_space<vmem>>, vector<1x2x512xbf16>
    %212 = vector.shape_cast %211 : vector<1x2x512xbf16> to vector<2x512xbf16>
    %213 = arith.maximumf %210, %212 : vector<2x512xbf16>
    %c15_205 = arith.constant 15 : index
    %c0_206 = arith.constant 0 : index
    %c0_207 = arith.constant 0 : index
    %214 = vector.load %arg1[%c15_205, %c0_206, %c0_207] : memref<18x2x512xbf16, #tpu.memory_space<vmem>>, vector<1x2x512xbf16>
    %215 = vector.shape_cast %214 : vector<1x2x512xbf16> to vector<2x512xbf16>
    %216 = arith.maximumf %213, %215 : vector<2x512xbf16>
    %c16_208 = arith.constant 16 : index
    %c0_209 = arith.constant 0 : index
    %c0_210 = arith.constant 0 : index
    %217 = vector.load %arg1[%c16_208, %c0_209, %c0_210] : memref<18x2x512xbf16, #tpu.memory_space<vmem>>, vector<1x2x512xbf16>
    %218 = vector.shape_cast %217 : vector<1x2x512xbf16> to vector<2x512xbf16>
    %219 = arith.maximumf %216, %218 : vector<2x512xbf16>
    %c14_211 = arith.constant 14 : index
    %c0_212 = arith.constant 0 : index
    %c0_213 = arith.constant 0 : index
    %220 = vector.load %arg2[%c14_211, %c0_212, %c0_213] : memref<18x2x512xbf16, #tpu.memory_space<vmem>>, vector<1x2x512xbf16>
    %221 = vector.shape_cast %220 : vector<1x2x512xbf16> to vector<2x512xbf16>
    %222 = arith.maximumf %219, %221 : vector<2x512xbf16>
    %c15_214 = arith.constant 15 : index
    %c0_215 = arith.constant 0 : index
    %c0_216 = arith.constant 0 : index
    %223 = vector.load %arg2[%c15_214, %c0_215, %c0_216] : memref<18x2x512xbf16, #tpu.memory_space<vmem>>, vector<1x2x512xbf16>
    %224 = vector.shape_cast %223 : vector<1x2x512xbf16> to vector<2x512xbf16>
    %225 = arith.maximumf %222, %224 : vector<2x512xbf16>
    %c16_217 = arith.constant 16 : index
    %c0_218 = arith.constant 0 : index
    %c0_219 = arith.constant 0 : index
    %226 = vector.load %arg2[%c16_217, %c0_218, %c0_219] : memref<18x2x512xbf16, #tpu.memory_space<vmem>>, vector<1x2x512xbf16>
    %227 = vector.shape_cast %226 : vector<1x2x512xbf16> to vector<2x512xbf16>
    %228 = arith.maximumf %225, %227 : vector<2x512xbf16>
    %c7_220 = arith.constant 7 : index
    %c0_221 = arith.constant 0 : index
    %c0_222 = arith.constant 0 : index
    %229 = vector.load %arg3[%c7_220, %c0_221, %c0_222] : memref<8x2x512xbf16, #tpu.memory_space<vmem>>, vector<1x2x512xbf16>
    %230 = vector.shape_cast %229 : vector<1x2x512xbf16> to vector<2x512xbf16>
    %231 = vector.shape_cast %228 : vector<2x512xbf16> to vector<1x2x512xbf16>
    tpu.vector_store %arg3[%c7_220, %c0_221, %c0_222], %231 {strides = array<i32>} : memref<8x2x512xbf16, #tpu.memory_space<vmem>>, vector<1x2x512xbf16>,
    return
  }
}

module attributes {stable_mosaic.version = 11 : i64} {
  func.func @_matmul_single_kernel(%arg0: i32, %arg1: i32, %arg2: memref<128x640xbf16, #tpu.memory_space<vmem>>, %arg3: memref<640x128xbf16, #tpu.memory_space<vmem>>, %arg4: memref<1x128xf32, #tpu.memory_space<vmem>>, %arg5: memref<128x128xbf16, #tpu.memory_space<vmem>>) attributes {dimension_semantics = [#tpu.dimension_semantics<parallel>, #tpu.dimension_semantics<parallel>], iteration_bounds = array<i64: 1, 1>, scalar_prefetch = 0 : i64, scratch_operands = 0 : i64, tpu.core_type = #tpu.core_type<tc>, window_params = [{transform_indices = @transform_0, window_bounds = array<i64: 128, 640>}, {transform_indices = @transform_1, window_bounds = array<i64: 640, 128>}, {transform_indices = @transform_2, window_bounds = array<i64: 1, 128>}, {transform_indices = @transform_3, window_bounds = array<i64: 128, 128>}]} {
    %c0 = arith.constant 0 : index
    %c0_0 = arith.constant 0 : index
    %0 = vector.load %arg2[%c0, %c0_0] : memref<128x640xbf16, #tpu.memory_space<vmem>>, vector<128x640xbf16>
    %c0_1 = arith.constant 0 : index
    %c0_2 = arith.constant 0 : index
    %1 = vector.load %arg3[%c0_1, %c0_2] : memref<640x128xbf16, #tpu.memory_space<vmem>>, vector<640x128xbf16>
    %cst = arith.constant dense<0.000000e+00> : vector<128x128xf32>
    %2 = tpu.matmul %0, %1, %cst {dimension_numbers = #tpu.dot_dimension_numbers<[1], [0], [0], [1], [0, 0, 1, 1], [], []>} : vector<128x640xbf16>, vector<640x128xbf16>, vector<128x128xf32> -> vector<128x128xf32>
    %c0_3 = arith.constant 0 : index
    %c0_4 = arith.constant 0 : index
    %3 = vector.load %arg4[%c0_3, %c0_4] : memref<1x128xf32, #tpu.memory_space<vmem>>, vector<1x128xf32>
    %4 = vector.broadcast %3 : vector<1x128xf32> to vector<128x128xf32>
    %5 = arith.addf %2, %4 : vector<128x128xf32>
    %cst_5 = arith.constant 0.000000e+00 : f32
    %6 = vector.broadcast %cst_5 : f32 to vector<128x128xf32>
    %7 = arith.maximumf %5, %6 : vector<128x128xf32>
    %8 = arith.truncf %7 : vector<128x128xf32> to vector<128x128xbf16>
    %c0_6 = arith.constant 0 : index
    %c0_7 = arith.constant 0 : index
    %9 = vector.load %arg5[%c0_6, %c0_7] : memref<128x128xbf16, #tpu.memory_space<vmem>>, vector<128x128xbf16>
    tpu.vector_store %arg5[%c0_6, %c0_7], %8 {strides = array<i32>} : memref<128x128xbf16, #tpu.memory_space<vmem>>, vector<128x128xbf16>,
    return
  }
  func.func @transform_0(%arg0: i32, %arg1: i32) -> (i32, i32) {
    %c0_i32 = arith.constant 0 : i32
    %c0_i32_0 = arith.constant 0 : i32
    return %arg0, %c0_i32 : i32, i32
  }
  func.func @transform_1(%arg0: i32, %arg1: i32) -> (i32, i32) {
    %c0_i32 = arith.constant 0 : i32
    %c0_i32_0 = arith.constant 0 : i32
    return %c0_i32, %arg1 : i32, i32
  }
  func.func @transform_2(%arg0: i32, %arg1: i32) -> (i32, i32) {
    %c0_i32 = arith.constant 0 : i32
    %c0_i32_0 = arith.constant 0 : i32
    return %c0_i32, %arg1 : i32, i32
  }
  func.func @transform_3(%arg0: i32, %arg1: i32) -> (i32, i32) {
    %c0_i32 = arith.constant 0 : i32
    return %arg0, %arg1 : i32, i32
  }
}

module attributes {stable_mosaic.version = 11 : i64} {
  func.func @_matmul_single_kernel(%arg0: i32, %arg1: i32, %arg2: memref<128x640xbf16, #tpu.memory_space<vmem>>, %arg3: memref<640x128xbf16, #tpu.memory_space<vmem>>, %arg4: memref<1x128xf32, #tpu.memory_space<vmem>>, %arg5: memref<128x128xbf16, #tpu.memory_space<vmem>>, %arg6: memref<128x128xbf16, #tpu.memory_space<vmem>>) attributes {dimension_semantics = [#tpu.dimension_semantics<parallel>, #tpu.dimension_semantics<parallel>], iteration_bounds = array<i64: 1, 1>, scalar_prefetch = 0 : i64, scratch_operands = 0 : i64, tpu.core_type = #tpu.core_type<tc>, window_params = [{transform_indices = @transform_0, window_bounds = array<i64: 128, 640>}, {transform_indices = @transform_1, window_bounds = array<i64: 640, 128>}, {transform_indices = @transform_2, window_bounds = array<i64: 1, 128>}, {transform_indices = @transform_3, window_bounds = array<i64: 128, 128>}, {transform_indices = @transform_4, window_bounds = array<i64: 128, 128>}]} {
    %c0 = arith.constant 0 : index
    %c0_0 = arith.constant 0 : index
    %0 = vector.load %arg2[%c0, %c0_0] : memref<128x640xbf16, #tpu.memory_space<vmem>>, vector<128x640xbf16>
    %c0_1 = arith.constant 0 : index
    %c0_2 = arith.constant 0 : index
    %1 = vector.load %arg3[%c0_1, %c0_2] : memref<640x128xbf16, #tpu.memory_space<vmem>>, vector<640x128xbf16>
    %cst = arith.constant dense<0.000000e+00> : vector<128x128xf32>
    %2 = tpu.matmul %0, %1, %cst {dimension_numbers = #tpu.dot_dimension_numbers<[1], [0], [0], [1], [0, 0, 1, 1], [], []>} : vector<128x640xbf16>, vector<640x128xbf16>, vector<128x128xf32> -> vector<128x128xf32>
    %c0_3 = arith.constant 0 : index
    %c0_4 = arith.constant 0 : index
    %3 = vector.load %arg4[%c0_3, %c0_4] : memref<1x128xf32, #tpu.memory_space<vmem>>, vector<1x128xf32>
    %4 = vector.broadcast %3 : vector<1x128xf32> to vector<128x128xf32>
    %5 = arith.addf %2, %4 : vector<128x128xf32>
    %c0_5 = arith.constant 0 : index
    %c0_6 = arith.constant 0 : index
    %6 = vector.load %arg5[%c0_5, %c0_6] : memref<128x128xbf16, #tpu.memory_space<vmem>>, vector<128x128xbf16>
    %7 = arith.extf %6 : vector<128x128xbf16> to vector<128x128xf32>
    %8 = arith.addf %5, %7 : vector<128x128xf32>
    %cst_7 = arith.constant 0.000000e+00 : f32
    %9 = vector.broadcast %cst_7 : f32 to vector<128x128xf32>
    %10 = arith.maximumf %8, %9 : vector<128x128xf32>
    %11 = arith.truncf %10 : vector<128x128xf32> to vector<128x128xbf16>
    %c0_8 = arith.constant 0 : index
    %c0_9 = arith.constant 0 : index
    %12 = vector.load %arg6[%c0_8, %c0_9] : memref<128x128xbf16, #tpu.memory_space<vmem>>, vector<128x128xbf16>
    tpu.vector_store %arg6[%c0_8, %c0_9], %11 {strides = array<i32>} : memref<128x128xbf16, #tpu.memory_space<vmem>>, vector<128x128xbf16>,
    return
  }
  func.func @transform_0(%arg0: i32, %arg1: i32) -> (i32, i32) {
    %c0_i32 = arith.constant 0 : i32
    %c0_i32_0 = arith.constant 0 : i32
    return %arg0, %c0_i32 : i32, i32
  }
  func.func @transform_1(%arg0: i32, %arg1: i32) -> (i32, i32) {
    %c0_i32 = arith.constant 0 : i32
    %c0_i32_0 = arith.constant 0 : i32
    return %c0_i32, %arg1 : i32, i32
  }
  func.func @transform_2(%arg0: i32, %arg1: i32) -> (i32, i32) {
    %c0_i32 = arith.constant 0 : i32
    %c0_i32_0 = arith.constant 0 : i32
    return %c0_i32, %arg1 : i32, i32
  }
  func.func @transform_3(%arg0: i32, %arg1: i32) -> (i32, i32) {
    %c0_i32 = arith.constant 0 : i32
    return %arg0, %arg1 : i32, i32
  }
  func.func @transform_4(%arg0: i32, %arg1: i32) -> (i32, i32) {
    %c0_i32 = arith.constant 0 : i32
    return %arg0, %arg1 : i32, i32
  }
}

module attributes {stable_mosaic.version = 11 : i64} {
  func.func @_matmul_single_kernel(%arg0: i32, %arg1: i32, %arg2: memref<32x640xbf16, #tpu.memory_space<vmem>>, %arg3: memref<640x128xbf16, #tpu.memory_space<vmem>>, %arg4: memref<1x128xf32, #tpu.memory_space<vmem>>, %arg5: memref<32x128xbf16, #tpu.memory_space<vmem>>) attributes {dimension_semantics = [#tpu.dimension_semantics<parallel>, #tpu.dimension_semantics<parallel>], iteration_bounds = array<i64: 1, 1>, scalar_prefetch = 0 : i64, scratch_operands = 0 : i64, tpu.core_type = #tpu.core_type<tc>, window_params = [{transform_indices = @transform_0, window_bounds = array<i64: 32, 640>}, {transform_indices = @transform_1, window_bounds = array<i64: 640, 128>}, {transform_indices = @transform_2, window_bounds = array<i64: 1, 128>}, {transform_indices = @transform_3, window_bounds = array<i64: 32, 128>}]} {
    %c0 = arith.constant 0 : index
    %c0_0 = arith.constant 0 : index
    %0 = vector.load %arg2[%c0, %c0_0] : memref<32x640xbf16, #tpu.memory_space<vmem>>, vector<32x640xbf16>
    %c0_1 = arith.constant 0 : index
    %c0_2 = arith.constant 0 : index
    %1 = vector.load %arg3[%c0_1, %c0_2] : memref<640x128xbf16, #tpu.memory_space<vmem>>, vector<640x128xbf16>
    %cst = arith.constant dense<0.000000e+00> : vector<32x128xf32>
    %2 = tpu.matmul %0, %1, %cst {dimension_numbers = #tpu.dot_dimension_numbers<[1], [0], [0], [1], [0, 0, 1, 1], [], []>} : vector<32x640xbf16>, vector<640x128xbf16>, vector<32x128xf32> -> vector<32x128xf32>
    %c0_3 = arith.constant 0 : index
    %c0_4 = arith.constant 0 : index
    %3 = vector.load %arg4[%c0_3, %c0_4] : memref<1x128xf32, #tpu.memory_space<vmem>>, vector<1x128xf32>
    %4 = vector.broadcast %3 : vector<1x128xf32> to vector<32x128xf32>
    %5 = arith.addf %2, %4 : vector<32x128xf32>
    %cst_5 = arith.constant 0.000000e+00 : f32
    %6 = vector.broadcast %cst_5 : f32 to vector<32x128xf32>
    %7 = arith.maximumf %5, %6 : vector<32x128xf32>
    %8 = arith.truncf %7 : vector<32x128xf32> to vector<32x128xbf16>
    %c0_6 = arith.constant 0 : index
    %c0_7 = arith.constant 0 : index
    %9 = vector.load %arg5[%c0_6, %c0_7] : memref<32x128xbf16, #tpu.memory_space<vmem>>, vector<32x128xbf16>
    tpu.vector_store %arg5[%c0_6, %c0_7], %8 {strides = array<i32>} : memref<32x128xbf16, #tpu.memory_space<vmem>>, vector<32x128xbf16>,
    return
  }
  func.func @transform_0(%arg0: i32, %arg1: i32) -> (i32, i32) {
    %c0_i32 = arith.constant 0 : i32
    %c0_i32_0 = arith.constant 0 : i32
    return %arg0, %c0_i32 : i32, i32
  }
  func.func @transform_1(%arg0: i32, %arg1: i32) -> (i32, i32) {
    %c0_i32 = arith.constant 0 : i32
    %c0_i32_0 = arith.constant 0 : i32
    return %c0_i32, %arg1 : i32, i32
  }
  func.func @transform_2(%arg0: i32, %arg1: i32) -> (i32, i32) {
    %c0_i32 = arith.constant 0 : i32
    %c0_i32_0 = arith.constant 0 : i32
    return %c0_i32, %arg1 : i32, i32
  }
  func.func @transform_3(%arg0: i32, %arg1: i32) -> (i32, i32) {
    %c0_i32 = arith.constant 0 : i32
    return %arg0, %arg1 : i32, i32
  }
}

module attributes {stable_mosaic.version = 11 : i64} {
  func.func @_matmul_single_kernel(%arg0: i32, %arg1: i32, %arg2: memref<32x128xbf16, #tpu.memory_space<vmem>>, %arg3: memref<128x128xbf16, #tpu.memory_space<vmem>>, %arg4: memref<1x128xf32, #tpu.memory_space<vmem>>, %arg5: memref<32x128xbf16, #tpu.memory_space<vmem>>) attributes {dimension_semantics = [#tpu.dimension_semantics<parallel>, #tpu.dimension_semantics<parallel>], iteration_bounds = array<i64: 1, 1>, scalar_prefetch = 0 : i64, scratch_operands = 0 : i64, tpu.core_type = #tpu.core_type<tc>, window_params = [{transform_indices = @transform_0, window_bounds = array<i64: 32, 128>}, {transform_indices = @transform_1, window_bounds = array<i64: 128, 128>}, {transform_indices = @transform_2, window_bounds = array<i64: 1, 128>}, {transform_indices = @transform_3, window_bounds = array<i64: 32, 128>}]} {
    %c0 = arith.constant 0 : index
    %c0_0 = arith.constant 0 : index
    %0 = vector.load %arg2[%c0, %c0_0] : memref<32x128xbf16, #tpu.memory_space<vmem>>, vector<32x128xbf16>
    %c0_1 = arith.constant 0 : index
    %c0_2 = arith.constant 0 : index
    %1 = vector.load %arg3[%c0_1, %c0_2] : memref<128x128xbf16, #tpu.memory_space<vmem>>, vector<128x128xbf16>
    %cst = arith.constant dense<0.000000e+00> : vector<32x128xf32>
    %2 = tpu.matmul %0, %1, %cst {dimension_numbers = #tpu.dot_dimension_numbers<[1], [0], [0], [1], [0, 0, 1, 1], [], []>} : vector<32x128xbf16>, vector<128x128xbf16>, vector<32x128xf32> -> vector<32x128xf32>
    %c0_3 = arith.constant 0 : index
    %c0_4 = arith.constant 0 : index
    %3 = vector.load %arg4[%c0_3, %c0_4] : memref<1x128xf32, #tpu.memory_space<vmem>>, vector<1x128xf32>
    %4 = vector.broadcast %3 : vector<1x128xf32> to vector<32x128xf32>
    %5 = arith.addf %2, %4 : vector<32x128xf32>
    %6 = arith.truncf %5 : vector<32x128xf32> to vector<32x128xbf16>
    %c0_5 = arith.constant 0 : index
    %c0_6 = arith.constant 0 : index
    %7 = vector.load %arg5[%c0_5, %c0_6] : memref<32x128xbf16, #tpu.memory_space<vmem>>, vector<32x128xbf16>
    tpu.vector_store %arg5[%c0_5, %c0_6], %6 {strides = array<i32>} : memref<32x128xbf16, #tpu.memory_space<vmem>>, vector<32x128xbf16>,
    return
  }
  func.func @transform_0(%arg0: i32, %arg1: i32) -> (i32, i32) {
    %c0_i32 = arith.constant 0 : i32
    %c0_i32_0 = arith.constant 0 : i32
    return %arg0, %c0_i32 : i32, i32
  }
  func.func @transform_1(%arg0: i32, %arg1: i32) -> (i32, i32) {
    %c0_i32 = arith.constant 0 : i32
    %c0_i32_0 = arith.constant 0 : i32
    return %c0_i32, %arg1 : i32, i32
  }
  func.func @transform_2(%arg0: i32, %arg1: i32) -> (i32, i32) {
    %c0_i32 = arith.constant 0 : i32
    %c0_i32_0 = arith.constant 0 : i32
    return %c0_i32, %arg1 : i32, i32
  }
  func.func @transform_3(%arg0: i32, %arg1: i32) -> (i32, i32) {
    %c0_i32 = arith.constant 0 : i32
    return %arg0, %arg1 : i32, i32
  }
}

module attributes {stable_mosaic.version = 11 : i64} {
  func.func @_matmul_acc_kernel(%arg0: i32, %arg1: i32, %arg2: i32, %arg3: memref<32x384xbf16, #tpu.memory_space<vmem>>, %arg4: memref<384x128xbf16, #tpu.memory_space<vmem>>, %arg5: memref<1x128xf32, #tpu.memory_space<vmem>>, %arg6: memref<32x128xbf16, #tpu.memory_space<vmem>>, %arg7: memref<32x128xbf16, #tpu.memory_space<vmem>>, %arg8: memref<32x128xf32, #tpu.memory_space<vmem>>) attributes {dimension_semantics = [#tpu.dimension_semantics<parallel>, #tpu.dimension_semantics<parallel>, #tpu.dimension_semantics<arbitrary>], iteration_bounds = array<i64: 1, 1, 3>, scalar_prefetch = 0 : i64, scratch_operands = 1 : i64, tpu.core_type = #tpu.core_type<tc>, window_params = [{transform_indices = @transform_0, window_bounds = array<i64: 32, 384>}, {transform_indices = @transform_1, window_bounds = array<i64: 384, 128>}, {transform_indices = @transform_2, window_bounds = array<i64: 1, 128>}, {transform_indices = @transform_3, window_bounds = array<i64: 32, 128>}, {transform_indices = @transform_4, window_bounds = array<i64: 32, 128>}]} {
    %c0_i32 = arith.constant 0 : i32
    %0 = arith.cmpi eq, %arg2, %c0_i32 : i32
    %1 = arith.extui %0 : i1 to i32
    %c0_i32_0 = arith.constant 0 : i32
    %2 = arith.cmpi ne, %1, %c0_i32_0 : i32
    scf.if %2 {
      %cst_9 = arith.constant 0.000000e+00 : f32
      %12 = vector.broadcast %cst_9 : f32 to vector<32x128xf32>
      %c0_10 = arith.constant 0 : index
      %c0_11 = arith.constant 0 : index
      %13 = vector.load %arg8[%c0_10, %c0_11] : memref<32x128xf32, #tpu.memory_space<vmem>>, vector<32x128xf32>
      tpu.vector_store %arg8[%c0_10, %c0_11], %12 {strides = array<i32>} : memref<32x128xf32, #tpu.memory_space<vmem>>, vector<32x128xf32>,
    } else {
    }
    %c0 = arith.constant 0 : index
    %c0_1 = arith.constant 0 : index
    %3 = vector.load %arg8[%c0, %c0_1] : memref<32x128xf32, #tpu.memory_space<vmem>>, vector<32x128xf32>
    %c0_2 = arith.constant 0 : index
    %c0_3 = arith.constant 0 : index
    %4 = vector.load %arg3[%c0_2, %c0_3] : memref<32x384xbf16, #tpu.memory_space<vmem>>, vector<32x384xbf16>
    %c0_4 = arith.constant 0 : index
    %c0_5 = arith.constant 0 : index
    %5 = vector.load %arg4[%c0_4, %c0_5] : memref<384x128xbf16, #tpu.memory_space<vmem>>, vector<384x128xbf16>
    %cst = arith.constant dense<0.000000e+00> : vector<32x128xf32>
    %6 = tpu.matmul %4, %5, %cst {dimension_numbers = #tpu.dot_dimension_numbers<[1], [0], [0], [1], [0, 0, 1, 1], [], []>} : vector<32x384xbf16>, vector<384x128xbf16>, vector<32x128xf32> -> vector<32x128xf32>
    %7 = arith.addf %3, %6 : vector<32x128xf32>
    %c0_6 = arith.constant 0 : index
    %c0_7 = arith.constant 0 : index
    %8 = vector.load %arg8[%c0_6, %c0_7] : memref<32x128xf32, #tpu.memory_space<vmem>>, vector<32x128xf32>
    tpu.vector_store %arg8[%c0_6, %c0_7], %7 {strides = array<i32>} : memref<32x128xf32, #tpu.memory_space<vmem>>, vector<32x128xf32>,
    %c2_i32 = arith.constant 2 : i32
    %9 = arith.cmpi eq, %arg2, %c2_i32 : i32
    %10 = arith.extui %9 : i1 to i32
    %c0_i32_8 = arith.constant 0 : i32
    %11 = arith.cmpi ne, %10, %c0_i32_8 : i32
    scf.if %11 {
      %c0_9 = arith.constant 0 : index
      %c0_10 = arith.constant 0 : index
      %12 = vector.load %arg8[%c0_9, %c0_10] : memref<32x128xf32, #tpu.memory_space<vmem>>, vector<32x128xf32>
      %c0_11 = arith.constant 0 : index
      %c0_12 = arith.constant 0 : index
      %13 = vector.load %arg5[%c0_11, %c0_12] : memref<1x128xf32, #tpu.memory_space<vmem>>, vector<1x128xf32>
      %14 = vector.broadcast %13 : vector<1x128xf32> to vector<32x128xf32>
      %15 = arith.addf %12, %14 : vector<32x128xf32>
      %c0_13 = arith.constant 0 : index
      %c0_14 = arith.constant 0 : index
      %16 = vector.load %arg6[%c0_13, %c0_14] : memref<32x128xbf16, #tpu.memory_space<vmem>>, vector<32x128xbf16>
      %17 = arith.extf %16 : vector<32x128xbf16> to vector<32x128xf32>
      %18 = arith.addf %15, %17 : vector<32x128xf32>
      %cst_15 = arith.constant 0.000000e+00 : f32
      %19 = vector.broadcast %cst_15 : f32 to vector<32x128xf32>
      %20 = arith.maximumf %18, %19 : vector<32x128xf32>
      %21 = arith.truncf %20 : vector<32x128xf32> to vector<32x128xbf16>
      %c0_16 = arith.constant 0 : index
      %c0_17 = arith.constant 0 : index
      %22 = vector.load %arg7[%c0_16, %c0_17] : memref<32x128xbf16, #tpu.memory_space<vmem>>, vector<32x128xbf16>
      tpu.vector_store %arg7[%c0_16, %c0_17], %21 {strides = array<i32>} : memref<32x128xbf16, #tpu.memory_space<vmem>>, vector<32x128xbf16>,
    } else {
    }
    return
  }
  func.func @transform_0(%arg0: i32, %arg1: i32, %arg2: i32) -> (i32, i32) {
    %c0_i32 = arith.constant 0 : i32
    return %arg0, %arg2 : i32, i32
  }
  func.func @transform_1(%arg0: i32, %arg1: i32, %arg2: i32) -> (i32, i32) {
    %c0_i32 = arith.constant 0 : i32
    return %arg2, %arg1 : i32, i32
  }
  func.func @transform_2(%arg0: i32, %arg1: i32, %arg2: i32) -> (i32, i32) {
    %c0_i32 = arith.constant 0 : i32
    %c0_i32_0 = arith.constant 0 : i32
    return %c0_i32, %arg1 : i32, i32
  }
  func.func @transform_3(%arg0: i32, %arg1: i32, %arg2: i32) -> (i32, i32) {
    %c0_i32 = arith.constant 0 : i32
    return %arg0, %arg1 : i32, i32
  }
  func.func @transform_4(%arg0: i32, %arg1: i32, %arg2: i32) -> (i32, i32) {
    %c0_i32 = arith.constant 0 : i32
    return %arg0, %arg1 : i32, i32
  }
}

module attributes {stable_mosaic.version = 11 : i64} {
  func.func @_matmul_acc_kernel(%arg0: i32, %arg1: i32, %arg2: i32, %arg3: memref<32x384xbf16, #tpu.memory_space<vmem>>, %arg4: memref<384x128xbf16, #tpu.memory_space<vmem>>, %arg5: memref<1x128xf32, #tpu.memory_space<vmem>>, %arg6: memref<32x128xbf16, #tpu.memory_space<vmem>>, %arg7: memref<32x128xf32, #tpu.memory_space<vmem>>) attributes {dimension_semantics = [#tpu.dimension_semantics<parallel>, #tpu.dimension_semantics<parallel>, #tpu.dimension_semantics<arbitrary>], iteration_bounds = array<i64: 1, 1, 3>, scalar_prefetch = 0 : i64, scratch_operands = 1 : i64, tpu.core_type = #tpu.core_type<tc>, window_params = [{transform_indices = @transform_0, window_bounds = array<i64: 32, 384>}, {transform_indices = @transform_1, window_bounds = array<i64: 384, 128>}, {transform_indices = @transform_2, window_bounds = array<i64: 1, 128>}, {transform_indices = @transform_3, window_bounds = array<i64: 32, 128>}]} {
    %c0_i32 = arith.constant 0 : i32
    %0 = arith.cmpi eq, %arg2, %c0_i32 : i32
    %1 = arith.extui %0 : i1 to i32
    %c0_i32_0 = arith.constant 0 : i32
    %2 = arith.cmpi ne, %1, %c0_i32_0 : i32
    scf.if %2 {
      %cst_9 = arith.constant 0.000000e+00 : f32
      %12 = vector.broadcast %cst_9 : f32 to vector<32x128xf32>
      %c0_10 = arith.constant 0 : index
      %c0_11 = arith.constant 0 : index
      %13 = vector.load %arg7[%c0_10, %c0_11] : memref<32x128xf32, #tpu.memory_space<vmem>>, vector<32x128xf32>
      tpu.vector_store %arg7[%c0_10, %c0_11], %12 {strides = array<i32>} : memref<32x128xf32, #tpu.memory_space<vmem>>, vector<32x128xf32>,
    } else {
    }
    %c0 = arith.constant 0 : index
    %c0_1 = arith.constant 0 : index
    %3 = vector.load %arg7[%c0, %c0_1] : memref<32x128xf32, #tpu.memory_space<vmem>>, vector<32x128xf32>
    %c0_2 = arith.constant 0 : index
    %c0_3 = arith.constant 0 : index
    %4 = vector.load %arg3[%c0_2, %c0_3] : memref<32x384xbf16, #tpu.memory_space<vmem>>, vector<32x384xbf16>
    %c0_4 = arith.constant 0 : index
    %c0_5 = arith.constant 0 : index
    %5 = vector.load %arg4[%c0_4, %c0_5] : memref<384x128xbf16, #tpu.memory_space<vmem>>, vector<384x128xbf16>
    %cst = arith.constant dense<0.000000e+00> : vector<32x128xf32>
    %6 = tpu.matmul %4, %5, %cst {dimension_numbers = #tpu.dot_dimension_numbers<[1], [0], [0], [1], [0, 0, 1, 1], [], []>} : vector<32x384xbf16>, vector<384x128xbf16>, vector<32x128xf32> -> vector<32x128xf32>
    %7 = arith.addf %3, %6 : vector<32x128xf32>
    %c0_6 = arith.constant 0 : index
    %c0_7 = arith.constant 0 : index
    %8 = vector.load %arg7[%c0_6, %c0_7] : memref<32x128xf32, #tpu.memory_space<vmem>>, vector<32x128xf32>
    tpu.vector_store %arg7[%c0_6, %c0_7], %7 {strides = array<i32>} : memref<32x128xf32, #tpu.memory_space<vmem>>, vector<32x128xf32>,
    %c2_i32 = arith.constant 2 : i32
    %9 = arith.cmpi eq, %arg2, %c2_i32 : i32
    %10 = arith.extui %9 : i1 to i32
    %c0_i32_8 = arith.constant 0 : i32
    %11 = arith.cmpi ne, %10, %c0_i32_8 : i32
    scf.if %11 {
      %c0_9 = arith.constant 0 : index
      %c0_10 = arith.constant 0 : index
      %12 = vector.load %arg7[%c0_9, %c0_10] : memref<32x128xf32, #tpu.memory_space<vmem>>, vector<32x128xf32>
      %c0_11 = arith.constant 0 : index
      %c0_12 = arith.constant 0 : index
      %13 = vector.load %arg5[%c0_11, %c0_12] : memref<1x128xf32, #tpu.memory_space<vmem>>, vector<1x128xf32>
      %14 = vector.broadcast %13 : vector<1x128xf32> to vector<32x128xf32>
      %15 = arith.addf %12, %14 : vector<32x128xf32>
      %cst_13 = arith.constant 0.000000e+00 : f32
      %16 = vector.broadcast %cst_13 : f32 to vector<32x128xf32>
      %17 = arith.maximumf %15, %16 : vector<32x128xf32>
      %18 = arith.truncf %17 : vector<32x128xf32> to vector<32x128xbf16>
      %c0_14 = arith.constant 0 : index
      %c0_15 = arith.constant 0 : index
      %19 = vector.load %arg6[%c0_14, %c0_15] : memref<32x128xbf16, #tpu.memory_space<vmem>>, vector<32x128xbf16>
      tpu.vector_store %arg6[%c0_14, %c0_15], %18 {strides = array<i32>} : memref<32x128xbf16, #tpu.memory_space<vmem>>, vector<32x128xbf16>,
    } else {
    }
    return
  }
  func.func @transform_0(%arg0: i32, %arg1: i32, %arg2: i32) -> (i32, i32) {
    %c0_i32 = arith.constant 0 : i32
    return %arg0, %arg2 : i32, i32
  }
  func.func @transform_1(%arg0: i32, %arg1: i32, %arg2: i32) -> (i32, i32) {
    %c0_i32 = arith.constant 0 : i32
    return %arg2, %arg1 : i32, i32
  }
  func.func @transform_2(%arg0: i32, %arg1: i32, %arg2: i32) -> (i32, i32) {
    %c0_i32 = arith.constant 0 : i32
    %c0_i32_0 = arith.constant 0 : i32
    return %c0_i32, %arg1 : i32, i32
  }
  func.func @transform_3(%arg0: i32, %arg1: i32, %arg2: i32) -> (i32, i32) {
    %c0_i32 = arith.constant 0 : i32
    return %arg0, %arg1 : i32, i32
  }
}

module attributes {stable_mosaic.version = 11 : i64} {
  func.func @_matmul_acc_kernel(%arg0: i32, %arg1: i32, %arg2: i32, %arg3: memref<8x384xbf16, #tpu.memory_space<vmem>>, %arg4: memref<384x256xbf16, #tpu.memory_space<vmem>>, %arg5: memref<1x256xf32, #tpu.memory_space<vmem>>, %arg6: memref<8x256xbf16, #tpu.memory_space<vmem>>, %arg7: memref<8x256xf32, #tpu.memory_space<vmem>>) attributes {dimension_semantics = [#tpu.dimension_semantics<parallel>, #tpu.dimension_semantics<parallel>, #tpu.dimension_semantics<arbitrary>], iteration_bounds = array<i64: 1, 1, 3>, scalar_prefetch = 0 : i64, scratch_operands = 1 : i64, tpu.core_type = #tpu.core_type<tc>, window_params = [{transform_indices = @transform_0, window_bounds = array<i64: 8, 384>}, {transform_indices = @transform_1, window_bounds = array<i64: 384, 256>}, {transform_indices = @transform_2, window_bounds = array<i64: 1, 256>}, {transform_indices = @transform_3, window_bounds = array<i64: 8, 256>}]} {
    %c0_i32 = arith.constant 0 : i32
    %0 = arith.cmpi eq, %arg2, %c0_i32 : i32
    %1 = arith.extui %0 : i1 to i32
    %c0_i32_0 = arith.constant 0 : i32
    %2 = arith.cmpi ne, %1, %c0_i32_0 : i32
    scf.if %2 {
      %cst_9 = arith.constant 0.000000e+00 : f32
      %12 = vector.broadcast %cst_9 : f32 to vector<8x256xf32>
      %c0_10 = arith.constant 0 : index
      %c0_11 = arith.constant 0 : index
      %13 = vector.load %arg7[%c0_10, %c0_11] : memref<8x256xf32, #tpu.memory_space<vmem>>, vector<8x256xf32>
      tpu.vector_store %arg7[%c0_10, %c0_11], %12 {strides = array<i32>} : memref<8x256xf32, #tpu.memory_space<vmem>>, vector<8x256xf32>,
    } else {
    }
    %c0 = arith.constant 0 : index
    %c0_1 = arith.constant 0 : index
    %3 = vector.load %arg7[%c0, %c0_1] : memref<8x256xf32, #tpu.memory_space<vmem>>, vector<8x256xf32>
    %c0_2 = arith.constant 0 : index
    %c0_3 = arith.constant 0 : index
    %4 = vector.load %arg3[%c0_2, %c0_3] : memref<8x384xbf16, #tpu.memory_space<vmem>>, vector<8x384xbf16>
    %c0_4 = arith.constant 0 : index
    %c0_5 = arith.constant 0 : index
    %5 = vector.load %arg4[%c0_4, %c0_5] : memref<384x256xbf16, #tpu.memory_space<vmem>>, vector<384x256xbf16>
    %cst = arith.constant dense<0.000000e+00> : vector<8x256xf32>
    %6 = tpu.matmul %4, %5, %cst {dimension_numbers = #tpu.dot_dimension_numbers<[1], [0], [0], [1], [0, 0, 1, 1], [], []>} : vector<8x384xbf16>, vector<384x256xbf16>, vector<8x256xf32> -> vector<8x256xf32>
    %7 = arith.addf %3, %6 : vector<8x256xf32>
    %c0_6 = arith.constant 0 : index
    %c0_7 = arith.constant 0 : index
    %8 = vector.load %arg7[%c0_6, %c0_7] : memref<8x256xf32, #tpu.memory_space<vmem>>, vector<8x256xf32>
    tpu.vector_store %arg7[%c0_6, %c0_7], %7 {strides = array<i32>} : memref<8x256xf32, #tpu.memory_space<vmem>>, vector<8x256xf32>,
    %c2_i32 = arith.constant 2 : i32
    %9 = arith.cmpi eq, %arg2, %c2_i32 : i32
    %10 = arith.extui %9 : i1 to i32
    %c0_i32_8 = arith.constant 0 : i32
    %11 = arith.cmpi ne, %10, %c0_i32_8 : i32
    scf.if %11 {
      %c0_9 = arith.constant 0 : index
      %c0_10 = arith.constant 0 : index
      %12 = vector.load %arg7[%c0_9, %c0_10] : memref<8x256xf32, #tpu.memory_space<vmem>>, vector<8x256xf32>
      %c0_11 = arith.constant 0 : index
      %c0_12 = arith.constant 0 : index
      %13 = vector.load %arg5[%c0_11, %c0_12] : memref<1x256xf32, #tpu.memory_space<vmem>>, vector<1x256xf32>
      %14 = vector.broadcast %13 : vector<1x256xf32> to vector<8x256xf32>
      %15 = arith.addf %12, %14 : vector<8x256xf32>
      %cst_13 = arith.constant 0.000000e+00 : f32
      %16 = vector.broadcast %cst_13 : f32 to vector<8x256xf32>
      %17 = arith.maximumf %15, %16 : vector<8x256xf32>
      %18 = arith.truncf %17 : vector<8x256xf32> to vector<8x256xbf16>
      %c0_14 = arith.constant 0 : index
      %c0_15 = arith.constant 0 : index
      %19 = vector.load %arg6[%c0_14, %c0_15] : memref<8x256xbf16, #tpu.memory_space<vmem>>, vector<8x256xbf16>
      tpu.vector_store %arg6[%c0_14, %c0_15], %18 {strides = array<i32>} : memref<8x256xbf16, #tpu.memory_space<vmem>>, vector<8x256xbf16>,
    } else {
    }
    return
  }
  func.func @transform_0(%arg0: i32, %arg1: i32, %arg2: i32) -> (i32, i32) {
    %c0_i32 = arith.constant 0 : i32
    return %arg0, %arg2 : i32, i32
  }
  func.func @transform_1(%arg0: i32, %arg1: i32, %arg2: i32) -> (i32, i32) {
    %c0_i32 = arith.constant 0 : i32
    return %arg2, %arg1 : i32, i32
  }
  func.func @transform_2(%arg0: i32, %arg1: i32, %arg2: i32) -> (i32, i32) {
    %c0_i32 = arith.constant 0 : i32
    %c0_i32_0 = arith.constant 0 : i32
    return %c0_i32, %arg1 : i32, i32
  }
  func.func @transform_3(%arg0: i32, %arg1: i32, %arg2: i32) -> (i32, i32) {
    %c0_i32 = arith.constant 0 : i32
    return %arg0, %arg1 : i32, i32
  }
}

module attributes {stable_mosaic.version = 11 : i64} {
  func.func @_matmul_acc_kernel(%arg0: i32, %arg1: i32, %arg2: i32, %arg3: memref<8x768xbf16, #tpu.memory_space<vmem>>, %arg4: memref<768x256xbf16, #tpu.memory_space<vmem>>, %arg5: memref<1x256xf32, #tpu.memory_space<vmem>>, %arg6: memref<8x256xbf16, #tpu.memory_space<vmem>>, %arg7: memref<8x256xf32, #tpu.memory_space<vmem>>) attributes {dimension_semantics = [#tpu.dimension_semantics<parallel>, #tpu.dimension_semantics<parallel>, #tpu.dimension_semantics<arbitrary>], iteration_bounds = array<i64: 1, 1, 3>, scalar_prefetch = 0 : i64, scratch_operands = 1 : i64, tpu.core_type = #tpu.core_type<tc>, window_params = [{transform_indices = @transform_0, window_bounds = array<i64: 8, 768>}, {transform_indices = @transform_1, window_bounds = array<i64: 768, 256>}, {transform_indices = @transform_2, window_bounds = array<i64: 1, 256>}, {transform_indices = @transform_3, window_bounds = array<i64: 8, 256>}]} {
    %c0_i32 = arith.constant 0 : i32
    %0 = arith.cmpi eq, %arg2, %c0_i32 : i32
    %1 = arith.extui %0 : i1 to i32
    %c0_i32_0 = arith.constant 0 : i32
    %2 = arith.cmpi ne, %1, %c0_i32_0 : i32
    scf.if %2 {
      %cst_9 = arith.constant 0.000000e+00 : f32
      %12 = vector.broadcast %cst_9 : f32 to vector<8x256xf32>
      %c0_10 = arith.constant 0 : index
      %c0_11 = arith.constant 0 : index
      %13 = vector.load %arg7[%c0_10, %c0_11] : memref<8x256xf32, #tpu.memory_space<vmem>>, vector<8x256xf32>
      tpu.vector_store %arg7[%c0_10, %c0_11], %12 {strides = array<i32>} : memref<8x256xf32, #tpu.memory_space<vmem>>, vector<8x256xf32>,
    } else {
    }
    %c0 = arith.constant 0 : index
    %c0_1 = arith.constant 0 : index
    %3 = vector.load %arg7[%c0, %c0_1] : memref<8x256xf32, #tpu.memory_space<vmem>>, vector<8x256xf32>
    %c0_2 = arith.constant 0 : index
    %c0_3 = arith.constant 0 : index
    %4 = vector.load %arg3[%c0_2, %c0_3] : memref<8x768xbf16, #tpu.memory_space<vmem>>, vector<8x768xbf16>
    %c0_4 = arith.constant 0 : index
    %c0_5 = arith.constant 0 : index
    %5 = vector.load %arg4[%c0_4, %c0_5] : memref<768x256xbf16, #tpu.memory_space<vmem>>, vector<768x256xbf16>
    %cst = arith.constant dense<0.000000e+00> : vector<8x256xf32>
    %6 = tpu.matmul %4, %5, %cst {dimension_numbers = #tpu.dot_dimension_numbers<[1], [0], [0], [1], [0, 0, 1, 1], [], []>} : vector<8x768xbf16>, vector<768x256xbf16>, vector<8x256xf32> -> vector<8x256xf32>
    %7 = arith.addf %3, %6 : vector<8x256xf32>
    %c0_6 = arith.constant 0 : index
    %c0_7 = arith.constant 0 : index
    %8 = vector.load %arg7[%c0_6, %c0_7] : memref<8x256xf32, #tpu.memory_space<vmem>>, vector<8x256xf32>
    tpu.vector_store %arg7[%c0_6, %c0_7], %7 {strides = array<i32>} : memref<8x256xf32, #tpu.memory_space<vmem>>, vector<8x256xf32>,
    %c2_i32 = arith.constant 2 : i32
    %9 = arith.cmpi eq, %arg2, %c2_i32 : i32
    %10 = arith.extui %9 : i1 to i32
    %c0_i32_8 = arith.constant 0 : i32
    %11 = arith.cmpi ne, %10, %c0_i32_8 : i32
    scf.if %11 {
      %c0_9 = arith.constant 0 : index
      %c0_10 = arith.constant 0 : index
      %12 = vector.load %arg7[%c0_9, %c0_10] : memref<8x256xf32, #tpu.memory_space<vmem>>, vector<8x256xf32>
      %c0_11 = arith.constant 0 : index
      %c0_12 = arith.constant 0 : index
      %13 = vector.load %arg5[%c0_11, %c0_12] : memref<1x256xf32, #tpu.memory_space<vmem>>, vector<1x256xf32>
      %14 = vector.broadcast %13 : vector<1x256xf32> to vector<8x256xf32>
      %15 = arith.addf %12, %14 : vector<8x256xf32>
      %cst_13 = arith.constant 0.000000e+00 : f32
      %16 = vector.broadcast %cst_13 : f32 to vector<8x256xf32>
      %17 = arith.maximumf %15, %16 : vector<8x256xf32>
      %18 = arith.truncf %17 : vector<8x256xf32> to vector<8x256xbf16>
      %c0_14 = arith.constant 0 : index
      %c0_15 = arith.constant 0 : index
      %19 = vector.load %arg6[%c0_14, %c0_15] : memref<8x256xbf16, #tpu.memory_space<vmem>>, vector<8x256xbf16>
      tpu.vector_store %arg6[%c0_14, %c0_15], %18 {strides = array<i32>} : memref<8x256xbf16, #tpu.memory_space<vmem>>, vector<8x256xbf16>,
    } else {
    }
    return
  }
  func.func @transform_0(%arg0: i32, %arg1: i32, %arg2: i32) -> (i32, i32) {
    %c0_i32 = arith.constant 0 : i32
    return %arg0, %arg2 : i32, i32
  }
  func.func @transform_1(%arg0: i32, %arg1: i32, %arg2: i32) -> (i32, i32) {
    %c0_i32 = arith.constant 0 : i32
    return %arg2, %arg1 : i32, i32
  }
  func.func @transform_2(%arg0: i32, %arg1: i32, %arg2: i32) -> (i32, i32) {
    %c0_i32 = arith.constant 0 : i32
    %c0_i32_0 = arith.constant 0 : i32
    return %c0_i32, %arg1 : i32, i32
  }
  func.func @transform_3(%arg0: i32, %arg1: i32, %arg2: i32) -> (i32, i32) {
    %c0_i32 = arith.constant 0 : i32
    return %arg0, %arg1 : i32, i32
  }
}

module attributes {stable_mosaic.version = 11 : i64} {
  func.func @_matmul_acc_kernel(%arg0: i32, %arg1: i32, %arg2: i32, %arg3: memref<8x768xbf16, #tpu.memory_space<vmem>>, %arg4: memref<768x256xbf16, #tpu.memory_space<vmem>>, %arg5: memref<1x256xf32, #tpu.memory_space<vmem>>, %arg6: memref<8x256xbf16, #tpu.memory_space<vmem>>, %arg7: memref<8x256xbf16, #tpu.memory_space<vmem>>, %arg8: memref<8x256xf32, #tpu.memory_space<vmem>>) attributes {dimension_semantics = [#tpu.dimension_semantics<parallel>, #tpu.dimension_semantics<parallel>, #tpu.dimension_semantics<arbitrary>], iteration_bounds = array<i64: 1, 1, 3>, scalar_prefetch = 0 : i64, scratch_operands = 1 : i64, tpu.core_type = #tpu.core_type<tc>, window_params = [{transform_indices = @transform_0, window_bounds = array<i64: 8, 768>}, {transform_indices = @transform_1, window_bounds = array<i64: 768, 256>}, {transform_indices = @transform_2, window_bounds = array<i64: 1, 256>}, {transform_indices = @transform_3, window_bounds = array<i64: 8, 256>}, {transform_indices = @transform_4, window_bounds = array<i64: 8, 256>}]} {
    %c0_i32 = arith.constant 0 : i32
    %0 = arith.cmpi eq, %arg2, %c0_i32 : i32
    %1 = arith.extui %0 : i1 to i32
    %c0_i32_0 = arith.constant 0 : i32
    %2 = arith.cmpi ne, %1, %c0_i32_0 : i32
    scf.if %2 {
      %cst_9 = arith.constant 0.000000e+00 : f32
      %12 = vector.broadcast %cst_9 : f32 to vector<8x256xf32>
      %c0_10 = arith.constant 0 : index
      %c0_11 = arith.constant 0 : index
      %13 = vector.load %arg8[%c0_10, %c0_11] : memref<8x256xf32, #tpu.memory_space<vmem>>, vector<8x256xf32>
      tpu.vector_store %arg8[%c0_10, %c0_11], %12 {strides = array<i32>} : memref<8x256xf32, #tpu.memory_space<vmem>>, vector<8x256xf32>,
    } else {
    }
    %c0 = arith.constant 0 : index
    %c0_1 = arith.constant 0 : index
    %3 = vector.load %arg8[%c0, %c0_1] : memref<8x256xf32, #tpu.memory_space<vmem>>, vector<8x256xf32>
    %c0_2 = arith.constant 0 : index
    %c0_3 = arith.constant 0 : index
    %4 = vector.load %arg3[%c0_2, %c0_3] : memref<8x768xbf16, #tpu.memory_space<vmem>>, vector<8x768xbf16>
    %c0_4 = arith.constant 0 : index
    %c0_5 = arith.constant 0 : index
    %5 = vector.load %arg4[%c0_4, %c0_5] : memref<768x256xbf16, #tpu.memory_space<vmem>>, vector<768x256xbf16>
    %cst = arith.constant dense<0.000000e+00> : vector<8x256xf32>
    %6 = tpu.matmul %4, %5, %cst {dimension_numbers = #tpu.dot_dimension_numbers<[1], [0], [0], [1], [0, 0, 1, 1], [], []>} : vector<8x768xbf16>, vector<768x256xbf16>, vector<8x256xf32> -> vector<8x256xf32>
    %7 = arith.addf %3, %6 : vector<8x256xf32>
    %c0_6 = arith.constant 0 : index
    %c0_7 = arith.constant 0 : index
    %8 = vector.load %arg8[%c0_6, %c0_7] : memref<8x256xf32, #tpu.memory_space<vmem>>, vector<8x256xf32>
    tpu.vector_store %arg8[%c0_6, %c0_7], %7 {strides = array<i32>} : memref<8x256xf32, #tpu.memory_space<vmem>>, vector<8x256xf32>,
    %c2_i32 = arith.constant 2 : i32
    %9 = arith.cmpi eq, %arg2, %c2_i32 : i32
    %10 = arith.extui %9 : i1 to i32
    %c0_i32_8 = arith.constant 0 : i32
    %11 = arith.cmpi ne, %10, %c0_i32_8 : i32
    scf.if %11 {
      %c0_9 = arith.constant 0 : index
      %c0_10 = arith.constant 0 : index
      %12 = vector.load %arg8[%c0_9, %c0_10] : memref<8x256xf32, #tpu.memory_space<vmem>>, vector<8x256xf32>
      %c0_11 = arith.constant 0 : index
      %c0_12 = arith.constant 0 : index
      %13 = vector.load %arg5[%c0_11, %c0_12] : memref<1x256xf32, #tpu.memory_space<vmem>>, vector<1x256xf32>
      %14 = vector.broadcast %13 : vector<1x256xf32> to vector<8x256xf32>
      %15 = arith.addf %12, %14 : vector<8x256xf32>
      %c0_13 = arith.constant 0 : index
      %c0_14 = arith.constant 0 : index
      %16 = vector.load %arg6[%c0_13, %c0_14] : memref<8x256xbf16, #tpu.memory_space<vmem>>, vector<8x256xbf16>
      %17 = arith.extf %16 : vector<8x256xbf16> to vector<8x256xf32>
      %18 = arith.addf %15, %17 : vector<8x256xf32>
      %cst_15 = arith.constant 0.000000e+00 : f32
      %19 = vector.broadcast %cst_15 : f32 to vector<8x256xf32>
      %20 = arith.maximumf %18, %19 : vector<8x256xf32>
      %21 = arith.truncf %20 : vector<8x256xf32> to vector<8x256xbf16>
      %c0_16 = arith.constant 0 : index
      %c0_17 = arith.constant 0 : index
      %22 = vector.load %arg7[%c0_16, %c0_17] : memref<8x256xbf16, #tpu.memory_space<vmem>>, vector<8x256xbf16>
      tpu.vector_store %arg7[%c0_16, %c0_17], %21 {strides = array<i32>} : memref<8x256xbf16, #tpu.memory_space<vmem>>, vector<8x256xbf16>,
    } else {
    }
    return
  }
  func.func @transform_0(%arg0: i32, %arg1: i32, %arg2: i32) -> (i32, i32) {
    %c0_i32 = arith.constant 0 : i32
    return %arg0, %arg2 : i32, i32
  }
  func.func @transform_1(%arg0: i32, %arg1: i32, %arg2: i32) -> (i32, i32) {
    %c0_i32 = arith.constant 0 : i32
    return %arg2, %arg1 : i32, i32
  }
  func.func @transform_2(%arg0: i32, %arg1: i32, %arg2: i32) -> (i32, i32) {
    %c0_i32 = arith.constant 0 : i32
    %c0_i32_0 = arith.constant 0 : i32
    return %c0_i32, %arg1 : i32, i32
  }
  func.func @transform_3(%arg0: i32, %arg1: i32, %arg2: i32) -> (i32, i32) {
    %c0_i32 = arith.constant 0 : i32
    return %arg0, %arg1 : i32, i32
  }
  func.func @transform_4(%arg0: i32, %arg1: i32, %arg2: i32) -> (i32, i32) {
    %c0_i32 = arith.constant 0 : i32
    return %arg0, %arg1 : i32, i32
  }
}

module attributes {stable_mosaic.version = 11 : i64} {
  func.func @_matmul_single_kernel(%arg0: i32, %arg1: i32, %arg2: memref<8x128xbf16, #tpu.memory_space<vmem>>, %arg3: memref<128x256xbf16, #tpu.memory_space<vmem>>, %arg4: memref<1x256xf32, #tpu.memory_space<vmem>>, %arg5: memref<8x256xbf16, #tpu.memory_space<vmem>>) attributes {dimension_semantics = [#tpu.dimension_semantics<parallel>, #tpu.dimension_semantics<parallel>], iteration_bounds = array<i64: 1, 1>, scalar_prefetch = 0 : i64, scratch_operands = 0 : i64, tpu.core_type = #tpu.core_type<tc>, window_params = [{transform_indices = @transform_0, window_bounds = array<i64: 8, 128>}, {transform_indices = @transform_1, window_bounds = array<i64: 128, 256>}, {transform_indices = @transform_2, window_bounds = array<i64: 1, 256>}, {transform_indices = @transform_3, window_bounds = array<i64: 8, 256>}]} {
    %c0 = arith.constant 0 : index
    %c0_0 = arith.constant 0 : index
    %0 = vector.load %arg2[%c0, %c0_0] : memref<8x128xbf16, #tpu.memory_space<vmem>>, vector<8x128xbf16>
    %c0_1 = arith.constant 0 : index
    %c0_2 = arith.constant 0 : index
    %1 = vector.load %arg3[%c0_1, %c0_2] : memref<128x256xbf16, #tpu.memory_space<vmem>>, vector<128x256xbf16>
    %cst = arith.constant dense<0.000000e+00> : vector<8x256xf32>
    %2 = tpu.matmul %0, %1, %cst {dimension_numbers = #tpu.dot_dimension_numbers<[1], [0], [0], [1], [0, 0, 1, 1], [], []>} : vector<8x128xbf16>, vector<128x256xbf16>, vector<8x256xf32> -> vector<8x256xf32>
    %c0_3 = arith.constant 0 : index
    %c0_4 = arith.constant 0 : index
    %3 = vector.load %arg4[%c0_3, %c0_4] : memref<1x256xf32, #tpu.memory_space<vmem>>, vector<1x256xf32>
    %4 = vector.broadcast %3 : vector<1x256xf32> to vector<8x256xf32>
    %5 = arith.addf %2, %4 : vector<8x256xf32>
    %6 = arith.truncf %5 : vector<8x256xf32> to vector<8x256xbf16>
    %c0_5 = arith.constant 0 : index
    %c0_6 = arith.constant 0 : index
    %7 = vector.load %arg5[%c0_5, %c0_6] : memref<8x256xbf16, #tpu.memory_space<vmem>>, vector<8x256xbf16>
    tpu.vector_store %arg5[%c0_5, %c0_6], %6 {strides = array<i32>} : memref<8x256xbf16, #tpu.memory_space<vmem>>, vector<8x256xbf16>,
    return
  }
  func.func @transform_0(%arg0: i32, %arg1: i32) -> (i32, i32) {
    %c0_i32 = arith.constant 0 : i32
    %c0_i32_0 = arith.constant 0 : i32
    return %arg0, %c0_i32 : i32, i32
  }
  func.func @transform_1(%arg0: i32, %arg1: i32) -> (i32, i32) {
    %c0_i32 = arith.constant 0 : i32
    %c0_i32_0 = arith.constant 0 : i32
    return %c0_i32, %arg1 : i32, i32
  }
  func.func @transform_2(%arg0: i32, %arg1: i32) -> (i32, i32) {
    %c0_i32 = arith.constant 0 : i32
    %c0_i32_0 = arith.constant 0 : i32
    return %c0_i32, %arg1 : i32, i32
  }
  func.func @transform_3(%arg0: i32, %arg1: i32) -> (i32, i32) {
    %c0_i32 = arith.constant 0 : i32
    return %arg0, %arg1 : i32, i32
  }
}

module attributes {stable_mosaic.version = 11 : i64} {
  func.func @_matmul_acc_kernel(%arg0: i32, %arg1: i32, %arg2: i32, %arg3: memref<8x768xbf16, #tpu.memory_space<vmem>>, %arg4: memref<768x256xbf16, #tpu.memory_space<vmem>>, %arg5: memref<1x256xf32, #tpu.memory_space<vmem>>, %arg6: memref<8x256xbf16, #tpu.memory_space<vmem>>, %arg7: memref<8x256xf32, #tpu.memory_space<vmem>>) attributes {dimension_semantics = [#tpu.dimension_semantics<parallel>, #tpu.dimension_semantics<parallel>, #tpu.dimension_semantics<arbitrary>], iteration_bounds = array<i64: 1, 2, 3>, scalar_prefetch = 0 : i64, scratch_operands = 1 : i64, tpu.core_type = #tpu.core_type<tc>, window_params = [{transform_indices = @transform_0, window_bounds = array<i64: 8, 768>}, {transform_indices = @transform_1, window_bounds = array<i64: 768, 256>}, {transform_indices = @transform_2, window_bounds = array<i64: 1, 256>}, {transform_indices = @transform_3, window_bounds = array<i64: 8, 256>}]} {
    %c0_i32 = arith.constant 0 : i32
    %0 = arith.cmpi eq, %arg2, %c0_i32 : i32
    %1 = arith.extui %0 : i1 to i32
    %c0_i32_0 = arith.constant 0 : i32
    %2 = arith.cmpi ne, %1, %c0_i32_0 : i32
    scf.if %2 {
      %cst_9 = arith.constant 0.000000e+00 : f32
      %12 = vector.broadcast %cst_9 : f32 to vector<8x256xf32>
      %c0_10 = arith.constant 0 : index
      %c0_11 = arith.constant 0 : index
      %13 = vector.load %arg7[%c0_10, %c0_11] : memref<8x256xf32, #tpu.memory_space<vmem>>, vector<8x256xf32>
      tpu.vector_store %arg7[%c0_10, %c0_11], %12 {strides = array<i32>} : memref<8x256xf32, #tpu.memory_space<vmem>>, vector<8x256xf32>,
    } else {
    }
    %c0 = arith.constant 0 : index
    %c0_1 = arith.constant 0 : index
    %3 = vector.load %arg7[%c0, %c0_1] : memref<8x256xf32, #tpu.memory_space<vmem>>, vector<8x256xf32>
    %c0_2 = arith.constant 0 : index
    %c0_3 = arith.constant 0 : index
    %4 = vector.load %arg3[%c0_2, %c0_3] : memref<8x768xbf16, #tpu.memory_space<vmem>>, vector<8x768xbf16>
    %c0_4 = arith.constant 0 : index
    %c0_5 = arith.constant 0 : index
    %5 = vector.load %arg4[%c0_4, %c0_5] : memref<768x256xbf16, #tpu.memory_space<vmem>>, vector<768x256xbf16>
    %cst = arith.constant dense<0.000000e+00> : vector<8x256xf32>
    %6 = tpu.matmul %4, %5, %cst {dimension_numbers = #tpu.dot_dimension_numbers<[1], [0], [0], [1], [0, 0, 1, 1], [], []>} : vector<8x768xbf16>, vector<768x256xbf16>, vector<8x256xf32> -> vector<8x256xf32>
    %7 = arith.addf %3, %6 : vector<8x256xf32>
    %c0_6 = arith.constant 0 : index
    %c0_7 = arith.constant 0 : index
    %8 = vector.load %arg7[%c0_6, %c0_7] : memref<8x256xf32, #tpu.memory_space<vmem>>, vector<8x256xf32>
    tpu.vector_store %arg7[%c0_6, %c0_7], %7 {strides = array<i32>} : memref<8x256xf32, #tpu.memory_space<vmem>>, vector<8x256xf32>,
    %c2_i32 = arith.constant 2 : i32
    %9 = arith.cmpi eq, %arg2, %c2_i32 : i32
    %10 = arith.extui %9 : i1 to i32
    %c0_i32_8 = arith.constant 0 : i32
    %11 = arith.cmpi ne, %10, %c0_i32_8 : i32
    scf.if %11 {
      %c0_9 = arith.constant 0 : index
      %c0_10 = arith.constant 0 : index
      %12 = vector.load %arg7[%c0_9, %c0_10] : memref<8x256xf32, #tpu.memory_space<vmem>>, vector<8x256xf32>
      %c0_11 = arith.constant 0 : index
      %c0_12 = arith.constant 0 : index
      %13 = vector.load %arg5[%c0_11, %c0_12] : memref<1x256xf32, #tpu.memory_space<vmem>>, vector<1x256xf32>
      %14 = vector.broadcast %13 : vector<1x256xf32> to vector<8x256xf32>
      %15 = arith.addf %12, %14 : vector<8x256xf32>
      %cst_13 = arith.constant 0.000000e+00 : f32
      %16 = vector.broadcast %cst_13 : f32 to vector<8x256xf32>
      %17 = arith.maximumf %15, %16 : vector<8x256xf32>
      %18 = arith.truncf %17 : vector<8x256xf32> to vector<8x256xbf16>
      %c0_14 = arith.constant 0 : index
      %c0_15 = arith.constant 0 : index
      %19 = vector.load %arg6[%c0_14, %c0_15] : memref<8x256xbf16, #tpu.memory_space<vmem>>, vector<8x256xbf16>
      tpu.vector_store %arg6[%c0_14, %c0_15], %18 {strides = array<i32>} : memref<8x256xbf16, #tpu.memory_space<vmem>>, vector<8x256xbf16>,
    } else {
    }
    return
  }
  func.func @transform_0(%arg0: i32, %arg1: i32, %arg2: i32) -> (i32, i32) {
    %c0_i32 = arith.constant 0 : i32
    return %arg0, %arg2 : i32, i32
  }
  func.func @transform_1(%arg0: i32, %arg1: i32, %arg2: i32) -> (i32, i32) {
    %c0_i32 = arith.constant 0 : i32
    return %arg2, %arg1 : i32, i32
  }
  func.func @transform_2(%arg0: i32, %arg1: i32, %arg2: i32) -> (i32, i32) {
    %c0_i32 = arith.constant 0 : i32
    %c0_i32_0 = arith.constant 0 : i32
    return %c0_i32, %arg1 : i32, i32
  }
  func.func @transform_3(%arg0: i32, %arg1: i32, %arg2: i32) -> (i32, i32) {
    %c0_i32 = arith.constant 0 : i32
    return %arg0, %arg1 : i32, i32
  }
}

module attributes {stable_mosaic.version = 11 : i64} {
  func.func @_matmul_single_kernel(%arg0: i32, %arg1: i32, %arg2: memref<8x256xbf16, #tpu.memory_space<vmem>>, %arg3: memref<256x256xbf16, #tpu.memory_space<vmem>>, %arg4: memref<1x256xf32, #tpu.memory_space<vmem>>, %arg5: memref<8x256xbf16, #tpu.memory_space<vmem>>) attributes {dimension_semantics = [#tpu.dimension_semantics<parallel>, #tpu.dimension_semantics<parallel>], iteration_bounds = array<i64: 1, 2>, scalar_prefetch = 0 : i64, scratch_operands = 0 : i64, tpu.core_type = #tpu.core_type<tc>, window_params = [{transform_indices = @transform_0, window_bounds = array<i64: 8, 256>}, {transform_indices = @transform_1, window_bounds = array<i64: 256, 256>}, {transform_indices = @transform_2, window_bounds = array<i64: 1, 256>}, {transform_indices = @transform_3, window_bounds = array<i64: 8, 256>}]} {
    %c0 = arith.constant 0 : index
    %c0_0 = arith.constant 0 : index
    %0 = vector.load %arg2[%c0, %c0_0] : memref<8x256xbf16, #tpu.memory_space<vmem>>, vector<8x256xbf16>
    %c0_1 = arith.constant 0 : index
    %c0_2 = arith.constant 0 : index
    %1 = vector.load %arg3[%c0_1, %c0_2] : memref<256x256xbf16, #tpu.memory_space<vmem>>, vector<256x256xbf16>
    %cst = arith.constant dense<0.000000e+00> : vector<8x256xf32>
    %2 = tpu.matmul %0, %1, %cst {dimension_numbers = #tpu.dot_dimension_numbers<[1], [0], [0], [1], [0, 0, 1, 1], [], []>} : vector<8x256xbf16>, vector<256x256xbf16>, vector<8x256xf32> -> vector<8x256xf32>
    %c0_3 = arith.constant 0 : index
    %c0_4 = arith.constant 0 : index
    %3 = vector.load %arg4[%c0_3, %c0_4] : memref<1x256xf32, #tpu.memory_space<vmem>>, vector<1x256xf32>
    %4 = vector.broadcast %3 : vector<1x256xf32> to vector<8x256xf32>
    %5 = arith.addf %2, %4 : vector<8x256xf32>
    %6 = arith.truncf %5 : vector<8x256xf32> to vector<8x256xbf16>
    %c0_5 = arith.constant 0 : index
    %c0_6 = arith.constant 0 : index
    %7 = vector.load %arg5[%c0_5, %c0_6] : memref<8x256xbf16, #tpu.memory_space<vmem>>, vector<8x256xbf16>
    tpu.vector_store %arg5[%c0_5, %c0_6], %6 {strides = array<i32>} : memref<8x256xbf16, #tpu.memory_space<vmem>>, vector<8x256xbf16>,
    return
  }
  func.func @transform_0(%arg0: i32, %arg1: i32) -> (i32, i32) {
    %c0_i32 = arith.constant 0 : i32
    %c0_i32_0 = arith.constant 0 : i32
    return %arg0, %c0_i32 : i32, i32
  }
  func.func @transform_1(%arg0: i32, %arg1: i32) -> (i32, i32) {
    %c0_i32 = arith.constant 0 : i32
    %c0_i32_0 = arith.constant 0 : i32
    return %c0_i32, %arg1 : i32, i32
  }
  func.func @transform_2(%arg0: i32, %arg1: i32) -> (i32, i32) {
    %c0_i32 = arith.constant 0 : i32
    %c0_i32_0 = arith.constant 0 : i32
    return %c0_i32, %arg1 : i32, i32
  }
  func.func @transform_3(%arg0: i32, %arg1: i32) -> (i32, i32) {
    %c0_i32 = arith.constant 0 : i32
    return %arg0, %arg1 : i32, i32
  }
}

module attributes {stable_mosaic.version = 11 : i64} {
  func.func @_matmul_acc_kernel(%arg0: i32, %arg1: i32, %arg2: i32, %arg3: memref<8x768xbf16, #tpu.memory_space<vmem>>, %arg4: memref<768x256xbf16, #tpu.memory_space<vmem>>, %arg5: memref<1x256xf32, #tpu.memory_space<vmem>>, %arg6: memref<8x256xbf16, #tpu.memory_space<vmem>>, %arg7: memref<8x256xbf16, #tpu.memory_space<vmem>>, %arg8: memref<8x256xf32, #tpu.memory_space<vmem>>) attributes {dimension_semantics = [#tpu.dimension_semantics<parallel>, #tpu.dimension_semantics<parallel>, #tpu.dimension_semantics<arbitrary>], iteration_bounds = array<i64: 1, 2, 6>, scalar_prefetch = 0 : i64, scratch_operands = 1 : i64, tpu.core_type = #tpu.core_type<tc>, window_params = [{transform_indices = @transform_0, window_bounds = array<i64: 8, 768>}, {transform_indices = @transform_1, window_bounds = array<i64: 768, 256>}, {transform_indices = @transform_2, window_bounds = array<i64: 1, 256>}, {transform_indices = @transform_3, window_bounds = array<i64: 8, 256>}, {transform_indices = @transform_4, window_bounds = array<i64: 8, 256>}]} {
    %c0_i32 = arith.constant 0 : i32
    %0 = arith.cmpi eq, %arg2, %c0_i32 : i32
    %1 = arith.extui %0 : i1 to i32
    %c0_i32_0 = arith.constant 0 : i32
    %2 = arith.cmpi ne, %1, %c0_i32_0 : i32
    scf.if %2 {
      %cst_9 = arith.constant 0.000000e+00 : f32
      %12 = vector.broadcast %cst_9 : f32 to vector<8x256xf32>
      %c0_10 = arith.constant 0 : index
      %c0_11 = arith.constant 0 : index
      %13 = vector.load %arg8[%c0_10, %c0_11] : memref<8x256xf32, #tpu.memory_space<vmem>>, vector<8x256xf32>
      tpu.vector_store %arg8[%c0_10, %c0_11], %12 {strides = array<i32>} : memref<8x256xf32, #tpu.memory_space<vmem>>, vector<8x256xf32>,
    } else {
    }
    %c0 = arith.constant 0 : index
    %c0_1 = arith.constant 0 : index
    %3 = vector.load %arg8[%c0, %c0_1] : memref<8x256xf32, #tpu.memory_space<vmem>>, vector<8x256xf32>
    %c0_2 = arith.constant 0 : index
    %c0_3 = arith.constant 0 : index
    %4 = vector.load %arg3[%c0_2, %c0_3] : memref<8x768xbf16, #tpu.memory_space<vmem>>, vector<8x768xbf16>
    %c0_4 = arith.constant 0 : index
    %c0_5 = arith.constant 0 : index
    %5 = vector.load %arg4[%c0_4, %c0_5] : memref<768x256xbf16, #tpu.memory_space<vmem>>, vector<768x256xbf16>
    %cst = arith.constant dense<0.000000e+00> : vector<8x256xf32>
    %6 = tpu.matmul %4, %5, %cst {dimension_numbers = #tpu.dot_dimension_numbers<[1], [0], [0], [1], [0, 0, 1, 1], [], []>} : vector<8x768xbf16>, vector<768x256xbf16>, vector<8x256xf32> -> vector<8x256xf32>
    %7 = arith.addf %3, %6 : vector<8x256xf32>
    %c0_6 = arith.constant 0 : index
    %c0_7 = arith.constant 0 : index
    %8 = vector.load %arg8[%c0_6, %c0_7] : memref<8x256xf32, #tpu.memory_space<vmem>>, vector<8x256xf32>
    tpu.vector_store %arg8[%c0_6, %c0_7], %7 {strides = array<i32>} : memref<8x256xf32, #tpu.memory_space<vmem>>, vector<8x256xf32>,
    %c5_i32 = arith.constant 5 : i32
    %9 = arith.cmpi eq, %arg2, %c5_i32 : i32
    %10 = arith.extui %9 : i1 to i32
    %c0_i32_8 = arith.constant 0 : i32
    %11 = arith.cmpi ne, %10, %c0_i32_8 : i32
    scf.if %11 {
      %c0_9 = arith.constant 0 : index
      %c0_10 = arith.constant 0 : index
      %12 = vector.load %arg8[%c0_9, %c0_10] : memref<8x256xf32, #tpu.memory_space<vmem>>, vector<8x256xf32>
      %c0_11 = arith.constant 0 : index
      %c0_12 = arith.constant 0 : index
      %13 = vector.load %arg5[%c0_11, %c0_12] : memref<1x256xf32, #tpu.memory_space<vmem>>, vector<1x256xf32>
      %14 = vector.broadcast %13 : vector<1x256xf32> to vector<8x256xf32>
      %15 = arith.addf %12, %14 : vector<8x256xf32>
      %c0_13 = arith.constant 0 : index
      %c0_14 = arith.constant 0 : index
      %16 = vector.load %arg6[%c0_13, %c0_14] : memref<8x256xbf16, #tpu.memory_space<vmem>>, vector<8x256xbf16>
      %17 = arith.extf %16 : vector<8x256xbf16> to vector<8x256xf32>
      %18 = arith.addf %15, %17 : vector<8x256xf32>
      %cst_15 = arith.constant 0.000000e+00 : f32
      %19 = vector.broadcast %cst_15 : f32 to vector<8x256xf32>
      %20 = arith.maximumf %18, %19 : vector<8x256xf32>
      %21 = arith.truncf %20 : vector<8x256xf32> to vector<8x256xbf16>
      %c0_16 = arith.constant 0 : index
      %c0_17 = arith.constant 0 : index
      %22 = vector.load %arg7[%c0_16, %c0_17] : memref<8x256xbf16, #tpu.memory_space<vmem>>, vector<8x256xbf16>
      tpu.vector_store %arg7[%c0_16, %c0_17], %21 {strides = array<i32>} : memref<8x256xbf16, #tpu.memory_space<vmem>>, vector<8x256xbf16>,
    } else {
    }
    return
  }
  func.func @transform_0(%arg0: i32, %arg1: i32, %arg2: i32) -> (i32, i32) {
    %c0_i32 = arith.constant 0 : i32
    return %arg0, %arg2 : i32, i32
  }
  func.func @transform_1(%arg0: i32, %arg1: i32, %arg2: i32) -> (i32, i32) {
    %c0_i32 = arith.constant 0 : i32
    return %arg2, %arg1 : i32, i32
  }
  func.func @transform_2(%arg0: i32, %arg1: i32, %arg2: i32) -> (i32, i32) {
    %c0_i32 = arith.constant 0 : i32
    %c0_i32_0 = arith.constant 0 : i32
    return %c0_i32, %arg1 : i32, i32
  }
  func.func @transform_3(%arg0: i32, %arg1: i32, %arg2: i32) -> (i32, i32) {
    %c0_i32 = arith.constant 0 : i32
    return %arg0, %arg1 : i32, i32
  }
  func.func @transform_4(%arg0: i32, %arg1: i32, %arg2: i32) -> (i32, i32) {
    %c0_i32 = arith.constant 0 : i32
    return %arg0, %arg1 : i32, i32
  }
}

module attributes {stable_mosaic.version = 11 : i64} {
  func.func @_matmul_acc_kernel(%arg0: i32, %arg1: i32, %arg2: i32, %arg3: memref<8x768xbf16, #tpu.memory_space<vmem>>, %arg4: memref<768x256xbf16, #tpu.memory_space<vmem>>, %arg5: memref<1x256xf32, #tpu.memory_space<vmem>>, %arg6: memref<8x256xbf16, #tpu.memory_space<vmem>>, %arg7: memref<8x256xf32, #tpu.memory_space<vmem>>) attributes {dimension_semantics = [#tpu.dimension_semantics<parallel>, #tpu.dimension_semantics<parallel>, #tpu.dimension_semantics<arbitrary>], iteration_bounds = array<i64: 1, 2, 6>, scalar_prefetch = 0 : i64, scratch_operands = 1 : i64, tpu.core_type = #tpu.core_type<tc>, window_params = [{transform_indices = @transform_0, window_bounds = array<i64: 8, 768>}, {transform_indices = @transform_1, window_bounds = array<i64: 768, 256>}, {transform_indices = @transform_2, window_bounds = array<i64: 1, 256>}, {transform_indices = @transform_3, window_bounds = array<i64: 8, 256>}]} {
    %c0_i32 = arith.constant 0 : i32
    %0 = arith.cmpi eq, %arg2, %c0_i32 : i32
    %1 = arith.extui %0 : i1 to i32
    %c0_i32_0 = arith.constant 0 : i32
    %2 = arith.cmpi ne, %1, %c0_i32_0 : i32
    scf.if %2 {
      %cst_9 = arith.constant 0.000000e+00 : f32
      %12 = vector.broadcast %cst_9 : f32 to vector<8x256xf32>
      %c0_10 = arith.constant 0 : index
      %c0_11 = arith.constant 0 : index
      %13 = vector.load %arg7[%c0_10, %c0_11] : memref<8x256xf32, #tpu.memory_space<vmem>>, vector<8x256xf32>
      tpu.vector_store %arg7[%c0_10, %c0_11], %12 {strides = array<i32>} : memref<8x256xf32, #tpu.memory_space<vmem>>, vector<8x256xf32>,
    } else {
    }
    %c0 = arith.constant 0 : index
    %c0_1 = arith.constant 0 : index
    %3 = vector.load %arg7[%c0, %c0_1] : memref<8x256xf32, #tpu.memory_space<vmem>>, vector<8x256xf32>
    %c0_2 = arith.constant 0 : index
    %c0_3 = arith.constant 0 : index
    %4 = vector.load %arg3[%c0_2, %c0_3] : memref<8x768xbf16, #tpu.memory_space<vmem>>, vector<8x768xbf16>
    %c0_4 = arith.constant 0 : index
    %c0_5 = arith.constant 0 : index
    %5 = vector.load %arg4[%c0_4, %c0_5] : memref<768x256xbf16, #tpu.memory_space<vmem>>, vector<768x256xbf16>
    %cst = arith.constant dense<0.000000e+00> : vector<8x256xf32>
    %6 = tpu.matmul %4, %5, %cst {dimension_numbers = #tpu.dot_dimension_numbers<[1], [0], [0], [1], [0, 0, 1, 1], [], []>} : vector<8x768xbf16>, vector<768x256xbf16>, vector<8x256xf32> -> vector<8x256xf32>
    %7 = arith.addf %3, %6 : vector<8x256xf32>
    %c0_6 = arith.constant 0 : index
    %c0_7 = arith.constant 0 : index
    %8 = vector.load %arg7[%c0_6, %c0_7] : memref<8x256xf32, #tpu.memory_space<vmem>>, vector<8x256xf32>
    tpu.vector_store %arg7[%c0_6, %c0_7], %7 {strides = array<i32>} : memref<8x256xf32, #tpu.memory_space<vmem>>, vector<8x256xf32>,
    %c5_i32 = arith.constant 5 : i32
    %9 = arith.cmpi eq, %arg2, %c5_i32 : i32
    %10 = arith.extui %9 : i1 to i32
    %c0_i32_8 = arith.constant 0 : i32
    %11 = arith.cmpi ne, %10, %c0_i32_8 : i32
    scf.if %11 {
      %c0_9 = arith.constant 0 : index
      %c0_10 = arith.constant 0 : index
      %12 = vector.load %arg7[%c0_9, %c0_10] : memref<8x256xf32, #tpu.memory_space<vmem>>, vector<8x256xf32>
      %c0_11 = arith.constant 0 : index
      %c0_12 = arith.constant 0 : index
      %13 = vector.load %arg5[%c0_11, %c0_12] : memref<1x256xf32, #tpu.memory_space<vmem>>, vector<1x256xf32>
      %14 = vector.broadcast %13 : vector<1x256xf32> to vector<8x256xf32>
      %15 = arith.addf %12, %14 : vector<8x256xf32>
      %cst_13 = arith.constant 0.000000e+00 : f32
      %16 = vector.broadcast %cst_13 : f32 to vector<8x256xf32>
      %17 = arith.maximumf %15, %16 : vector<8x256xf32>
      %18 = arith.truncf %17 : vector<8x256xf32> to vector<8x256xbf16>
      %c0_14 = arith.constant 0 : index
      %c0_15 = arith.constant 0 : index
      %19 = vector.load %arg6[%c0_14, %c0_15] : memref<8x256xbf16, #tpu.memory_space<vmem>>, vector<8x256xbf16>
      tpu.vector_store %arg6[%c0_14, %c0_15], %18 {strides = array<i32>} : memref<8x256xbf16, #tpu.memory_space<vmem>>, vector<8x256xbf16>,
    } else {
    }
    return
  }
  func.func @transform_0(%arg0: i32, %arg1: i32, %arg2: i32) -> (i32, i32) {
    %c0_i32 = arith.constant 0 : i32
    return %arg0, %arg2 : i32, i32
  }
  func.func @transform_1(%arg0: i32, %arg1: i32, %arg2: i32) -> (i32, i32) {
    %c0_i32 = arith.constant 0 : i32
    return %arg2, %arg1 : i32, i32
  }
  func.func @transform_2(%arg0: i32, %arg1: i32, %arg2: i32) -> (i32, i32) {
    %c0_i32 = arith.constant 0 : i32
    %c0_i32_0 = arith.constant 0 : i32
    return %c0_i32, %arg1 : i32, i32
  }
  func.func @transform_3(%arg0: i32, %arg1: i32, %arg2: i32) -> (i32, i32) {
    %c0_i32 = arith.constant 0 : i32
    return %arg0, %arg1 : i32, i32
  }
}

module attributes {stable_mosaic.version = 11 : i64} {
  func.func @_avgpool_fc_kernel(%arg0: memref<2x1x512xbf16, #tpu.memory_space<vmem>>, %arg1: memref<512x128xf32, #tpu.memory_space<vmem>>, %arg2: memref<1x128xf32, #tpu.memory_space<vmem>>, %arg3: memref<2x128xf32, #tpu.memory_space<vmem>>) attributes {dimension_semantics = [], scalar_prefetch = 0 : i64, scratch_operands = 0 : i64, tpu.core_type = #tpu.core_type<tc>} {
    %c0 = arith.constant 0 : index
    %c0_0 = arith.constant 0 : index
    %c0_1 = arith.constant 0 : index
    %0 = vector.load %arg0[%c0, %c0_0, %c0_1] : memref<2x1x512xbf16, #tpu.memory_space<vmem>>, vector<2x1x512xbf16>
    %1 = arith.extf %0 : vector<2x1x512xbf16> to vector<2x1x512xf32>
    %cst = arith.constant dense<0.000000e+00> : vector<2x512xf32>
    %2 = vector.multi_reduction <add>, %1, %cst [1] : vector<2x1x512xf32> to vector<2x512xf32>
    %cst_2 = arith.constant 1.000000e+00 : f32
    %3 = vector.broadcast %cst_2 : f32 to vector<2x512xf32>
    %4 = arith.divf %2, %3 : vector<2x512xf32>
    %c0_3 = arith.constant 0 : index
    %c0_4 = arith.constant 0 : index
    %5 = vector.load %arg1[%c0_3, %c0_4] : memref<512x128xf32, #tpu.memory_space<vmem>>, vector<512x128xf32>
    %cst_5 = arith.constant dense<0.000000e+00> : vector<2x128xf32>
    %6 = tpu.matmul %4, %5, %cst_5 {dimension_numbers = #tpu.dot_dimension_numbers<[1], [0], [0], [1], [0, 0, 1, 1], [], []>} : vector<2x512xf32>, vector<512x128xf32>, vector<2x128xf32> -> vector<2x128xf32>
    %c0_6 = arith.constant 0 : index
    %c0_7 = arith.constant 0 : index
    %7 = vector.load %arg2[%c0_6, %c0_7] : memref<1x128xf32, #tpu.memory_space<vmem>>, vector<1x128xf32>
    %8 = vector.broadcast %7 : vector<1x128xf32> to vector<2x128xf32>
    %9 = arith.addf %6, %8 : vector<2x128xf32>
    %c0_8 = arith.constant 0 : index
    %c0_9 = arith.constant 0 : index
    %10 = vector.load %arg3[%c0_8, %c0_9] : memref<2x128xf32, #tpu.memory_space<vmem>>, vector<2x128xf32>
    tpu.vector_store %arg3[%c0_8, %c0_9], %9 {strides = array<i32>} : memref<2x128xf32, #tpu.memory_space<vmem>>, vector<2x128xf32>,
    return
  }
}

</mosaic_0001>

<bundles_post_ra>
// kernel: resnet18_forward.22
= control target key start
LH: loop header
LB: loop body
LE: loop exit
PB: predicated region body
PF: predicated region fallthrough
CT: control target
= control target key end

     0   :  { %s1070_s12 = smov 0   ;;  %s1072_s13 = smov 0   ;;  %s1204_s0 = inlined_call_operand.vmem [shape: bf16[512,256], index: 0, kind: input, shape index: {}]   ;;  %s1205_s1 = inlined_call_operand.vmem [shape: bf16[256,128], index: 1, kind: input, shape index: {}]   ;;  %s1206_s2 = inlined_call_operand.vmem [shape: f32[1,128], index: 2, kind: input, shape index: {}]   ;;  %s1207_s3 = inlined_call_operand.vmem [shape: bf16[512,128], index: 3, kind: output, shape index: {}]  }
   0x1   :  { %s1074_s14 = smov 0  }
   0x2 LB: > { %s25_s15 = sadd.s32 1, %s1044_s13  ;;  %p761_p0 = scmp.ge.s32.totalorder %s1048_s14, 1  ;;  %s1048_s14 = sphi %s1074_s14, %s13_s14   ;;  %s1044_s13 = sphi %s1072_s13, %s1209_s13   ;;  %s1040_s12 = sphi %s1070_s12, %s1208_s12  }
   0x3   : > { %p27_p1 = scmp.ge.s32.totalorder %s25_s15, 4  ;;  %p170_p2 = scmp.lt.s32.totalorder %s1048_s14, 5 }
   0x5   : > { %s1211_s15 = smov (%p27_p1, %s25_s15), 0  ;;  %p171_p3 = pnand %p761_p0, %p170_p2 }
   0x6   : > { %s762_s18 = sshll.u32 (!%p171_p3), %s1040_s12, 4 }
   0x7   : > { %174 = sbr.rel (%p171_p3) target bundleno = 277 (0x115), region = 32  ;;  %p206_p4 = scmp.lt.s32.totalorder (!%p171_p3), %s762_s18, 63 }
   0xc   : > { %v986_v0 = vld [vmem:[%s1205_s1 + $0x78] sm:$0xff]   ;;  %v988_v2 = vld [vmem:[%s1205_s1 + $0x70] sm:$0xff]   ;;  %v990_v4 = vld [vmem:[%s1205_s1 + $0x68] sm:$0xff]   ;;  %s1213_s18 = smov (!%p206_p4, %s762_s18), 63 }
   0xd   : > { %v987_v1 = vld [vmem:[%s1205_s1 + $0x38] sm:$0xff]   ;;  %882 = vmatprep.subr.bf16.mxu0 %v986_v0  ;;  %946 = vmatprep.subr.bf16.mxu1 %v986_v0  ;;  %v989_v3 = vld [vmem:[%s1205_s1 + $0x30] sm:$0xff]   ;;  %v991_v5 = vld [vmem:[%s1205_s1 + $0x28] sm:$0xff]   ;;  %s818_s6 = sshll.u32 %s1213_s18, 3  ;;  %s766_s5 = sshll.u32 %s1213_s18, 2 }
   0xe   : > { %883 = vmatpush3.bf16.msra.mxu0 %v987_v1  ;;  %954 = vmatpush3.bf16.msra.mxu1 %v987_v1  ;;  %v992_v6 = vld [vmem:[%s1205_s1 + $0x60] sm:$0xff]   ;;  %v994_v8 = vld [vmem:[%s1205_s1 + $0x58] sm:$0xff]   ;;  %s1121_s11 = scalar_lea.vmem %s1204_s0, %s818_s6  ;;  %v996_v10 = vld [vmem:[%s1205_s1 + $0x50] sm:$0xff]   ;;  %s1173_s8 = scalar_lea.vmem %s1207_s3, %s766_s5 }
   0xf   : > { %884 = vmatprep.subr.bf16.mxu0 %v988_v2  ;;  %947 = vmatprep.subr.bf16.mxu1 %v988_v2  ;;  %v993_v7 = vld [vmem:[%s1205_s1 + $0x20] sm:$0xff]   ;;  %v995_v9 = vld [vmem:[%s1205_s1 + $0x18] sm:$0xff]   ;;  %v997_v13 = vld [vmem:[%s1205_s1 + $0x10] sm:$0xff]  }
  0x10   : > { %v1004_v11 = vld [vmem:[%s1121_s11 + $0x4] ss:$8 sps:$4 sm:$0xff]   ;;  %v1002_v18 = vld [vmem:[%s1121_s11] ss:$8 sps:$4 sm:$0xff]   ;;  %v1008_v20 = vld [vmem:[%s1121_s11 + $0x14] ss:$8 sps:$4 sm:$0xff]  }
  0x11   : > { %v1007_v12 = vld [vmem:[%s1121_s11 + $0x44] ss:$8 sps:$4 sm:$0xff]   ;;  %492 = vmatprep.mubr.bf16.mxu0 %v1004_v11  ;;  %v1005_v19 = vld [vmem:[%s1121_s11 + $0x40] ss:$8 sps:$4 sm:$0xff]   ;;  %v1010_v21 = vld [vmem:[%s1121_s11 + $0x54] ss:$8 sps:$4 sm:$0xff]  }
  0x12   : > { %885 = vmatpush3.bf16.msra.mxu0 %v989_v3  ;;  %955 = vmatpush3.bf16.msra.mxu1 %v989_v3  ;;  %v998_v14 = vld [vmem:[%s1205_s1 + $0x48] sm:$0xff]   ;;  %v1000_v16 = vld [vmem:[%s1205_s1 + $0x40] sm:$0xff]   ;;  %v1012_v22 = vld [vmem:[%s1121_s11 + $0x10] ss:$8 sps:$4 sm:$0xff]  }
  0x13   : > { %886 = vmatprep.subr.bf16.mxu0 %v990_v4  ;;  %948 = vmatprep.subr.bf16.mxu1 %v990_v4  ;;  %v999_v15 = vld [vmem:[%s1205_s1 + $0x8] sm:$0xff]   ;;  %v1001_v17 = vld [vmem:[%s1205_s1] sm:$0xff]   ;;  %v1013_v23 = vld [vmem:[%s1121_s11 + $0x50] ss:$8 sps:$4 sm:$0xff]  }
  0x14   : > { %524 = vmatprep.mubr.bf16.mxu1 %v1007_v12  ;;  %v1014_v24 = vld [vmem:[%s1121_s11 + $0x24] ss:$8 sps:$4 sm:$0xff]   ;;  %v1018_v26 = vld [vmem:[%s1121_s11 + $0x20] ss:$8 sps:$4 sm:$0xff]   ;;  %v1020_v28 = vld [vmem:[%s1121_s11 + $0x34] ss:$8 sps:$4 sm:$0xff]  }
  0x15   : > { %v1016_v25 = vld [vmem:[%s1121_s11 + $0x64] ss:$8 sps:$4 sm:$0xff]   ;;  %v1019_v27 = vld [vmem:[%s1121_s11 + $0x60] ss:$8 sps:$4 sm:$0xff]   ;;  %v1022_v29 = vld [vmem:[%s1121_s11 + $0x74] ss:$8 sps:$4 sm:$0xff]  }
  0x16   : > { %887 = vmatpush3.bf16.msra.mxu0 %v991_v5  ;;  %956 = vmatpush3.bf16.msra.mxu1 %v991_v5  ;;  %v1024_v30 = vld [vmem:[%s1121_s11 + $0x30] ss:$8 sps:$4 sm:$0xff]   ;;  %v1163_v36 = vld [vmem:[%s1206_s2] ss:$0 sm:$0xff] }
  0x17   : > { %888 = vmatprep.subr.bf16.mxu0 %v992_v6  ;;  %949 = vmatprep.subr.bf16.mxu1 %v992_v6  ;;  %v1025_v31 = vld [vmem:[%s1121_s11 + $0x70] ss:$8 sps:$4 sm:$0xff]  }
  0x1a   : > { %889 = vmatpush3.bf16.msra.mxu0 %v993_v7  ;;  %957 = vmatpush3.bf16.msra.mxu1 %v993_v7 }
  0x1b   : > { %890 = vmatprep.subr.bf16.mxu0 %v994_v8  ;;  %950 = vmatprep.subr.bf16.mxu1 %v994_v8 }
  0x1e   : > { %891 = vmatpush3.bf16.msra.mxu0 %v995_v9  ;;  %958 = vmatpush3.bf16.msra.mxu1 %v995_v9 }
  0x1f   : > { %892 = vmatprep.subr.bf16.mxu0 %v996_v10  ;;  %951 = vmatprep.subr.bf16.mxu1 %v996_v10 }
  0x22   : > { %893 = vmatpush3.bf16.msra.mxu0 %v997_v13  ;;  %959 = vmatpush3.bf16.msra.mxu1 %v997_v13 }
  0x23   : > { %894 = vmatprep.subr.bf16.mxu0 %v998_v14  ;;  %952 = vmatprep.subr.bf16.mxu1 %v998_v14 }
  0x26   : > { %895 = vmatpush3.bf16.msra.mxu0 %v999_v15  ;;  %960 = vmatpush3.bf16.msra.mxu1 %v999_v15 }
  0x27   : > { %896 = vmatprep.subr.bf16.mxu0 %v1000_v16  ;;  %953 = vmatprep.subr.bf16.mxu1 %v1000_v16 }
  0x2a   : > { %897 = vmatpush3.bf16.msra.mxu0 %v1001_v17  ;;  %961 = vmatpush3.bf16.msra.mxu1 %v1001_v17 }
  0x2d   : > { %493 = vmatmul.mubr.bf16.vlgmr.msra.gmra.mxu0 %v1002_v18  ;;  %525 = vmatmul.mubr.bf16.vlgmr.msra.gmra.mxu1 %v1005_v19 }
  0x2e   : > { %500 = vmatprep.mubr.bf16.mxu0 %v1008_v20  ;;  %532 = vmatprep.mubr.bf16.mxu1 %v1010_v21 }
  0x35   : > { %501 = vmatmul.mubr.bf16.gmra.mxu0 %v1012_v22  ;;  %533 = vmatmul.mubr.bf16.gmra.mxu1 %v1013_v23 }
  0x36   : > { %508 = vmatprep.mubr.bf16.mxu0 %v1014_v24  ;;  %540 = vmatprep.mubr.bf16.mxu1 %v1016_v25 }
  0x3d   : > { %509 = vmatmul.mubr.bf16.gmra.mxu0 %v1018_v26  ;;  %541 = vmatmul.mubr.bf16.gmra.mxu1 %v1019_v27 }
  0x3e   : > { %516 = vmatprep.mubr.bf16.mxu0 %v1020_v28  ;;  %548 = vmatprep.mubr.bf16.mxu1 %v1022_v29 }
  0x45   : > { %517 = vmatmul.mubr.bf16.gmra.mxu0 %v1024_v30  ;;  %549 = vmatmul.mubr.bf16.gmra.mxu1 %v1025_v31 }
  0xed   : > { %v898_v32 = vpop.f32.mrf.mxu0  ;;  %v922_v33 = vpop.f32.mrf.mxu1 }
  0xef   : > { %v899_v34 = vpop.f32.mrf.mxu0  ;;  %v923_v35 = vpop.f32.mrf.mxu1 }
  0xf0   : > { %v900_v37 = vadd.f32 %v899_v34, %v898_v32  ;;  %v924_v38 = vadd.f32 %v923_v35, %v922_v33 }
  0xf1   : > { %v901_v39 = vpop.f32.mrf.mxu0  ;;  %v925_v40 = vpop.f32.mrf.mxu1 }
  0xf2   : > { %v495_v41 = vadd.f32 %v900_v37, %v1163_v36  ;;  %v527_v42 = vadd.f32 %v924_v38, %v1163_v36 }
  0xf3   : > { %v902_v43 = vpop.f32.mrf.mxu0  ;;  %v926_v44 = vpop.f32.mrf.mxu1 }
  0xf4   : > { %v903_v45 = vadd.f32 %v902_v43, %v901_v39  ;;  %v927_v46 = vadd.f32 %v926_v44, %v925_v40  ;;  %v557_v51 = vmax.f32 %v495_v41, 0.0  ;;  %v565_v52 = vmax.f32 %v527_v42, 0.0 }
  0xf5   : > { %v904_v47 = vpop.f32.mrf.mxu0  ;;  %v928_v48 = vpop.f32.mrf.mxu1 }
  0xf6   : > { %v498_v49 = vadd.f32 %v903_v45, %v1163_v36  ;;  %v530_v50 = vadd.f32 %v927_v46, %v1163_v36 }
  0xf7   : > { %v905_v53 = vpop.f32.mrf.mxu0  ;;  %v929_v54 = vpop.f32.mrf.mxu1 }
  0xf8   : > { %v558_v55 = vmax.f32 %v498_v49, 0.0  ;;  %v566_v56 = vmax.f32 %v530_v50, 0.0  ;;  %v906_v57 = vadd.f32 %v905_v53, %v904_v47  ;;  %v930_v58 = vadd.f32 %v929_v54, %v928_v48 }
  0xf9   : > { %v907_v59 = vpop.f32.mrf.mxu0  ;;  %v931_v60 = vpop.f32.mrf.mxu1 }
  0xfa   : > { %v838_v61 = vpack.c.bf16 %v558_v55, %v557_v51  ;;  %v858_v62 = vpack.c.bf16 %v566_v56, %v565_v52  ;;  %v503_v63 = vadd.f32 %v906_v57, %v1163_v36  ;;  %v535_v0 = vadd.f32 %v930_v58, %v1163_v36 }
  0xfb   : > { %v908_v1 = vpop.f32.mrf.mxu0  ;;  %v932_v2 = vpop.f32.mrf.mxu1 }
  0xfc   : > { %839 = vst [vmem:[%s1173_s8] sm:$0xff] %v838_v61   ;;  %878 = vst [vmem:[%s1173_s8 + $0x20] sm:$0xff] %v858_v62   ;;  %v909_v3 = vadd.f32 %v908_v1, %v907_v59  ;;  %v933_v4 = vadd.f32 %v932_v2, %v931_v60  ;;  %v559_v9 = vmax.f32 %v503_v63, 0.0  ;;  %v567_v10 = vmax.f32 %v535_v0, 0.0 }
  0xfd   : > { %v910_v5 = vpop.f32.mrf.mxu0  ;;  %v934_v6 = vpop.f32.mrf.mxu1 }
  0xfe   : > { %v506_v7 = vadd.f32 %v909_v3, %v1163_v36  ;;  %v538_v8 = vadd.f32 %v933_v4, %v1163_v36 }
  0xff   : > { %v911_v11 = vpop.f32.mrf.mxu0  ;;  %v935_v12 = vpop.f32.mrf.mxu1 }
 0x100   : > { %v560_v13 = vmax.f32 %v506_v7, 0.0  ;;  %v568_v14 = vmax.f32 %v538_v8, 0.0  ;;  %v912_v15 = vadd.f32 %v911_v11, %v910_v5  ;;  %v936_v16 = vadd.f32 %v935_v12, %v934_v6 }
 0x101   : > { %v913_v17 = vpop.f32.mrf.mxu0  ;;  %v937_v18 = vpop.f32.mrf.mxu1 }
 0x102   : > { %v843_v19 = vpack.c.bf16 %v560_v13, %v559_v9  ;;  %v863_v20 = vpack.c.bf16 %v568_v14, %v567_v10  ;;  %v511_v21 = vadd.f32 %v912_v15, %v1163_v36  ;;  %v543_v22 = vadd.f32 %v936_v16, %v1163_v36 }
 0x103   : > { %v914_v23 = vpop.f32.mrf.mxu0  ;;  %v938_v24 = vpop.f32.mrf.mxu1 }
 0x104   : > { %875 = vst [vmem:[%s1173_s8 + $0x8] sm:$0xff] %v843_v19   ;;  %879 = vst [vmem:[%s1173_s8 + $0x28] sm:$0xff] %v863_v20   ;;  %v915_v25 = vadd.f32 %v914_v23, %v913_v17  ;;  %v939_v26 = vadd.f32 %v938_v24, %v937_v18  ;;  %v561_v31 = vmax.f32 %v511_v21, 0.0  ;;  %v569_v32 = vmax.f32 %v543_v22, 0.0 }
 0x105   : > { %v916_v27 = vpop.f32.mrf.mxu0  ;;  %v940_v28 = vpop.f32.mrf.mxu1 }
 0x106   : > { %v514_v29 = vadd.f32 %v915_v25, %v1163_v36  ;;  %v546_v30 = vadd.f32 %v939_v26, %v1163_v36 }
 0x107   : > { %v917_v33 = vpop.f32.mrf.mxu0  ;;  %v941_v34 = vpop.f32.mrf.mxu1 }
 0x108   : > { %v562_v35 = vmax.f32 %v514_v29, 0.0  ;;  %v570_v37 = vmax.f32 %v546_v30, 0.0  ;;  %v918_v38 = vadd.f32 %v917_v33, %v916_v27  ;;  %v942_v39 = vadd.f32 %v941_v34, %v940_v28 }
 0x109   : > { %v919_v40 = vpop.f32.mrf.mxu0  ;;  %v943_v41 = vpop.f32.mrf.mxu1 }
 0x10a   : > { %v848_v42 = vpack.c.bf16 %v562_v35, %v561_v31  ;;  %v868_v43 = vpack.c.bf16 %v570_v37, %v569_v32  ;;  %v519_v46 = vadd.f32 %v918_v38, %v1163_v36  ;;  %v551_v47 = vadd.f32 %v942_v39, %v1163_v36 }
 0x10b   : > { %v920_v44 = vpop.f32.mrf.mxu0  ;;  %v944_v45 = vpop.f32.mrf.mxu1 }
 0x10c   : > { %876 = vst [vmem:[%s1173_s8 + $0x10] sm:$0xff] %v848_v42   ;;  %880 = vst [vmem:[%s1173_s8 + $0x30] sm:$0xff] %v868_v43   ;;  %v921_v48 = vadd.f32 %v920_v44, %v919_v40  ;;  %v945_v49 = vadd.f32 %v944_v45, %v943_v41  ;;  %v563_v52 = vmax.f32 %v519_v46, 0.0  ;;  %v571_v53 = vmax.f32 %v551_v47, 0.0 }
 0x10e   : > { %v522_v50 = vadd.f32 %v921_v48, %v1163_v36  ;;  %v554_v51 = vadd.f32 %v945_v49, %v1163_v36 }
 0x110   : > { %v564_v54 = vmax.f32 %v522_v50, 0.0  ;;  %v572_v55 = vmax.f32 %v554_v51, 0.0 }
 0x112   : > { %v853_v56 = vpack.c.bf16 %v564_v54, %v563_v52  ;;  %v873_v57 = vpack.c.bf16 %v572_v55, %v571_v53 }
 0x114   : > { %877 = vst [vmem:[%s1173_s8 + $0x18] sm:$0xff] %v853_v56   ;;  %881 = vst [vmem:[%s1173_s8 + $0x38] sm:$0xff] %v873_v57  }
 0x115 PF: > { %s13_s14 = sadd.s32 1, %s1048_s14   ;;  %s1208_s12 = smov %s1044_s13 }
 0x116   : > { %p10_p5 = scmp.ge.s32.totalorder %s13_s14, 6   ;;  %s1209_s13 = smov %s1211_s15 }
 0x118   :  { %12 = sbr.rel (!%p10_p5) target bundleno = 2 (0x2), region = 68 }

// kernel: resnet18_forward.23
= control target key start
LH: loop header
LB: loop body
LE: loop exit
PB: predicated region body
PF: predicated region fallthrough
CT: control target
= control target key end

     0   :  { %s553_s0 = inlined_call_operand.vmem [shape: bf16[18,2,512], index: 0, kind: input, shape index: {}]   ;;  %s554_s1 = inlined_call_operand.vmem [shape: bf16[18,2,512], index: 1, kind: input, shape index: {}]   ;;  %s555_s2 = inlined_call_operand.vmem [shape: bf16[18,2,512], index: 2, kind: input, shape index: {}]   ;;  %s556_s3 = inlined_call_operand.vmem [shape: bf16[8,2,512], index: 3, kind: output, shape index: {}]  }
   0x1   :  { %v14_v0 = vld [vmem:[%s553_s0] sm:$0xf]  ;;  %v217_v1 = vld [vmem:[%s553_s0 + $0x4] sm:$0xf]  ;;  %v218_v2 = vld [vmem:[%s553_s0 + $0x8] sm:$0xf] }
   0x2   :  { %v17_v3 = vmax.bf16 %v217_v1, %v14_v0  ;;  %v21_v4 = vld [vmem:[%s554_s1] sm:$0xf]  ;;  %v223_v6 = vld [vmem:[%s553_s0 + $0x8] sm:$0xf]  ;;  %v224_v7 = vld [vmem:[%s553_s0 + $0xc] sm:$0xf] }
   0x3   :  { %v225_v8 = vld [vmem:[%s553_s0 + $0x10] sm:$0xf]  ;;  %v219_v9 = vld [vmem:[%s554_s1 + $0x4] sm:$0xf]  ;;  %v41_v10 = vmax.bf16 %v224_v7, %v223_v6  ;;  %v220_v12 = vld [vmem:[%s554_s1 + $0x8] sm:$0xf] }
   0x4   :  { %v20_v5 = vmax.bf16 %v218_v2, %v17_v3  ;;  %v226_v13 = vld [vmem:[%s554_s1 + $0x8] sm:$0xf]  ;;  %v233_v15 = vld [vmem:[%s553_s0 + $0x10] sm:$0xf]  ;;  %v234_v16 = vld [vmem:[%s553_s0 + $0x14] sm:$0xf] }
   0x5   :  { %v44_v14 = vmax.bf16 %v225_v8, %v41_v10  ;;  %v235_v17 = vld [vmem:[%s553_s0 + $0x18] sm:$0xf]  ;;  %v227_v19 = vld [vmem:[%s554_s1 + $0xc] sm:$0xf]  ;;  %v66_v20 = vmax.bf16 %v234_v16, %v233_v15  ;;  %v29_v21 = vld [vmem:[%s555_s2] sm:$0xf] }
   0x6   :  { %v22_v11 = vmax.bf16 %v21_v4, %v20_v5  ;;  %v228_v23 = vld [vmem:[%s554_s1 + $0x10] sm:$0xf]  ;;  %v243_v27 = vld [vmem:[%s553_s0 + $0x18] sm:$0xf]  ;;  %v244_v28 = vld [vmem:[%s553_s0 + $0x1c] sm:$0xf] }
   0x7   :  { %v46_v22 = vmax.bf16 %v226_v13, %v44_v14  ;;  %v236_v24 = vld [vmem:[%s554_s1 + $0x10] sm:$0xf]  ;;  %v69_v26 = vmax.bf16 %v235_v17, %v66_v20  ;;  %v245_v29 = vld [vmem:[%s553_s0 + $0x20] sm:$0xf]  ;;  %v221_v30 = vld [vmem:[%s555_s2 + $0x4] sm:$0xf]  ;;  %v91_v34 = vmax.bf16 %v244_v28, %v243_v27 }
   0x8   :  { %v25_v18 = vmax.bf16 %v219_v9, %v22_v11  ;;  %v222_v31 = vld [vmem:[%s555_s2 + $0x8] sm:$0xf]  ;;  %v237_v33 = vld [vmem:[%s554_s1 + $0x14] sm:$0xf]  ;;  %v238_v38 = vld [vmem:[%s554_s1 + $0x18] sm:$0xf] }
   0x9   :  { %v49_v32 = vmax.bf16 %v227_v19, %v46_v22  ;;  %v229_v36 = vld [vmem:[%s555_s2 + $0x8] sm:$0xf]  ;;  %v71_v37 = vmax.bf16 %v236_v24, %v69_v26  ;;  %v246_v39 = vld [vmem:[%s554_s1 + $0x18] sm:$0xf]  ;;  %v94_v41 = vmax.bf16 %v245_v29, %v91_v34  ;;  %v253_v42 = vld [vmem:[%s553_s0 + $0x20] sm:$0xf] }
   0xa   :  { %v28_v25 = vmax.bf16 %v220_v12, %v25_v18  ;;  %v254_v43 = vld [vmem:[%s553_s0 + $0x24] sm:$0xf]  ;;  %v255_v44 = vld [vmem:[%s553_s0 + $0x28] sm:$0xf]  ;;  %v230_v46 = vld [vmem:[%s555_s2 + $0xc] sm:$0xf] }
   0xb   :  { %v52_v40 = vmax.bf16 %v228_v23, %v49_v32  ;;  %v231_v47 = vld [vmem:[%s555_s2 + $0x10] sm:$0xf]  ;;  %v74_v48 = vmax.bf16 %v237_v33, %v71_v37  ;;  %v247_v49 = vld [vmem:[%s554_s1 + $0x1c] sm:$0xf]  ;;  %v116_v50 = vmax.bf16 %v254_v43, %v253_v42  ;;  %v96_v53 = vmax.bf16 %v246_v39, %v94_v41  ;;  %v248_v54 = vld [vmem:[%s554_s1 + $0x20] sm:$0xf] }
   0xc   :  { %v30_v35 = vmax.bf16 %v29_v21, %v28_v25  ;;  %v239_v52 = vld [vmem:[%s555_s2 + $0x10] sm:$0xf]  ;;  %v256_v55 = vld [vmem:[%s554_s1 + $0x20] sm:$0xf]  ;;  %v263_v59 = vld [vmem:[%s553_s0 + $0x28] sm:$0xf] }
   0xd   :  { %v54_v51 = vmax.bf16 %v229_v36, %v52_v40  ;;  %v77_v57 = vmax.bf16 %v238_v38, %v74_v48  ;;  %v119_v58 = vmax.bf16 %v255_v44, %v116_v50  ;;  %v264_v60 = vld [vmem:[%s553_s0 + $0x2c] sm:$0xf]  ;;  %v265_v61 = vld [vmem:[%s553_s0 + $0x30] sm:$0xf]  ;;  %v240_v63 = vld [vmem:[%s555_s2 + $0x14] sm:$0xf]  ;;  %v99_v1 = vmax.bf16 %v247_v49, %v96_v53 }
   0xe   :  { %v33_v45 = vmax.bf16 %v221_v30, %v30_v35  ;;  %v241_v0 = vld [vmem:[%s555_s2 + $0x18] sm:$0xf]  ;;  %v257_v2 = vld [vmem:[%s554_s1 + $0x24] sm:$0xf]  ;;  %v141_v3 = vmax.bf16 %v264_v60, %v263_v59  ;;  %v258_v7 = vld [vmem:[%s554_s1 + $0x28] sm:$0xf] }
   0xf   :  { %v57_v62 = vmax.bf16 %v230_v46, %v54_v51  ;;  %v79_v4 = vmax.bf16 %v239_v52, %v77_v57  ;;  %v249_v5 = vld [vmem:[%s555_s2 + $0x18] sm:$0xf]  ;;  %v121_v6 = vmax.bf16 %v256_v55, %v119_v58  ;;  %v266_v8 = vld [vmem:[%s554_s1 + $0x28] sm:$0xf]  ;;  %v102_v10 = vmax.bf16 %v248_v54, %v99_v1  ;;  %v273_v12 = vld [vmem:[%s553_s0 + $0x30] sm:$0xf] }
  0x10   :  { %v36_v56 = vmax.bf16 %v222_v31, %v33_v45  ;;  %v144_v11 = vmax.bf16 %v265_v61, %v141_v3  ;;  %v274_v13 = vld [vmem:[%s553_s0 + $0x34] sm:$0xf]  ;;  %v275_v14 = vld [vmem:[%s553_s0 + $0x38] sm:$0xf]  ;;  %v250_v16 = vld [vmem:[%s555_s2 + $0x1c] sm:$0xf] }
  0x11   :  { %v60_v9 = vmax.bf16 %v231_v47, %v57_v62  ;;  %v82_v15 = vmax.bf16 %v240_v63, %v79_v4  ;;  %v251_v17 = vld [vmem:[%s555_s2 + $0x20] sm:$0xf]  ;;  %v124_v18 = vmax.bf16 %v257_v2, %v121_v6  ;;  %v267_v19 = vld [vmem:[%s554_s1 + $0x2c] sm:$0xf]  ;;  %v166_v20 = vmax.bf16 %v274_v13, %v273_v12  ;;  %v268_v24 = vld [vmem:[%s554_s1 + $0x30] sm:$0xf] }
  0x12   :  { %37 = vst [vmem:[%s556_s3] sm:$0xf] %v36_v56  ;;  %v104_v21 = vmax.bf16 %v249_v5, %v102_v10  ;;  %v259_v22 = vld [vmem:[%s555_s2 + $0x20] sm:$0xf]  ;;  %v146_v23 = vmax.bf16 %v266_v8, %v144_v11  ;;  %v276_v25 = vld [vmem:[%s554_s1 + $0x30] sm:$0xf] }
  0x13   :  { %232 = vst [vmem:[%s556_s3 + $0x4] sm:$0xf] %v60_v9  ;;  %v85_v26 = vmax.bf16 %v241_v0, %v82_v15  ;;  %v127_v27 = vmax.bf16 %v258_v7, %v124_v18  ;;  %v169_v28 = vmax.bf16 %v275_v14, %v166_v20  ;;  %v283_v29 = vld [vmem:[%s553_s0 + $0x38] sm:$0xf]  ;;  %v284_v30 = vld [vmem:[%s553_s0 + $0x3c] sm:$0xf] }
  0x14   :  { %v285_v31 = vld [vmem:[%s553_s0 + $0x40] sm:$0xf]  ;;  %v107_v32 = vmax.bf16 %v250_v16, %v104_v21  ;;  %v260_v33 = vld [vmem:[%s555_s2 + $0x24] sm:$0xf]  ;;  %v149_v34 = vmax.bf16 %v267_v19, %v146_v23  ;;  %v277_v35 = vld [vmem:[%s554_s1 + $0x34] sm:$0xf]  ;;  %v191_v36 = vmax.bf16 %v284_v30, %v283_v29 }
  0x15   :  { %242 = vst [vmem:[%s556_s3 + $0x8] sm:$0xf] %v85_v26  ;;  %v129_v37 = vmax.bf16 %v259_v22, %v127_v27  ;;  %v269_v38 = vld [vmem:[%s555_s2 + $0x28] sm:$0xf]  ;;  %v171_v39 = vmax.bf16 %v276_v25, %v169_v28  ;;  %v286_v40 = vld [vmem:[%s554_s1 + $0x38] sm:$0xf] }
  0x16   :  { %v110_v41 = vmax.bf16 %v251_v17, %v107_v32  ;;  %v261_v42 = vld [vmem:[%s555_s2 + $0x28] sm:$0xf]  ;;  %v152_v43 = vmax.bf16 %v268_v24, %v149_v34  ;;  %v278_v44 = vld [vmem:[%s554_s1 + $0x38] sm:$0xf]  ;;  %v194_v45 = vmax.bf16 %v285_v31, %v191_v36  ;;  %v270_v47 = vld [vmem:[%s555_s2 + $0x2c] sm:$0xf] }
  0x17   :  { %v132_v46 = vmax.bf16 %v260_v33, %v129_v37  ;;  %v174_v48 = vmax.bf16 %v277_v35, %v171_v39  ;;  %v287_v49 = vld [vmem:[%s554_s1 + $0x3c] sm:$0xf]  ;;  %v279_v51 = vld [vmem:[%s555_s2 + $0x30] sm:$0xf]  ;;  %v288_v56 = vld [vmem:[%s554_s1 + $0x40] sm:$0xf] }
  0x18   :  { %252 = vst [vmem:[%s556_s3 + $0xc] sm:$0xf] %v110_v41  ;;  %v154_v50 = vmax.bf16 %v269_v38, %v152_v43  ;;  %v196_v52 = vmax.bf16 %v286_v40, %v194_v45  ;;  %v271_v54 = vld [vmem:[%s555_s2 + $0x30] sm:$0xf]  ;;  %v280_v58 = vld [vmem:[%s555_s2 + $0x34] sm:$0xf] }
  0x19   :  { %v135_v53 = vmax.bf16 %v261_v42, %v132_v46  ;;  %v177_v55 = vmax.bf16 %v278_v44, %v174_v48  ;;  %v289_v61 = vld [vmem:[%s555_s2 + $0x38] sm:$0xf]  ;;  %v290_v2 = vld [vmem:[%s555_s2 + $0x3c] sm:$0xf]  ;;  %v291_v5 = vld [vmem:[%s555_s2 + $0x40] sm:$0xf] }
  0x1a   :  { %v157_v57 = vmax.bf16 %v270_v47, %v154_v50  ;;  %v199_v59 = vmax.bf16 %v287_v49, %v196_v52  ;;  %v281_v63 = vld [vmem:[%s555_s2 + $0x38] sm:$0xf] }
  0x1b   :  { %262 = vst [vmem:[%s556_s3 + $0x10] sm:$0xf] %v135_v53  ;;  %v179_v60 = vmax.bf16 %v279_v51, %v177_v55 }
  0x1c   :  { %v160_v62 = vmax.bf16 %v271_v54, %v157_v57  ;;  %v202_v0 = vmax.bf16 %v288_v56, %v199_v59 }
  0x1d   :  { %v182_v1 = vmax.bf16 %v280_v58, %v179_v60 }
  0x1e   :  { %272 = vst [vmem:[%s556_s3 + $0x14] sm:$0xf] %v160_v62  ;;  %v204_v3 = vmax.bf16 %v289_v61, %v202_v0 }
  0x1f   :  { %v185_v4 = vmax.bf16 %v281_v63, %v182_v1 }
  0x20   :  { %v207_v6 = vmax.bf16 %v290_v2, %v204_v3 }
  0x21   :  { %282 = vst [vmem:[%s556_s3 + $0x18] sm:$0xf] %v185_v4 }
  0x22   :  { %v210_v7 = vmax.bf16 %v291_v5, %v207_v6 }
  0x24   :  { %292 = vst [vmem:[%s556_s3 + $0x1c] sm:$0xf] %v210_v7 }

// kernel: resnet18_forward.24
= control target key start
LH: loop header
LB: loop body
LE: loop exit
PB: predicated region body
PF: predicated region fallthrough
CT: control target
= control target key end

     0   :  { %s1796_s1 = inlined_call_operand.vmem [shape: bf16[640,128], index: 1, kind: input, shape index: {}]   ;;  %s1797_s0 = inlined_call_operand.vmem [shape: bf16[128,640], index: 0, kind: input, shape index: {}]   ;;  %s1798_s2 = inlined_call_operand.vmem [shape: f32[1,128], index: 2, kind: input, shape index: {}]   ;;  %s1799_s3 = inlined_call_operand.vmem [shape: bf16[128,128], index: 3, kind: output, shape index: {}]  }
   0x1   :  { %v1341_v0 = vld [vmem:[%s1796_s1 + $0x78] sm:$0xff]   ;;  %v1345_v4 = vld [vmem:[%s1796_s1 + $0x70] sm:$0xff]   ;;  %v1349_v8 = vld [vmem:[%s1796_s1 + $0x68] sm:$0xff]  }
   0x2   :  { %v1342_v1 = vld [vmem:[%s1796_s1 + $0xf8] sm:$0xff]   ;;  %1149 = vmatprep.subr.bf16.mxu0 %v1341_v0  ;;  %v1346_v5 = vld [vmem:[%s1796_s1 + $0xf0] sm:$0xff]   ;;  %v1350_v9 = vld [vmem:[%s1796_s1 + $0xe8] sm:$0xff]  }
   0x3   :  { %v1343_v2 = vld [vmem:[%s1796_s1 + $0x38] sm:$0xff]   ;;  %1213 = vmatprep.subr.bf16.mxu1 %v1342_v1  ;;  %v1347_v6 = vld [vmem:[%s1796_s1 + $0x30] sm:$0xff]   ;;  %v1351_v10 = vld [vmem:[%s1796_s1 + $0x28] sm:$0xff]  }
   0x4   :  { %v1344_v3 = vld [vmem:[%s1796_s1 + $0xb8] sm:$0xff]   ;;  %1150 = vmatpush3.bf16.msra.mxu0 %v1343_v2  ;;  %v1348_v7 = vld [vmem:[%s1796_s1 + $0xb0] sm:$0xff]   ;;  %v1352_v11 = vld [vmem:[%s1796_s1 + $0xa8] sm:$0xff]  }
   0x5   :  { %1214 = vmatpush3.bf16.msra.mxu1 %v1344_v3  ;;  %1151 = vmatprep.subr.bf16.mxu0 %v1345_v4  ;;  %v1353_v12 = vld [vmem:[%s1796_s1 + $0x60] sm:$0xff]   ;;  %v1357_v16 = vld [vmem:[%s1796_s1 + $0x58] sm:$0xff]   ;;  %v1361_v20 = vld [vmem:[%s1796_s1 + $0x50] sm:$0xff]  }
   0x6   :  { %1215 = vmatprep.subr.bf16.mxu1 %v1346_v5  ;;  %v1354_v13 = vld [vmem:[%s1796_s1 + $0xe0] sm:$0xff]   ;;  %v1358_v17 = vld [vmem:[%s1796_s1 + $0xd8] sm:$0xff]   ;;  %v1362_v21 = vld [vmem:[%s1796_s1 + $0xd0] sm:$0xff]  }
   0x7   :  { %v1355_v14 = vld [vmem:[%s1796_s1 + $0x20] sm:$0xff]   ;;  %v1359_v18 = vld [vmem:[%s1796_s1 + $0x18] sm:$0xff]   ;;  %v1363_v22 = vld [vmem:[%s1796_s1 + $0x10] sm:$0xff]  }
   0x8   :  { %1152 = vmatpush3.bf16.msra.mxu0 %v1347_v6  ;;  %v1356_v15 = vld [vmem:[%s1796_s1 + $0xa0] sm:$0xff]   ;;  %v1360_v19 = vld [vmem:[%s1796_s1 + $0x98] sm:$0xff]   ;;  %v1364_v23 = vld [vmem:[%s1796_s1 + $0x90] sm:$0xff]  }
   0x9   :  { %1216 = vmatpush3.bf16.msra.mxu1 %v1348_v7  ;;  %1153 = vmatprep.subr.bf16.mxu0 %v1349_v8  ;;  %v1365_v24 = vld [vmem:[%s1796_s1 + $0x48] sm:$0xff]   ;;  %v1369_v28 = vld [vmem:[%s1796_s1 + $0x40] sm:$0xff]   ;;  %v1379_v36 = vld [vmem:[%s1796_s1 + $0x138] sm:$0xff]  }
   0xa   :  { %1217 = vmatprep.subr.bf16.mxu1 %v1350_v9  ;;  %v1366_v25 = vld [vmem:[%s1796_s1 + $0xc8] sm:$0xff]   ;;  %v1370_v29 = vld [vmem:[%s1796_s1 + $0xc0] sm:$0xff]   ;;  %v1386_v39 = vld [vmem:[%s1796_s1 + $0x130] sm:$0xff]  }
   0xb   :  { %v1367_v26 = vld [vmem:[%s1796_s1 + $0x8] sm:$0xff]   ;;  %v1371_v30 = vld [vmem:[%s1796_s1] sm:$0xff]   ;;  %v1389_v43 = vld [vmem:[%s1797_s0 + $0x5c] ss:$20 sps:$4 sm:$0xff]  }
   0xc   :  { %1154 = vmatpush3.bf16.msra.mxu0 %v1351_v10  ;;  %v1368_v27 = vld [vmem:[%s1796_s1 + $0x88] sm:$0xff]   ;;  %v1372_v31 = vld [vmem:[%s1796_s1 + $0x80] sm:$0xff]   ;;  %v1394_v48 = vld [vmem:[%s1797_s0 + $0x7c] ss:$20 sps:$4 sm:$0xff]  }
   0xd   :  { %1218 = vmatpush3.bf16.msra.mxu1 %v1352_v11  ;;  %1155 = vmatprep.subr.bf16.mxu0 %v1353_v12  ;;  %v1373_v32 = vld [vmem:[%s1797_s0] ss:$20 sps:$4 sm:$0xff]   ;;  %v1375_v33 = vld [vmem:[%s1797_s0 + $0x4] ss:$20 sps:$4 sm:$0xff]   ;;  %v1376_v34 = vld [vmem:[%s1797_s0 + $0x8] ss:$20 sps:$4 sm:$0xff]  }
   0xe   :  { %1219 = vmatprep.subr.bf16.mxu1 %v1354_v13  ;;  %v1378_v35 = vld [vmem:[%s1797_s0 + $0xc] ss:$20 sps:$4 sm:$0xff]   ;;  %630 = vmatprep.mubr.bf16.mxu0 %v1375_v33  ;;  %v1382_v38 = vld [vmem:[%s1797_s0 + $0x34] ss:$20 sps:$4 sm:$0xff]   ;;  %v1385_v41 = vld [vmem:[%s1797_s0 + $0x30] ss:$20 sps:$4 sm:$0xff]  }
   0xf   :  { %727 = vmatprep.mubr.bf16.mxu1 %v1378_v35  ;;  %v1380_v37 = vld [vmem:[%s1797_s0 + $0x2c] ss:$20 sps:$4 sm:$0xff]   ;;  %v1384_v40 = vld [vmem:[%s1797_s0 + $0x28] ss:$20 sps:$4 sm:$0xff]   ;;  %v1391_v46 = vld [vmem:[%s1797_s0 + $0x50] ss:$20 sps:$4 sm:$0xff]  }
  0x10   :  { %1156 = vmatpush3.bf16.msra.mxu0 %v1355_v14  ;;  %v1387_v42 = vld [vmem:[%s1797_s0 + $0x54] ss:$20 sps:$4 sm:$0xff]   ;;  %v1400_v45 = vld [vmem:[%s1796_s1 + $0x120] sm:$0xff]   ;;  %v1392_v47 = vld [vmem:[%s1797_s0 + $0x58] ss:$20 sps:$4 sm:$0xff]  }
  0x11   :  { %1220 = vmatpush3.bf16.msra.mxu1 %v1356_v15  ;;  %1157 = vmatprep.subr.bf16.mxu0 %v1357_v16  ;;  %v1393_v44 = vld [vmem:[%s1796_s1 + $0x128] sm:$0xff]   ;;  %v1396_v49 = vld [vmem:[%s1797_s0 + $0x84] ss:$20 sps:$4 sm:$0xff]   ;;  %v1414_v51 = vld [vmem:[%s1796_s1 + $0x110] sm:$0xff]  }
  0x12   :  { %1221 = vmatprep.subr.bf16.mxu1 %v1358_v17  ;;  %v1407_v50 = vld [vmem:[%s1796_s1 + $0x118] sm:$0xff]   ;;  %v1399_v53 = vld [vmem:[%s1797_s0 + $0x80] ss:$20 sps:$4 sm:$0xff]   ;;  %v1421_v55 = vld [vmem:[%s1796_s1 + $0x108] sm:$0xff]  }
  0x13   :  { %v1398_v52 = vld [vmem:[%s1797_s0 + $0x78] ss:$20 sps:$4 sm:$0xff]   ;;  %v1428_v57 = vld [vmem:[%s1796_s1 + $0x100] sm:$0xff]   ;;  %v1406_v59 = vld [vmem:[%s1797_s0 + $0xa8] ss:$20 sps:$4 sm:$0xff]  }
  0x14   :  { %1158 = vmatpush3.bf16.msra.mxu0 %v1359_v18  ;;  %v1401_v54 = vld [vmem:[%s1797_s0 + $0xa4] ss:$20 sps:$4 sm:$0xff]   ;;  %v1403_v56 = vld [vmem:[%s1797_s0 + $0xac] ss:$20 sps:$4 sm:$0xff]   ;;  %v1410_v61 = vld [vmem:[%s1797_s0 + $0xd4] ss:$20 sps:$4 sm:$0xff]  }
  0x15   :  { %1222 = vmatpush3.bf16.msra.mxu1 %v1360_v19  ;;  %1159 = vmatprep.subr.bf16.mxu0 %v1361_v20  ;;  %v1405_v58 = vld [vmem:[%s1797_s0 + $0xa0] ss:$20 sps:$4 sm:$0xff]   ;;  %v1412_v62 = vld [vmem:[%s1797_s0 + $0xc8] ss:$20 sps:$4 sm:$0xff]   ;;  %v1413_v63 = vld [vmem:[%s1797_s0 + $0xd0] ss:$20 sps:$4 sm:$0xff]  }
  0x16   :  { %1223 = vmatprep.subr.bf16.mxu1 %v1362_v21  ;;  %v1408_v60 = vld [vmem:[%s1797_s0 + $0xcc] ss:$20 sps:$4 sm:$0xff]   ;;  %v1415_v0 = vld [vmem:[%s1797_s0 + $0xf4] ss:$20 sps:$4 sm:$0xff]   ;;  %v1417_v1 = vld [vmem:[%s1797_s0 + $0xfc] ss:$20 sps:$4 sm:$0xff]  }
  0x17   :  { %v1419_v2 = vld [vmem:[%s1797_s0 + $0xf0] ss:$20 sps:$4 sm:$0xff]   ;;  %v1420_v3 = vld [vmem:[%s1797_s0 + $0xf8] ss:$20 sps:$4 sm:$0xff]   ;;  %v1427_v7 = vld [vmem:[%s1797_s0 + $0x120] ss:$20 sps:$4 sm:$0xff]  }
  0x18   :  { %1160 = vmatpush3.bf16.msra.mxu0 %v1363_v22  ;;  %v1422_v4 = vld [vmem:[%s1797_s0 + $0x11c] ss:$20 sps:$4 sm:$0xff]   ;;  %v1424_v5 = vld [vmem:[%s1797_s0 + $0x124] ss:$20 sps:$4 sm:$0xff]   ;;  %v1433_v12 = vld [vmem:[%s1797_s0 + $0x60] ss:$20 sps:$4 sm:$0xff]  }
  0x19   :  { %1224 = vmatpush3.bf16.msra.mxu1 %v1364_v23  ;;  %1161 = vmatprep.subr.bf16.mxu0 %v1365_v24  ;;  %v1426_v6 = vld [vmem:[%s1797_s0 + $0x118] ss:$20 sps:$4 sm:$0xff]   ;;  %v1429_v8 = vld [vmem:[%s1797_s0 + $0x10] ss:$20 sps:$4 sm:$0xff]   ;;  %v1434_v13 = vld [vmem:[%s1797_s0 + $0x100] ss:$20 sps:$4 sm:$0xff]  }
  0x1a   :  { %1225 = vmatprep.subr.bf16.mxu1 %v1366_v25  ;;  %v1430_v9 = vld [vmem:[%s1797_s0 + $0xb0] ss:$20 sps:$4 sm:$0xff]   ;;  %v1431_v10 = vld [vmem:[%s1797_s0 + $0x38] ss:$20 sps:$4 sm:$0xff]   ;;  %v1435_v14 = vld [vmem:[%s1797_s0 + $0x88] ss:$20 sps:$4 sm:$0xff]  }
  0x1b   :  { %v1432_v11 = vld [vmem:[%s1797_s0 + $0xd8] ss:$20 sps:$4 sm:$0xff]   ;;  %v1436_v15 = vld [vmem:[%s1797_s0 + $0x128] ss:$20 sps:$4 sm:$0xff]   ;;  %v1700_v18 = vld [vmem:[%s1798_s2] ss:$0 sm:$0xff] }
  0x1c   :  { %1162 = vmatpush3.bf16.msra.mxu0 %v1367_v26 }
  0x1d   :  { %1226 = vmatpush3.bf16.msra.mxu1 %v1368_v27  ;;  %1163 = vmatprep.subr.bf16.mxu0 %v1369_v28 }
  0x1e   :  { %1227 = vmatprep.subr.bf16.mxu1 %v1370_v29 }
  0x20   :  { %1164 = vmatpush3.bf16.msra.mxu0 %v1371_v30 }
  0x21   :  { %1228 = vmatpush3.bf16.msra.mxu1 %v1372_v31  ;;  %1293 = vmatprep.subr.bf16.mxu0 %v1379_v36 }
  0x22   :  { %1325 = vmatprep.subr.bf16.mxu1 %v1379_v36 }
  0x23   :  { %631 = vmatmul.mubr.bf16.vlgmr.msra.gmra.mxu0 %v1373_v32 }
  0x24   :  { %728 = vmatmul.mubr.bf16.vlgmr.msra.gmra.mxu1 %v1376_v34  ;;  %1294 = vmatpush3.bf16.msra.mxu0 %v1379_v36 }
  0x25   :  { %1333 = vmatpush3.bf16.msra.mxu1 %v1379_v36  ;;  %638 = vmatprep.mubr.bf16.mxu0 %v1380_v37 }
  0x26   :  { %735 = vmatprep.mubr.bf16.mxu1 %v1382_v38  ;;  %1295 = vmatprep.subr.bf16.mxu0 %v1386_v39 }
  0x27   :  { %1326 = vmatprep.subr.bf16.mxu1 %v1386_v39 }
  0x28   :  { %1296 = vmatpush3.bf16.msra.mxu0 %v1386_v39 }
  0x29   :  { %1334 = vmatpush3.bf16.msra.mxu1 %v1386_v39  ;;  %1297 = vmatprep.subr.bf16.mxu0 %v1393_v44 }
  0x2a   :  { %1327 = vmatprep.subr.bf16.mxu1 %v1393_v44 }
  0x2b   :  { %639 = vmatmul.mubr.bf16.gmra.mxu0 %v1384_v40 }
  0x2c   :  { %736 = vmatmul.mubr.bf16.gmra.mxu1 %v1385_v41  ;;  %646 = vmatprep.mubr.bf16.mxu0 %v1387_v42 }
  0x2d   :  { %743 = vmatprep.mubr.bf16.mxu1 %v1389_v43  ;;  %1298 = vmatpush3.bf16.msra.mxu0 %v1393_v44 }
  0x2e   :  { %1335 = vmatpush3.bf16.msra.mxu1 %v1393_v44  ;;  %1299 = vmatprep.subr.bf16.mxu0 %v1400_v45 }
  0x2f   :  { %1328 = vmatprep.subr.bf16.mxu1 %v1400_v45 }
  0x31   :  { %1300 = vmatpush3.bf16.msra.mxu0 %v1400_v45 }
  0x32   :  { %1336 = vmatpush3.bf16.msra.mxu1 %v1400_v45  ;;  %1301 = vmatprep.subr.bf16.mxu0 %v1407_v50 }
  0x33   :  { %647 = vmatmul.mubr.bf16.gmra.mxu0 %v1391_v46  ;;  %1329 = vmatprep.subr.bf16.mxu1 %v1407_v50 }
  0x34   :  { %744 = vmatmul.mubr.bf16.gmra.mxu1 %v1392_v47  ;;  %654 = vmatprep.mubr.bf16.mxu0 %v1394_v48 }
  0x35   :  { %751 = vmatprep.mubr.bf16.mxu1 %v1396_v49  ;;  %1302 = vmatpush3.bf16.msra.mxu0 %v1407_v50 }
  0x36   :  { %1337 = vmatpush3.bf16.msra.mxu1 %v1407_v50  ;;  %1303 = vmatprep.subr.bf16.mxu0 %v1414_v51 }
  0x37   :  { %1330 = vmatprep.subr.bf16.mxu1 %v1414_v51 }
  0x39   :  { %1304 = vmatpush3.bf16.msra.mxu0 %v1414_v51 }
  0x3a   :  { %1338 = vmatpush3.bf16.msra.mxu1 %v1414_v51  ;;  %1305 = vmatprep.subr.bf16.mxu0 %v1421_v55 }
  0x3b   :  { %655 = vmatmul.mubr.bf16.gmra.mxu0 %v1398_v52  ;;  %1331 = vmatprep.subr.bf16.mxu1 %v1421_v55 }
  0x3c   :  { %752 = vmatmul.mubr.bf16.gmra.mxu1 %v1399_v53  ;;  %662 = vmatprep.mubr.bf16.mxu0 %v1401_v54 }
  0x3d   :  { %759 = vmatprep.mubr.bf16.mxu1 %v1403_v56  ;;  %1306 = vmatpush3.bf16.msra.mxu0 %v1421_v55 }
  0x3e   :  { %1339 = vmatpush3.bf16.msra.mxu1 %v1421_v55  ;;  %1307 = vmatprep.subr.bf16.mxu0 %v1428_v57 }
  0x3f   :  { %1332 = vmatprep.subr.bf16.mxu1 %v1428_v57 }
  0x41   :  { %1308 = vmatpush3.bf16.msra.mxu0 %v1428_v57 }
  0x42   :  { %1340 = vmatpush3.bf16.msra.mxu1 %v1428_v57 }
  0x43   :  { %663 = vmatmul.mubr.bf16.gmra.mxu0 %v1405_v58 }
  0x44   :  { %760 = vmatmul.mubr.bf16.gmra.mxu1 %v1406_v59  ;;  %670 = vmatprep.mubr.bf16.mxu0 %v1408_v60 }
  0x45   :  { %767 = vmatprep.mubr.bf16.mxu1 %v1410_v61 }
  0x4b   :  { %671 = vmatmul.mubr.bf16.gmra.mxu0 %v1412_v62 }
  0x4c   :  { %768 = vmatmul.mubr.bf16.gmra.mxu1 %v1413_v63  ;;  %678 = vmatprep.mubr.bf16.mxu0 %v1415_v0 }
  0x4d   :  { %775 = vmatprep.mubr.bf16.mxu1 %v1417_v1 }
  0x53   :  { %679 = vmatmul.mubr.bf16.gmra.mxu0 %v1419_v2 }
  0x54   :  { %776 = vmatmul.mubr.bf16.gmra.mxu1 %v1420_v3  ;;  %686 = vmatprep.mubr.bf16.mxu0 %v1422_v4 }
  0x55   :  { %783 = vmatprep.mubr.bf16.mxu1 %v1424_v5 }
  0x5b   :  { %687 = vmatmul.mubr.bf16.gmra.mxu0 %v1426_v6 }
  0x5c   :  { %784 = vmatmul.mubr.bf16.gmra.mxu1 %v1427_v7  ;;  %1309 = vmatprep.mubr.bf16.mxu0 %v1429_v8 }
  0x5d   :  { %1317 = vmatprep.mubr.bf16.mxu1 %v1430_v9 }
  0x63   :  { %1310 = vmatmul.mubr.bf16.vlgmr.msra.gmra.mxu0 %v1431_v10 }
  0x64   :  { %1318 = vmatmul.mubr.bf16.vlgmr.msra.gmra.mxu1 %v1432_v11  ;;  %1313 = vmatprep.mubr.bf16.mxu0 %v1433_v12 }
  0x65   :  { %1321 = vmatprep.mubr.bf16.mxu1 %v1434_v13 }
  0x6b   :  { %1314 = vmatmul.mubr.bf16.gmra.mxu0 %v1435_v14 }
  0x6c   :  { %1322 = vmatmul.mubr.bf16.gmra.mxu1 %v1436_v15 }
  0xe3   :  { %v1165_v16 = vpop.f32.mrf.mxu0 }
  0xe4   :  { %v1229_v17 = vpop.f32.mrf.mxu1 }
  0xe5   :  { %v1166_v19 = vpop.f32.mrf.mxu0 }
  0xe6   :  { %v1167_v20 = vadd.f32 %v1166_v19, %v1165_v16  ;;  %v1230_v21 = vpop.f32.mrf.mxu1 }
  0xe7   :  { %v1168_v22 = vpop.f32.mrf.mxu0  ;;  %v1231_v24 = vadd.f32 %v1230_v21, %v1229_v17 }
  0xe8   :  { %v633_v23 = vadd.f32 %v1167_v20, %v1700_v18  ;;  %v1703_v25 = vpop.f32.mrf.mxu1 }
  0xe9   :  { %v1169_v26 = vpop.f32.mrf.mxu0 }
  0xea   :  { %v1705_v27 = vpop.f32.mrf.mxu1  ;;  %v1707_v28 = vadd.f32 %v1231_v24, %v633_v23  ;;  %v1170_v10 = vadd.f32 %v1169_v26, %v1168_v22 }
  0xeb   :  { %v1171_v29 = vpop.f32.mrf.mxu0 }
  0xec   :  { %1800 = vst [vmem:[#allocation2_spill] sm:$0xff] %v1707_v28  ;;  %v1235_v30 = vpop.f32.mrf.mxu1  ;;  %v636_v19 = vadd.f32 %v1170_v10, %v1700_v18 }
  0xed   :  { %v1172_v31 = vpop.f32.mrf.mxu0 }
  0xee   :  { %v1236_v32 = vpop.f32.mrf.mxu1  ;;  %v1173_v12 = vadd.f32 %v1172_v31, %v1171_v29  ;;  %v1234_v29 = vadd.f32 %v1705_v27, %v1703_v25 }
  0xef   :  { %v1174_v33 = vpop.f32.mrf.mxu0  ;;  %v1237_v31 = vadd.f32 %v1236_v32, %v1235_v30 }
  0xf0   :  { %v1238_v34 = vpop.f32.mrf.mxu1  ;;  %v641_v23 = vadd.f32 %v1173_v12, %v1700_v18 }
  0xf1   :  { %v1175_v35 = vpop.f32.mrf.mxu0 }
  0xf2   :  { %v1239_v36 = vpop.f32.mrf.mxu1  ;;  %v1176_v13 = vadd.f32 %v1175_v35, %v1174_v33 }
  0xf3   :  { %v1177_v37 = vpop.f32.mrf.mxu0  ;;  %v1240_v33 = vadd.f32 %v1239_v36, %v1238_v34 }
  0xf4   :  { %v1241_v38 = vpop.f32.mrf.mxu1  ;;  %v644_v24 = vadd.f32 %v1176_v13, %v1700_v18  ;;  %v733_v13 = vadd.f32 %v1234_v29, %v636_v19 }
  0xf5   :  { %v1178_v39 = vpop.f32.mrf.mxu0 }
  0xf6   :  { %v1242_v40 = vpop.f32.mrf.mxu1  ;;  %v1179_v14 = vadd.f32 %v1178_v39, %v1177_v37  ;;  %v741_v28 = vadd.f32 %v1240_v33, %v644_v24 }
  0xf7   :  { %v1180_v41 = vpop.f32.mrf.mxu0  ;;  %v1243_v39 = vadd.f32 %v1242_v40, %v1241_v38 }
  0xf8   :  { %v1709_v42 = vpop.f32.mrf.mxu1  ;;  %v649_v22 = vadd.f32 %v1179_v14, %v1700_v18  ;;  %v738_v14 = vadd.f32 %v1237_v31, %v641_v23 }
  0xf9   :  { %v1181_v43 = vpop.f32.mrf.mxu0 }
  0xfa   :  { %v1711_v44 = vpop.f32.mrf.mxu1  ;;  %v1182_v10 = vadd.f32 %v1181_v43, %v1180_v41  ;;  %v1741_v25 = vadd.f32 %v1243_v39, %v649_v22 }
  0xfb   :  { %v1183_v45 = vpop.f32.mrf.mxu0  ;;  %v1745_v27 = vadd.f32 %v1711_v44, %v1709_v42 }
  0xfc   :  { %v1713_v46 = vpop.f32.mrf.mxu1  ;;  %v1750_v38 = vadd.f32 %v1182_v10, %v1700_v18 }
  0xfd   :  { %v1184_v47 = vpop.f32.mrf.mxu0 }
  0xfe   :  { %v1248_v48 = vpop.f32.mrf.mxu1  ;;  %v1185_v20 = vadd.f32 %v1184_v47, %v1183_v45 }
  0xff   :  { %v1186_v49 = vpop.f32.mrf.mxu0  ;;  %v1249_v30 = vadd.f32 %v1248_v48, %v1713_v46 }
 0x100   :  { %v1715_v50 = vpop.f32.mrf.mxu1  ;;  %v657_v12 = vadd.f32 %v1185_v20, %v1700_v18 }
 0x101   :  { %v1187_v51 = vpop.f32.mrf.mxu0 }
 0x102   :  { %v1717_v52 = vpop.f32.mrf.mxu1  ;;  %v1188_v32 = vadd.f32 %v1187_v51, %v1186_v49 }
 0x103   :  { %v1189_v53 = vpop.f32.mrf.mxu0  ;;  %v1252_v19 = vadd.f32 %v1717_v52, %v1715_v50 }
 0x104   :  { %v1719_v54 = vpop.f32.mrf.mxu1 }
 0x105   :  { %v1190_v55 = vpop.f32.mrf.mxu0 }
 0x106   :  { %v1254_v56 = vpop.f32.mrf.mxu1  ;;  %v1191_v35 = vadd.f32 %v1190_v55, %v1189_v53 }
 0x107   :  { %v1192_v57 = vpop.f32.mrf.mxu0  ;;  %v1255_v55 = vadd.f32 %v1254_v56, %v1719_v54 }
 0x108   :  { %v1256_v58 = vpop.f32.mrf.mxu1  ;;  %v665_v34 = vadd.f32 %v1191_v35, %v1700_v18 }
 0x109   :  { %v1193_v59 = vpop.f32.mrf.mxu0 }
 0x10a   :  { %v1257_v60 = vpop.f32.mrf.mxu1  ;;  %v1194_v45 = vadd.f32 %v1193_v59, %v1192_v57  ;;  %v754_v59 = vadd.f32 %v1249_v30, %v657_v12 }
 0x10b   :  { %v1195_v61 = vpop.f32.mrf.mxu0  ;;  %v1258_v57 = vadd.f32 %v1257_v60, %v1256_v58 }
 0x10c   :  { %v1259_v62 = vpop.f32.mrf.mxu1  ;;  %v668_v40 = vadd.f32 %v1194_v45, %v1700_v18 }
 0x10d   :  { %v1196_v63 = vpop.f32.mrf.mxu0 }
 0x10e   :  { %v1260_v0 = vpop.f32.mrf.mxu1  ;;  %v1197_v26 = vadd.f32 %v1196_v63, %v1195_v61  ;;  %v765_v58 = vadd.f32 %v1258_v57, %v668_v40 }
 0x10f   :  { %v1198_v1 = vpop.f32.mrf.mxu0  ;;  %v1261_v41 = vadd.f32 %v1260_v0, %v1259_v62  ;;  %v762_v0 = vadd.f32 %v1255_v55, %v665_v34 }
 0x110   :  { %v1262_v2 = vpop.f32.mrf.mxu1  ;;  %v673_v61 = vadd.f32 %v1197_v26, %v1700_v18 }
 0x111   :  { %v1199_v3 = vpop.f32.mrf.mxu0 }
 0x112   :  { %v1263_v4 = vpop.f32.mrf.mxu1  ;;  %v1200_v47 = vadd.f32 %v1199_v3, %v1198_v1  ;;  %v770_v51 = vadd.f32 %v1261_v41, %v673_v61  ;;  %v660_v3 = vadd.f32 %v1188_v32, %v1700_v18 }
 0x113   :  { %v1201_v5 = vpop.f32.mrf.mxu0  ;;  %v1264_v46 = vadd.f32 %v1263_v4, %v1262_v2  ;;  %v1804_v4 = vld [vmem:[#allocation2_spill] sm:$0xff] }
 0x114   :  { %v1721_v6 = vpop.f32.mrf.mxu1  ;;  %v676_v43 = vadd.f32 %v1200_v47, %v1700_v18  ;;  %v757_v41 = vadd.f32 %v1252_v19, %v660_v3 }
 0x115   :  { %v1202_v7 = vpop.f32.mrf.mxu0 }
 0x116   :  { %v1723_v8 = vpop.f32.mrf.mxu1  ;;  %v1203_v48 = vadd.f32 %v1202_v7, %v1201_v5  ;;  %v773_v56 = vadd.f32 %v1264_v46, %v676_v43 }
 0x117   :  { %v1204_v9 = vpop.f32.mrf.mxu0  ;;  %v1267_v60 = vadd.f32 %v1723_v8, %v1721_v6 }
 0x118   :  { %v1725_v11 = vpop.f32.mrf.mxu1 }
 0x119   :  { %1801 = vst [vmem:[#allocation3_spill] sm:$0xff] %v1725_v11  ;;  %v1205_v15 = vpop.f32.mrf.mxu0 }
 0x11a   :  { %v1727_v16 = vpop.f32.mrf.mxu1  ;;  %v1206_v49 = vadd.f32 %v1205_v15, %v1204_v9 }
 0x11b   :  { %1802 = vst [vmem:[#allocation4_spill] sm:$0xff] %v1727_v16  ;;  %v1207_v17 = vpop.f32.mrf.mxu0 }
 0x11c   :  { %v1730_v21 = vpop.f32.mrf.mxu1  ;;  %v684_v50 = vadd.f32 %v1206_v49, %v1700_v18 }
 0x11d   :  { %1803 = vst [vmem:[#allocation5_spill] sm:$0xff] %v1730_v21  ;;  %v1208_v11 = vpop.f32.mrf.mxu0 }
 0x11e   :  { %v1272_v37 = vpop.f32.mrf.mxu1  ;;  %v1209_v42 = vadd.f32 %v1208_v11, %v1207_v17  ;;  %v681_v11 = vadd.f32 %v1203_v48, %v1700_v18  ;;  %v749_v48 = vadd.f32 %v1745_v27, %v1750_v38 }
 0x11f   :  { %v1210_v16 = vpop.f32.mrf.mxu0 }
 0x120   :  { %v1738_v21 = vpop.f32.mrf.mxu1  ;;  %v689_v2 = vadd.f32 %v1209_v42, %v1700_v18  ;;  %v778_v34 = vadd.f32 %v1267_v60, %v681_v11  ;;  %v1806_v43 = vld [vmem:[#allocation3_spill] sm:$0xff] }
 0x121   :  { %v1211_v63 = vpop.f32.mrf.mxu0 }
 0x122   :  { %v1275_v36 = vpop.f32.mrf.mxu1  ;;  %v1212_v23 = vadd.f32 %v1211_v63, %v1210_v16 }
 0x123   :  { %v1311_v53 = vpop.f32.mrf.mxu0  ;;  %v1276_v63 = vadd.f32 %v1275_v36, %v1738_v21 }
 0x124   :  { %v1319_v44 = vpop.f32.mrf.mxu1  ;;  %v835_v62 = vadd.f32 %v1311_v53, %v738_v14  ;;  %v1805_v17 = vld [vmem:[#allocation5_spill] sm:$0xff]  ;;  %v692_v6 = vadd.f32 %v1212_v23, %v1700_v18  ;;  %v1807_v53 = vld [vmem:[#allocation4_spill] sm:$0xff] }
 0x125   :  { %v826_v1 = vpop.f32.mrf.mxu0  ;;  %v867_v24 = vadd.f32 %v1319_v44, %v770_v51  ;;  %v1273_v22 = vadd.f32 %v1272_v37, %v1805_v17  ;;  %v1270_v55 = vadd.f32 %v1807_v53, %v1806_v43 }
 0x126   :  { %v858_v20 = vpop.f32.mrf.mxu1  ;;  %v827_v5 = vadd.f32 %v826_v1, %v1804_v4  ;;  %v891_v26 = vmax.f32 %v835_v62, 0.0  ;;  %v789_v42 = vadd.f32 %v1276_v63, %v692_v6 }
 0x127   :  { %v1312_v54 = vpop.f32.mrf.mxu0  ;;  %v859_v52 = vadd.f32 %v858_v20, %v762_v0  ;;  %v899_v8 = vmax.f32 %v867_v24, 0.0  ;;  %v786_v12 = vadd.f32 %v1273_v22, %v689_v2  ;;  %v781_v3 = vadd.f32 %v1270_v55, %v684_v50 }
 0x128   :  { %v838_v7 = vadd.f32 %v1312_v54, %v741_v28  ;;  %v1320_v9 = vpop.f32.mrf.mxu1  ;;  %v889_v10 = vmax.f32 %v827_v5, 0.0 }
 0x129   :  { %v870_v15 = vadd.f32 %v1320_v9, %v773_v56  ;;  %v829_v16 = vpop.f32.mrf.mxu0  ;;  %v897_v14 = vmax.f32 %v859_v52, 0.0 }
 0x12a   :  { %v892_v29 = vmax.f32 %v838_v7, 0.0  ;;  %v830_v31 = vadd.f32 %v829_v16, %v733_v13  ;;  %v861_v33 = vpop.f32.mrf.mxu1 }
 0x12b   :  { %v900_v35 = vmax.f32 %v870_v15, 0.0  ;;  %v862_v39 = vadd.f32 %v861_v33, %v765_v58  ;;  %v1315_v28 = vpop.f32.mrf.mxu0 }
 0x12c   :  { %v1110_v45 = vpack.c.bf16 %v892_v29, %v891_v26  ;;  %v890_v47 = vmax.f32 %v830_v31, 0.0  ;;  %v1323_v61 = vpop.f32.mrf.mxu1  ;;  %v851_v13 = vadd.f32 %v1315_v28, %v754_v59 }
 0x12d   :  { %v1130_v30 = vpack.c.bf16 %v900_v35, %v899_v8  ;;  %v898_v37 = vmax.f32 %v862_v39, 0.0  ;;  %v842_v32 = vpop.f32.mrf.mxu0  ;;  %v883_v36 = vadd.f32 %v1323_v61, %v786_v12 }
 0x12e   :  { %1142 = vst [vmem:[%s1799_s3 + $0x8] sm:$0xff] %v1110_v45   ;;  %v1105_v18 = vpack.c.bf16 %v890_v47, %v889_v10  ;;  %v874_v40 = vpop.f32.mrf.mxu1  ;;  %v843_v44 = vadd.f32 %v842_v32, %v1741_v25  ;;  %v895_v19 = vmax.f32 %v851_v13, 0.0 }
 0x12f   :  { %1146 = vst [vmem:[%s1799_s3 + $0x28] sm:$0xff] %v1130_v30   ;;  %v1125_v21 = vpack.c.bf16 %v898_v37, %v897_v14  ;;  %v1316_v57 = vpop.f32.mrf.mxu0  ;;  %v875_v49 = vadd.f32 %v874_v40, %v778_v34  ;;  %v903_v23 = vmax.f32 %v883_v36, 0.0 }
 0x130   :  { %1106 = vst [vmem:[%s1799_s3] sm:$0xff] %v1105_v18   ;;  %v854_v59 = vadd.f32 %v1316_v57, %v757_v41  ;;  %v1324_v46 = vpop.f32.mrf.mxu1  ;;  %v893_v54 = vmax.f32 %v843_v44, 0.0 }
 0x131   :  { %1145 = vst [vmem:[%s1799_s3 + $0x20] sm:$0xff] %v1125_v21   ;;  %v886_v51 = vadd.f32 %v1324_v46, %v789_v42  ;;  %v845_v1 = vpop.f32.mrf.mxu0  ;;  %v901_v60 = vmax.f32 %v875_v49, 0.0 }
 0x132   :  { %v896_v62 = vmax.f32 %v854_v59, 0.0  ;;  %v846_v0 = vadd.f32 %v845_v1, %v749_v48  ;;  %v877_v20 = vpop.f32.mrf.mxu1 }
 0x133   :  { %v904_v24 = vmax.f32 %v886_v51, 0.0  ;;  %v878_v25 = vadd.f32 %v877_v20, %v781_v3 }
 0x134   :  { %v1120_v56 = vpack.c.bf16 %v896_v62, %v895_v19  ;;  %v894_v58 = vmax.f32 %v846_v0, 0.0 }
 0x135   :  { %v1140_v27 = vpack.c.bf16 %v904_v24, %v903_v23  ;;  %v902_v38 = vmax.f32 %v878_v25, 0.0 }
 0x136   :  { %1144 = vst [vmem:[%s1799_s3 + $0x18] sm:$0xff] %v1120_v56   ;;  %v1115_v2 = vpack.c.bf16 %v894_v58, %v893_v54 }
 0x137   :  { %1148 = vst [vmem:[%s1799_s3 + $0x38] sm:$0xff] %v1140_v27   ;;  %v1135_v4 = vpack.c.bf16 %v902_v38, %v901_v60 }
 0x138   :  { %1143 = vst [vmem:[%s1799_s3 + $0x10] sm:$0xff] %v1115_v2  }
 0x139   :  { %1147 = vst [vmem:[%s1799_s3 + $0x30] sm:$0xff] %v1135_v4  }

// kernel: resnet18_forward.25
= control target key start
LH: loop header
LB: loop body
LE: loop exit
PB: predicated region body
PF: predicated region fallthrough
CT: control target
= control target key end

     0   :  { %s2042_s1 = inlined_call_operand.vmem [shape: bf16[640,128], index: 1, kind: input, shape index: {}]   ;;  %s2043_s0 = inlined_call_operand.vmem [shape: bf16[128,640], index: 0, kind: input, shape index: {}]   ;;  %s2044_s2 = inlined_call_operand.vmem [shape: f32[1,128], index: 2, kind: input, shape index: {}]   ;;  %s2045_s3 = inlined_call_operand.vmem [shape: bf16[128,128], index: 3, kind: input, shape index: {}]   ;;  %s2046_s4 = inlined_call_operand.vmem [shape: bf16[128,128], index: 4, kind: output, shape index: {}]  }
   0x1   :  { %v1431_v0 = vld [vmem:[%s2042_s1 + $0x78] sm:$0xff]   ;;  %v1435_v4 = vld [vmem:[%s2042_s1 + $0x70] sm:$0xff]   ;;  %v1439_v8 = vld [vmem:[%s2042_s1 + $0x68] sm:$0xff]  }
   0x2   :  { %v1432_v1 = vld [vmem:[%s2042_s1 + $0xf8] sm:$0xff]   ;;  %1239 = vmatprep.subr.bf16.mxu0 %v1431_v0  ;;  %v1436_v5 = vld [vmem:[%s2042_s1 + $0xf0] sm:$0xff]   ;;  %v1440_v9 = vld [vmem:[%s2042_s1 + $0xe8] sm:$0xff]  }
   0x3   :  { %v1433_v2 = vld [vmem:[%s2042_s1 + $0x38] sm:$0xff]   ;;  %1303 = vmatprep.subr.bf16.mxu1 %v1432_v1  ;;  %v1437_v6 = vld [vmem:[%s2042_s1 + $0x30] sm:$0xff]   ;;  %v1441_v10 = vld [vmem:[%s2042_s1 + $0x28] sm:$0xff]  }
   0x4   :  { %v1434_v3 = vld [vmem:[%s2042_s1 + $0xb8] sm:$0xff]   ;;  %1240 = vmatpush3.bf16.msra.mxu0 %v1433_v2  ;;  %v1438_v7 = vld [vmem:[%s2042_s1 + $0xb0] sm:$0xff]   ;;  %v1442_v11 = vld [vmem:[%s2042_s1 + $0xa8] sm:$0xff]  }
   0x5   :  { %1304 = vmatpush3.bf16.msra.mxu1 %v1434_v3  ;;  %1241 = vmatprep.subr.bf16.mxu0 %v1435_v4  ;;  %v1443_v12 = vld [vmem:[%s2042_s1 + $0x60] sm:$0xff]   ;;  %v1447_v16 = vld [vmem:[%s2042_s1 + $0x58] sm:$0xff]   ;;  %v1451_v20 = vld [vmem:[%s2042_s1 + $0x50] sm:$0xff]  }
   0x6   :  { %1305 = vmatprep.subr.bf16.mxu1 %v1436_v5  ;;  %v1444_v13 = vld [vmem:[%s2042_s1 + $0xe0] sm:$0xff]   ;;  %v1448_v17 = vld [vmem:[%s2042_s1 + $0xd8] sm:$0xff]   ;;  %v1452_v21 = vld [vmem:[%s2042_s1 + $0xd0] sm:$0xff]  }
   0x7   :  { %v1445_v14 = vld [vmem:[%s2042_s1 + $0x20] sm:$0xff]   ;;  %v1449_v18 = vld [vmem:[%s2042_s1 + $0x18] sm:$0xff]   ;;  %v1453_v22 = vld [vmem:[%s2042_s1 + $0x10] sm:$0xff]  }
   0x8   :  { %1242 = vmatpush3.bf16.msra.mxu0 %v1437_v6  ;;  %v1446_v15 = vld [vmem:[%s2042_s1 + $0xa0] sm:$0xff]   ;;  %v1450_v19 = vld [vmem:[%s2042_s1 + $0x98] sm:$0xff]   ;;  %v1454_v23 = vld [vmem:[%s2042_s1 + $0x90] sm:$0xff]  }
   0x9   :  { %1306 = vmatpush3.bf16.msra.mxu1 %v1438_v7  ;;  %1243 = vmatprep.subr.bf16.mxu0 %v1439_v8  ;;  %v1455_v24 = vld [vmem:[%s2042_s1 + $0x48] sm:$0xff]   ;;  %v1459_v28 = vld [vmem:[%s2042_s1 + $0x40] sm:$0xff]   ;;  %v1469_v36 = vld [vmem:[%s2042_s1 + $0x138] sm:$0xff]  }
   0xa   :  { %1307 = vmatprep.subr.bf16.mxu1 %v1440_v9  ;;  %v1456_v25 = vld [vmem:[%s2042_s1 + $0xc8] sm:$0xff]   ;;  %v1460_v29 = vld [vmem:[%s2042_s1 + $0xc0] sm:$0xff]   ;;  %v1476_v39 = vld [vmem:[%s2042_s1 + $0x130] sm:$0xff]  }
   0xb   :  { %v1457_v26 = vld [vmem:[%s2042_s1 + $0x8] sm:$0xff]   ;;  %v1461_v30 = vld [vmem:[%s2042_s1] sm:$0xff]   ;;  %v1479_v43 = vld [vmem:[%s2043_s0 + $0x5c] ss:$20 sps:$4 sm:$0xff]  }
   0xc   :  { %1244 = vmatpush3.bf16.msra.mxu0 %v1441_v10  ;;  %v1458_v27 = vld [vmem:[%s2042_s1 + $0x88] sm:$0xff]   ;;  %v1462_v31 = vld [vmem:[%s2042_s1 + $0x80] sm:$0xff]   ;;  %v1484_v48 = vld [vmem:[%s2043_s0 + $0x7c] ss:$20 sps:$4 sm:$0xff]  }
   0xd   :  { %1308 = vmatpush3.bf16.msra.mxu1 %v1442_v11  ;;  %1245 = vmatprep.subr.bf16.mxu0 %v1443_v12  ;;  %v1463_v32 = vld [vmem:[%s2043_s0] ss:$20 sps:$4 sm:$0xff]   ;;  %v1465_v33 = vld [vmem:[%s2043_s0 + $0x4] ss:$20 sps:$4 sm:$0xff]   ;;  %v1466_v34 = vld [vmem:[%s2043_s0 + $0x8] ss:$20 sps:$4 sm:$0xff]  }
   0xe   :  { %1309 = vmatprep.subr.bf16.mxu1 %v1444_v13  ;;  %v1468_v35 = vld [vmem:[%s2043_s0 + $0xc] ss:$20 sps:$4 sm:$0xff]   ;;  %633 = vmatprep.mubr.bf16.mxu0 %v1465_v33  ;;  %v1472_v38 = vld [vmem:[%s2043_s0 + $0x34] ss:$20 sps:$4 sm:$0xff]   ;;  %v1475_v41 = vld [vmem:[%s2043_s0 + $0x30] ss:$20 sps:$4 sm:$0xff]  }
   0xf   :  { %730 = vmatprep.mubr.bf16.mxu1 %v1468_v35  ;;  %v1470_v37 = vld [vmem:[%s2043_s0 + $0x2c] ss:$20 sps:$4 sm:$0xff]   ;;  %v1474_v40 = vld [vmem:[%s2043_s0 + $0x28] ss:$20 sps:$4 sm:$0xff]   ;;  %v1481_v46 = vld [vmem:[%s2043_s0 + $0x50] ss:$20 sps:$4 sm:$0xff]  }
  0x10   :  { %1246 = vmatpush3.bf16.msra.mxu0 %v1445_v14  ;;  %v1477_v42 = vld [vmem:[%s2043_s0 + $0x54] ss:$20 sps:$4 sm:$0xff]   ;;  %v1490_v45 = vld [vmem:[%s2042_s1 + $0x120] sm:$0xff]   ;;  %v1482_v47 = vld [vmem:[%s2043_s0 + $0x58] ss:$20 sps:$4 sm:$0xff]  }
  0x11   :  { %1310 = vmatpush3.bf16.msra.mxu1 %v1446_v15  ;;  %1247 = vmatprep.subr.bf16.mxu0 %v1447_v16  ;;  %v1483_v44 = vld [vmem:[%s2042_s1 + $0x128] sm:$0xff]   ;;  %v1486_v49 = vld [vmem:[%s2043_s0 + $0x84] ss:$20 sps:$4 sm:$0xff]   ;;  %v1504_v51 = vld [vmem:[%s2042_s1 + $0x110] sm:$0xff]  }
  0x12   :  { %1311 = vmatprep.subr.bf16.mxu1 %v1448_v17  ;;  %v1497_v50 = vld [vmem:[%s2042_s1 + $0x118] sm:$0xff]   ;;  %v1489_v53 = vld [vmem:[%s2043_s0 + $0x80] ss:$20 sps:$4 sm:$0xff]   ;;  %v1511_v55 = vld [vmem:[%s2042_s1 + $0x108] sm:$0xff]  }
  0x13   :  { %v1488_v52 = vld [vmem:[%s2043_s0 + $0x78] ss:$20 sps:$4 sm:$0xff]   ;;  %v1518_v57 = vld [vmem:[%s2042_s1 + $0x100] sm:$0xff]   ;;  %v1496_v59 = vld [vmem:[%s2043_s0 + $0xa8] ss:$20 sps:$4 sm:$0xff]  }
  0x14   :  { %1248 = vmatpush3.bf16.msra.mxu0 %v1449_v18  ;;  %v1491_v54 = vld [vmem:[%s2043_s0 + $0xa4] ss:$20 sps:$4 sm:$0xff]   ;;  %v1493_v56 = vld [vmem:[%s2043_s0 + $0xac] ss:$20 sps:$4 sm:$0xff]   ;;  %v1500_v61 = vld [vmem:[%s2043_s0 + $0xd4] ss:$20 sps:$4 sm:$0xff]  }
  0x15   :  { %1312 = vmatpush3.bf16.msra.mxu1 %v1450_v19  ;;  %1249 = vmatprep.subr.bf16.mxu0 %v1451_v20  ;;  %v1495_v58 = vld [vmem:[%s2043_s0 + $0xa0] ss:$20 sps:$4 sm:$0xff]   ;;  %v1502_v62 = vld [vmem:[%s2043_s0 + $0xc8] ss:$20 sps:$4 sm:$0xff]   ;;  %v1503_v63 = vld [vmem:[%s2043_s0 + $0xd0] ss:$20 sps:$4 sm:$0xff]  }
  0x16   :  { %1313 = vmatprep.subr.bf16.mxu1 %v1452_v21  ;;  %v1498_v60 = vld [vmem:[%s2043_s0 + $0xcc] ss:$20 sps:$4 sm:$0xff]   ;;  %v1505_v0 = vld [vmem:[%s2043_s0 + $0xf4] ss:$20 sps:$4 sm:$0xff]   ;;  %v1507_v1 = vld [vmem:[%s2043_s0 + $0xfc] ss:$20 sps:$4 sm:$0xff]  }
  0x17   :  { %v1509_v2 = vld [vmem:[%s2043_s0 + $0xf0] ss:$20 sps:$4 sm:$0xff]   ;;  %v1510_v3 = vld [vmem:[%s2043_s0 + $0xf8] ss:$20 sps:$4 sm:$0xff]   ;;  %v1517_v7 = vld [vmem:[%s2043_s0 + $0x120] ss:$20 sps:$4 sm:$0xff]  }
  0x18   :  { %1250 = vmatpush3.bf16.msra.mxu0 %v1453_v22  ;;  %v1512_v4 = vld [vmem:[%s2043_s0 + $0x11c] ss:$20 sps:$4 sm:$0xff]   ;;  %v1514_v5 = vld [vmem:[%s2043_s0 + $0x124] ss:$20 sps:$4 sm:$0xff]   ;;  %v1523_v12 = vld [vmem:[%s2043_s0 + $0x60] ss:$20 sps:$4 sm:$0xff]  }
  0x19   :  { %1314 = vmatpush3.bf16.msra.mxu1 %v1454_v23  ;;  %1251 = vmatprep.subr.bf16.mxu0 %v1455_v24  ;;  %v1516_v6 = vld [vmem:[%s2043_s0 + $0x118] ss:$20 sps:$4 sm:$0xff]   ;;  %v1519_v8 = vld [vmem:[%s2043_s0 + $0x10] ss:$20 sps:$4 sm:$0xff]   ;;  %v1524_v13 = vld [vmem:[%s2043_s0 + $0x100] ss:$20 sps:$4 sm:$0xff]  }
  0x1a   :  { %1315 = vmatprep.subr.bf16.mxu1 %v1456_v25  ;;  %v1520_v9 = vld [vmem:[%s2043_s0 + $0xb0] ss:$20 sps:$4 sm:$0xff]   ;;  %v1521_v10 = vld [vmem:[%s2043_s0 + $0x38] ss:$20 sps:$4 sm:$0xff]   ;;  %v1525_v14 = vld [vmem:[%s2043_s0 + $0x88] ss:$20 sps:$4 sm:$0xff]  }
  0x1b   :  { %v1522_v11 = vld [vmem:[%s2043_s0 + $0xd8] ss:$20 sps:$4 sm:$0xff]   ;;  %v1526_v15 = vld [vmem:[%s2043_s0 + $0x128] ss:$20 sps:$4 sm:$0xff]   ;;  %v1795_v18 = vld [vmem:[%s2044_s2] ss:$0 sm:$0xff] }
  0x1c   :  { %1252 = vmatpush3.bf16.msra.mxu0 %v1457_v26 }
  0x1d   :  { %1316 = vmatpush3.bf16.msra.mxu1 %v1458_v27  ;;  %1253 = vmatprep.subr.bf16.mxu0 %v1459_v28 }
  0x1e   :  { %1317 = vmatprep.subr.bf16.mxu1 %v1460_v29 }
  0x20   :  { %1254 = vmatpush3.bf16.msra.mxu0 %v1461_v30 }
  0x21   :  { %1318 = vmatpush3.bf16.msra.mxu1 %v1462_v31  ;;  %1383 = vmatprep.subr.bf16.mxu0 %v1469_v36 }
  0x22   :  { %1415 = vmatprep.subr.bf16.mxu1 %v1469_v36 }
  0x23   :  { %634 = vmatmul.mubr.bf16.vlgmr.msra.gmra.mxu0 %v1463_v32 }
  0x24   :  { %731 = vmatmul.mubr.bf16.vlgmr.msra.gmra.mxu1 %v1466_v34  ;;  %1384 = vmatpush3.bf16.msra.mxu0 %v1469_v36 }
  0x25   :  { %1423 = vmatpush3.bf16.msra.mxu1 %v1469_v36  ;;  %641 = vmatprep.mubr.bf16.mxu0 %v1470_v37 }
  0x26   :  { %738 = vmatprep.mubr.bf16.mxu1 %v1472_v38  ;;  %1385 = vmatprep.subr.bf16.mxu0 %v1476_v39 }
  0x27   :  { %1416 = vmatprep.subr.bf16.mxu1 %v1476_v39 }
  0x28   :  { %1386 = vmatpush3.bf16.msra.mxu0 %v1476_v39 }
  0x29   :  { %1424 = vmatpush3.bf16.msra.mxu1 %v1476_v39  ;;  %1387 = vmatprep.subr.bf16.mxu0 %v1483_v44 }
  0x2a   :  { %1417 = vmatprep.subr.bf16.mxu1 %v1483_v44 }
  0x2b   :  { %642 = vmatmul.mubr.bf16.gmra.mxu0 %v1474_v40 }
  0x2c   :  { %739 = vmatmul.mubr.bf16.gmra.mxu1 %v1475_v41  ;;  %649 = vmatprep.mubr.bf16.mxu0 %v1477_v42 }
  0x2d   :  { %746 = vmatprep.mubr.bf16.mxu1 %v1479_v43  ;;  %1388 = vmatpush3.bf16.msra.mxu0 %v1483_v44 }
  0x2e   :  { %1425 = vmatpush3.bf16.msra.mxu1 %v1483_v44  ;;  %1389 = vmatprep.subr.bf16.mxu0 %v1490_v45 }
  0x2f   :  { %1418 = vmatprep.subr.bf16.mxu1 %v1490_v45 }
  0x31   :  { %1390 = vmatpush3.bf16.msra.mxu0 %v1490_v45 }
  0x32   :  { %1426 = vmatpush3.bf16.msra.mxu1 %v1490_v45  ;;  %1391 = vmatprep.subr.bf16.mxu0 %v1497_v50 }
  0x33   :  { %650 = vmatmul.mubr.bf16.gmra.mxu0 %v1481_v46  ;;  %1419 = vmatprep.subr.bf16.mxu1 %v1497_v50 }
  0x34   :  { %747 = vmatmul.mubr.bf16.gmra.mxu1 %v1482_v47  ;;  %657 = vmatprep.mubr.bf16.mxu0 %v1484_v48 }
  0x35   :  { %754 = vmatprep.mubr.bf16.mxu1 %v1486_v49  ;;  %1392 = vmatpush3.bf16.msra.mxu0 %v1497_v50 }
  0x36   :  { %1427 = vmatpush3.bf16.msra.mxu1 %v1497_v50  ;;  %1393 = vmatprep.subr.bf16.mxu0 %v1504_v51 }
  0x37   :  { %1420 = vmatprep.subr.bf16.mxu1 %v1504_v51 }
  0x39   :  { %1394 = vmatpush3.bf16.msra.mxu0 %v1504_v51 }
  0x3a   :  { %1428 = vmatpush3.bf16.msra.mxu1 %v1504_v51  ;;  %1395 = vmatprep.subr.bf16.mxu0 %v1511_v55 }
  0x3b   :  { %658 = vmatmul.mubr.bf16.gmra.mxu0 %v1488_v52  ;;  %1421 = vmatprep.subr.bf16.mxu1 %v1511_v55 }
  0x3c   :  { %755 = vmatmul.mubr.bf16.gmra.mxu1 %v1489_v53  ;;  %665 = vmatprep.mubr.bf16.mxu0 %v1491_v54 }
  0x3d   :  { %762 = vmatprep.mubr.bf16.mxu1 %v1493_v56  ;;  %1396 = vmatpush3.bf16.msra.mxu0 %v1511_v55 }
  0x3e   :  { %1429 = vmatpush3.bf16.msra.mxu1 %v1511_v55  ;;  %1397 = vmatprep.subr.bf16.mxu0 %v1518_v57 }
  0x3f   :  { %1422 = vmatprep.subr.bf16.mxu1 %v1518_v57 }
  0x41   :  { %1398 = vmatpush3.bf16.msra.mxu0 %v1518_v57 }
  0x42   :  { %1430 = vmatpush3.bf16.msra.mxu1 %v1518_v57 }
  0x43   :  { %666 = vmatmul.mubr.bf16.gmra.mxu0 %v1495_v58 }
  0x44   :  { %763 = vmatmul.mubr.bf16.gmra.mxu1 %v1496_v59  ;;  %673 = vmatprep.mubr.bf16.mxu0 %v1498_v60 }
  0x45   :  { %770 = vmatprep.mubr.bf16.mxu1 %v1500_v61 }
  0x4b   :  { %674 = vmatmul.mubr.bf16.gmra.mxu0 %v1502_v62 }
  0x4c   :  { %771 = vmatmul.mubr.bf16.gmra.mxu1 %v1503_v63  ;;  %681 = vmatprep.mubr.bf16.mxu0 %v1505_v0 }
  0x4d   :  { %778 = vmatprep.mubr.bf16.mxu1 %v1507_v1 }
  0x53   :  { %682 = vmatmul.mubr.bf16.gmra.mxu0 %v1509_v2 }
  0x54   :  { %779 = vmatmul.mubr.bf16.gmra.mxu1 %v1510_v3  ;;  %689 = vmatprep.mubr.bf16.mxu0 %v1512_v4 }
  0x55   :  { %786 = vmatprep.mubr.bf16.mxu1 %v1514_v5 }
  0x5b   :  { %690 = vmatmul.mubr.bf16.gmra.mxu0 %v1516_v6  ;;  %v1861_v6 = vld [vmem:[%s2045_s3 + $0x8] sm:$0xff]  }
  0x5c   :  { %787 = vmatmul.mubr.bf16.gmra.mxu1 %v1517_v7  ;;  %1399 = vmatprep.mubr.bf16.mxu0 %v1519_v8  ;;  %2054 = vst [vmem:[#allocation3_spill] sm:$0xff] %v1861_v6  ;;  %v1866_v7 = vld [vmem:[%s2045_s3 + $0x28] sm:$0xff]   ;;  %v1871_v8 = vld [vmem:[%s2045_s3] sm:$0xff]  }
  0x5d   :  { %1407 = vmatprep.mubr.bf16.mxu1 %v1520_v9  ;;  %2055 = vst [vmem:[#allocation4_spill] sm:$0xff] %v1866_v7  ;;  %2056 = vst [vmem:[#allocation5_spill] sm:$0xff] %v1871_v8 }
  0x63   :  { %1400 = vmatmul.mubr.bf16.vlgmr.msra.gmra.mxu0 %v1521_v10  ;;  %v1878_v10 = vld [vmem:[%s2045_s3 + $0x20] sm:$0xff]  }
  0x64   :  { %1408 = vmatmul.mubr.bf16.vlgmr.msra.gmra.mxu1 %v1522_v11  ;;  %1403 = vmatprep.mubr.bf16.mxu0 %v1523_v12 }
  0x65   :  { %1411 = vmatprep.mubr.bf16.mxu1 %v1524_v13 }
  0x6b   :  { %1404 = vmatmul.mubr.bf16.gmra.mxu0 %v1525_v14 }
  0x6c   :  { %1412 = vmatmul.mubr.bf16.gmra.mxu1 %v1526_v15 }
  0xe3   :  { %v1255_v16 = vpop.f32.mrf.mxu0 }
  0xe4   :  { %v1319_v17 = vpop.f32.mrf.mxu1 }
  0xe5   :  { %v1256_v19 = vpop.f32.mrf.mxu0 }
  0xe6   :  { %v1257_v20 = vadd.f32 %v1256_v19, %v1255_v16  ;;  %v1320_v21 = vpop.f32.mrf.mxu1  ;;  %v1893_v19 = vld [vmem:[%s2045_s3 + $0x38] sm:$0xff]   ;;  %v1909_v16 = vld [vmem:[%s2045_s3 + $0x30] sm:$0xff]  }
  0xe7   :  { %v1258_v22 = vpop.f32.mrf.mxu0  ;;  %v1321_v24 = vadd.f32 %v1320_v21, %v1319_v17  ;;  %v1888_v17 = vld [vmem:[%s2045_s3 + $0x18] sm:$0xff]  }
  0xe8   :  { %v636_v23 = vadd.f32 %v1257_v20, %v1795_v18  ;;  %v1798_v25 = vpop.f32.mrf.mxu1 }
  0xe9   :  { %v1259_v26 = vpop.f32.mrf.mxu0 }
  0xea   :  { %v1800_v27 = vpop.f32.mrf.mxu1  ;;  %v1802_v28 = vadd.f32 %v1321_v24, %v636_v23  ;;  %v1260_v11 = vadd.f32 %v1259_v26, %v1258_v22  ;;  %v1904_v26 = vld [vmem:[%s2045_s3 + $0x10] sm:$0xff]   ;;  %v1172_v22 = vunpack.c.h.bf16 %v1878_v10 }
  0xeb   :  { %v1261_v29 = vpop.f32.mrf.mxu0 }
  0xec   :  { %2053 = vst [vmem:[#allocation2_spill] sm:$0xff] %v1802_v28  ;;  %v1804_v30 = vpop.f32.mrf.mxu1  ;;  %v639_v23 = vadd.f32 %v1260_v11, %v1795_v18 }
  0xed   :  { %v1262_v31 = vpop.f32.mrf.mxu0 }
  0xee   :  { %v1806_v32 = vpop.f32.mrf.mxu1  ;;  %v1263_v15 = vadd.f32 %v1262_v31, %v1261_v29  ;;  %v1168_v31 = vunpack.c.h.bf16 %v1888_v17 }
  0xef   :  { %v1264_v33 = vpop.f32.mrf.mxu0 }
  0xf0   :  { %v1808_v34 = vpop.f32.mrf.mxu1  ;;  %v644_v11 = vadd.f32 %v1263_v15, %v1795_v18 }
  0xf1   :  { %v1265_v35 = vpop.f32.mrf.mxu0 }
  0xf2   :  { %v1810_v36 = vpop.f32.mrf.mxu1  ;;  %v1266_v14 = vadd.f32 %v1265_v35, %v1264_v33  ;;  %v1324_v35 = vadd.f32 %v1800_v27, %v1798_v25  ;;  %v1327_v33 = vadd.f32 %v1806_v32, %v1804_v30 }
  0xf3   :  { %v1267_v37 = vpop.f32.mrf.mxu0  ;;  %v1330_v15 = vadd.f32 %v1810_v36, %v1808_v34 }
  0xf4   :  { %v1812_v38 = vpop.f32.mrf.mxu1  ;;  %v647_v6 = vadd.f32 %v1266_v14, %v1795_v18 }
  0xf5   :  { %v1268_v39 = vpop.f32.mrf.mxu0 }
  0xf6   :  { %v1814_v40 = vpop.f32.mrf.mxu1  ;;  %v1269_v28 = vadd.f32 %v1268_v39, %v1267_v37 }
  0xf7   :  { %v1816_v41 = vpop.f32.mrf.mxu0  ;;  %v1333_v14 = vadd.f32 %v1814_v40, %v1812_v38  ;;  %v741_v38 = vadd.f32 %v1327_v33, %v644_v11  ;;  %v744_v40 = vadd.f32 %v1330_v15, %v647_v6 }
  0xf8   :  { %v1818_v42 = vpop.f32.mrf.mxu1 }
  0xf9   :  { %v1820_v43 = vpop.f32.mrf.mxu0 }
  0xfa   :  { %v1822_v44 = vpop.f32.mrf.mxu1  ;;  %v1272_v25 = vadd.f32 %v1820_v43, %v1816_v41 }
  0xfb   :  { %v1273_v45 = vpop.f32.mrf.mxu0 }
  0xfc   :  { %v1824_v46 = vpop.f32.mrf.mxu1 }
  0xfd   :  { %v1274_v47 = vpop.f32.mrf.mxu0 }
  0xfe   :  { %v1826_v48 = vpop.f32.mrf.mxu1  ;;  %v1275_v24 = vadd.f32 %v1274_v47, %v1273_v45  ;;  %v1164_v45 = vunpack.c.h.bf16 %v1904_v26  ;;  %v1180_v47 = vunpack.c.h.bf16 %v1909_v16 }
  0xff   :  { %v1828_v49 = vpop.f32.mrf.mxu0  ;;  %v1339_v41 = vadd.f32 %v1826_v48, %v1824_v46 }
 0x100   :  { %v1830_v50 = vpop.f32.mrf.mxu1  ;;  %v660_v27 = vadd.f32 %v1275_v24, %v1795_v18 }
 0x101   :  { %v1832_v51 = vpop.f32.mrf.mxu0 }
 0x102   :  { %v1834_v52 = vpop.f32.mrf.mxu1 }
 0x103   :  { %v1279_v53 = vpop.f32.mrf.mxu0 }
 0x104   :  { %v1836_v54 = vpop.f32.mrf.mxu1 }
 0x105   :  { %v1280_v55 = vpop.f32.mrf.mxu0 }
 0x106   :  { %v1838_v56 = vpop.f32.mrf.mxu1  ;;  %v1281_v29 = vadd.f32 %v1280_v55, %v1279_v53 }
 0x107   :  { %v1840_v57 = vpop.f32.mrf.mxu0 }
 0x108   :  { %v1842_v58 = vpop.f32.mrf.mxu1  ;;  %v668_v34 = vadd.f32 %v1281_v29, %v1795_v18 }
 0x109   :  { %v1844_v59 = vpop.f32.mrf.mxu0 }
 0x10a   :  { %v1846_v60 = vpop.f32.mrf.mxu1  ;;  %v1284_v30 = vadd.f32 %v1844_v59, %v1840_v57  ;;  %v757_v57 = vadd.f32 %v1339_v41, %v660_v27 }
 0x10b   :  { %v1285_v61 = vpop.f32.mrf.mxu0 }
 0x10c   :  { %v1848_v62 = vpop.f32.mrf.mxu1 }
 0x10d   :  { %v1286_v63 = vpop.f32.mrf.mxu0 }
 0x10e   :  { %v1850_v0 = vpop.f32.mrf.mxu1  ;;  %v1287_v37 = vadd.f32 %v1286_v63, %v1285_v61  ;;  %v1935_v63 = vadd.f32 %v1324_v35, %v639_v23 }
 0x10f   :  { %v1852_v1 = vpop.f32.mrf.mxu0  ;;  %v1351_v46 = vadd.f32 %v1850_v0, %v1848_v62  ;;  %v1342_v62 = vadd.f32 %v1834_v52, %v1830_v50  ;;  %v1348_v0 = vadd.f32 %v1846_v60, %v1842_v58 }
 0x110   :  { %v1854_v2 = vpop.f32.mrf.mxu1  ;;  %v676_v43 = vadd.f32 %v1287_v37, %v1795_v18 }
 0x111   :  { %v1289_v3 = vpop.f32.mrf.mxu0 }
 0x112   :  { %v1856_v4 = vpop.f32.mrf.mxu1  ;;  %v1290_v53 = vadd.f32 %v1289_v3, %v1852_v1  ;;  %v1345_v1 = vadd.f32 %v1838_v56, %v1836_v54  ;;  %v671_v3 = vadd.f32 %v1284_v30, %v1795_v18  ;;  %v773_v29 = vadd.f32 %v1351_v46, %v676_v43 }
 0x113   :  { %v1291_v5 = vpop.f32.mrf.mxu0  ;;  %v1354_v56 = vadd.f32 %v1856_v4, %v1854_v2 }
 0x114   :  { %v1873_v9 = vpop.f32.mrf.mxu1  ;;  %v765_v54 = vadd.f32 %v1345_v1, %v668_v34 }
 0x115   :  { %v1292_v12 = vpop.f32.mrf.mxu0 }
 0x116   :  { %v1880_v13 = vpop.f32.mrf.mxu1  ;;  %v1293_v55 = vadd.f32 %v1292_v12, %v1291_v5  ;;  %v679_v12 = vadd.f32 %v1290_v53, %v1795_v18 }
 0x117   :  { %2057 = vst [vmem:[#allocation6_spill] sm:$0xff] %v1880_v13  ;;  %v1895_v20 = vpop.f32.mrf.mxu0  ;;  %v652_v13 = vadd.f32 %v1269_v28, %v1795_v18  ;;  %v1278_v28 = vadd.f32 %v1832_v51, %v1828_v49  ;;  %v1953_v49 = vadd.f32 %v1272_v25, %v1795_v18  ;;  %v1957_v51 = vadd.f32 %v1822_v44, %v1818_v42 }
 0x118   :  { %2058 = vst [vmem:[#allocation7_spill] sm:$0xff] %v1895_v20  ;;  %v1911_v21 = vpop.f32.mrf.mxu1  ;;  %v776_v43 = vadd.f32 %v1354_v56, %v679_v12 }
 0x119   :  { %v1295_v8 = vpop.f32.mrf.mxu0  ;;  %v1950_v24 = vadd.f32 %v1333_v14, %v652_v13  ;;  %v663_v59 = vadd.f32 %v1278_v28, %v1795_v18  ;;  %v684_v13 = vadd.f32 %v1293_v55, %v1795_v18  ;;  %v2061_v14 = vld [vmem:[#allocation2_spill] sm:$0xff]  ;;  %v768_v28 = vadd.f32 %v1348_v0, %v671_v3 }
 0x11a   :  { %v1917_v20 = vpop.f32.mrf.mxu1 }
 0x11b   :  { %v1297_v39 = vpop.f32.mrf.mxu0  ;;  %v760_v58 = vadd.f32 %v1342_v62, %v663_v59  ;;  %v1360_v4 = vadd.f32 %v1917_v20, %v1911_v21 }
 0x11c   :  { %v1361_v7 = vpop.f32.mrf.mxu1 }
 0x11d   :  { %v1298_v61 = vpop.f32.mrf.mxu0 }
 0x11e   :  { %v1362_v32 = vpop.f32.mrf.mxu1  ;;  %v1299_v5 = vadd.f32 %v1298_v61, %v1297_v39  ;;  %v2059_v37 = vld [vmem:[#allocation6_spill] sm:$0xff] }
 0x11f   :  { %v1300_v23 = vpop.f32.mrf.mxu0  ;;  %v1357_v39 = vadd.f32 %v2059_v37, %v1873_v9  ;;  %v2060_v11 = vld [vmem:[#allocation7_spill] sm:$0xff]  ;;  %v1363_v9 = vadd.f32 %v1362_v32, %v1361_v7 }
 0x120   :  { %v1364_v36 = vpop.f32.mrf.mxu1  ;;  %v1296_v25 = vadd.f32 %v1295_v8, %v2060_v11  ;;  %v692_v15 = vadd.f32 %v1299_v5, %v1795_v18  ;;  %v2062_v8 = vld [vmem:[#allocation3_spill] sm:$0xff] }
 0x121   :  { %v1301_v48 = vpop.f32.mrf.mxu0  ;;  %v781_v2 = vadd.f32 %v1357_v39, %v684_v13  ;;  %v2063_v53 = vunpack.c.l.bf16 %v2062_v8 }
 0x122   :  { %v1365_v6 = vpop.f32.mrf.mxu1  ;;  %v1302_v42 = vadd.f32 %v1301_v48, %v1300_v23  ;;  %v2064_v48 = vld [vmem:[#allocation4_spill] sm:$0xff]  ;;  %v789_v32 = vadd.f32 %v1363_v9, %v692_v15 }
 0x123   :  { %v1401_v44 = vpop.f32.mrf.mxu0  ;;  %v1366_v46 = vadd.f32 %v1365_v6, %v1364_v36  ;;  %v2065_v59 = vunpack.c.l.bf16 %v2064_v48 }
 0x124   :  { %v838_v33 = vadd.f32 %v1401_v44, %v741_v38  ;;  %v1409_v35 = vpop.f32.mrf.mxu1  ;;  %v695_v60 = vadd.f32 %v1302_v42, %v1795_v18  ;;  %v687_v38 = vadd.f32 %v1296_v25, %v1795_v18  ;;  %v2066_v42 = vld [vmem:[#allocation5_spill] sm:$0xff]  ;;  %v2068_v44 = vunpack.c.h.bf16 %v2062_v8 }
 0x125   :  { %v870_v27 = vadd.f32 %v1409_v35, %v773_v29  ;;  %v829_v61 = vpop.f32.mrf.mxu0  ;;  %v2067_v12 = vunpack.c.l.bf16 %v2066_v42  ;;  %v2070_v18 = vunpack.c.h.bf16 %v2064_v48 }
 0x126   :  { %v830_v50 = vadd.f32 %v829_v61, %v2061_v14  ;;  %v861_v52 = vpop.f32.mrf.mxu1  ;;  %v926_v55 = vadd.f32 %v2063_v53, %v838_v33  ;;  %v792_v0 = vadd.f32 %v1366_v46, %v695_v60  ;;  %v784_v48 = vadd.f32 %v1360_v4, %v687_v38 }
 0x127   :  { %v862_v30 = vadd.f32 %v861_v52, %v765_v54  ;;  %v1402_v41 = vpop.f32.mrf.mxu0  ;;  %v934_v1 = vadd.f32 %v2065_v59, %v870_v27  ;;  %v2071_v54 = vunpack.c.h.bf16 %v2066_v42  ;;  %v2076_v4 = vunpack.c.h.bf16 %v1893_v19 }
 0x128   :  { %v841_v23 = vadd.f32 %v1402_v41, %v744_v40  ;;  %v1410_v34 = vpop.f32.mrf.mxu1  ;;  %v924_v13 = vadd.f32 %v2067_v12, %v830_v50  ;;  %v2069_v40 = vunpack.c.l.bf16 %v1878_v10  ;;  %v942_v33 = vmax.f32 %v926_v55, 0.0 }
 0x129   :  { %v873_v3 = vadd.f32 %v1410_v34, %v776_v43  ;;  %v832_v5 = vpop.f32.mrf.mxu0  ;;  %v950_v11 = vmax.f32 %v934_v1, 0.0  ;;  %v2072_v10 = vunpack.c.l.bf16 %v1888_v17  ;;  %v752_v55 = vadd.f32 %v1957_v51, %v1953_v49 }
 0x12a   :  { %v927_v20 = vadd.f32 %v2068_v44, %v841_v23  ;;  %v833_v7 = vadd.f32 %v832_v5, %v1935_v63  ;;  %v864_v21 = vpop.f32.mrf.mxu1  ;;  %v932_v29 = vadd.f32 %v2069_v40, %v862_v30  ;;  %v940_v15 = vmax.f32 %v924_v13, 0.0 }
 0x12b   :  { %v935_v36 = vadd.f32 %v2070_v18, %v873_v3  ;;  %v865_v6 = vadd.f32 %v864_v21, %v768_v28  ;;  %v1405_v62 = vpop.f32.mrf.mxu0  ;;  %v2075_v3 = vunpack.c.l.bf16 %v1909_v16 }
 0x12c   :  { %v943_v35 = vmax.f32 %v927_v20, 0.0  ;;  %v925_v56 = vadd.f32 %v2071_v54, %v833_v7  ;;  %v854_v37 = vadd.f32 %v1405_v62, %v757_v57  ;;  %v1413_v39 = vpop.f32.mrf.mxu1  ;;  %v948_v60 = vmax.f32 %v932_v29, 0.0 }
 0x12d   :  { %v951_v63 = vmax.f32 %v935_v36, 0.0  ;;  %v933_v25 = vadd.f32 %v1172_v22, %v865_v6  ;;  %v886_v27 = vadd.f32 %v1413_v39, %v789_v32  ;;  %v845_v61 = vpop.f32.mrf.mxu0 }
 0x12e   :  { %v1193_v14 = vpack.c.bf16 %v943_v35, %v942_v33  ;;  %v941_v50 = vmax.f32 %v925_v56, 0.0  ;;  %v846_v52 = vadd.f32 %v845_v61, %v1950_v24  ;;  %v877_v28 = vpop.f32.mrf.mxu1  ;;  %v930_v22 = vadd.f32 %v2072_v10, %v854_v37 }
 0x12f   :  { %v1213_v30 = vpack.c.bf16 %v951_v63, %v950_v11  ;;  %v949_v41 = vmax.f32 %v933_v25, 0.0  ;;  %v878_v43 = vadd.f32 %v877_v28, %v781_v2  ;;  %v1406_v9 = vpop.f32.mrf.mxu0  ;;  %v2073_v2 = vunpack.c.l.bf16 %v1893_v19 }
 0x130   :  { %1232 = vst [vmem:[%s2046_s4 + $0x8] sm:$0xff] %v1193_v14   ;;  %v1188_v57 = vpack.c.bf16 %v941_v50, %v940_v15  ;;  %v857_v8 = vadd.f32 %v1406_v9, %v760_v58  ;;  %v1414_v53 = vpop.f32.mrf.mxu1  ;;  %v2074_v58 = vunpack.c.l.bf16 %v1904_v26  ;;  %v946_v12 = vmax.f32 %v930_v22, 0.0 }
 0x131   :  { %1236 = vst [vmem:[%s2046_s4 + $0x28] sm:$0xff] %v1213_v30   ;;  %v1208_v24 = vpack.c.bf16 %v949_v41, %v948_v60  ;;  %v938_v23 = vadd.f32 %v2073_v2, %v886_v27  ;;  %v889_v34 = vadd.f32 %v1414_v53, %v792_v0  ;;  %v848_v46 = vpop.f32.mrf.mxu0  ;;  %v936_v5 = vadd.f32 %v2075_v3, %v878_v43 }
 0x132   :  { %1189 = vst [vmem:[%s2046_s4] sm:$0xff] %v1188_v57   ;;  %v928_v59 = vadd.f32 %v2074_v58, %v846_v52  ;;  %v931_v49 = vadd.f32 %v1168_v31, %v857_v8  ;;  %v849_v51 = vadd.f32 %v848_v46, %v752_v55  ;;  %v880_v1 = vpop.f32.mrf.mxu1 }
 0x133   :  { %1235 = vst [vmem:[%s2046_s4 + $0x20] sm:$0xff] %v1208_v24   ;;  %v939_v38 = vadd.f32 %v2076_v4, %v889_v34  ;;  %v881_v42 = vadd.f32 %v880_v1, %v784_v48  ;;  %v954_v17 = vmax.f32 %v938_v23, 0.0  ;;  %v952_v40 = vmax.f32 %v936_v5, 0.0 }
 0x134   :  { %v947_v13 = vmax.f32 %v931_v49, 0.0  ;;  %v929_v44 = vadd.f32 %v1164_v45, %v849_v51  ;;  %v944_v7 = vmax.f32 %v928_v59, 0.0 }
 0x135   :  { %v955_v31 = vmax.f32 %v939_v38, 0.0  ;;  %v937_v20 = vadd.f32 %v1180_v47, %v881_v42 }
 0x136   :  { %v1203_v21 = vpack.c.bf16 %v947_v13, %v946_v12  ;;  %v945_v32 = vmax.f32 %v929_v44, 0.0 }
 0x137   :  { %v1223_v29 = vpack.c.bf16 %v955_v31, %v954_v17  ;;  %v953_v18 = vmax.f32 %v937_v20, 0.0 }
 0x138   :  { %1234 = vst [vmem:[%s2046_s4 + $0x18] sm:$0xff] %v1203_v21   ;;  %v1198_v19 = vpack.c.bf16 %v945_v32, %v944_v7 }
 0x139   :  { %1238 = vst [vmem:[%s2046_s4 + $0x38] sm:$0xff] %v1223_v29   ;;  %v1218_v26 = vpack.c.bf16 %v953_v18, %v952_v40 }
 0x13a   :  { %1233 = vst [vmem:[%s2046_s4 + $0x10] sm:$0xff] %v1198_v19  }
 0x13b   :  { %1237 = vst [vmem:[%s2046_s4 + $0x30] sm:$0xff] %v1218_v26  }

// kernel: resnet18_forward.28
= control target key start
LH: loop header
LB: loop body
LE: loop exit
PB: predicated region body
PF: predicated region fallthrough
CT: control target
= control target key end

     0   :  { %s970_s1 = inlined_call_operand.vmem [shape: bf16[640,128], index: 1, kind: input, shape index: {}]   ;;  %s971_s0 = inlined_call_operand.vmem [shape: bf16[32,640], index: 0, kind: input, shape index: {}]   ;;  %s972_s2 = inlined_call_operand.vmem [shape: f32[1,128], index: 2, kind: input, shape index: {}]   ;;  %s973_s3 = inlined_call_operand.vmem [shape: bf16[32,128], index: 3, kind: output, shape index: {}]  }
   0x1   :  { %v737_v0 = vld [vmem:[%s970_s1 + $0x78] sm:$0xff]   ;;  %v741_v4 = vld [vmem:[%s970_s1 + $0x70] sm:$0xff]   ;;  %v745_v8 = vld [vmem:[%s970_s1 + $0x68] sm:$0xff]  }
   0x2   :  { %v738_v1 = vld [vmem:[%s970_s1 + $0x38] sm:$0xff]   ;;  %651 = vmatprep.subr.bf16.mxu0 %v737_v0  ;;  %v742_v5 = vld [vmem:[%s970_s1 + $0x30] sm:$0xff]   ;;  %v746_v9 = vld [vmem:[%s970_s1 + $0x28] sm:$0xff]  }
   0x3   :  { %v739_v2 = vld [vmem:[%s970_s1 + $0xf8] sm:$0xff]   ;;  %652 = vmatpush3.bf16.msra.mxu0 %v738_v1  ;;  %v743_v6 = vld [vmem:[%s970_s1 + $0xf0] sm:$0xff]   ;;  %v747_v10 = vld [vmem:[%s970_s1 + $0xe8] sm:$0xff]  }
   0x4   :  { %v740_v3 = vld [vmem:[%s970_s1 + $0xb8] sm:$0xff]   ;;  %679 = vmatprep.subr.bf16.mxu1 %v739_v2  ;;  %653 = vmatprep.subr.bf16.mxu0 %v741_v4  ;;  %v744_v7 = vld [vmem:[%s970_s1 + $0xb0] sm:$0xff]   ;;  %v748_v11 = vld [vmem:[%s970_s1 + $0xa8] sm:$0xff]  }
   0x5   :  { %680 = vmatpush3.bf16.msra.mxu1 %v740_v3  ;;  %v749_v12 = vld [vmem:[%s970_s1 + $0x60] sm:$0xff]   ;;  %v753_v16 = vld [vmem:[%s970_s1 + $0x58] sm:$0xff]   ;;  %v757_v20 = vld [vmem:[%s970_s1 + $0x50] sm:$0xff]  }
   0x6   :  { %681 = vmatprep.subr.bf16.mxu1 %v743_v6  ;;  %v750_v13 = vld [vmem:[%s970_s1 + $0x20] sm:$0xff]   ;;  %v754_v17 = vld [vmem:[%s970_s1 + $0x18] sm:$0xff]   ;;  %v758_v21 = vld [vmem:[%s970_s1 + $0x10] sm:$0xff]  }
   0x7   :  { %654 = vmatpush3.bf16.msra.mxu0 %v742_v5  ;;  %v751_v14 = vld [vmem:[%s970_s1 + $0xe0] sm:$0xff]   ;;  %v755_v18 = vld [vmem:[%s970_s1 + $0xd8] sm:$0xff]   ;;  %v759_v22 = vld [vmem:[%s970_s1 + $0xd0] sm:$0xff]  }
   0x8   :  { %655 = vmatprep.subr.bf16.mxu0 %v745_v8  ;;  %v752_v15 = vld [vmem:[%s970_s1 + $0xa0] sm:$0xff]   ;;  %v756_v19 = vld [vmem:[%s970_s1 + $0x98] sm:$0xff]   ;;  %v760_v23 = vld [vmem:[%s970_s1 + $0x90] sm:$0xff]  }
   0x9   :  { %682 = vmatpush3.bf16.msra.mxu1 %v744_v7  ;;  %v761_v24 = vld [vmem:[%s970_s1 + $0x48] sm:$0xff]   ;;  %v765_v28 = vld [vmem:[%s970_s1 + $0x40] sm:$0xff]   ;;  %v772_v34 = vld [vmem:[%s970_s1 + $0x138] sm:$0xff]  }
   0xa   :  { %683 = vmatprep.subr.bf16.mxu1 %v747_v10  ;;  %v762_v25 = vld [vmem:[%s970_s1 + $0x8] sm:$0xff]   ;;  %v766_v29 = vld [vmem:[%s970_s1] sm:$0xff]   ;;  %v776_v37 = vld [vmem:[%s970_s1 + $0x130] sm:$0xff]  }
   0xb   :  { %656 = vmatpush3.bf16.msra.mxu0 %v746_v9  ;;  %v763_v26 = vld [vmem:[%s970_s1 + $0xc8] sm:$0xff]   ;;  %v767_v30 = vld [vmem:[%s970_s1 + $0xc0] sm:$0xff]   ;;  %v779_v44 = vld [vmem:[%s970_s1 + $0x118] sm:$0xff]  }
   0xc   :  { %657 = vmatprep.subr.bf16.mxu0 %v749_v12  ;;  %v764_v27 = vld [vmem:[%s970_s1 + $0x88] sm:$0xff]   ;;  %v768_v31 = vld [vmem:[%s971_s0] ss:$20 sps:$4 sm:$0xff]   ;;  %v770_v32 = vld [vmem:[%s971_s0 + $0x4] ss:$20 sps:$4 sm:$0xff]  }
   0xd   :  { %684 = vmatpush3.bf16.msra.mxu1 %v748_v11  ;;  %v771_v33 = vld [vmem:[%s970_s1 + $0x80] sm:$0xff]   ;;  %438 = vmatprep.mubr.bf16.mxu0 %v770_v32  ;;  %v773_v35 = vld [vmem:[%s971_s0 + $0x8] ss:$20 sps:$4 sm:$0xff]   ;;  %v786_v46 = vld [vmem:[%s970_s1 + $0x110] sm:$0xff]  }
   0xe   :  { %685 = vmatprep.subr.bf16.mxu1 %v751_v14  ;;  %v775_v36 = vld [vmem:[%s971_s0 + $0xc] ss:$20 sps:$4 sm:$0xff]   ;;  %v782_v41 = vld [vmem:[%s971_s0 + $0x28] ss:$20 sps:$4 sm:$0xff]   ;;  %v785_v43 = vld [vmem:[%s971_s0 + $0x30] ss:$20 sps:$4 sm:$0xff]  }
   0xf   :  { %658 = vmatpush3.bf16.msra.mxu0 %v750_v13  ;;  %487 = vmatprep.mubr.bf16.mxu1 %v775_v36  ;;  %v777_v38 = vld [vmem:[%s970_s1 + $0x128] sm:$0xff]   ;;  %v778_v39 = vld [vmem:[%s970_s1 + $0x120] sm:$0xff]  }
  0x10   :  { %659 = vmatprep.subr.bf16.mxu0 %v753_v16  ;;  %v780_v40 = vld [vmem:[%s971_s0 + $0x2c] ss:$20 sps:$4 sm:$0xff]   ;;  %v783_v42 = vld [vmem:[%s971_s0 + $0x34] ss:$20 sps:$4 sm:$0xff]   ;;  %v789_v45 = vld [vmem:[%s971_s0 + $0x10] ss:$20 sps:$4 sm:$0xff]  }
  0x11   :  { %686 = vmatpush3.bf16.msra.mxu1 %v752_v15  ;;  %v787_v47 = vld [vmem:[%s970_s1 + $0x108] sm:$0xff]   ;;  %v788_v48 = vld [vmem:[%s970_s1 + $0x100] sm:$0xff]  }
  0x12   :  { %687 = vmatprep.subr.bf16.mxu1 %v755_v18  ;;  %v790_v49 = vld [vmem:[%s971_s0 + $0x38] ss:$20 sps:$4 sm:$0xff]   ;;  %v581_v4 = vld [vmem:[%s972_s2] ss:$0 sm:$0xff] }
  0x13   :  { %660 = vmatpush3.bf16.msra.mxu0 %v754_v17 }
  0x14   :  { %661 = vmatprep.subr.bf16.mxu0 %v757_v20 }
  0x15   :  { %688 = vmatpush3.bf16.msra.mxu1 %v756_v19 }
  0x16   :  { %689 = vmatprep.subr.bf16.mxu1 %v759_v22 }
  0x17   :  { %662 = vmatpush3.bf16.msra.mxu0 %v758_v21 }
  0x18   :  { %663 = vmatprep.subr.bf16.mxu0 %v761_v24 }
  0x19   :  { %690 = vmatpush3.bf16.msra.mxu1 %v760_v23 }
  0x1a   :  { %691 = vmatprep.subr.bf16.mxu1 %v763_v26 }
  0x1b   :  { %664 = vmatpush3.bf16.msra.mxu0 %v762_v25 }
  0x1c   :  { %665 = vmatprep.subr.bf16.mxu0 %v765_v28 }
  0x1d   :  { %692 = vmatpush3.bf16.msra.mxu1 %v764_v27 }
  0x1e   :  { %693 = vmatprep.subr.bf16.mxu1 %v767_v30 }
  0x1f   :  { %666 = vmatpush3.bf16.msra.mxu0 %v766_v29 }
  0x20   :  { %717 = vmatprep.subr.bf16.mxu0 %v772_v34 }
  0x21   :  { %694 = vmatpush3.bf16.msra.mxu1 %v771_v33 }
  0x22   :  { %439 = vmatmul.mubr.bf16.vlgmr.msra.gmra.mxu0 %v768_v31 }
  0x23   :  { %718 = vmatpush3.bf16.msra.mxu0 %v772_v34  ;;  %446 = vmatprep.mubr.bf16.mxu0 %v780_v40 }
  0x24   :  { %488 = vmatmul.mubr.bf16.vlgmr.msra.gmra.mxu1 %v773_v35  ;;  %719 = vmatprep.subr.bf16.mxu0 %v776_v37 }
  0x25   :  { %495 = vmatprep.mubr.bf16.mxu1 %v783_v42 }
  0x27   :  { %720 = vmatpush3.bf16.msra.mxu0 %v776_v37 }
  0x28   :  { %721 = vmatprep.subr.bf16.mxu0 %v777_v38 }
  0x2a   :  { %447 = vmatmul.mubr.bf16.gmra.mxu0 %v782_v41 }
  0x2b   :  { %722 = vmatpush3.bf16.msra.mxu0 %v777_v38  ;;  %733 = vmatprep.mubr.bf16.mxu0 %v789_v45 }
  0x2c   :  { %723 = vmatprep.subr.bf16.mxu0 %v778_v39  ;;  %496 = vmatmul.mubr.bf16.gmra.mxu1 %v785_v43 }
  0x2f   :  { %724 = vmatpush3.bf16.msra.mxu0 %v778_v39 }
  0x30   :  { %725 = vmatprep.subr.bf16.mxu0 %v779_v44 }
  0x33   :  { %726 = vmatpush3.bf16.msra.mxu0 %v779_v44 }
  0x34   :  { %727 = vmatprep.subr.bf16.mxu0 %v786_v46 }
  0x37   :  { %728 = vmatpush3.bf16.msra.mxu0 %v786_v46 }
  0x38   :  { %729 = vmatprep.subr.bf16.mxu0 %v787_v47 }
  0x3b   :  { %730 = vmatpush3.bf16.msra.mxu0 %v787_v47 }
  0x3c   :  { %731 = vmatprep.subr.bf16.mxu0 %v788_v48 }
  0x3f   :  { %732 = vmatpush3.bf16.msra.mxu0 %v788_v48 }
  0x42   :  { %734 = vmatmul.mubr.bf16.vlgmr.msra.gmra.mxu0 %v790_v49 }
  0xe2   :  { %v667_v50 = vpop.f32.mrf.mxu0 }
  0xe4   :  { %v668_v51 = vpop.f32.mrf.mxu0  ;;  %v695_v52 = vpop.f32.mrf.mxu1 }
  0xe5   :  { %v669_v2 = vadd.f32 %v668_v51, %v667_v50 }
  0xe6   :  { %v670_v53 = vpop.f32.mrf.mxu0  ;;  %v696_v54 = vpop.f32.mrf.mxu1 }
  0xe7   :  { %v441_v9 = vadd.f32 %v669_v2, %v581_v4  ;;  %v697_v10 = vadd.f32 %v696_v54, %v695_v52 }
  0xe8   :  { %v671_v55 = vpop.f32.mrf.mxu0  ;;  %v698_v56 = vpop.f32.mrf.mxu1 }
  0xe9   :  { %v672_v6 = vadd.f32 %v671_v55, %v670_v53  ;;  %v490_v19 = vadd.f32 %v697_v10, %v441_v9 }
  0xea   :  { %v673_v57 = vpop.f32.mrf.mxu0  ;;  %v699_v58 = vpop.f32.mrf.mxu1 }
  0xeb   :  { %v444_v14 = vadd.f32 %v672_v6, %v581_v4  ;;  %v700_v15 = vadd.f32 %v699_v58, %v698_v56 }
  0xec   :  { %v674_v59 = vpop.f32.mrf.mxu0  ;;  %v701_v60 = vpop.f32.mrf.mxu1 }
  0xed   :  { %v675_v1 = vadd.f32 %v674_v59, %v673_v57  ;;  %v493_v24 = vadd.f32 %v700_v15, %v444_v14 }
  0xee   :  { %v676_v61 = vpop.f32.mrf.mxu0  ;;  %v702_v62 = vpop.f32.mrf.mxu1 }
  0xef   :  { %v449_v7 = vadd.f32 %v675_v1, %v581_v4  ;;  %v703_v8 = vadd.f32 %v702_v62, %v701_v60 }
  0xf0   :  { %v677_v63 = vpop.f32.mrf.mxu0  ;;  %v704_v0 = vpop.f32.mrf.mxu1 }
  0xf1   :  { %v678_v3 = vadd.f32 %v677_v63, %v676_v61  ;;  %v498_v16 = vadd.f32 %v703_v8, %v449_v7 }
  0xf2   :  { %v705_v5 = vpop.f32.mrf.mxu1 }
  0xf3   :  { %v452_v11 = vadd.f32 %v678_v3, %v581_v4  ;;  %v706_v12 = vadd.f32 %v705_v5, %v704_v0 }
  0xf5   :  { %v501_v20 = vadd.f32 %v706_v12, %v452_v11 }
 0x102   :  { %v735_v13 = vpop.f32.mrf.mxu0 }
 0x103   :  { %v547_v18 = vadd.f32 %v735_v13, %v498_v16 }
 0x104   :  { %v538_v17 = vpop.f32.mrf.mxu0 }
 0x105   :  { %v539_v22 = vadd.f32 %v538_v17, %v490_v19  ;;  %v555_v26 = vmax.f32 %v547_v18, 0.0 }
 0x106   :  { %v736_v21 = vpop.f32.mrf.mxu0 }
 0x107   :  { %v550_v23 = vadd.f32 %v736_v21, %v501_v20  ;;  %v553_v29 = vmax.f32 %v539_v22, 0.0 }
 0x108   :  { %v541_v25 = vpop.f32.mrf.mxu0 }
 0x109   :  { %v556_v27 = vmax.f32 %v550_v23, 0.0  ;;  %v542_v28 = vadd.f32 %v541_v25, %v493_v24 }
 0x10b   :  { %v648_v30 = vpack.c.bf16 %v556_v27, %v555_v26  ;;  %v554_v31 = vmax.f32 %v542_v28, 0.0 }
 0x10d   :  { %650 = vst [vmem:[%s973_s3 + $0x8] sm:$0xff] %v648_v30   ;;  %v643_v32 = vpack.c.bf16 %v554_v31, %v553_v29 }
 0x10f   :  { %644 = vst [vmem:[%s973_s3] sm:$0xff] %v643_v32  }

// kernel: resnet18_forward.29
= control target key start
LH: loop header
LB: loop body
LE: loop exit
PB: predicated region body
PF: predicated region fallthrough
CT: control target
= control target key end

     0   :  { %s304_s1 = inlined_call_operand.vmem [shape: bf16[128,128], index: 1, kind: input, shape index: {}]   ;;  %s305_s0 = inlined_call_operand.vmem [shape: bf16[32,128], index: 0, kind: input, shape index: {}]   ;;  %s306_s2 = inlined_call_operand.vmem [shape: f32[1,128], index: 2, kind: input, shape index: {}]   ;;  %s307_s3 = inlined_call_operand.vmem [shape: bf16[32,128], index: 3, kind: output, shape index: {}]  }
   0x1   :  { %v235_v0 = vld [vmem:[%s304_s1 + $0x38] sm:$0xff]   ;;  %v236_v1 = vld [vmem:[%s304_s1 + $0x30] sm:$0xff]   ;;  %v237_v2 = vld [vmem:[%s304_s1 + $0x28] sm:$0xff]  }
   0x2   :  { %215 = vmatprep.subr.bf16.mxu0 %v235_v0  ;;  %v238_v3 = vld [vmem:[%s304_s1 + $0x20] sm:$0xff]   ;;  %v239_v5 = vld [vmem:[%s304_s1 + $0x18] sm:$0xff]   ;;  %v240_v6 = vld [vmem:[%s304_s1 + $0x10] sm:$0xff]  }
   0x3   :  { %216 = vmatpush3.bf16.msra.mxu0 %v235_v0  ;;  %v243_v4 = vld [vmem:[%s305_s0] sm:$0xff]   ;;  %v241_v7 = vld [vmem:[%s304_s1 + $0x8] sm:$0xff]  }
   0x4   :  { %217 = vmatprep.subr.bf16.mxu0 %v236_v1  ;;  %231 = vmatprep.mubr.bf16.mxu0 %v243_v4  ;;  %v242_v8 = vld [vmem:[%s304_s1] sm:$0xff]   ;;  %v244_v9 = vld [vmem:[%s305_s0 + $0x8] sm:$0xff]  }
   0x5   :  { %v175_v11 = vld [vmem:[%s306_s2] ss:$0 sm:$0xff] }
   0x7   :  { %218 = vmatpush3.bf16.msra.mxu0 %v236_v1 }
   0x8   :  { %219 = vmatprep.subr.bf16.mxu0 %v237_v2 }
   0xb   :  { %220 = vmatpush3.bf16.msra.mxu0 %v237_v2 }
   0xc   :  { %221 = vmatprep.subr.bf16.mxu0 %v238_v3 }
   0xf   :  { %222 = vmatpush3.bf16.msra.mxu0 %v238_v3 }
  0x10   :  { %223 = vmatprep.subr.bf16.mxu0 %v239_v5 }
  0x13   :  { %224 = vmatpush3.bf16.msra.mxu0 %v239_v5 }
  0x14   :  { %225 = vmatprep.subr.bf16.mxu0 %v240_v6 }
  0x17   :  { %226 = vmatpush3.bf16.msra.mxu0 %v240_v6 }
  0x18   :  { %227 = vmatprep.subr.bf16.mxu0 %v241_v7 }
  0x1b   :  { %228 = vmatpush3.bf16.msra.mxu0 %v241_v7 }
  0x1c   :  { %229 = vmatprep.subr.bf16.mxu0 %v242_v8 }
  0x1f   :  { %230 = vmatpush3.bf16.msra.mxu0 %v242_v8 }
  0x22   :  { %232 = vmatmul.mubr.bf16.vlgmr.msra.gmra.mxu0 %v244_v9 }
  0xe2   :  { %v233_v10 = vpop.f32.mrf.mxu0 }
  0xe3   :  { %v145_v14 = vadd.f32 %v233_v10, %v175_v11 }
  0xe4   :  { %v136_v12 = vpop.f32.mrf.mxu0 }
  0xe5   :  { %v137_v17 = vadd.f32 %v175_v11, %v136_v12 }
  0xe6   :  { %v234_v13 = vpop.f32.mrf.mxu0 }
  0xe7   :  { %v148_v15 = vadd.f32 %v234_v13, %v175_v11 }
  0xe8   :  { %v139_v16 = vpop.f32.mrf.mxu0 }
  0xe9   :  { %v202_v18 = vpack.c.bf16 %v148_v15, %v145_v14  ;;  %v140_v19 = vadd.f32 %v175_v11, %v139_v16 }
  0xeb   :  { %204 = vst [vmem:[%s307_s3 + $0x8] sm:$0xff] %v202_v18   ;;  %v197_v20 = vpack.c.bf16 %v140_v19, %v137_v17 }
  0xed   :  { %198 = vst [vmem:[%s307_s3] sm:$0xff] %v197_v20  }

// kernel: resnet18_forward.30
= control target key start
LH: loop header
LB: loop body
LE: loop exit
PB: predicated region body
PF: predicated region fallthrough
CT: control target
= control target key end

     0   :  { %s1177_s15 = smov 0   ;;  %s1179_s16 = smov 0   ;;  %s1293_s0 = inlined_call_operand.vmem [shape: bf16[32,1152], index: 0, kind: input, shape index: {}]   ;;  %s1294_s1 = inlined_call_operand.vmem [shape: bf16[1152,128], index: 1, kind: input, shape index: {}]   ;;  %s1295_s2 = inlined_call_operand.vmem [shape: f32[1,128], index: 2, kind: input, shape index: {}]   ;;  %s1296_s3 = inlined_call_operand.vmem [shape: bf16[32,128], index: 3, kind: input, shape index: {}]   ;;  %s1297_s4 = inlined_call_operand.vmem [shape: bf16[32,128], index: 4, kind: output, shape index: {}]  }
   0x1   :  { %s1181_s17 = smov 0   ;;  %s1183_s18 = smov 0  }
   0x2   :  { %s1185_s19 = smov 0  }
   0x3 LB: > { %s26_s20 = sadd.s32 1, %s1145_s18  ;;  %p49_p1 = scmp.ne.s32.totalorder %s1137_s16, %s1133_s15  ;;  %s1149_s19 = sphi %s1185_s19, %s14_s19   ;;  %s1145_s18 = sphi %s1183_s18, %s1301_s18   ;;  %s1141_s17 = sphi %s1181_s17, %s1300_s17   ;;  %s1137_s16 = sphi %s1179_s16, %s1299_s16   ;;  %s1133_s15 = sphi %s1177_s15, %s1298_s15  }
   0x4   : > { %p27_p0 = scmp.ge.s32.totalorder %s26_s20, 3  ;;  %p50_p2 = scmp.eq.s32.totalorder %s1149_s19, 0 }
   0x5   : > { %s42_s22 = sadd.s32 1, %s1137_s16  ;;  %p900_p5 = scmp.ge.s32.totalorder %s1149_s19, 3 }
   0x6   : > { %s1303_s20 = smov (%p27_p0, %s26_s20), 0  ;;  %p51_p3 = por %p50_p2, %p49_p1 }
   0x7   : > { %s38_s21 = ssub.s32 %s1145_s18, %s1303_s20  ;;  %203 = sbr.rel (%p900_p5) target bundleno = 21 (0x15), region = 24 }
   0x8   : > { %p40_p4 = scmp.eq.s32.totalorder %s38_s21, 0 }
   0xa   : > { %s1212_s23 = scalar_select %p40_p4, %s1137_s16, %s42_s22  }
   0xc   : > { %206 = sbr.rel (!%p51_p3) target bundleno = 21 (0x15), region = 28  ;;  %s208_s24 = sand.u32 (%p51_p3), 1, %s1137_s16  }
   0xd   : > { %s953_s25 = smul.u32 (%p51_p3), 12, %s1145_s18 }
   0xe   : > { %s1036_s26 = smul.u32 (%p51_p3), 48, %s208_s24 }
   0xf   : > { %s216_s29 = scalar_lea.vmem (%p51_p3), %s1293_s0, %s953_s25 }
  0x10   : > { %v231_v0 = vld [vmem:[%s216_s29] sm:$0xff] (%p51_p3)  ;;  %v235_v2 = vld [vmem:[%s216_s29 + $0x48] sm:$0xff] (%p51_p3)  ;;  %s210_s30 = scalar_lea.vmem (%p51_p3), [#allocation3], %s1036_s26  ;;  %v906_v6 = vld [vmem:[%s216_s29 + $0x50] sm:$0xf] (%p51_p3) }
  0x11   : > { %v233_v1 = vld [vmem:[%s216_s29 + $0x24] sm:$0xff]  ;;  %232 = vst [vmem:[%s210_s30] sm:$0xff] %v231_v0  ;;  %236 = vst [vmem:[%s210_s30 + $0x18] sm:$0xff] %v235_v2  ;;  %v237_v3 = vld [vmem:[%s216_s29 + $0x6c] sm:$0xff] }
  0x12   : > { %234 = vst [vmem:[%s210_s30 + $0xc] sm:$0xff] %v233_v1  ;;  %v902_v4 = vld [vmem:[%s216_s29 + $0x8] sm:$0xf]  ;;  %v904_v5 = vld [vmem:[%s216_s29 + $0x2c] sm:$0xf]  ;;  %238 = vst [vmem:[%s210_s30 + $0x24] sm:$0xff] %v237_v3 }
  0x13   : > { %903 = vst [vmem:[%s210_s30 + $0x8] sm:$0xf] %v902_v4  ;;  %905 = vst [vmem:[%s210_s30 + $0x14] sm:$0xf] %v904_v5  ;;  %v908_v7 = vld [vmem:[%s216_s29 + $0x74] sm:$0xf] }
  0x14   : > { %907 = vst [vmem:[%s210_s30 + $0x20] sm:$0xf] %v906_v6  ;;  %909 = vst [vmem:[%s210_s30 + $0x2c] sm:$0xf] %v908_v7 }
  0x15 PF: > { %p910_p6 = scmp.ge.s32.totalorder %s1149_s19, 1  ;;  %p271_p7 = scmp.lt.s32.totalorder %s1149_s19, 4 }
  0x17   : > { %p272_p8 = pnand %p910_p6, %p271_p7 }
  0x18   : > { %s278_s5 = sand.u32 (!%p272_p8), 1, %s1133_s15   ;;  %s327_s6 = smul.u32 (!%p272_p8), 48, %s1141_s17 }
  0x19   : > { %275 = sbr.rel (%p272_p8) target bundleno = 301 (0x12d), region = 58  ;;  %p912_p10 = scmp.ne.s32.totalorder (!%p272_p8), %s1141_s17, 0 }
  0x1a   : > { %s1037_s7 = smul.u32 (!%p272_p8), 48, %s278_s5  ;;  %p328_p9 = scmp.lt.s32.totalorder (!%p272_p8), %s327_s6, 143 }
  0x1c   : > { %s1229_s12 = scalar_lea.vmem (!%p272_p8), [#allocation3], %s1037_s7 }
  0x1e   : > { %s1305_s6 = smov (!%p328_p9, %s327_s6), 143  ;;  %361 = sbr.rel (%p912_p10) target bundleno = 38 (0x26), region = 66 }
  0x1f   : > { %s911_s8 = sshll.u32 %s1305_s6, 2 }
  0x20   : > { %s1227_s11 = scalar_lea.vmem %s1294_s1, %s911_s8 }
  0x23   : > { %v1151_v8 = vmov 0.0  }
  0x24   : > { %362 = vst [vmem:[#allocation2 + $0x10] sm:$0xff] %v1151_v8  ;;  %363 = vst [vmem:[#allocation2] sm:$0xff] %v1151_v8 }
  0x25   : > { %364 = vst [vmem:[#allocation2 + $0x18] sm:$0xff] %v1151_v8  ;;  %365 = vst [vmem:[#allocation2 + $0x8] sm:$0xff] %v1151_v8 }
  0x26 PF: > { %v1079_v9 = vld [vmem:[%s1227_s11 + $0x78] sm:$0xff]   ;;  %v1082_v12 = vld [vmem:[%s1227_s11 + $0x70] sm:$0xff]   ;;  %v1085_v15 = vld [vmem:[%s1227_s11 + $0x68] sm:$0xff]   ;;  %p943_p11 = scmp.ne.s32.totalorder %s1141_s17, 2 }
  0x27   : > { %v1080_v10 = vld [vmem:[%s1227_s11 + $0x38] sm:$0xff]   ;;  %978 = vmatprep.subr.bf16.mxu0 %v1079_v9  ;;  %v1083_v13 = vld [vmem:[%s1227_s11 + $0x30] sm:$0xff]   ;;  %v1086_v16 = vld [vmem:[%s1227_s11 + $0x28] sm:$0xff]  }
  0x28   : > { %v1081_v11 = vld [vmem:[%s1227_s11 + $0xb8] sm:$0xff]   ;;  %979 = vmatpush3.bf16.msra.mxu0 %v1080_v10  ;;  %v1084_v14 = vld [vmem:[%s1227_s11 + $0xb0] sm:$0xff]   ;;  %v1087_v17 = vld [vmem:[%s1227_s11 + $0xa8] sm:$0xff]  }
  0x29   : > { %1016 = vmatprep.subr.bf16.mxu1 %v1081_v11  ;;  %980 = vmatprep.subr.bf16.mxu0 %v1082_v12  ;;  %v1088_v18 = vld [vmem:[%s1227_s11 + $0x60] sm:$0xff]   ;;  %v1091_v21 = vld [vmem:[%s1227_s11 + $0x58] sm:$0xff]   ;;  %v1094_v24 = vld [vmem:[%s1227_s11 + $0x50] sm:$0xff]  }
  0x2a   : > { %1017 = vmatpush3.bf16.msra.mxu1 %v1081_v11  ;;  %v1089_v19 = vld [vmem:[%s1227_s11 + $0x20] sm:$0xff]   ;;  %v1093_v22 = vld [vmem:[%s1227_s11 + $0x98] sm:$0xff]   ;;  %v1096_v25 = vld [vmem:[%s1227_s11 + $0x90] sm:$0xff]  }
  0x2b   : > { %1018 = vmatprep.subr.bf16.mxu1 %v1084_v14  ;;  %v1090_v20 = vld [vmem:[%s1227_s11 + $0xa0] sm:$0xff]   ;;  %v1092_v23 = vld [vmem:[%s1227_s11 + $0x18] sm:$0xff]   ;;  %v1095_v26 = vld [vmem:[%s1227_s11 + $0x10] sm:$0xff]  }
  0x2c   : > { %981 = vmatpush3.bf16.msra.mxu0 %v1083_v13  ;;  %v1097_v27 = vld [vmem:[%s1227_s11 + $0x48] sm:$0xff]   ;;  %v1100_v30 = vld [vmem:[%s1227_s11 + $0x40] sm:$0xff]   ;;  %v366_v44 = vld [vmem:[#allocation2 + $0x10] sm:$0xff] }
  0x2d   : > { %982 = vmatprep.subr.bf16.mxu0 %v1085_v15  ;;  %v1098_v28 = vld [vmem:[%s1227_s11 + $0x8] sm:$0xff]   ;;  %v1102_v31 = vld [vmem:[%s1227_s11 + $0x80] sm:$0xff]   ;;  %v368_v58 = vld [vmem:[#allocation2 + $0x18] sm:$0xff] }
  0x2e   : > { %1019 = vmatpush3.bf16.msra.mxu1 %v1084_v14  ;;  %v1099_v29 = vld [vmem:[%s1227_s11 + $0x88] sm:$0xff]   ;;  %v1105_v32 = vld [vmem:[%s1229_s12 + $0x4] ss:$12 sps:$4 sm:$0xff]  }
  0x2f   : > { %1020 = vmatprep.subr.bf16.mxu1 %v1087_v17  ;;  %v1106_v33 = vld [vmem:[%s1229_s12 + $0x8] ss:$12 sps:$4 sm:$0xff]   ;;  %634 = vmatprep.mubr.bf16.mxu0 %v1105_v32  ;;  %v1103_v35 = vld [vmem:[%s1229_s12] ss:$12 sps:$4 sm:$0xff]   ;;  %v1110_v38 = vld [vmem:[%s1229_s12 + $0x18] ss:$12 sps:$4 sm:$0xff]  }
  0x30   : > { %983 = vmatpush3.bf16.msra.mxu0 %v1086_v16  ;;  %v1101_v34 = vld [vmem:[%s1227_s11] sm:$0xff]   ;;  %1032 = vmatprep.mubr.bf16.mxu1 %v1106_v33  ;;  %v1108_v36 = vld [vmem:[%s1229_s12 + $0x1c] ss:$12 sps:$4 sm:$0xff]  }
  0x31   : > { %984 = vmatprep.subr.bf16.mxu0 %v1088_v18  ;;  %v1107_v37 = vld [vmem:[%s1229_s12 + $0x20] ss:$12 sps:$4 sm:$0xff]  }
  0x32   : > { %1021 = vmatpush3.bf16.msra.mxu1 %v1087_v17  ;;  %v367_v52 = vld [vmem:[#allocation2] sm:$0xff]  ;;  %v369_v0 = vld [vmem:[#allocation2 + $0x8] sm:$0xff] }
  0x33   : > { %1022 = vmatprep.subr.bf16.mxu1 %v1090_v20 }
  0x34   : > { %985 = vmatpush3.bf16.msra.mxu0 %v1089_v19 }
  0x35   : > { %986 = vmatprep.subr.bf16.mxu0 %v1091_v21 }
  0x36   : > { %1023 = vmatpush3.bf16.msra.mxu1 %v1090_v20 }
  0x37   : > { %1024 = vmatprep.subr.bf16.mxu1 %v1093_v22 }
  0x38   : > { %987 = vmatpush3.bf16.msra.mxu0 %v1092_v23 }
  0x39   : > { %988 = vmatprep.subr.bf16.mxu0 %v1094_v24 }
  0x3a   : > { %1025 = vmatpush3.bf16.msra.mxu1 %v1093_v22 }
  0x3b   : > { %1026 = vmatprep.subr.bf16.mxu1 %v1096_v25 }
  0x3c   : > { %989 = vmatpush3.bf16.msra.mxu0 %v1095_v26 }
  0x3d   : > { %990 = vmatprep.subr.bf16.mxu0 %v1097_v27 }
  0x3e   : > { %1027 = vmatpush3.bf16.msra.mxu1 %v1096_v25 }
  0x3f   : > { %1028 = vmatprep.subr.bf16.mxu1 %v1099_v29 }
  0x40   : > { %991 = vmatpush3.bf16.msra.mxu0 %v1098_v28 }
  0x41   : > { %992 = vmatprep.subr.bf16.mxu0 %v1100_v30 }
  0x42   : > { %1029 = vmatpush3.bf16.msra.mxu1 %v1099_v29 }
  0x43   : > { %1030 = vmatprep.subr.bf16.mxu1 %v1102_v31 }
  0x44   : > { %993 = vmatpush3.bf16.msra.mxu0 %v1101_v34 }
  0x46   : > { %1031 = vmatpush3.bf16.msra.mxu1 %v1102_v31 }
  0x47   : > { %635 = vmatmul.mubr.bf16.vlgmr.msra.gmra.mxu0 %v1103_v35 }
  0x48   : > { %642 = vmatprep.mubr.bf16.mxu0 %v1108_v36 }
  0x49   : > { %1033 = vmatmul.mubr.bf16.vlgmr.msra.gmra.mxu1 %v1107_v37 }
  0x4f   : > { %643 = vmatmul.mubr.bf16.gmra.mxu0 %v1110_v38 }
 0x107   : > { %v994_v39 = vpop.f32.mrf.mxu0 }
 0x109   : > { %v995_v40 = vpop.f32.mrf.mxu0  ;;  %v1034_v41 = vpop.f32.mrf.mxu1 }
 0x10a   : > { %v996_v42 = vadd.f32 %v995_v40, %v994_v39 }
 0x10b   : > { %v997_v43 = vpop.f32.mrf.mxu0  ;;  %v685_v45 = vpop.f32.mrf.mxu1 }
 0x10c   : > { %v686_v46 = vadd.f32 %v996_v42, %v685_v45 }
 0x10d   : > { %v998_v47 = vpop.f32.mrf.mxu0  ;;  %v1035_v48 = vpop.f32.mrf.mxu1 }
 0x10e   : > { %v700_v49 = vadd.f32 %v686_v46, %v366_v44  ;;  %v999_v50 = vadd.f32 %v998_v47, %v997_v43 }
 0x10f   : > { %v1000_v51 = vpop.f32.mrf.mxu0  ;;  %v688_v53 = vpop.f32.mrf.mxu1 }
 0x110   : > { %704 = vst [vmem:[#allocation2 + $0x10] sm:$0xff] %v700_v49  ;;  %v689_v54 = vadd.f32 %v999_v50, %v688_v53 }
 0x111   : > { %v1001_v55 = vpop.f32.mrf.mxu0 }
 0x112   : > { %v701_v56 = vadd.f32 %v689_v54, %v367_v52  ;;  %v1002_v57 = vadd.f32 %v1001_v55, %v1000_v51 }
 0x113   : > { %v1003_v59 = vpop.f32.mrf.mxu0 }
 0x114   : > { %705 = vst [vmem:[#allocation2] sm:$0xff] %v701_v56  ;;  %v694_v60 = vadd.f32 %v1034_v41, %v1002_v57 }
 0x115   : > { %v1004_v61 = vpop.f32.mrf.mxu0 }
 0x116   : > { %v702_v62 = vadd.f32 %v694_v60, %v368_v58  ;;  %v1005_v63 = vadd.f32 %v1004_v61, %v1003_v59 }
 0x118   : > { %706 = vst [vmem:[#allocation2 + $0x18] sm:$0xff] %v702_v62  ;;  %v697_v1 = vadd.f32 %v1035_v48, %v1005_v63  ;;  %711 = sbr.rel (%p943_p11) target bundleno = 301 (0x12d), region = 70 }
 0x11a   : > { %v703_v2 = vadd.f32 %v697_v1, %v369_v0 }
 0x11c   : > { %707 = vst [vmem:[#allocation2 + $0x8] sm:$0xff] %v703_v2 }
 0x11d   : > { %v712_v3 = vld [vmem:[#allocation2 + $0x10] sm:$0xff]  ;;  %v713_v4 = vld [vmem:[#allocation2] sm:$0xff]  ;;  %v976_v15 = vld [vmem:[%s1296_s3 + $0x8] sm:$0xff]  }
 0x11e   : > { %v944_v5 = vld [vmem:[%s1295_s2] ss:$0 sm:$0xff]  ;;  %v964_v16 = vunpack.c.l.bf16 %v976_v15  ;;  %v965_v17 = vunpack.c.h.bf16 %v976_v15 }
 0x11f   : > { %v723_v6 = vadd.f32 %v944_v5, %v712_v3  ;;  %v724_v7 = vadd.f32 %v944_v5, %v713_v4  ;;  %v959_v8 = vld [vmem:[%s1296_s3] sm:$0xff]   ;;  %v714_v9 = vld [vmem:[#allocation2 + $0x18] sm:$0xff] }
 0x120   : > { %v960_v11 = vunpack.c.l.bf16 %v959_v8  ;;  %v961_v12 = vunpack.c.h.bf16 %v959_v8  ;;  %v725_v13 = vadd.f32 %v944_v5, %v714_v9 }
 0x122   : > { %v735_v18 = vadd.f32 %v960_v11, %v723_v6  ;;  %v736_v19 = vadd.f32 %v961_v12, %v724_v7  ;;  %v737_v20 = vadd.f32 %v964_v16, %v725_v13 }
 0x123   : > { %v715_v10 = vld [vmem:[#allocation2 + $0x8] sm:$0xff] }
 0x124   : > { %v726_v14 = vadd.f32 %v944_v5, %v715_v10  ;;  %v739_v22 = vmax.f32 %v735_v18, 0.0  ;;  %v740_v23 = vmax.f32 %v736_v19, 0.0  ;;  %v741_v24 = vmax.f32 %v737_v20, 0.0 }
 0x126   : > { %v738_v21 = vadd.f32 %v965_v17, %v726_v14  ;;  %v969_v26 = vpack.c.bf16 %v740_v23, %v739_v22 }
 0x128   : > { %v742_v25 = vmax.f32 %v738_v21, 0.0  ;;  %970 = vst [vmem:[%s1297_s4] sm:$0xff] %v969_v26  }
 0x12a   : > { %v974_v27 = vpack.c.bf16 %v742_v25, %v741_v24 }
 0x12c   : > { %977 = vst [vmem:[%s1297_s4 + $0x8] sm:$0xff] %v974_v27  }
 0x12d PF: > { %s14_s19 = sadd.s32 1, %s1149_s19   ;;  %s1298_s15 = smov %s1137_s16 }
 0x12e   : > { %p11_p12 = scmp.ge.s32.totalorder %s14_s19, 5   ;;  %s1299_s16 = smov %s1212_s23 }
 0x12f   : > { %s1300_s17 = smov %s1145_s18  ;;  %s1301_s18 = smov %s1303_s20 }
 0x130   :  { %13 = sbr.rel (!%p11_p12) target bundleno = 3 (0x3), region = 120 }

// kernel: resnet18_forward.31
= control target key start
LH: loop header
LB: loop body
LE: loop exit
PB: predicated region body
PF: predicated region fallthrough
CT: control target
= control target key end

     0   :  { %s1072_s12 = smov 0   ;;  %s1074_s13 = smov 0   ;;  %s1182_s0 = inlined_call_operand.vmem [shape: bf16[32,1152], index: 0, kind: input, shape index: {}]   ;;  %s1183_s1 = inlined_call_operand.vmem [shape: bf16[1152,128], index: 1, kind: input, shape index: {}]   ;;  %s1184_s2 = inlined_call_operand.vmem [shape: f32[1,128], index: 2, kind: input, shape index: {}]   ;;  %s1185_s3 = inlined_call_operand.vmem [shape: bf16[32,128], index: 3, kind: output, shape index: {}]  }
   0x1   :  { %s1076_s14 = smov 0   ;;  %s1078_s15 = smov 0  }
   0x2   :  { %s1080_s16 = smov 0  }
   0x3 LB: > { %s25_s17 = sadd.s32 1, %s1045_s15  ;;  %p48_p1 = scmp.ne.s32.totalorder %s1037_s13, %s1033_s12  ;;  %s1049_s16 = sphi %s1080_s16, %s13_s16   ;;  %s1045_s15 = sphi %s1078_s15, %s1189_s15   ;;  %s1041_s14 = sphi %s1076_s14, %s1188_s14   ;;  %s1037_s13 = sphi %s1074_s13, %s1187_s13   ;;  %s1033_s12 = sphi %s1072_s12, %s1186_s12  }
   0x4   : > { %p26_p0 = scmp.ge.s32.totalorder %s25_s17, 3  ;;  %p49_p2 = scmp.eq.s32.totalorder %s1049_s16, 0 }
   0x5   : > { %s41_s19 = sadd.s32 1, %s1037_s13  ;;  %p809_p5 = scmp.ge.s32.totalorder %s1049_s16, 3 }
   0x6   : > { %s1191_s17 = smov (%p26_p0, %s25_s17), 0  ;;  %p50_p3 = por %p49_p2, %p48_p1 }
   0x7   : > { %s37_s18 = ssub.s32 %s1045_s15, %s1191_s17  ;;  %162 = sbr.rel (%p809_p5) target bundleno = 21 (0x15), region = 20 }
   0x8   : > { %p39_p4 = scmp.eq.s32.totalorder %s37_s18, 0 }
   0xa   : > { %s1107_s20 = scalar_select %p39_p4, %s1037_s13, %s41_s19  }
   0xc   : > { %165 = sbr.rel (!%p50_p3) target bundleno = 21 (0x15), region = 24  ;;  %s167_s21 = sand.u32 (%p50_p3), 1, %s1037_s13  }
   0xd   : > { %s862_s22 = smul.u32 (%p50_p3), 12, %s1045_s15 }
   0xe   : > { %s936_s23 = smul.u32 (%p50_p3), 48, %s167_s21 }
   0xf   : > { %s175_s26 = scalar_lea.vmem (%p50_p3), %s1182_s0, %s862_s22 }
  0x10   : > { %v190_v0 = vld [vmem:[%s175_s26] sm:$0xff] (%p50_p3)  ;;  %v194_v2 = vld [vmem:[%s175_s26 + $0x48] sm:$0xff] (%p50_p3)  ;;  %s169_s27 = scalar_lea.vmem (%p50_p3), [#allocation3], %s936_s23  ;;  %v815_v6 = vld [vmem:[%s175_s26 + $0x50] sm:$0xf] (%p50_p3) }
  0x11   : > { %v192_v1 = vld [vmem:[%s175_s26 + $0x24] sm:$0xff]  ;;  %191 = vst [vmem:[%s169_s27] sm:$0xff] %v190_v0  ;;  %195 = vst [vmem:[%s169_s27 + $0x18] sm:$0xff] %v194_v2  ;;  %v196_v3 = vld [vmem:[%s175_s26 + $0x6c] sm:$0xff] }
  0x12   : > { %193 = vst [vmem:[%s169_s27 + $0xc] sm:$0xff] %v192_v1  ;;  %v811_v4 = vld [vmem:[%s175_s26 + $0x8] sm:$0xf]  ;;  %v813_v5 = vld [vmem:[%s175_s26 + $0x2c] sm:$0xf]  ;;  %197 = vst [vmem:[%s169_s27 + $0x24] sm:$0xff] %v196_v3 }
  0x13   : > { %812 = vst [vmem:[%s169_s27 + $0x8] sm:$0xf] %v811_v4  ;;  %814 = vst [vmem:[%s169_s27 + $0x14] sm:$0xf] %v813_v5  ;;  %v817_v7 = vld [vmem:[%s175_s26 + $0x74] sm:$0xf] }
  0x14   : > { %816 = vst [vmem:[%s169_s27 + $0x20] sm:$0xf] %v815_v6  ;;  %818 = vst [vmem:[%s169_s27 + $0x2c] sm:$0xf] %v817_v7 }
  0x15 PF: > { %p819_p6 = scmp.ge.s32.totalorder %s1049_s16, 1  ;;  %p230_p7 = scmp.lt.s32.totalorder %s1049_s16, 4 }
  0x17   : > { %p231_p8 = pnand %p819_p6, %p230_p7 }
  0x18   : > { %s237_s28 = sand.u32 (!%p231_p8), 1, %s1033_s12   ;;  %s276_s29 = smul.u32 (!%p231_p8), 48, %s1041_s14 }
  0x19   : > { %234 = sbr.rel (%p231_p8) target bundleno = 299 (0x12b), region = 54  ;;  %p821_p10 = scmp.ne.s32.totalorder (!%p231_p8), %s1041_s14, 0 }
  0x1a   : > { %s937_s30 = smul.u32 (!%p231_p8), 48, %s237_s28  ;;  %p277_p9 = scmp.lt.s32.totalorder (!%p231_p8), %s276_s29, 143 }
  0x1c   : > { %s1124_s8 = scalar_lea.vmem (!%p231_p8), [#allocation3], %s937_s30 }
  0x1e   : > { %s1193_s29 = smov (!%p277_p9, %s276_s29), 143  ;;  %301 = sbr.rel (%p821_p10) target bundleno = 38 (0x26), region = 62 }
  0x1f   : > { %s820_s4 = sshll.u32 %s1193_s29, 2 }
  0x20   : > { %s1122_s7 = scalar_lea.vmem %s1183_s1, %s820_s4 }
  0x23   : > { %v1051_v8 = vmov 0.0  }
  0x24   : > { %302 = vst [vmem:[#allocation2 + $0x10] sm:$0xff] %v1051_v8  ;;  %303 = vst [vmem:[#allocation2] sm:$0xff] %v1051_v8 }
  0x25   : > { %304 = vst [vmem:[#allocation2 + $0x18] sm:$0xff] %v1051_v8  ;;  %305 = vst [vmem:[#allocation2 + $0x8] sm:$0xff] %v1051_v8 }
  0x26 PF: > { %v979_v9 = vld [vmem:[%s1122_s7 + $0x78] sm:$0xff]   ;;  %v982_v12 = vld [vmem:[%s1122_s7 + $0x70] sm:$0xff]   ;;  %v985_v15 = vld [vmem:[%s1122_s7 + $0x68] sm:$0xff]   ;;  %p852_p11 = scmp.ne.s32.totalorder %s1041_s14, 2 }
  0x27   : > { %v980_v10 = vld [vmem:[%s1122_s7 + $0x38] sm:$0xff]   ;;  %878 = vmatprep.subr.bf16.mxu0 %v979_v9  ;;  %v983_v13 = vld [vmem:[%s1122_s7 + $0x30] sm:$0xff]   ;;  %v986_v16 = vld [vmem:[%s1122_s7 + $0x28] sm:$0xff]  }
  0x28   : > { %v981_v11 = vld [vmem:[%s1122_s7 + $0xb8] sm:$0xff]   ;;  %879 = vmatpush3.bf16.msra.mxu0 %v980_v10  ;;  %v984_v14 = vld [vmem:[%s1122_s7 + $0xb0] sm:$0xff]   ;;  %v987_v17 = vld [vmem:[%s1122_s7 + $0xa8] sm:$0xff]  }
  0x29   : > { %916 = vmatprep.subr.bf16.mxu1 %v981_v11  ;;  %880 = vmatprep.subr.bf16.mxu0 %v982_v12  ;;  %v988_v18 = vld [vmem:[%s1122_s7 + $0x60] sm:$0xff]   ;;  %v991_v21 = vld [vmem:[%s1122_s7 + $0x58] sm:$0xff]   ;;  %v994_v24 = vld [vmem:[%s1122_s7 + $0x50] sm:$0xff]  }
  0x2a   : > { %917 = vmatpush3.bf16.msra.mxu1 %v981_v11  ;;  %v989_v19 = vld [vmem:[%s1122_s7 + $0x20] sm:$0xff]   ;;  %v993_v22 = vld [vmem:[%s1122_s7 + $0x98] sm:$0xff]   ;;  %v996_v25 = vld [vmem:[%s1122_s7 + $0x90] sm:$0xff]  }
  0x2b   : > { %918 = vmatprep.subr.bf16.mxu1 %v984_v14  ;;  %v990_v20 = vld [vmem:[%s1122_s7 + $0xa0] sm:$0xff]   ;;  %v992_v23 = vld [vmem:[%s1122_s7 + $0x18] sm:$0xff]   ;;  %v995_v26 = vld [vmem:[%s1122_s7 + $0x10] sm:$0xff]  }
  0x2c   : > { %881 = vmatpush3.bf16.msra.mxu0 %v983_v13  ;;  %v997_v27 = vld [vmem:[%s1122_s7 + $0x48] sm:$0xff]   ;;  %v1000_v30 = vld [vmem:[%s1122_s7 + $0x40] sm:$0xff]   ;;  %v306_v44 = vld [vmem:[#allocation2 + $0x10] sm:$0xff] }
  0x2d   : > { %882 = vmatprep.subr.bf16.mxu0 %v985_v15  ;;  %v998_v28 = vld [vmem:[%s1122_s7 + $0x8] sm:$0xff]   ;;  %v1002_v31 = vld [vmem:[%s1122_s7 + $0x80] sm:$0xff]   ;;  %v308_v58 = vld [vmem:[#allocation2 + $0x18] sm:$0xff] }
  0x2e   : > { %919 = vmatpush3.bf16.msra.mxu1 %v984_v14  ;;  %v999_v29 = vld [vmem:[%s1122_s7 + $0x88] sm:$0xff]   ;;  %v1005_v32 = vld [vmem:[%s1124_s8 + $0x4] ss:$12 sps:$4 sm:$0xff]  }
  0x2f   : > { %920 = vmatprep.subr.bf16.mxu1 %v987_v17  ;;  %v1006_v33 = vld [vmem:[%s1124_s8 + $0x8] ss:$12 sps:$4 sm:$0xff]   ;;  %574 = vmatprep.mubr.bf16.mxu0 %v1005_v32  ;;  %v1003_v35 = vld [vmem:[%s1124_s8] ss:$12 sps:$4 sm:$0xff]   ;;  %v1010_v38 = vld [vmem:[%s1124_s8 + $0x18] ss:$12 sps:$4 sm:$0xff]  }
  0x30   : > { %883 = vmatpush3.bf16.msra.mxu0 %v986_v16  ;;  %v1001_v34 = vld [vmem:[%s1122_s7] sm:$0xff]   ;;  %932 = vmatprep.mubr.bf16.mxu1 %v1006_v33  ;;  %v1008_v36 = vld [vmem:[%s1124_s8 + $0x1c] ss:$12 sps:$4 sm:$0xff]  }
  0x31   : > { %884 = vmatprep.subr.bf16.mxu0 %v988_v18  ;;  %v1007_v37 = vld [vmem:[%s1124_s8 + $0x20] ss:$12 sps:$4 sm:$0xff]  }
  0x32   : > { %921 = vmatpush3.bf16.msra.mxu1 %v987_v17  ;;  %v307_v52 = vld [vmem:[#allocation2] sm:$0xff]  ;;  %v309_v0 = vld [vmem:[#allocation2 + $0x8] sm:$0xff] }
  0x33   : > { %922 = vmatprep.subr.bf16.mxu1 %v990_v20 }
  0x34   : > { %885 = vmatpush3.bf16.msra.mxu0 %v989_v19 }
  0x35   : > { %886 = vmatprep.subr.bf16.mxu0 %v991_v21 }
  0x36   : > { %923 = vmatpush3.bf16.msra.mxu1 %v990_v20 }
  0x37   : > { %924 = vmatprep.subr.bf16.mxu1 %v993_v22 }
  0x38   : > { %887 = vmatpush3.bf16.msra.mxu0 %v992_v23 }
  0x39   : > { %888 = vmatprep.subr.bf16.mxu0 %v994_v24 }
  0x3a   : > { %925 = vmatpush3.bf16.msra.mxu1 %v993_v22 }
  0x3b   : > { %926 = vmatprep.subr.bf16.mxu1 %v996_v25 }
  0x3c   : > { %889 = vmatpush3.bf16.msra.mxu0 %v995_v26 }
  0x3d   : > { %890 = vmatprep.subr.bf16.mxu0 %v997_v27 }
  0x3e   : > { %927 = vmatpush3.bf16.msra.mxu1 %v996_v25 }
  0x3f   : > { %928 = vmatprep.subr.bf16.mxu1 %v999_v29 }
  0x40   : > { %891 = vmatpush3.bf16.msra.mxu0 %v998_v28 }
  0x41   : > { %892 = vmatprep.subr.bf16.mxu0 %v1000_v30 }
  0x42   : > { %929 = vmatpush3.bf16.msra.mxu1 %v999_v29 }
  0x43   : > { %930 = vmatprep.subr.bf16.mxu1 %v1002_v31 }
  0x44   : > { %893 = vmatpush3.bf16.msra.mxu0 %v1001_v34 }
  0x46   : > { %931 = vmatpush3.bf16.msra.mxu1 %v1002_v31 }
  0x47   : > { %575 = vmatmul.mubr.bf16.vlgmr.msra.gmra.mxu0 %v1003_v35 }
  0x48   : > { %582 = vmatprep.mubr.bf16.mxu0 %v1008_v36 }
  0x49   : > { %933 = vmatmul.mubr.bf16.vlgmr.msra.gmra.mxu1 %v1007_v37 }
  0x4f   : > { %583 = vmatmul.mubr.bf16.gmra.mxu0 %v1010_v38 }
 0x107   : > { %v894_v39 = vpop.f32.mrf.mxu0 }
 0x109   : > { %v895_v40 = vpop.f32.mrf.mxu0  ;;  %v934_v41 = vpop.f32.mrf.mxu1 }
 0x10a   : > { %v896_v42 = vadd.f32 %v895_v40, %v894_v39 }
 0x10b   : > { %v897_v43 = vpop.f32.mrf.mxu0  ;;  %v625_v45 = vpop.f32.mrf.mxu1 }
 0x10c   : > { %v626_v46 = vadd.f32 %v896_v42, %v625_v45 }
 0x10d   : > { %v898_v47 = vpop.f32.mrf.mxu0  ;;  %v935_v48 = vpop.f32.mrf.mxu1 }
 0x10e   : > { %v640_v49 = vadd.f32 %v626_v46, %v306_v44  ;;  %v899_v50 = vadd.f32 %v898_v47, %v897_v43 }
 0x10f   : > { %v900_v51 = vpop.f32.mrf.mxu0  ;;  %v628_v53 = vpop.f32.mrf.mxu1 }
 0x110   : > { %644 = vst [vmem:[#allocation2 + $0x10] sm:$0xff] %v640_v49  ;;  %v629_v54 = vadd.f32 %v899_v50, %v628_v53 }
 0x111   : > { %v901_v55 = vpop.f32.mrf.mxu0 }
 0x112   : > { %v641_v56 = vadd.f32 %v629_v54, %v307_v52  ;;  %v902_v57 = vadd.f32 %v901_v55, %v900_v51 }
 0x113   : > { %v903_v59 = vpop.f32.mrf.mxu0 }
 0x114   : > { %645 = vst [vmem:[#allocation2] sm:$0xff] %v641_v56  ;;  %v634_v60 = vadd.f32 %v934_v41, %v902_v57 }
 0x115   : > { %v904_v61 = vpop.f32.mrf.mxu0 }
 0x116   : > { %v642_v62 = vadd.f32 %v634_v60, %v308_v58  ;;  %v905_v63 = vadd.f32 %v904_v61, %v903_v59 }
 0x118   : > { %646 = vst [vmem:[#allocation2 + $0x18] sm:$0xff] %v642_v62  ;;  %v637_v1 = vadd.f32 %v935_v48, %v905_v63  ;;  %651 = sbr.rel (%p852_p11) target bundleno = 299 (0x12b), region = 66 }
 0x11a   : > { %v643_v2 = vadd.f32 %v637_v1, %v309_v0 }
 0x11c   : > { %647 = vst [vmem:[#allocation2 + $0x8] sm:$0xff] %v643_v2 }
 0x11d   : > { %v652_v3 = vld [vmem:[#allocation2 + $0x10] sm:$0xff]  ;;  %v653_v4 = vld [vmem:[#allocation2] sm:$0xff] }
 0x11e   : > { %v853_v5 = vld [vmem:[%s1184_s2] ss:$0 sm:$0xff] }
 0x11f   : > { %v663_v6 = vadd.f32 %v853_v5, %v652_v3  ;;  %v664_v7 = vadd.f32 %v853_v5, %v653_v4  ;;  %v654_v8 = vld [vmem:[#allocation2 + $0x18] sm:$0xff] }
 0x120   : > { %v665_v10 = vadd.f32 %v853_v5, %v654_v8 }
 0x121   : > { %v667_v12 = vmax.f32 %v663_v6, 0.0  ;;  %v668_v13 = vmax.f32 %v664_v7, 0.0 }
 0x122   : > { %v669_v14 = vmax.f32 %v665_v10, 0.0 }
 0x123   : > { %v655_v9 = vld [vmem:[#allocation2 + $0x8] sm:$0xff]  ;;  %v870_v16 = vpack.c.bf16 %v668_v13, %v667_v12 }
 0x124   : > { %v666_v11 = vadd.f32 %v853_v5, %v655_v9 }
 0x125   : > { %871 = vst [vmem:[%s1185_s3] sm:$0xff] %v870_v16  }
 0x126   : > { %v670_v15 = vmax.f32 %v666_v11, 0.0 }
 0x128   : > { %v875_v17 = vpack.c.bf16 %v670_v15, %v669_v14 }
 0x12a   : > { %877 = vst [vmem:[%s1185_s3 + $0x8] sm:$0xff] %v875_v17  }
 0x12b PF: > { %s13_s16 = sadd.s32 1, %s1049_s16   ;;  %s1186_s12 = smov %s1037_s13 }
 0x12c   : > { %p10_p12 = scmp.ge.s32.totalorder %s13_s16, 5   ;;  %s1187_s13 = smov %s1107_s20 }
 0x12d   : > { %s1188_s14 = smov %s1045_s15  ;;  %s1189_s15 = smov %s1191_s17 }
 0x12e   :  { %12 = sbr.rel (!%p10_p12) target bundleno = 3 (0x3), region = 113 }

// kernel: resnet18_forward.33
= control target key start
LH: loop header
LB: loop body
LE: loop exit
PB: predicated region body
PF: predicated region fallthrough
CT: control target
= control target key end

     0   :  { %s1036_s12 = smov 0   ;;  %s1038_s13 = smov 0   ;;  %s1135_s0 = inlined_call_operand.vmem [shape: bf16[8,1152], index: 0, kind: input, shape index: {}]   ;;  %s1136_s1 = inlined_call_operand.vmem [shape: bf16[1152,256], index: 1, kind: input, shape index: {}]   ;;  %s1137_s2 = inlined_call_operand.vmem [shape: f32[1,256], index: 2, kind: input, shape index: {}]   ;;  %s1138_s3 = inlined_call_operand.vmem [shape: bf16[8,256], index: 3, kind: output, shape index: {}]  }
   0x1   :  { %s1040_s14 = smov 0  }
   0x2 LB: > { %s25_s15 = sadd.s32 1, %s1008_s13  ;;  %p825_p0 = scmp.ge.s32.totalorder %s1012_s14, 1  ;;  %s1012_s14 = sphi %s1040_s14, %s13_s14   ;;  %s1008_s13 = sphi %s1038_s13, %s1140_s13   ;;  %s1004_s12 = sphi %s1036_s12, %s1139_s12  }
   0x3   : > { %p26_p1 = scmp.ge.s32.totalorder %s25_s15, 3  ;;  %p194_p2 = scmp.lt.s32.totalorder %s1012_s14, 4 }
   0x5   : > { %s1142_s15 = smov (%p26_p1, %s25_s15), 0  ;;  %p195_p3 = pnand %p825_p0, %p194_p2 }
   0x6   : > { %s240_s16 = smul.u32 (!%p195_p3), 3, %s1004_s12  ;;  %p829_p6 = scmp.ne.s32.totalorder (!%p195_p3), %s1004_s12, 0 }
   0x7   : > { %198 = sbr.rel (%p195_p3) target bundleno = 302 (0x12e), region = 32 }
   0x8   : > { %s250_s17 = smul.u32 (!%p195_p3), 48, %s1004_s12  ;;  %p243_p4 = scmp.lt.s32.totalorder (!%p195_p3), %s240_s16, 8 }
   0xa   : > { %p252_p5 = scmp.lt.s32.totalorder (!%p195_p3), %s250_s17, 143 }
   0xc   : > { %s1144_s16 = smov (!%p243_p4, %s240_s16), 8  ;;  %s1146_s17 = smov (!%p252_p5, %s250_s17), 143 }
   0xd   : > { %s826_s18 = sshll.u32 %s1144_s16, 2  ;;  %s887_s22 = sshll.u32 %s1146_s17, 3 }
   0xe   : > { %s1061_s21 = scalar_lea.vmem %s1135_s0, %s826_s18  ;;  %s1066_s25 = scalar_lea.vmem %s1136_s1, %s887_s22 }
   0xf   : > { %281 = sbr.rel (%p829_p6) target bundleno = 22 (0x16), region = 36 }
  0x14   : > { %v1014_v0 = vmov 0.0  }
  0x15   : > { %282 = vst [vmem:[#allocation2] sm:$0xff] %v1014_v0  ;;  %283 = vst [vmem:[#allocation2 + $0x8] sm:$0xff] %v1014_v0 }
  0x16 PF: > { %v915_v1 = vld [vmem:[%s1066_s25 + $0x74] ss:$8 sps:$4 sm:$0xff]   ;;  %v917_v2 = vld [vmem:[%s1066_s25 + $0x70] ss:$8 sps:$4 sm:$0xff]   ;;  %v1015_v3 = vmov 0   ;;  %v286_v34 = vld [vmem:[%s1061_s21] sm:$0xff] }
  0x17   : > { %660 = vmatprep.mubr.bf16.mxu1 %v1015_v3  ;;  %587 = vmatprep.subr.bf16.mxu0 %v915_v1  ;;  %v918_v4 = vld [vmem:[%s1066_s25 + $0x64] ss:$8 sps:$4 sm:$0xff]   ;;  %v920_v5 = vld [vmem:[%s1066_s25 + $0x60] ss:$8 sps:$4 sm:$0xff]   ;;  %v921_v6 = vld [vmem:[%s1066_s25 + $0x54] ss:$8 sps:$4 sm:$0xff]   ;;  %v831_v36 = vcombine.high %v286_v34, %v286_v34  ;;  %v830_v53 = vcombine.low %v286_v34, %v286_v34 }
  0x18   : > { %588 = vmatpush1.bf16.msra.mxu0 %v917_v2  ;;  %v923_v7 = vld [vmem:[%s1066_s25 + $0x50] ss:$8 sps:$4 sm:$0xff]   ;;  %v924_v8 = vld [vmem:[%s1066_s25 + $0x44] ss:$8 sps:$4 sm:$0xff]   ;;  %v936_v9 = vld [vmem:[%s1066_s25 + $0x174] ss:$8 sps:$4 sm:$0xff]  }
  0x19   : > { %589 = vmatprep.subr.bf16.mxu0 %v918_v4  ;;  %v938_v10 = vld [vmem:[%s1066_s25 + $0x170] ss:$8 sps:$4 sm:$0xff]   ;;  %v926_v11 = vld [vmem:[%s1066_s25 + $0x40] ss:$8 sps:$4 sm:$0xff]   ;;  %v927_v12 = vld [vmem:[%s1066_s25 + $0x34] ss:$8 sps:$4 sm:$0xff]   ;;  %628 = vmatprep.subr.bf16.mxu1 %v936_v9 }
  0x1a   : > { %v942_v13 = vld [vmem:[%s1066_s25 + $0x164] ss:$8 sps:$4 sm:$0xff]   ;;  %629 = vmatpush1.bf16.msra.mxu1 %v938_v10  ;;  %v944_v14 = vld [vmem:[%s1066_s25 + $0x160] ss:$8 sps:$4 sm:$0xff]   ;;  %v929_v15 = vld [vmem:[%s1066_s25 + $0x30] ss:$8 sps:$4 sm:$0xff]   ;;  %619 = vmatprep.mubr.bf16.mxu0 %v831_v36 }
  0x1b   : > { %630 = vmatprep.subr.bf16.mxu1 %v942_v13  ;;  %v948_v16 = vld [vmem:[%s1066_s25 + $0x154] ss:$8 sps:$4 sm:$0xff]   ;;  %v930_v17 = vld [vmem:[%s1066_s25 + $0x24] ss:$8 sps:$4 sm:$0xff]   ;;  %v950_v18 = vld [vmem:[%s1066_s25 + $0x150] ss:$8 sps:$4 sm:$0xff]  }
  0x1c   : > { %590 = vmatpush1.bf16.msra.mxu0 %v920_v5  ;;  %v954_v19 = vld [vmem:[%s1066_s25 + $0x144] ss:$8 sps:$4 sm:$0xff]   ;;  %v932_v20 = vld [vmem:[%s1066_s25 + $0x20] ss:$8 sps:$4 sm:$0xff]   ;;  %v933_v21 = vld [vmem:[%s1066_s25 + $0x14] ss:$8 sps:$4 sm:$0xff]  }
  0x1d   : > { %591 = vmatprep.subr.bf16.mxu0 %v921_v6  ;;  %v956_v22 = vld [vmem:[%s1066_s25 + $0x140] ss:$8 sps:$4 sm:$0xff]   ;;  %v960_v23 = vld [vmem:[%s1066_s25 + $0x134] ss:$8 sps:$4 sm:$0xff]   ;;  %v935_v24 = vld [vmem:[%s1066_s25 + $0x10] ss:$8 sps:$4 sm:$0xff]  }
  0x1e   : > { %631 = vmatpush1.bf16.msra.mxu1 %v944_v14  ;;  %v939_v25 = vld [vmem:[%s1066_s25 + $0x4] ss:$8 sps:$4 sm:$0xff]   ;;  %v962_v26 = vld [vmem:[%s1066_s25 + $0x130] ss:$8 sps:$4 sm:$0xff]   ;;  %v941_v28 = vld [vmem:[%s1066_s25] ss:$8 sps:$4 sm:$0xff]  }
  0x1f   : > { %632 = vmatprep.subr.bf16.mxu1 %v948_v16  ;;  %v966_v27 = vld [vmem:[%s1066_s25 + $0x124] ss:$8 sps:$4 sm:$0xff]   ;;  %v945_v29 = vld [vmem:[%s1066_s25 + $0xf4] ss:$8 sps:$4 sm:$0xff]   ;;  %v968_v30 = vld [vmem:[%s1066_s25 + $0x120] ss:$8 sps:$4 sm:$0xff]  }
  0x20   : > { %592 = vmatpush1.bf16.msra.mxu0 %v923_v7  ;;  %v972_v31 = vld [vmem:[%s1066_s25 + $0x114] ss:$8 sps:$4 sm:$0xff]   ;;  %v947_v32 = vld [vmem:[%s1066_s25 + $0xf0] ss:$8 sps:$4 sm:$0xff]   ;;  %v951_v33 = vld [vmem:[%s1066_s25 + $0xe4] ss:$8 sps:$4 sm:$0xff]  }
  0x21   : > { %593 = vmatprep.subr.bf16.mxu0 %v924_v8  ;;  %v974_v35 = vld [vmem:[%s1066_s25 + $0x110] ss:$8 sps:$4 sm:$0xff]   ;;  %v978_v37 = vld [vmem:[%s1066_s25 + $0x104] ss:$8 sps:$4 sm:$0xff]   ;;  %v953_v38 = vld [vmem:[%s1066_s25 + $0xe0] ss:$8 sps:$4 sm:$0xff]  }
  0x22   : > { %633 = vmatpush1.bf16.msra.mxu1 %v950_v18  ;;  %v957_v39 = vld [vmem:[%s1066_s25 + $0xd4] ss:$8 sps:$4 sm:$0xff]   ;;  %v980_v40 = vld [vmem:[%s1066_s25 + $0x100] ss:$8 sps:$4 sm:$0xff]   ;;  %v959_v41 = vld [vmem:[%s1066_s25 + $0xd0] ss:$8 sps:$4 sm:$0xff]  }
  0x23   : > { %634 = vmatprep.subr.bf16.mxu1 %v954_v19  ;;  %v963_v42 = vld [vmem:[%s1066_s25 + $0xc4] ss:$8 sps:$4 sm:$0xff]   ;;  %v984_v43 = vld [vmem:[%s1061_s21 + $0x8] ss:$0 sps:$4 sm:$0xff]   ;;  %v969_v45 = vld [vmem:[%s1066_s25 + $0xb4] ss:$8 sps:$4 sm:$0xff]  }
  0x24   : > { %594 = vmatpush1.bf16.msra.mxu0 %v926_v11  ;;  %v965_v44 = vld [vmem:[%s1066_s25 + $0xc0] ss:$8 sps:$4 sm:$0xff]   ;;  %v971_v46 = vld [vmem:[%s1066_s25 + $0xb0] ss:$8 sps:$4 sm:$0xff]   ;;  %v975_v47 = vld [vmem:[%s1066_s25 + $0xa4] ss:$8 sps:$4 sm:$0xff]  }
  0x25   : > { %595 = vmatprep.subr.bf16.mxu0 %v927_v12  ;;  %v977_v48 = vld [vmem:[%s1066_s25 + $0xa0] ss:$8 sps:$4 sm:$0xff]   ;;  %v981_v49 = vld [vmem:[%s1066_s25 + $0x94] ss:$8 sps:$4 sm:$0xff]   ;;  %v983_v50 = vld [vmem:[%s1066_s25 + $0x90] ss:$8 sps:$4 sm:$0xff]  }
  0x26   : > { %635 = vmatpush1.bf16.msra.mxu1 %v956_v22  ;;  %v985_v51 = vld [vmem:[%s1066_s25 + $0x84] ss:$8 sps:$4 sm:$0xff]   ;;  %v987_v52 = vld [vmem:[%s1066_s25 + $0x80] ss:$8 sps:$4 sm:$0xff]   ;;  %p881_p7 = scmp.ne.s32.totalorder %s1004_s12, 2 }
  0x27   : > { %636 = vmatprep.subr.bf16.mxu1 %v960_v23  ;;  %v284_v58 = vld [vmem:[#allocation2] sm:$0xff]  ;;  %v285_v61 = vld [vmem:[#allocation2 + $0x8] sm:$0xff] }
  0x28   : > { %596 = vmatpush1.bf16.msra.mxu0 %v929_v15 }
  0x29   : > { %597 = vmatprep.subr.bf16.mxu0 %v930_v17 }
  0x2a   : > { %637 = vmatpush1.bf16.msra.mxu1 %v962_v26 }
  0x2b   : > { %638 = vmatprep.subr.bf16.mxu1 %v966_v27 }
  0x2c   : > { %598 = vmatpush1.bf16.msra.mxu0 %v932_v20 }
  0x2d   : > { %599 = vmatprep.subr.bf16.mxu0 %v933_v21 }
  0x2e   : > { %639 = vmatpush1.bf16.msra.mxu1 %v968_v30 }
  0x2f   : > { %640 = vmatprep.subr.bf16.mxu1 %v972_v31 }
  0x30   : > { %600 = vmatpush1.bf16.msra.mxu0 %v935_v24 }
  0x31   : > { %601 = vmatprep.subr.bf16.mxu0 %v939_v25 }
  0x32   : > { %641 = vmatpush1.bf16.msra.mxu1 %v974_v35 }
  0x33   : > { %642 = vmatprep.subr.bf16.mxu1 %v978_v37 }
  0x34   : > { %602 = vmatpush1.bf16.msra.mxu0 %v941_v28 }
  0x35   : > { %603 = vmatprep.subr.bf16.mxu0 %v945_v29 }
  0x36   : > { %643 = vmatpush1.bf16.msra.mxu1 %v980_v40 }
  0x38   : > { %604 = vmatpush2.bf16.msra.mxu0 %v947_v32 }
  0x39   : > { %605 = vmatprep.subr.bf16.mxu0 %v951_v33  ;;  %661 = vmatmul.mubr.bf16.vlgmr.msra.gmra.mxu1 %v984_v43 }
  0x3c   : > { %606 = vmatpush2.bf16.msra.mxu0 %v953_v38 }
  0x3d   : > { %607 = vmatprep.subr.bf16.mxu0 %v957_v39 }
  0x40   : > { %608 = vmatpush2.bf16.msra.mxu0 %v959_v41 }
  0x41   : > { %609 = vmatprep.subr.bf16.mxu0 %v963_v42 }
  0x44   : > { %610 = vmatpush2.bf16.msra.mxu0 %v965_v44 }
  0x45   : > { %611 = vmatprep.subr.bf16.mxu0 %v969_v45 }
  0x48   : > { %612 = vmatpush2.bf16.msra.mxu0 %v971_v46 }
  0x49   : > { %613 = vmatprep.subr.bf16.mxu0 %v975_v47 }
  0x4c   : > { %614 = vmatpush2.bf16.msra.mxu0 %v977_v48 }
  0x4d   : > { %615 = vmatprep.subr.bf16.mxu0 %v981_v49 }
  0x50   : > { %616 = vmatpush2.bf16.msra.mxu0 %v983_v50 }
  0x51   : > { %617 = vmatprep.subr.bf16.mxu0 %v985_v51 }
  0x54   : > { %618 = vmatpush2.bf16.msra.mxu0 %v987_v52 }
  0x57   : > { %620 = vmatmul.mubr.bf16.vlgmr.msra.gmra.mxu0 %v830_v53 }
  0xf9   : > { %v662_v54 = vpop.f32.mrf.mxu1 }
  0xfb   : > { %v664_v55 = vpop.f32.mrf.mxu1 }
  0xfd   : > { %v666_v56 = vpop.f32.mrf.mxu1 }
  0xff   : > { %v667_v57 = vpop.f32.mrf.mxu1 }
 0x117   : > { %v621_v59 = vpop.f32.mrf.mxu0 }
 0x118   : > { %v663_v60 = vadd.f32 %v662_v54, %v621_v59 }
 0x119   : > { %v623_v62 = vpop.f32.mrf.mxu0 }
 0x11a   : > { %v669_v63 = vadd.f32 %v663_v60, %v284_v58  ;;  %v665_v0 = vadd.f32 %v664_v55, %v623_v62  ;;  %676 = sbr.rel (%p881_p7) target bundleno = 302 (0x12e), region = 40 }
 0x11b   : > { %v625_v1 = vpop.f32.mrf.mxu0 }
 0x11c   : > { %671 = vst [vmem:[#allocation2] sm:$0xff] %v669_v63  ;;  %v670_v2 = vadd.f32 %v665_v0, %v285_v61 }
 0x11d   : > { %v626_v3 = vpop.f32.mrf.mxu0 }
 0x11e   : > { %672 = vst [vmem:[#allocation2 + $0x8] sm:$0xff] %v670_v2 }
 0x11f   : > { %v681_v4 = vlaneseq  ;;  %v679_v6 = vld [vmem:[%s1137_s2] sm:$0x3] }
 0x121   : > { %v682_v5 = vshrl.u32 %v681_v4, 7 }
 0x123   : > { %v683_v7 = vsub.s32 0, %v682_v5  ;;  %v687_v8 = vsub.s32 1, %v682_v5  ;;  %v677_v9 = vld [vmem:[#allocation2] sm:$0xff] }
 0x125   : > { %v678_v10 = vld [vmem:[#allocation2 + $0x8] sm:$0xff]  ;;  %v684_v11 = vrot.slane %v679_v6, %v683_v7  ;;  %v688_v12 = vrot.slane %v679_v6, %v687_v8 }
 0x127   : > { %v691_v13 = vadd.f32 %v684_v11, %v677_v9  ;;  %v692_v14 = vadd.f32 %v688_v12, %v678_v10 }
 0x129   : > { %v693_v15 = vmax.f32 %v691_v13, 0.0  ;;  %v694_v16 = vmax.f32 %v692_v14, 0.0 }
 0x12b   : > { %v888_v17 = vpack.c.bf16 %v694_v16, %v693_v15 }
 0x12d   : > { %703 = vst [vmem:[%s1138_s3] sm:$0xff] %v888_v17 }
 0x12e PF: > { %s13_s14 = sadd.s32 1, %s1012_s14   ;;  %s1139_s12 = smov %s1008_s13 }
 0x12f   : > { %p10_p8 = scmp.ge.s32.totalorder %s13_s14, 5   ;;  %s1140_s13 = smov %s1142_s15 }
 0x131   :  { %12 = sbr.rel (!%p10_p8) target bundleno = 2 (0x2), region = 76 }

// kernel: resnet18_forward.34
= control target key start
LH: loop header
LB: loop body
LE: loop exit
PB: predicated region body
PF: predicated region fallthrough
CT: control target
= control target key end

     0   :  { %v221_v1 = vmov 0   ;;  %v34_v18 = vlaneseq  ;;  %s299_s1 = inlined_call_operand.vmem [shape: bf16[128,256], index: 1, kind: input, shape index: {}]   ;;  %s300_s0 = inlined_call_operand.vmem [shape: bf16[8,128], index: 0, kind: input, shape index: {}]   ;;  %s301_s2 = inlined_call_operand.vmem [shape: f32[1,256], index: 2, kind: input, shape index: {}]   ;;  %s302_s3 = inlined_call_operand.vmem [shape: bf16[8,256], index: 3, kind: output, shape index: {}]  }
   0x1   :  { %v197_v0 = vld [vmem:[%s299_s1 + $0x74] ss:$8 sps:$4 sm:$0xff]   ;;  %156 = vmatprep.mubr.bf16.mxu0 %v221_v1  ;;  %v199_v2 = vld [vmem:[%s299_s1 + $0x70] ss:$8 sps:$4 sm:$0xff]   ;;  %v200_v3 = vld [vmem:[%s299_s1 + $0x64] ss:$8 sps:$4 sm:$0xff]  }
   0x2   :  { %124 = vmatprep.subr.bf16.mxu0 %v197_v0  ;;  %v202_v4 = vld [vmem:[%s299_s1 + $0x60] ss:$8 sps:$4 sm:$0xff]   ;;  %v203_v5 = vld [vmem:[%s299_s1 + $0x54] ss:$8 sps:$4 sm:$0xff]   ;;  %v205_v6 = vld [vmem:[%s299_s1 + $0x50] ss:$8 sps:$4 sm:$0xff]  }
   0x3   :  { %125 = vmatpush1.bf16.msra.mxu0 %v199_v2  ;;  %v206_v7 = vld [vmem:[%s299_s1 + $0x44] ss:$8 sps:$4 sm:$0xff]   ;;  %v208_v8 = vld [vmem:[%s299_s1 + $0x40] ss:$8 sps:$4 sm:$0xff]   ;;  %v209_v9 = vld [vmem:[%s299_s1 + $0x34] ss:$8 sps:$4 sm:$0xff]  }
   0x4   :  { %126 = vmatprep.subr.bf16.mxu0 %v200_v3  ;;  %v211_v10 = vld [vmem:[%s299_s1 + $0x30] ss:$8 sps:$4 sm:$0xff]   ;;  %v212_v11 = vld [vmem:[%s299_s1 + $0x24] ss:$8 sps:$4 sm:$0xff]   ;;  %v214_v12 = vld [vmem:[%s299_s1 + $0x20] ss:$8 sps:$4 sm:$0xff]  }
   0x5   :  { %v215_v13 = vld [vmem:[%s299_s1 + $0x14] ss:$8 sps:$4 sm:$0xff]   ;;  %v217_v14 = vld [vmem:[%s299_s1 + $0x10] ss:$8 sps:$4 sm:$0xff]   ;;  %v218_v15 = vld [vmem:[%s299_s1 + $0x4] ss:$8 sps:$4 sm:$0xff]  }
   0x6   :  { %v220_v16 = vld [vmem:[%s299_s1] ss:$8 sps:$4 sm:$0xff]   ;;  %v35_v19 = vshrl.u32 %v34_v18, 7 }
   0x7   :  { %127 = vmatpush1.bf16.msra.mxu0 %v202_v4  ;;  %v15_v17 = vld [vmem:[%s300_s0] sm:$0xf] }
   0x8   :  { %128 = vmatprep.subr.bf16.mxu0 %v203_v5  ;;  %v36_v20 = vsub.s32 0, %v35_v19  ;;  %v40_v21 = vsub.s32 1, %v35_v19  ;;  %v32_v22 = vld [vmem:[%s301_s2] sm:$0x3] }
   0xa   :  { %v37_v23 = vrot.slane %v32_v22, %v36_v20  ;;  %v41_v24 = vrot.slane %v32_v22, %v40_v21 }
   0xb   :  { %129 = vmatpush1.bf16.msra.mxu0 %v205_v6 }
   0xc   :  { %130 = vmatprep.subr.bf16.mxu0 %v206_v7 }
   0xf   :  { %131 = vmatpush1.bf16.msra.mxu0 %v208_v8 }
  0x10   :  { %132 = vmatprep.subr.bf16.mxu0 %v209_v9 }
  0x13   :  { %133 = vmatpush1.bf16.msra.mxu0 %v211_v10 }
  0x14   :  { %134 = vmatprep.subr.bf16.mxu0 %v212_v11 }
  0x17   :  { %135 = vmatpush1.bf16.msra.mxu0 %v214_v12 }
  0x18   :  { %136 = vmatprep.subr.bf16.mxu0 %v215_v13 }
  0x1b   :  { %137 = vmatpush1.bf16.msra.mxu0 %v217_v14 }
  0x1c   :  { %138 = vmatprep.subr.bf16.mxu0 %v218_v15 }
  0x1f   :  { %139 = vmatpush1.bf16.msra.mxu0 %v220_v16 }
  0x22   :  { %157 = vmatmul.mubr.bf16.vlgmr.msra.gmra.mxu0 %v15_v17 }
  0xe2   :  { %v158_v25 = vpop.f32.mrf.mxu0 }
  0xe3   :  { %v159_v27 = vadd.f32 %v158_v25, %v37_v23 }
  0xe4   :  { %v160_v26 = vpop.f32.mrf.mxu0 }
  0xe5   :  { %v161_v28 = vadd.f32 %v160_v26, %v41_v24 }
  0xe6   :  { %v162_v29 = vpop.f32.mrf.mxu0 }
  0xe7   :  { %v195_v30 = vpack.c.bf16 %v161_v28, %v159_v27 }
  0xe8   :  { %v163_v31 = vpop.f32.mrf.mxu0 }
  0xe9   :  { %173 = vst [vmem:[%s302_s3] sm:$0xff] %v195_v30 }

// kernel: resnet18_forward.35
= control target key start
LH: loop header
LB: loop body
LE: loop exit
PB: predicated region body
PF: predicated region fallthrough
CT: control target
= control target key end

     0   :  { %s1594_s15 = smov 0   ;;  %s1596_s16 = smov 0   ;;  %s1751_s0 = inlined_call_operand.vmem [shape: bf16[8,2304], index: 0, kind: input, shape index: {}]   ;;  %s1752_s1 = inlined_call_operand.vmem [shape: bf16[2304,256], index: 1, kind: input, shape index: {}]   ;;  %s1753_s2 = inlined_call_operand.vmem [shape: f32[1,256], index: 2, kind: input, shape index: {}]   ;;  %s1754_s3 = inlined_call_operand.vmem [shape: bf16[8,256], index: 3, kind: input, shape index: {}]   ;;  %s1755_s4 = inlined_call_operand.vmem [shape: bf16[8,256], index: 4, kind: output, shape index: {}]  }
   0x1   :  { %s1598_s17 = smov 0  }
   0x2 LB: > { %s26_s18 = sadd.s32 1, %s1562_s16  ;;  %p1254_p0 = scmp.ge.s32.totalorder %s1566_s17, 1  ;;  %s1566_s17 = sphi %s1598_s17, %s14_s17   ;;  %s1562_s16 = sphi %s1596_s16, %s1757_s16   ;;  %s1558_s15 = sphi %s1594_s15, %s1756_s15  }
   0x3   : > { %p27_p1 = scmp.ge.s32.totalorder %s26_s18, 3  ;;  %p236_p2 = scmp.lt.s32.totalorder %s1566_s17, 4 }
   0x5   : > { %s1759_s18 = smov (%p27_p1, %s26_s18), 0  ;;  %p237_p3 = pnand %p1254_p0, %p236_p2 }
   0x6   : > { %s293_s19 = smul.u32 (!%p237_p3), 6, %s1558_s15  ;;  %p1258_p6 = scmp.ne.s32.totalorder (!%p237_p3), %s1558_s15, 0 }
   0x7   : > { %240 = sbr.rel (%p237_p3) target bundleno = 368 (0x170), region = 36 }
   0x8   : > { %s303_s20 = smul.u32 (!%p237_p3), 96, %s1558_s15  ;;  %p296_p4 = scmp.lt.s32.totalorder (!%p237_p3), %s293_s19, 17 }
   0xa   : > { %p305_p5 = scmp.lt.s32.totalorder (!%p237_p3), %s303_s20, 287 }
   0xc   : > { %s1761_s19 = smov (!%p296_p4, %s293_s19), 17  ;;  %s1763_s20 = smov (!%p305_p5, %s303_s20), 287 }
   0xd   : > { %s1255_s21 = sshll.u32 %s1761_s19, 2  ;;  %s1367_s25 = sshll.u32 %s1763_s20, 3 }
   0xe   : > { %s1619_s24 = scalar_lea.vmem %s1751_s0, %s1255_s21  ;;  %s1624_s28 = scalar_lea.vmem %s1752_s1, %s1367_s25 }
   0xf   : > { %343 = sbr.rel (%p1258_p6) target bundleno = 22 (0x16), region = 40 }
  0x14   : > { %v1568_v0 = vmov 0.0  }
  0x15   : > { %344 = vst [vmem:[#allocation2] sm:$0xff] %v1568_v0  ;;  %345 = vst [vmem:[#allocation2 + $0x8] sm:$0xff] %v1568_v0 }
  0x16 PF: > { %v1394_v1 = vld [vmem:[%s1624_s28 + $0x74] ss:$8 sps:$4 sm:$0xff]   ;;  %v1398_v3 = vld [vmem:[%s1624_s28 + $0x70] ss:$8 sps:$4 sm:$0xff]   ;;  %v1400_v5 = vld [vmem:[%s1624_s28 + $0x64] ss:$8 sps:$4 sm:$0xff]  }
  0x17   : > { %v1396_v2 = vld [vmem:[%s1624_s28 + $0x174] ss:$8 sps:$4 sm:$0xff]   ;;  %948 = vmatprep.subr.bf16.mxu0 %v1394_v1  ;;  %v1399_v4 = vld [vmem:[%s1624_s28 + $0x170] ss:$8 sps:$4 sm:$0xff]   ;;  %v1402_v6 = vld [vmem:[%s1624_s28 + $0x164] ss:$8 sps:$4 sm:$0xff]  }
  0x18   : > { %989 = vmatprep.subr.bf16.mxu1 %v1396_v2  ;;  %949 = vmatpush1.bf16.msra.mxu0 %v1398_v3  ;;  %v1404_v7 = vld [vmem:[%s1624_s28 + $0x60] ss:$8 sps:$4 sm:$0xff]   ;;  %v1406_v9 = vld [vmem:[%s1624_s28 + $0x54] ss:$8 sps:$4 sm:$0xff]   ;;  %v1410_v11 = vld [vmem:[%s1624_s28 + $0x50] ss:$8 sps:$4 sm:$0xff]  }
  0x19   : > { %990 = vmatpush1.bf16.msra.mxu1 %v1399_v4  ;;  %950 = vmatprep.subr.bf16.mxu0 %v1400_v5  ;;  %v1405_v8 = vld [vmem:[%s1624_s28 + $0x160] ss:$8 sps:$4 sm:$0xff]   ;;  %v1408_v10 = vld [vmem:[%s1624_s28 + $0x154] ss:$8 sps:$4 sm:$0xff]   ;;  %v1411_v12 = vld [vmem:[%s1624_s28 + $0x150] ss:$8 sps:$4 sm:$0xff]  }
  0x1a   : > { %991 = vmatprep.subr.bf16.mxu1 %v1402_v6  ;;  %v1412_v13 = vld [vmem:[%s1624_s28 + $0x44] ss:$8 sps:$4 sm:$0xff]   ;;  %v1416_v15 = vld [vmem:[%s1624_s28 + $0x40] ss:$8 sps:$4 sm:$0xff]   ;;  %v1418_v17 = vld [vmem:[%s1624_s28 + $0x34] ss:$8 sps:$4 sm:$0xff]  }
  0x1b   : > { %v1414_v14 = vld [vmem:[%s1624_s28 + $0x144] ss:$8 sps:$4 sm:$0xff]   ;;  %v1417_v16 = vld [vmem:[%s1624_s28 + $0x140] ss:$8 sps:$4 sm:$0xff]   ;;  %v1420_v18 = vld [vmem:[%s1624_s28 + $0x134] ss:$8 sps:$4 sm:$0xff]  }
  0x1c   : > { %951 = vmatpush1.bf16.msra.mxu0 %v1404_v7  ;;  %v1422_v19 = vld [vmem:[%s1624_s28 + $0x30] ss:$8 sps:$4 sm:$0xff]   ;;  %v1424_v21 = vld [vmem:[%s1624_s28 + $0x24] ss:$8 sps:$4 sm:$0xff]   ;;  %v1428_v23 = vld [vmem:[%s1624_s28 + $0x20] ss:$8 sps:$4 sm:$0xff]  }
  0x1d   : > { %992 = vmatpush1.bf16.msra.mxu1 %v1405_v8  ;;  %952 = vmatprep.subr.bf16.mxu0 %v1406_v9  ;;  %v1423_v20 = vld [vmem:[%s1624_s28 + $0x130] ss:$8 sps:$4 sm:$0xff]   ;;  %v1426_v22 = vld [vmem:[%s1624_s28 + $0x124] ss:$8 sps:$4 sm:$0xff]   ;;  %v1429_v24 = vld [vmem:[%s1624_s28 + $0x120] ss:$8 sps:$4 sm:$0xff]  }
  0x1e   : > { %993 = vmatprep.subr.bf16.mxu1 %v1408_v10  ;;  %v1430_v25 = vld [vmem:[%s1624_s28 + $0x14] ss:$8 sps:$4 sm:$0xff]   ;;  %v1434_v27 = vld [vmem:[%s1624_s28 + $0x10] ss:$8 sps:$4 sm:$0xff]   ;;  %v1436_v29 = vld [vmem:[%s1624_s28 + $0x4] ss:$8 sps:$4 sm:$0xff]  }
  0x1f   : > { %v1432_v26 = vld [vmem:[%s1624_s28 + $0x114] ss:$8 sps:$4 sm:$0xff]   ;;  %v1435_v28 = vld [vmem:[%s1624_s28 + $0x110] ss:$8 sps:$4 sm:$0xff]   ;;  %v1438_v30 = vld [vmem:[%s1624_s28 + $0x104] ss:$8 sps:$4 sm:$0xff]  }
  0x20   : > { %953 = vmatpush1.bf16.msra.mxu0 %v1410_v11  ;;  %v1440_v31 = vld [vmem:[%s1624_s28] ss:$8 sps:$4 sm:$0xff]   ;;  %v1442_v33 = vld [vmem:[%s1624_s28 + $0xf4] ss:$8 sps:$4 sm:$0xff]   ;;  %v1446_v35 = vld [vmem:[%s1624_s28 + $0xf0] ss:$8 sps:$4 sm:$0xff]  }
  0x21   : > { %994 = vmatpush1.bf16.msra.mxu1 %v1411_v12  ;;  %954 = vmatprep.subr.bf16.mxu0 %v1412_v13  ;;  %v1441_v32 = vld [vmem:[%s1624_s28 + $0x100] ss:$8 sps:$4 sm:$0xff]   ;;  %v1444_v34 = vld [vmem:[%s1624_s28 + $0x1f4] ss:$8 sps:$4 sm:$0xff]   ;;  %v1447_v36 = vld [vmem:[%s1624_s28 + $0x1f0] ss:$8 sps:$4 sm:$0xff]  }
  0x22   : > { %995 = vmatprep.subr.bf16.mxu1 %v1414_v14  ;;  %v1448_v37 = vld [vmem:[%s1624_s28 + $0xe4] ss:$8 sps:$4 sm:$0xff]   ;;  %v1452_v39 = vld [vmem:[%s1624_s28 + $0xe0] ss:$8 sps:$4 sm:$0xff]   ;;  %v1454_v41 = vld [vmem:[%s1624_s28 + $0xd4] ss:$8 sps:$4 sm:$0xff]  }
  0x23   : > { %v1450_v38 = vld [vmem:[%s1624_s28 + $0x1e4] ss:$8 sps:$4 sm:$0xff]   ;;  %v1453_v40 = vld [vmem:[%s1624_s28 + $0x1e0] ss:$8 sps:$4 sm:$0xff]   ;;  %v1456_v42 = vld [vmem:[%s1624_s28 + $0x1d4] ss:$8 sps:$4 sm:$0xff]  }
  0x24   : > { %955 = vmatpush1.bf16.msra.mxu0 %v1416_v15  ;;  %v1458_v43 = vld [vmem:[%s1624_s28 + $0xd0] ss:$8 sps:$4 sm:$0xff]   ;;  %v1460_v45 = vld [vmem:[%s1624_s28 + $0xc4] ss:$8 sps:$4 sm:$0xff]   ;;  %v1464_v50 = vld [vmem:[%s1624_s28 + $0xc0] ss:$8 sps:$4 sm:$0xff]  }
  0x25   : > { %996 = vmatpush1.bf16.msra.mxu1 %v1417_v16  ;;  %956 = vmatprep.subr.bf16.mxu0 %v1418_v17  ;;  %v1459_v44 = vld [vmem:[%s1624_s28 + $0x1d0] ss:$8 sps:$4 sm:$0xff]   ;;  %v1462_v46 = vld [vmem:[%s1624_s28 + $0x1c4] ss:$8 sps:$4 sm:$0xff]   ;;  %v1465_v51 = vld [vmem:[%s1624_s28 + $0x1c0] ss:$8 sps:$4 sm:$0xff]  }
  0x26   : > { %997 = vmatprep.subr.bf16.mxu1 %v1420_v18  ;;  %v348_v47 = vld [vmem:[%s1619_s24] sm:$0xff]  ;;  %v349_v49 = vld [vmem:[%s1619_s24 + $0x8] sm:$0xff]  ;;  %v1466_v53 = vld [vmem:[%s1624_s28 + $0xb4] ss:$8 sps:$4 sm:$0xff]   ;;  %p1361_p7 = scmp.ne.s32.totalorder %s1558_s15, 2 }
  0x27   : > { %v1260_v48 = vcombine.high %v348_v47, %v348_v47  ;;  %v1262_v52 = vcombine.high %v349_v49, %v349_v49  ;;  %v1468_v54 = vld [vmem:[%s1624_s28 + $0x1b4] ss:$8 sps:$4 sm:$0xff]   ;;  %v1470_v55 = vld [vmem:[%s1624_s28 + $0xb0] ss:$8 sps:$4 sm:$0xff]   ;;  %v1472_v57 = vld [vmem:[%s1624_s28 + $0xa4] ss:$8 sps:$4 sm:$0xff]   ;;  %v1259_v6 = vcombine.low %v348_v47, %v348_v47  ;;  %v1261_v7 = vcombine.low %v349_v49, %v349_v49 }
  0x28   : > { %957 = vmatpush1.bf16.msra.mxu0 %v1422_v19  ;;  %v1471_v56 = vld [vmem:[%s1624_s28 + $0x1b0] ss:$8 sps:$4 sm:$0xff]   ;;  %v1474_v58 = vld [vmem:[%s1624_s28 + $0x1a4] ss:$8 sps:$4 sm:$0xff]   ;;  %v1476_v59 = vld [vmem:[%s1624_s28 + $0xa0] ss:$8 sps:$4 sm:$0xff]  }
  0x29   : > { %998 = vmatpush1.bf16.msra.mxu1 %v1423_v20  ;;  %958 = vmatprep.subr.bf16.mxu0 %v1424_v21  ;;  %v1477_v60 = vld [vmem:[%s1624_s28 + $0x1a0] ss:$8 sps:$4 sm:$0xff]   ;;  %v1478_v61 = vld [vmem:[%s1624_s28 + $0x94] ss:$8 sps:$4 sm:$0xff]   ;;  %v1482_v63 = vld [vmem:[%s1624_s28 + $0x90] ss:$8 sps:$4 sm:$0xff]  }
  0x2a   : > { %999 = vmatprep.subr.bf16.mxu1 %v1426_v22  ;;  %980 = vmatprep.mubr.bf16.mxu0 %v1260_v48  ;;  %v1480_v62 = vld [vmem:[%s1624_s28 + $0x194] ss:$8 sps:$4 sm:$0xff]   ;;  %v1483_v0 = vld [vmem:[%s1624_s28 + $0x190] ss:$8 sps:$4 sm:$0xff]   ;;  %v1484_v1 = vld [vmem:[%s1624_s28 + $0x84] ss:$8 sps:$4 sm:$0xff]  }
  0x2b   : > { %1021 = vmatprep.mubr.bf16.mxu1 %v1262_v52  ;;  %v1486_v2 = vld [vmem:[%s1624_s28 + $0x184] ss:$8 sps:$4 sm:$0xff]   ;;  %v1488_v3 = vld [vmem:[%s1624_s28 + $0x80] ss:$8 sps:$4 sm:$0xff]   ;;  %v1496_v5 = vld [vmem:[%s1624_s28 + $0x274] ss:$8 sps:$4 sm:$0xff]  }
  0x2c   : > { %959 = vmatpush1.bf16.msra.mxu0 %v1428_v23  ;;  %v1489_v4 = vld [vmem:[%s1624_s28 + $0x180] ss:$8 sps:$4 sm:$0xff]   ;;  %v1494_v8 = vld [vmem:[%s1624_s28 + $0x270] ss:$8 sps:$4 sm:$0xff]   ;;  %v1499_v10 = vld [vmem:[%s1624_s28 + $0x264] ss:$8 sps:$4 sm:$0xff]  }
  0x2d   : > { %1000 = vmatpush1.bf16.msra.mxu1 %v1429_v24  ;;  %960 = vmatprep.subr.bf16.mxu0 %v1430_v25  ;;  %v1696_v9 = vld [vmem:[%s1619_s24 + $0x10] sm:$0xff]  ;;  %v1497_v12 = vld [vmem:[%s1624_s28 + $0x260] ss:$8 sps:$4 sm:$0xff]   ;;  %v1505_v15 = vld [vmem:[%s1624_s28 + $0x244] ss:$8 sps:$4 sm:$0xff]  }
  0x2e   : > { %1001 = vmatprep.subr.bf16.mxu1 %v1432_v26  ;;  %v1264_v11 = vcombine.high %v1696_v9, %v1696_v9  ;;  %v1502_v13 = vld [vmem:[%s1624_s28 + $0x254] ss:$8 sps:$4 sm:$0xff]   ;;  %v1500_v14 = vld [vmem:[%s1624_s28 + $0x250] ss:$8 sps:$4 sm:$0xff]   ;;  %v1503_v16 = vld [vmem:[%s1624_s28 + $0x240] ss:$8 sps:$4 sm:$0xff]  }
  0x2f   : > { %v1508_v17 = vld [vmem:[%s1624_s28 + $0x234] ss:$8 sps:$4 sm:$0xff]   ;;  %v1506_v18 = vld [vmem:[%s1624_s28 + $0x230] ss:$8 sps:$4 sm:$0xff]   ;;  %v1511_v19 = vld [vmem:[%s1624_s28 + $0x224] ss:$8 sps:$4 sm:$0xff]  }
  0x30   : > { %961 = vmatpush1.bf16.msra.mxu0 %v1434_v27  ;;  %v1509_v20 = vld [vmem:[%s1624_s28 + $0x220] ss:$8 sps:$4 sm:$0xff]   ;;  %v1514_v21 = vld [vmem:[%s1624_s28 + $0x214] ss:$8 sps:$4 sm:$0xff]   ;;  %v1512_v22 = vld [vmem:[%s1624_s28 + $0x210] ss:$8 sps:$4 sm:$0xff]  }
  0x31   : > { %1002 = vmatpush1.bf16.msra.mxu1 %v1435_v28  ;;  %962 = vmatprep.subr.bf16.mxu0 %v1436_v29  ;;  %v1517_v23 = vld [vmem:[%s1624_s28 + $0x204] ss:$8 sps:$4 sm:$0xff]   ;;  %v1515_v24 = vld [vmem:[%s1624_s28 + $0x200] ss:$8 sps:$4 sm:$0xff]   ;;  %v1520_v25 = vld [vmem:[%s1624_s28 + $0x2f4] ss:$8 sps:$4 sm:$0xff]  }
  0x32   : > { %1003 = vmatprep.subr.bf16.mxu1 %v1438_v30  ;;  %v1518_v26 = vld [vmem:[%s1624_s28 + $0x2f0] ss:$8 sps:$4 sm:$0xff]   ;;  %v1523_v27 = vld [vmem:[%s1624_s28 + $0x2e4] ss:$8 sps:$4 sm:$0xff]   ;;  %v1521_v28 = vld [vmem:[%s1624_s28 + $0x2e0] ss:$8 sps:$4 sm:$0xff]  }
  0x33   : > { %v1526_v29 = vld [vmem:[%s1624_s28 + $0x2d4] ss:$8 sps:$4 sm:$0xff]   ;;  %v1524_v30 = vld [vmem:[%s1624_s28 + $0x2d0] ss:$8 sps:$4 sm:$0xff]  }
  0x34   : > { %963 = vmatpush1.bf16.msra.mxu0 %v1440_v31  ;;  %v1529_v31 = vld [vmem:[%s1624_s28 + $0x2c4] ss:$8 sps:$4 sm:$0xff]  }
  0x35   : > { %1004 = vmatpush1.bf16.msra.mxu1 %v1441_v32  ;;  %964 = vmatprep.subr.bf16.mxu0 %v1442_v33  ;;  %v1527_v32 = vld [vmem:[%s1624_s28 + $0x2c0] ss:$8 sps:$4 sm:$0xff]   ;;  %v1532_v33 = vld [vmem:[%s1624_s28 + $0x2b4] ss:$8 sps:$4 sm:$0xff]  }
  0x36   : > { %1005 = vmatprep.subr.bf16.mxu1 %v1444_v34  ;;  %v1530_v34 = vld [vmem:[%s1624_s28 + $0x2b0] ss:$8 sps:$4 sm:$0xff]  }
  0x38   : > { %965 = vmatpush2.bf16.msra.mxu0 %v1446_v35  ;;  %v1535_v35 = vld [vmem:[%s1624_s28 + $0x2a4] ss:$8 sps:$4 sm:$0xff]  }
  0x39   : > { %1006 = vmatpush2.bf16.msra.mxu1 %v1447_v36  ;;  %966 = vmatprep.subr.bf16.mxu0 %v1448_v37  ;;  %v1533_v36 = vld [vmem:[%s1624_s28 + $0x2a0] ss:$8 sps:$4 sm:$0xff]   ;;  %v1538_v37 = vld [vmem:[%s1624_s28 + $0x294] ss:$8 sps:$4 sm:$0xff]  }
  0x3a   : > { %1007 = vmatprep.subr.bf16.mxu1 %v1450_v38  ;;  %v1536_v38 = vld [vmem:[%s1624_s28 + $0x290] ss:$8 sps:$4 sm:$0xff]  }
  0x3c   : > { %967 = vmatpush2.bf16.msra.mxu0 %v1452_v39  ;;  %v1541_v39 = vld [vmem:[%s1624_s28 + $0x284] ss:$8 sps:$4 sm:$0xff]  }
  0x3d   : > { %1008 = vmatpush2.bf16.msra.mxu1 %v1453_v40  ;;  %968 = vmatprep.subr.bf16.mxu0 %v1454_v41  ;;  %v1539_v40 = vld [vmem:[%s1624_s28 + $0x280] ss:$8 sps:$4 sm:$0xff]   ;;  %v1263_v41 = vcombine.low %v1696_v9, %v1696_v9 }
  0x3e   : > { %1009 = vmatprep.subr.bf16.mxu1 %v1456_v42 }
  0x40   : > { %969 = vmatpush2.bf16.msra.mxu0 %v1458_v43 }
  0x41   : > { %1010 = vmatpush2.bf16.msra.mxu1 %v1459_v44  ;;  %970 = vmatprep.subr.bf16.mxu0 %v1460_v45 }
  0x42   : > { %1011 = vmatprep.subr.bf16.mxu1 %v1462_v46 }
  0x44   : > { %971 = vmatpush2.bf16.msra.mxu0 %v1464_v50 }
  0x45   : > { %1012 = vmatpush2.bf16.msra.mxu1 %v1465_v51  ;;  %972 = vmatprep.subr.bf16.mxu0 %v1466_v53  ;;  %v346_v51 = vld [vmem:[#allocation2] sm:$0xff] }
  0x46   : > { %1013 = vmatprep.subr.bf16.mxu1 %v1468_v54 }
  0x48   : > { %973 = vmatpush2.bf16.msra.mxu0 %v1470_v55  ;;  %v347_v55 = vld [vmem:[#allocation2 + $0x8] sm:$0xff] }
  0x49   : > { %1014 = vmatpush2.bf16.msra.mxu1 %v1471_v56  ;;  %974 = vmatprep.subr.bf16.mxu0 %v1472_v57 }
  0x4a   : > { %1015 = vmatprep.subr.bf16.mxu1 %v1474_v58 }
  0x4c   : > { %975 = vmatpush2.bf16.msra.mxu0 %v1476_v59 }
  0x4d   : > { %1016 = vmatpush2.bf16.msra.mxu1 %v1477_v60  ;;  %976 = vmatprep.subr.bf16.mxu0 %v1478_v61 }
  0x4e   : > { %1017 = vmatprep.subr.bf16.mxu1 %v1480_v62 }
  0x50   : > { %977 = vmatpush2.bf16.msra.mxu0 %v1482_v63 }
  0x51   : > { %1018 = vmatpush2.bf16.msra.mxu1 %v1483_v0  ;;  %978 = vmatprep.subr.bf16.mxu0 %v1484_v1 }
  0x52   : > { %1019 = vmatprep.subr.bf16.mxu1 %v1486_v2 }
  0x54   : > { %979 = vmatpush2.bf16.msra.mxu0 %v1488_v3 }
  0x55   : > { %1020 = vmatpush2.bf16.msra.mxu1 %v1489_v4  ;;  %1030 = vmatprep.subr.bf16.mxu0 %v1496_v5 }
  0x57   : > { %981 = vmatmul.mubr.bf16.vlgmr.msra.gmra.mxu0 %v1259_v6 }
  0x58   : > { %1022 = vmatmul.mubr.bf16.vlgmr.msra.gmra.mxu1 %v1261_v7  ;;  %1031 = vmatpush1.bf16.msra.mxu0 %v1494_v8 }
  0x59   : > { %1062 = vmatprep.mubr.bf16.mxu0 %v1264_v11  ;;  %1032 = vmatprep.subr.bf16.mxu0 %v1499_v10 }
  0x5c   : > { %1033 = vmatpush1.bf16.msra.mxu0 %v1497_v12 }
  0x5d   : > { %1034 = vmatprep.subr.bf16.mxu0 %v1502_v13 }
  0x60   : > { %1035 = vmatpush1.bf16.msra.mxu0 %v1500_v14 }
  0x61   : > { %1036 = vmatprep.subr.bf16.mxu0 %v1505_v15 }
  0x64   : > { %1037 = vmatpush1.bf16.msra.mxu0 %v1503_v16 }
  0x65   : > { %1038 = vmatprep.subr.bf16.mxu0 %v1508_v17 }
  0x68   : > { %1039 = vmatpush1.bf16.msra.mxu0 %v1506_v18 }
  0x69   : > { %1040 = vmatprep.subr.bf16.mxu0 %v1511_v19 }
  0x6c   : > { %1041 = vmatpush1.bf16.msra.mxu0 %v1509_v20 }
  0x6d   : > { %1042 = vmatprep.subr.bf16.mxu0 %v1514_v21 }
  0x70   : > { %1043 = vmatpush1.bf16.msra.mxu0 %v1512_v22 }
  0x71   : > { %1044 = vmatprep.subr.bf16.mxu0 %v1517_v23 }
  0x74   : > { %1045 = vmatpush1.bf16.msra.mxu0 %v1515_v24 }
  0x75   : > { %1046 = vmatprep.subr.bf16.mxu0 %v1520_v25 }
  0x78   : > { %1047 = vmatpush2.bf16.msra.mxu0 %v1518_v26 }
  0x79   : > { %1048 = vmatprep.subr.bf16.mxu0 %v1523_v27 }
  0x7c   : > { %1049 = vmatpush2.bf16.msra.mxu0 %v1521_v28 }
  0x7d   : > { %1050 = vmatprep.subr.bf16.mxu0 %v1526_v29 }
  0x80   : > { %1051 = vmatpush2.bf16.msra.mxu0 %v1524_v30 }
  0x81   : > { %1052 = vmatprep.subr.bf16.mxu0 %v1529_v31 }
  0x84   : > { %1053 = vmatpush2.bf16.msra.mxu0 %v1527_v32 }
  0x85   : > { %1054 = vmatprep.subr.bf16.mxu0 %v1532_v33 }
  0x88   : > { %1055 = vmatpush2.bf16.msra.mxu0 %v1530_v34 }
  0x89   : > { %1056 = vmatprep.subr.bf16.mxu0 %v1535_v35 }
  0x8c   : > { %1057 = vmatpush2.bf16.msra.mxu0 %v1533_v36 }
  0x8d   : > { %1058 = vmatprep.subr.bf16.mxu0 %v1538_v37 }
  0x90   : > { %1059 = vmatpush2.bf16.msra.mxu0 %v1536_v38 }
  0x91   : > { %1060 = vmatprep.subr.bf16.mxu0 %v1541_v39 }
  0x94   : > { %1061 = vmatpush2.bf16.msra.mxu0 %v1539_v40 }
  0x97   : > { %1063 = vmatmul.mubr.bf16.vlgmr.msra.gmra.mxu0 %v1263_v41 }
 0x117   : > { %v982_v42 = vpop.f32.mrf.mxu0 }
 0x118   : > { %v1023_v43 = vpop.f32.mrf.mxu1 }
 0x119   : > { %v984_v44 = vpop.f32.mrf.mxu0  ;;  %v1024_v50 = vadd.f32 %v1023_v43, %v982_v42 }
 0x11a   : > { %v1025_v45 = vpop.f32.mrf.mxu1 }
 0x11b   : > { %v986_v46 = vpop.f32.mrf.mxu0  ;;  %v1026_v53 = vadd.f32 %v1025_v45, %v984_v44 }
 0x11c   : > { %v1027_v47 = vpop.f32.mrf.mxu1 }
 0x11d   : > { %v987_v48 = vpop.f32.mrf.mxu0 }
 0x11e   : > { %v1028_v49 = vpop.f32.mrf.mxu1 }
 0x157   : > { %v1064_v52 = vpop.f32.mrf.mxu0 }
 0x158   : > { %v1065_v54 = vadd.f32 %v1064_v52, %v1024_v50 }
 0x159   : > { %v1066_v56 = vpop.f32.mrf.mxu0 }
 0x15a   : > { %v1071_v57 = vadd.f32 %v1065_v54, %v346_v51  ;;  %v1067_v58 = vadd.f32 %v1066_v56, %v1026_v53  ;;  %1078 = sbr.rel (%p1361_p7) target bundleno = 368 (0x170), region = 44 }
 0x15b   : > { %v1068_v59 = vpop.f32.mrf.mxu0 }
 0x15c   : > { %1073 = vst [vmem:[#allocation2] sm:$0xff] %v1071_v57  ;;  %v1072_v60 = vadd.f32 %v1067_v58, %v347_v55 }
 0x15d   : > { %v1069_v61 = vpop.f32.mrf.mxu0 }
 0x15e   : > { %1074 = vst [vmem:[#allocation2 + $0x8] sm:$0xff] %v1072_v60 }
 0x15f   : > { %v1083_v62 = vlaneseq  ;;  %v1081_v0 = vld [vmem:[%s1753_s2] sm:$0x3] }
 0x160   : > { %v1095_v1 = vld [vmem:[%s1754_s3] sm:$0xff] }
 0x161   : > { %v1084_v63 = vshrl.u32 %v1083_v62, 7  ;;  %v1096_v8 = vunpack.c.l.bf16 %v1095_v1  ;;  %v1097_v9 = vunpack.c.h.bf16 %v1095_v1 }
 0x163   : > { %v1085_v2 = vsub.s32 0, %v1084_v63  ;;  %v1089_v3 = vsub.s32 1, %v1084_v63  ;;  %v1079_v4 = vld [vmem:[#allocation2] sm:$0xff] }
 0x165   : > { %v1080_v5 = vld [vmem:[#allocation2 + $0x8] sm:$0xff]  ;;  %v1086_v6 = vrot.slane %v1081_v0, %v1085_v2  ;;  %v1090_v7 = vrot.slane %v1081_v0, %v1089_v3 }
 0x167   : > { %v1093_v10 = vadd.f32 %v1086_v6, %v1079_v4  ;;  %v1094_v11 = vadd.f32 %v1090_v7, %v1080_v5 }
 0x169   : > { %v1098_v12 = vadd.f32 %v1096_v8, %v1093_v10  ;;  %v1099_v13 = vadd.f32 %v1097_v9, %v1094_v11 }
 0x16b   : > { %v1100_v14 = vmax.f32 %v1098_v12, 0.0  ;;  %v1101_v15 = vmax.f32 %v1099_v13, 0.0 }
 0x16d   : > { %v1368_v16 = vpack.c.bf16 %v1101_v15, %v1100_v14 }
 0x16f   : > { %1110 = vst [vmem:[%s1755_s4] sm:$0xff] %v1368_v16 }
 0x170 PF: > { %s14_s17 = sadd.s32 1, %s1566_s17   ;;  %s1756_s15 = smov %s1562_s16 }
 0x171   : > { %p11_p8 = scmp.ge.s32.totalorder %s14_s17, 5   ;;  %s1757_s16 = smov %s1759_s18 }
 0x173   :  { %13 = sbr.rel (!%p11_p8) target bundleno = 2 (0x2), region = 83 }

// kernel: resnet18_forward.36
= control target key start
LH: loop header
LB: loop body
LE: loop exit
PB: predicated region body
PF: predicated region fallthrough
CT: control target
= control target key end

     0   :  { %s1499_s12 = smov 0   ;;  %s1501_s13 = smov 0   ;;  %s1653_s0 = inlined_call_operand.vmem [shape: bf16[8,2304], index: 0, kind: input, shape index: {}]   ;;  %s1654_s1 = inlined_call_operand.vmem [shape: bf16[2304,256], index: 1, kind: input, shape index: {}]   ;;  %s1655_s2 = inlined_call_operand.vmem [shape: f32[1,256], index: 2, kind: input, shape index: {}]   ;;  %s1656_s3 = inlined_call_operand.vmem [shape: bf16[8,256], index: 3, kind: output, shape index: {}]  }
   0x1   :  { %s1503_s14 = smov 0  }
   0x2 LB: > { %s25_s15 = sadd.s32 1, %s1472_s13  ;;  %p1164_p0 = scmp.ge.s32.totalorder %s1476_s14, 1  ;;  %s1476_s14 = sphi %s1503_s14, %s13_s14   ;;  %s1472_s13 = sphi %s1501_s13, %s1658_s13   ;;  %s1468_s12 = sphi %s1499_s12, %s1657_s12  }
   0x3   : > { %p26_p1 = scmp.ge.s32.totalorder %s25_s15, 3  ;;  %p194_p2 = scmp.lt.s32.totalorder %s1476_s14, 4 }
   0x5   : > { %s1660_s15 = smov (%p26_p1, %s25_s15), 0  ;;  %p195_p3 = pnand %p1164_p0, %p194_p2 }
   0x6   : > { %s240_s16 = smul.u32 (!%p195_p3), 6, %s1468_s12  ;;  %p1168_p6 = scmp.ne.s32.totalorder (!%p195_p3), %s1468_s12, 0 }
   0x7   : > { %198 = sbr.rel (%p195_p3) target bundleno = 366 (0x16e), region = 32 }
   0x8   : > { %s250_s17 = smul.u32 (!%p195_p3), 96, %s1468_s12  ;;  %p243_p4 = scmp.lt.s32.totalorder (!%p195_p3), %s240_s16, 17 }
   0xa   : > { %p252_p5 = scmp.lt.s32.totalorder (!%p195_p3), %s250_s17, 287 }
   0xc   : > { %s1662_s16 = smov (!%p243_p4, %s240_s16), 17  ;;  %s1664_s17 = smov (!%p252_p5, %s250_s17), 287 }
   0xd   : > { %s1165_s18 = sshll.u32 %s1662_s16, 2  ;;  %s1277_s22 = sshll.u32 %s1664_s17, 3 }
   0xe   : > { %s1524_s21 = scalar_lea.vmem %s1653_s0, %s1165_s18  ;;  %s1529_s25 = scalar_lea.vmem %s1654_s1, %s1277_s22 }
   0xf   : > { %280 = sbr.rel (%p1168_p6) target bundleno = 22 (0x16), region = 36 }
  0x14   : > { %v1478_v0 = vmov 0.0  }
  0x15   : > { %281 = vst [vmem:[#allocation2] sm:$0xff] %v1478_v0  ;;  %282 = vst [vmem:[#allocation2 + $0x8] sm:$0xff] %v1478_v0 }
  0x16 PF: > { %v1304_v1 = vld [vmem:[%s1529_s25 + $0x74] ss:$8 sps:$4 sm:$0xff]   ;;  %v1308_v3 = vld [vmem:[%s1529_s25 + $0x70] ss:$8 sps:$4 sm:$0xff]   ;;  %v1310_v5 = vld [vmem:[%s1529_s25 + $0x64] ss:$8 sps:$4 sm:$0xff]  }
  0x17   : > { %v1306_v2 = vld [vmem:[%s1529_s25 + $0x174] ss:$8 sps:$4 sm:$0xff]   ;;  %885 = vmatprep.subr.bf16.mxu0 %v1304_v1  ;;  %v1309_v4 = vld [vmem:[%s1529_s25 + $0x170] ss:$8 sps:$4 sm:$0xff]   ;;  %v1312_v6 = vld [vmem:[%s1529_s25 + $0x164] ss:$8 sps:$4 sm:$0xff]  }
  0x18   : > { %926 = vmatprep.subr.bf16.mxu1 %v1306_v2  ;;  %886 = vmatpush1.bf16.msra.mxu0 %v1308_v3  ;;  %v1314_v7 = vld [vmem:[%s1529_s25 + $0x60] ss:$8 sps:$4 sm:$0xff]   ;;  %v1316_v9 = vld [vmem:[%s1529_s25 + $0x54] ss:$8 sps:$4 sm:$0xff]   ;;  %v1320_v11 = vld [vmem:[%s1529_s25 + $0x50] ss:$8 sps:$4 sm:$0xff]  }
  0x19   : > { %927 = vmatpush1.bf16.msra.mxu1 %v1309_v4  ;;  %887 = vmatprep.subr.bf16.mxu0 %v1310_v5  ;;  %v1315_v8 = vld [vmem:[%s1529_s25 + $0x160] ss:$8 sps:$4 sm:$0xff]   ;;  %v1318_v10 = vld [vmem:[%s1529_s25 + $0x154] ss:$8 sps:$4 sm:$0xff]   ;;  %v1321_v12 = vld [vmem:[%s1529_s25 + $0x150] ss:$8 sps:$4 sm:$0xff]  }
  0x1a   : > { %928 = vmatprep.subr.bf16.mxu1 %v1312_v6  ;;  %v1322_v13 = vld [vmem:[%s1529_s25 + $0x44] ss:$8 sps:$4 sm:$0xff]   ;;  %v1326_v15 = vld [vmem:[%s1529_s25 + $0x40] ss:$8 sps:$4 sm:$0xff]   ;;  %v1328_v17 = vld [vmem:[%s1529_s25 + $0x34] ss:$8 sps:$4 sm:$0xff]  }
  0x1b   : > { %v1324_v14 = vld [vmem:[%s1529_s25 + $0x144] ss:$8 sps:$4 sm:$0xff]   ;;  %v1327_v16 = vld [vmem:[%s1529_s25 + $0x140] ss:$8 sps:$4 sm:$0xff]   ;;  %v1330_v18 = vld [vmem:[%s1529_s25 + $0x134] ss:$8 sps:$4 sm:$0xff]  }
  0x1c   : > { %888 = vmatpush1.bf16.msra.mxu0 %v1314_v7  ;;  %v1332_v19 = vld [vmem:[%s1529_s25 + $0x30] ss:$8 sps:$4 sm:$0xff]   ;;  %v1334_v21 = vld [vmem:[%s1529_s25 + $0x24] ss:$8 sps:$4 sm:$0xff]   ;;  %v1338_v23 = vld [vmem:[%s1529_s25 + $0x20] ss:$8 sps:$4 sm:$0xff]  }
  0x1d   : > { %929 = vmatpush1.bf16.msra.mxu1 %v1315_v8  ;;  %889 = vmatprep.subr.bf16.mxu0 %v1316_v9  ;;  %v1333_v20 = vld [vmem:[%s1529_s25 + $0x130] ss:$8 sps:$4 sm:$0xff]   ;;  %v1336_v22 = vld [vmem:[%s1529_s25 + $0x124] ss:$8 sps:$4 sm:$0xff]   ;;  %v1339_v24 = vld [vmem:[%s1529_s25 + $0x120] ss:$8 sps:$4 sm:$0xff]  }
  0x1e   : > { %930 = vmatprep.subr.bf16.mxu1 %v1318_v10  ;;  %v1340_v25 = vld [vmem:[%s1529_s25 + $0x14] ss:$8 sps:$4 sm:$0xff]   ;;  %v1344_v27 = vld [vmem:[%s1529_s25 + $0x10] ss:$8 sps:$4 sm:$0xff]   ;;  %v1346_v29 = vld [vmem:[%s1529_s25 + $0x4] ss:$8 sps:$4 sm:$0xff]  }
  0x1f   : > { %v1342_v26 = vld [vmem:[%s1529_s25 + $0x114] ss:$8 sps:$4 sm:$0xff]   ;;  %v1345_v28 = vld [vmem:[%s1529_s25 + $0x110] ss:$8 sps:$4 sm:$0xff]   ;;  %v1348_v30 = vld [vmem:[%s1529_s25 + $0x104] ss:$8 sps:$4 sm:$0xff]  }
  0x20   : > { %890 = vmatpush1.bf16.msra.mxu0 %v1320_v11  ;;  %v1350_v31 = vld [vmem:[%s1529_s25] ss:$8 sps:$4 sm:$0xff]   ;;  %v1352_v33 = vld [vmem:[%s1529_s25 + $0xf4] ss:$8 sps:$4 sm:$0xff]   ;;  %v1356_v35 = vld [vmem:[%s1529_s25 + $0xf0] ss:$8 sps:$4 sm:$0xff]  }
  0x21   : > { %931 = vmatpush1.bf16.msra.mxu1 %v1321_v12  ;;  %891 = vmatprep.subr.bf16.mxu0 %v1322_v13  ;;  %v1351_v32 = vld [vmem:[%s1529_s25 + $0x100] ss:$8 sps:$4 sm:$0xff]   ;;  %v1354_v34 = vld [vmem:[%s1529_s25 + $0x1f4] ss:$8 sps:$4 sm:$0xff]   ;;  %v1357_v36 = vld [vmem:[%s1529_s25 + $0x1f0] ss:$8 sps:$4 sm:$0xff]  }
  0x22   : > { %932 = vmatprep.subr.bf16.mxu1 %v1324_v14  ;;  %v1358_v37 = vld [vmem:[%s1529_s25 + $0xe4] ss:$8 sps:$4 sm:$0xff]   ;;  %v1362_v39 = vld [vmem:[%s1529_s25 + $0xe0] ss:$8 sps:$4 sm:$0xff]   ;;  %v1364_v41 = vld [vmem:[%s1529_s25 + $0xd4] ss:$8 sps:$4 sm:$0xff]  }
  0x23   : > { %v1360_v38 = vld [vmem:[%s1529_s25 + $0x1e4] ss:$8 sps:$4 sm:$0xff]   ;;  %v1363_v40 = vld [vmem:[%s1529_s25 + $0x1e0] ss:$8 sps:$4 sm:$0xff]   ;;  %v1366_v42 = vld [vmem:[%s1529_s25 + $0x1d4] ss:$8 sps:$4 sm:$0xff]  }
  0x24   : > { %892 = vmatpush1.bf16.msra.mxu0 %v1326_v15  ;;  %v1368_v43 = vld [vmem:[%s1529_s25 + $0xd0] ss:$8 sps:$4 sm:$0xff]   ;;  %v1370_v45 = vld [vmem:[%s1529_s25 + $0xc4] ss:$8 sps:$4 sm:$0xff]   ;;  %v1374_v50 = vld [vmem:[%s1529_s25 + $0xc0] ss:$8 sps:$4 sm:$0xff]  }
  0x25   : > { %933 = vmatpush1.bf16.msra.mxu1 %v1327_v16  ;;  %893 = vmatprep.subr.bf16.mxu0 %v1328_v17  ;;  %v1369_v44 = vld [vmem:[%s1529_s25 + $0x1d0] ss:$8 sps:$4 sm:$0xff]   ;;  %v1372_v46 = vld [vmem:[%s1529_s25 + $0x1c4] ss:$8 sps:$4 sm:$0xff]   ;;  %v1375_v51 = vld [vmem:[%s1529_s25 + $0x1c0] ss:$8 sps:$4 sm:$0xff]  }
  0x26   : > { %934 = vmatprep.subr.bf16.mxu1 %v1330_v18  ;;  %v285_v47 = vld [vmem:[%s1524_s21] sm:$0xff]  ;;  %v286_v49 = vld [vmem:[%s1524_s21 + $0x8] sm:$0xff]  ;;  %v1376_v53 = vld [vmem:[%s1529_s25 + $0xb4] ss:$8 sps:$4 sm:$0xff]   ;;  %p1271_p7 = scmp.ne.s32.totalorder %s1468_s12, 2 }
  0x27   : > { %v1170_v48 = vcombine.high %v285_v47, %v285_v47  ;;  %v1172_v52 = vcombine.high %v286_v49, %v286_v49  ;;  %v1378_v54 = vld [vmem:[%s1529_s25 + $0x1b4] ss:$8 sps:$4 sm:$0xff]   ;;  %v1380_v55 = vld [vmem:[%s1529_s25 + $0xb0] ss:$8 sps:$4 sm:$0xff]   ;;  %v1382_v57 = vld [vmem:[%s1529_s25 + $0xa4] ss:$8 sps:$4 sm:$0xff]   ;;  %v1169_v6 = vcombine.low %v285_v47, %v285_v47  ;;  %v1171_v7 = vcombine.low %v286_v49, %v286_v49 }
  0x28   : > { %894 = vmatpush1.bf16.msra.mxu0 %v1332_v19  ;;  %v1381_v56 = vld [vmem:[%s1529_s25 + $0x1b0] ss:$8 sps:$4 sm:$0xff]   ;;  %v1384_v58 = vld [vmem:[%s1529_s25 + $0x1a4] ss:$8 sps:$4 sm:$0xff]   ;;  %v1386_v59 = vld [vmem:[%s1529_s25 + $0xa0] ss:$8 sps:$4 sm:$0xff]  }
  0x29   : > { %935 = vmatpush1.bf16.msra.mxu1 %v1333_v20  ;;  %895 = vmatprep.subr.bf16.mxu0 %v1334_v21  ;;  %v1387_v60 = vld [vmem:[%s1529_s25 + $0x1a0] ss:$8 sps:$4 sm:$0xff]   ;;  %v1388_v61 = vld [vmem:[%s1529_s25 + $0x94] ss:$8 sps:$4 sm:$0xff]   ;;  %v1392_v63 = vld [vmem:[%s1529_s25 + $0x90] ss:$8 sps:$4 sm:$0xff]  }
  0x2a   : > { %936 = vmatprep.subr.bf16.mxu1 %v1336_v22  ;;  %917 = vmatprep.mubr.bf16.mxu0 %v1170_v48  ;;  %v1390_v62 = vld [vmem:[%s1529_s25 + $0x194] ss:$8 sps:$4 sm:$0xff]   ;;  %v1393_v0 = vld [vmem:[%s1529_s25 + $0x190] ss:$8 sps:$4 sm:$0xff]   ;;  %v1394_v1 = vld [vmem:[%s1529_s25 + $0x84] ss:$8 sps:$4 sm:$0xff]  }
  0x2b   : > { %958 = vmatprep.mubr.bf16.mxu1 %v1172_v52  ;;  %v1396_v2 = vld [vmem:[%s1529_s25 + $0x184] ss:$8 sps:$4 sm:$0xff]   ;;  %v1398_v3 = vld [vmem:[%s1529_s25 + $0x80] ss:$8 sps:$4 sm:$0xff]   ;;  %v1406_v5 = vld [vmem:[%s1529_s25 + $0x274] ss:$8 sps:$4 sm:$0xff]  }
  0x2c   : > { %896 = vmatpush1.bf16.msra.mxu0 %v1338_v23  ;;  %v1399_v4 = vld [vmem:[%s1529_s25 + $0x180] ss:$8 sps:$4 sm:$0xff]   ;;  %v1404_v8 = vld [vmem:[%s1529_s25 + $0x270] ss:$8 sps:$4 sm:$0xff]   ;;  %v1409_v10 = vld [vmem:[%s1529_s25 + $0x264] ss:$8 sps:$4 sm:$0xff]  }
  0x2d   : > { %937 = vmatpush1.bf16.msra.mxu1 %v1339_v24  ;;  %897 = vmatprep.subr.bf16.mxu0 %v1340_v25  ;;  %v1601_v9 = vld [vmem:[%s1524_s21 + $0x10] sm:$0xff]  ;;  %v1407_v12 = vld [vmem:[%s1529_s25 + $0x260] ss:$8 sps:$4 sm:$0xff]   ;;  %v1415_v15 = vld [vmem:[%s1529_s25 + $0x244] ss:$8 sps:$4 sm:$0xff]  }
  0x2e   : > { %938 = vmatprep.subr.bf16.mxu1 %v1342_v26  ;;  %v1174_v11 = vcombine.high %v1601_v9, %v1601_v9  ;;  %v1412_v13 = vld [vmem:[%s1529_s25 + $0x254] ss:$8 sps:$4 sm:$0xff]   ;;  %v1410_v14 = vld [vmem:[%s1529_s25 + $0x250] ss:$8 sps:$4 sm:$0xff]   ;;  %v1413_v16 = vld [vmem:[%s1529_s25 + $0x240] ss:$8 sps:$4 sm:$0xff]  }
  0x2f   : > { %v1418_v17 = vld [vmem:[%s1529_s25 + $0x234] ss:$8 sps:$4 sm:$0xff]   ;;  %v1416_v18 = vld [vmem:[%s1529_s25 + $0x230] ss:$8 sps:$4 sm:$0xff]   ;;  %v1421_v19 = vld [vmem:[%s1529_s25 + $0x224] ss:$8 sps:$4 sm:$0xff]  }
  0x30   : > { %898 = vmatpush1.bf16.msra.mxu0 %v1344_v27  ;;  %v1419_v20 = vld [vmem:[%s1529_s25 + $0x220] ss:$8 sps:$4 sm:$0xff]   ;;  %v1424_v21 = vld [vmem:[%s1529_s25 + $0x214] ss:$8 sps:$4 sm:$0xff]   ;;  %v1422_v22 = vld [vmem:[%s1529_s25 + $0x210] ss:$8 sps:$4 sm:$0xff]  }
  0x31   : > { %939 = vmatpush1.bf16.msra.mxu1 %v1345_v28  ;;  %899 = vmatprep.subr.bf16.mxu0 %v1346_v29  ;;  %v1427_v23 = vld [vmem:[%s1529_s25 + $0x204] ss:$8 sps:$4 sm:$0xff]   ;;  %v1425_v24 = vld [vmem:[%s1529_s25 + $0x200] ss:$8 sps:$4 sm:$0xff]   ;;  %v1430_v25 = vld [vmem:[%s1529_s25 + $0x2f4] ss:$8 sps:$4 sm:$0xff]  }
  0x32   : > { %940 = vmatprep.subr.bf16.mxu1 %v1348_v30  ;;  %v1428_v26 = vld [vmem:[%s1529_s25 + $0x2f0] ss:$8 sps:$4 sm:$0xff]   ;;  %v1433_v27 = vld [vmem:[%s1529_s25 + $0x2e4] ss:$8 sps:$4 sm:$0xff]   ;;  %v1431_v28 = vld [vmem:[%s1529_s25 + $0x2e0] ss:$8 sps:$4 sm:$0xff]  }
  0x33   : > { %v1436_v29 = vld [vmem:[%s1529_s25 + $0x2d4] ss:$8 sps:$4 sm:$0xff]   ;;  %v1434_v30 = vld [vmem:[%s1529_s25 + $0x2d0] ss:$8 sps:$4 sm:$0xff]  }
  0x34   : > { %900 = vmatpush1.bf16.msra.mxu0 %v1350_v31  ;;  %v1439_v31 = vld [vmem:[%s1529_s25 + $0x2c4] ss:$8 sps:$4 sm:$0xff]  }
  0x35   : > { %941 = vmatpush1.bf16.msra.mxu1 %v1351_v32  ;;  %901 = vmatprep.subr.bf16.mxu0 %v1352_v33  ;;  %v1437_v32 = vld [vmem:[%s1529_s25 + $0x2c0] ss:$8 sps:$4 sm:$0xff]   ;;  %v1442_v33 = vld [vmem:[%s1529_s25 + $0x2b4] ss:$8 sps:$4 sm:$0xff]  }
  0x36   : > { %942 = vmatprep.subr.bf16.mxu1 %v1354_v34  ;;  %v1440_v34 = vld [vmem:[%s1529_s25 + $0x2b0] ss:$8 sps:$4 sm:$0xff]  }
  0x38   : > { %902 = vmatpush2.bf16.msra.mxu0 %v1356_v35  ;;  %v1445_v35 = vld [vmem:[%s1529_s25 + $0x2a4] ss:$8 sps:$4 sm:$0xff]  }
  0x39   : > { %943 = vmatpush2.bf16.msra.mxu1 %v1357_v36  ;;  %903 = vmatprep.subr.bf16.mxu0 %v1358_v37  ;;  %v1443_v36 = vld [vmem:[%s1529_s25 + $0x2a0] ss:$8 sps:$4 sm:$0xff]   ;;  %v1448_v37 = vld [vmem:[%s1529_s25 + $0x294] ss:$8 sps:$4 sm:$0xff]  }
  0x3a   : > { %944 = vmatprep.subr.bf16.mxu1 %v1360_v38  ;;  %v1446_v38 = vld [vmem:[%s1529_s25 + $0x290] ss:$8 sps:$4 sm:$0xff]  }
  0x3c   : > { %904 = vmatpush2.bf16.msra.mxu0 %v1362_v39  ;;  %v1451_v39 = vld [vmem:[%s1529_s25 + $0x284] ss:$8 sps:$4 sm:$0xff]  }
  0x3d   : > { %945 = vmatpush2.bf16.msra.mxu1 %v1363_v40  ;;  %905 = vmatprep.subr.bf16.mxu0 %v1364_v41  ;;  %v1449_v40 = vld [vmem:[%s1529_s25 + $0x280] ss:$8 sps:$4 sm:$0xff]   ;;  %v1173_v41 = vcombine.low %v1601_v9, %v1601_v9 }
  0x3e   : > { %946 = vmatprep.subr.bf16.mxu1 %v1366_v42 }
  0x40   : > { %906 = vmatpush2.bf16.msra.mxu0 %v1368_v43 }
  0x41   : > { %947 = vmatpush2.bf16.msra.mxu1 %v1369_v44  ;;  %907 = vmatprep.subr.bf16.mxu0 %v1370_v45 }
  0x42   : > { %948 = vmatprep.subr.bf16.mxu1 %v1372_v46 }
  0x44   : > { %908 = vmatpush2.bf16.msra.mxu0 %v1374_v50 }
  0x45   : > { %949 = vmatpush2.bf16.msra.mxu1 %v1375_v51  ;;  %909 = vmatprep.subr.bf16.mxu0 %v1376_v53  ;;  %v283_v51 = vld [vmem:[#allocation2] sm:$0xff] }
  0x46   : > { %950 = vmatprep.subr.bf16.mxu1 %v1378_v54 }
  0x48   : > { %910 = vmatpush2.bf16.msra.mxu0 %v1380_v55  ;;  %v284_v55 = vld [vmem:[#allocation2 + $0x8] sm:$0xff] }
  0x49   : > { %951 = vmatpush2.bf16.msra.mxu1 %v1381_v56  ;;  %911 = vmatprep.subr.bf16.mxu0 %v1382_v57 }
  0x4a   : > { %952 = vmatprep.subr.bf16.mxu1 %v1384_v58 }
  0x4c   : > { %912 = vmatpush2.bf16.msra.mxu0 %v1386_v59 }
  0x4d   : > { %953 = vmatpush2.bf16.msra.mxu1 %v1387_v60  ;;  %913 = vmatprep.subr.bf16.mxu0 %v1388_v61 }
  0x4e   : > { %954 = vmatprep.subr.bf16.mxu1 %v1390_v62 }
  0x50   : > { %914 = vmatpush2.bf16.msra.mxu0 %v1392_v63 }
  0x51   : > { %955 = vmatpush2.bf16.msra.mxu1 %v1393_v0  ;;  %915 = vmatprep.subr.bf16.mxu0 %v1394_v1 }
  0x52   : > { %956 = vmatprep.subr.bf16.mxu1 %v1396_v2 }
  0x54   : > { %916 = vmatpush2.bf16.msra.mxu0 %v1398_v3 }
  0x55   : > { %957 = vmatpush2.bf16.msra.mxu1 %v1399_v4  ;;  %967 = vmatprep.subr.bf16.mxu0 %v1406_v5 }
  0x57   : > { %918 = vmatmul.mubr.bf16.vlgmr.msra.gmra.mxu0 %v1169_v6 }
  0x58   : > { %959 = vmatmul.mubr.bf16.vlgmr.msra.gmra.mxu1 %v1171_v7  ;;  %968 = vmatpush1.bf16.msra.mxu0 %v1404_v8 }
  0x59   : > { %999 = vmatprep.mubr.bf16.mxu0 %v1174_v11  ;;  %969 = vmatprep.subr.bf16.mxu0 %v1409_v10 }
  0x5c   : > { %970 = vmatpush1.bf16.msra.mxu0 %v1407_v12 }
  0x5d   : > { %971 = vmatprep.subr.bf16.mxu0 %v1412_v13 }
  0x60   : > { %972 = vmatpush1.bf16.msra.mxu0 %v1410_v14 }
  0x61   : > { %973 = vmatprep.subr.bf16.mxu0 %v1415_v15 }
  0x64   : > { %974 = vmatpush1.bf16.msra.mxu0 %v1413_v16 }
  0x65   : > { %975 = vmatprep.subr.bf16.mxu0 %v1418_v17 }
  0x68   : > { %976 = vmatpush1.bf16.msra.mxu0 %v1416_v18 }
  0x69   : > { %977 = vmatprep.subr.bf16.mxu0 %v1421_v19 }
  0x6c   : > { %978 = vmatpush1.bf16.msra.mxu0 %v1419_v20 }
  0x6d   : > { %979 = vmatprep.subr.bf16.mxu0 %v1424_v21 }
  0x70   : > { %980 = vmatpush1.bf16.msra.mxu0 %v1422_v22 }
  0x71   : > { %981 = vmatprep.subr.bf16.mxu0 %v1427_v23 }
  0x74   : > { %982 = vmatpush1.bf16.msra.mxu0 %v1425_v24 }
  0x75   : > { %983 = vmatprep.subr.bf16.mxu0 %v1430_v25 }
  0x78   : > { %984 = vmatpush2.bf16.msra.mxu0 %v1428_v26 }
  0x79   : > { %985 = vmatprep.subr.bf16.mxu0 %v1433_v27 }
  0x7c   : > { %986 = vmatpush2.bf16.msra.mxu0 %v1431_v28 }
  0x7d   : > { %987 = vmatprep.subr.bf16.mxu0 %v1436_v29 }
  0x80   : > { %988 = vmatpush2.bf16.msra.mxu0 %v1434_v30 }
  0x81   : > { %989 = vmatprep.subr.bf16.mxu0 %v1439_v31 }
  0x84   : > { %990 = vmatpush2.bf16.msra.mxu0 %v1437_v32 }
  0x85   : > { %991 = vmatprep.subr.bf16.mxu0 %v1442_v33 }
  0x88   : > { %992 = vmatpush2.bf16.msra.mxu0 %v1440_v34 }
  0x89   : > { %993 = vmatprep.subr.bf16.mxu0 %v1445_v35 }
  0x8c   : > { %994 = vmatpush2.bf16.msra.mxu0 %v1443_v36 }
  0x8d   : > { %995 = vmatprep.subr.bf16.mxu0 %v1448_v37 }
  0x90   : > { %996 = vmatpush2.bf16.msra.mxu0 %v1446_v38 }
  0x91   : > { %997 = vmatprep.subr.bf16.mxu0 %v1451_v39 }
  0x94   : > { %998 = vmatpush2.bf16.msra.mxu0 %v1449_v40 }
  0x97   : > { %1000 = vmatmul.mubr.bf16.vlgmr.msra.gmra.mxu0 %v1173_v41 }
 0x117   : > { %v919_v42 = vpop.f32.mrf.mxu0 }
 0x118   : > { %v960_v43 = vpop.f32.mrf.mxu1 }
 0x119   : > { %v921_v44 = vpop.f32.mrf.mxu0  ;;  %v961_v50 = vadd.f32 %v960_v43, %v919_v42 }
 0x11a   : > { %v962_v45 = vpop.f32.mrf.mxu1 }
 0x11b   : > { %v923_v46 = vpop.f32.mrf.mxu0  ;;  %v963_v53 = vadd.f32 %v962_v45, %v921_v44 }
 0x11c   : > { %v964_v47 = vpop.f32.mrf.mxu1 }
 0x11d   : > { %v924_v48 = vpop.f32.mrf.mxu0 }
 0x11e   : > { %v965_v49 = vpop.f32.mrf.mxu1 }
 0x157   : > { %v1001_v52 = vpop.f32.mrf.mxu0 }
 0x158   : > { %v1002_v54 = vadd.f32 %v1001_v52, %v961_v50 }
 0x159   : > { %v1003_v56 = vpop.f32.mrf.mxu0 }
 0x15a   : > { %v1008_v57 = vadd.f32 %v1002_v54, %v283_v51  ;;  %v1004_v58 = vadd.f32 %v1003_v56, %v963_v53  ;;  %1015 = sbr.rel (%p1271_p7) target bundleno = 366 (0x16e), region = 40 }
 0x15b   : > { %v1005_v59 = vpop.f32.mrf.mxu0 }
 0x15c   : > { %1010 = vst [vmem:[#allocation2] sm:$0xff] %v1008_v57  ;;  %v1009_v60 = vadd.f32 %v1004_v58, %v284_v55 }
 0x15d   : > { %v1006_v61 = vpop.f32.mrf.mxu0 }
 0x15e   : > { %1011 = vst [vmem:[#allocation2 + $0x8] sm:$0xff] %v1009_v60 }
 0x15f   : > { %v1020_v62 = vlaneseq  ;;  %v1018_v0 = vld [vmem:[%s1655_s2] sm:$0x3] }
 0x161   : > { %v1021_v63 = vshrl.u32 %v1020_v62, 7 }
 0x163   : > { %v1022_v1 = vsub.s32 0, %v1021_v63  ;;  %v1026_v2 = vsub.s32 1, %v1021_v63  ;;  %v1016_v3 = vld [vmem:[#allocation2] sm:$0xff] }
 0x165   : > { %v1017_v4 = vld [vmem:[#allocation2 + $0x8] sm:$0xff]  ;;  %v1023_v5 = vrot.slane %v1018_v0, %v1022_v1  ;;  %v1027_v6 = vrot.slane %v1018_v0, %v1026_v2 }
 0x167   : > { %v1030_v7 = vadd.f32 %v1023_v5, %v1016_v3  ;;  %v1031_v8 = vadd.f32 %v1027_v6, %v1017_v4 }
 0x169   : > { %v1032_v9 = vmax.f32 %v1030_v7, 0.0  ;;  %v1033_v10 = vmax.f32 %v1031_v8, 0.0 }
 0x16b   : > { %v1278_v11 = vpack.c.bf16 %v1033_v10, %v1032_v9 }
 0x16d   : > { %1042 = vst [vmem:[%s1656_s3] sm:$0xff] %v1278_v11 }
 0x16e PF: > { %s13_s14 = sadd.s32 1, %s1476_s14   ;;  %s1657_s12 = smov %s1472_s13 }
 0x16f   : > { %p10_p8 = scmp.ge.s32.totalorder %s13_s14, 5   ;;  %s1658_s13 = smov %s1660_s15 }
 0x171   :  { %12 = sbr.rel (!%p10_p8) target bundleno = 2 (0x2), region = 76 }

// kernel: resnet18_forward.39
= control target key start
LH: loop header
LB: loop body
LE: loop exit
PB: predicated region body
PF: predicated region fallthrough
CT: control target
= control target key end

     0   :  { %s969_s12 = smov 0   ;;  %s971_s13 = smov 0   ;;  %s1148_s0 = inlined_call_operand.vmem [shape: bf16[8,256], index: 0, kind: input, shape index: {}]   ;;  %s1149_s1 = inlined_call_operand.vmem [shape: bf16[256,512], index: 1, kind: input, shape index: {}]   ;;  %s1150_s2 = inlined_call_operand.vmem [shape: f32[1,512], index: 2, kind: input, shape index: {}]   ;;  %s1151_s3 = inlined_call_operand.vmem [shape: bf16[8,512], index: 3, kind: output, shape index: {}]  }
   0x1   :  { %s973_s14 = smov 0   ;;  %s975_s15 = smov 0  }
   0x2   :  { %s977_s16 = smov 0  }
   0x3 LB: > { %s22_s17 = sadd.s32 1, %s943_s15  ;;  %p65_p1 = scmp.ne.s32.totalorder %s935_s13, %s931_s12  ;;  %s947_s16 = sphi %s977_s16, %s13_s16   ;;  %s943_s15 = sphi %s975_s15, %s1155_s15   ;;  %s939_s14 = sphi %s973_s14, %s1154_s14   ;;  %s935_s13 = sphi %s971_s13, %s1153_s13   ;;  %s931_s12 = sphi %s969_s12, %s1152_s12  }
   0x4   : > { %p23_p0 = scmp.ge.s32.totalorder %s22_s17, 2  ;;  %p66_p2 = scmp.eq.s32.totalorder %s947_s16, 0 }
   0x5   : > { %s58_s19 = sadd.s32 1, %s935_s13  ;;  %p771_p5 = scmp.ge.s32.totalorder %s947_s16, 2 }
   0x6   : > { %s1157_s17 = smov (%p23_p0, %s22_s17), 0  ;;  %p67_p3 = por %p66_p2, %p65_p1 }
   0x7   : > { %s55_s18 = ssub.s32 %s943_s15, %s1157_s17  ;;  %153 = sbr.rel (%p771_p5) target bundleno = 32 (0x20), region = 20 }
   0x8   : > { %p56_p4 = scmp.eq.s32.totalorder %s55_s18, 0 }
   0xa   : > { %s1004_s20 = scalar_select %p56_p4, %s935_s13, %s58_s19  }
   0xc   : > { %156 = sbr.rel (!%p67_p3) target bundleno = 32 (0x20), region = 24  ;;  %s158_s21 = sand.u32 (%p67_p3), 1, %s935_s13  }
   0xd   : > { %s817_s22 = sshll.u32 (%p67_p3), %s943_s15, 3  ;;  %s772_s23 = sshll.u32 (%p67_p3), %s158_s21, 8 }
   0xe   : > { %s1012_s26 = scalar_lea.vmem (%p67_p3), %s1149_s1, %s817_s22  ;;  %s1017_s27 = scalar_lea.vmem (%p67_p3), [#allocation2], %s772_s23 }
   0xf   : > { %v254_v0 = vld [vmem:[%s1012_s26] sm:$0xff] (%p67_p3)  ;;  %v256_v1 = vld [vmem:[%s1012_s26 + $0x10] sm:$0xff] (%p67_p3) }
  0x10   : > { %v258_v2 = vld [vmem:[%s1012_s26 + $0x20] sm:$0xff] (%p67_p3)  ;;  %255 = vst [vmem:[%s1017_s27] sm:$0xff] (%p67_p3), %v254_v0  ;;  %257 = vst [vmem:[%s1017_s27 + $0x8] sm:$0xff] (%p67_p3), %v256_v1  ;;  %v260_v3 = vld [vmem:[%s1012_s26 + $0x30] sm:$0xff] (%p67_p3) }
  0x11   : > { %259 = vst [vmem:[%s1017_s27 + $0x10] sm:$0xff] %v258_v2  ;;  %v262_v4 = vld [vmem:[%s1012_s26 + $0x40] sm:$0xff]  ;;  %v264_v5 = vld [vmem:[%s1012_s26 + $0x50] sm:$0xff]  ;;  %261 = vst [vmem:[%s1017_s27 + $0x18] sm:$0xff] %v260_v3 }
  0x12   : > { %263 = vst [vmem:[%s1017_s27 + $0x20] sm:$0xff] %v262_v4  ;;  %265 = vst [vmem:[%s1017_s27 + $0x28] sm:$0xff] %v264_v5  ;;  %v266_v6 = vld [vmem:[%s1012_s26 + $0x60] sm:$0xff]  ;;  %v268_v7 = vld [vmem:[%s1012_s26 + $0x70] sm:$0xff] }
  0x13   : > { %v270_v8 = vld [vmem:[%s1012_s26 + $0x80] sm:$0xff]  ;;  %267 = vst [vmem:[%s1017_s27 + $0x30] sm:$0xff] %v266_v6  ;;  %269 = vst [vmem:[%s1017_s27 + $0x38] sm:$0xff] %v268_v7  ;;  %v272_v9 = vld [vmem:[%s1012_s26 + $0x90] sm:$0xff] }
  0x14   : > { %271 = vst [vmem:[%s1017_s27 + $0x40] sm:$0xff] %v270_v8  ;;  %v274_v10 = vld [vmem:[%s1012_s26 + $0xa0] sm:$0xff]  ;;  %v276_v11 = vld [vmem:[%s1012_s26 + $0xb0] sm:$0xff]  ;;  %273 = vst [vmem:[%s1017_s27 + $0x48] sm:$0xff] %v272_v9 }
  0x15   : > { %275 = vst [vmem:[%s1017_s27 + $0x50] sm:$0xff] %v274_v10  ;;  %277 = vst [vmem:[%s1017_s27 + $0x58] sm:$0xff] %v276_v11  ;;  %v278_v12 = vld [vmem:[%s1012_s26 + $0xc0] sm:$0xff]  ;;  %v280_v13 = vld [vmem:[%s1012_s26 + $0xd0] sm:$0xff] }
  0x16   : > { %v282_v14 = vld [vmem:[%s1012_s26 + $0xe0] sm:$0xff]  ;;  %279 = vst [vmem:[%s1017_s27 + $0x60] sm:$0xff] %v278_v12  ;;  %281 = vst [vmem:[%s1017_s27 + $0x68] sm:$0xff] %v280_v13  ;;  %v284_v15 = vld [vmem:[%s1012_s26 + $0xf0] sm:$0xff] }
  0x17   : > { %283 = vst [vmem:[%s1017_s27 + $0x70] sm:$0xff] %v282_v14  ;;  %v286_v16 = vld [vmem:[%s1012_s26 + $0x100] sm:$0xff]  ;;  %v288_v17 = vld [vmem:[%s1012_s26 + $0x110] sm:$0xff]  ;;  %285 = vst [vmem:[%s1017_s27 + $0x78] sm:$0xff] %v284_v15 }
  0x18   : > { %287 = vst [vmem:[%s1017_s27 + $0x80] sm:$0xff] %v286_v16  ;;  %289 = vst [vmem:[%s1017_s27 + $0x88] sm:$0xff] %v288_v17  ;;  %v290_v18 = vld [vmem:[%s1012_s26 + $0x120] sm:$0xff]  ;;  %v292_v19 = vld [vmem:[%s1012_s26 + $0x130] sm:$0xff] }
  0x19   : > { %v294_v20 = vld [vmem:[%s1012_s26 + $0x140] sm:$0xff]  ;;  %291 = vst [vmem:[%s1017_s27 + $0x90] sm:$0xff] %v290_v18  ;;  %293 = vst [vmem:[%s1017_s27 + $0x98] sm:$0xff] %v292_v19  ;;  %v296_v21 = vld [vmem:[%s1012_s26 + $0x150] sm:$0xff] }
  0x1a   : > { %295 = vst [vmem:[%s1017_s27 + $0xa0] sm:$0xff] %v294_v20  ;;  %v298_v22 = vld [vmem:[%s1012_s26 + $0x160] sm:$0xff]  ;;  %v300_v23 = vld [vmem:[%s1012_s26 + $0x170] sm:$0xff]  ;;  %297 = vst [vmem:[%s1017_s27 + $0xa8] sm:$0xff] %v296_v21 }
  0x1b   : > { %299 = vst [vmem:[%s1017_s27 + $0xb0] sm:$0xff] %v298_v22  ;;  %301 = vst [vmem:[%s1017_s27 + $0xb8] sm:$0xff] %v300_v23  ;;  %v302_v24 = vld [vmem:[%s1012_s26 + $0x180] sm:$0xff]  ;;  %v304_v25 = vld [vmem:[%s1012_s26 + $0x190] sm:$0xff] }
  0x1c   : > { %v306_v26 = vld [vmem:[%s1012_s26 + $0x1a0] sm:$0xff]  ;;  %303 = vst [vmem:[%s1017_s27 + $0xc0] sm:$0xff] %v302_v24  ;;  %305 = vst [vmem:[%s1017_s27 + $0xc8] sm:$0xff] %v304_v25  ;;  %v308_v27 = vld [vmem:[%s1012_s26 + $0x1b0] sm:$0xff] }
  0x1d   : > { %307 = vst [vmem:[%s1017_s27 + $0xd0] sm:$0xff] %v306_v26  ;;  %v310_v28 = vld [vmem:[%s1012_s26 + $0x1c0] sm:$0xff]  ;;  %v312_v29 = vld [vmem:[%s1012_s26 + $0x1d0] sm:$0xff]  ;;  %309 = vst [vmem:[%s1017_s27 + $0xd8] sm:$0xff] %v308_v27 }
  0x1e   : > { %311 = vst [vmem:[%s1017_s27 + $0xe0] sm:$0xff] %v310_v28  ;;  %313 = vst [vmem:[%s1017_s27 + $0xe8] sm:$0xff] %v312_v29  ;;  %v314_v30 = vld [vmem:[%s1012_s26 + $0x1e0] sm:$0xff]  ;;  %v316_v31 = vld [vmem:[%s1012_s26 + $0x1f0] sm:$0xff] }
  0x1f   : > { %315 = vst [vmem:[%s1017_s27 + $0xf0] sm:$0xff] %v314_v30  ;;  %317 = vst [vmem:[%s1017_s27 + $0xf8] sm:$0xff] %v316_v31 }
  0x20 PF: > { %p775_p6 = scmp.ge.s32.totalorder %s947_s16, 1  ;;  %p330_p7 = scmp.lt.s32.totalorder %s947_s16, 3 }
  0x22   : > { %p331_p8 = pnand %p775_p6, %p330_p7 }
  0x23   : > { %s337_s28 = sand.u32 (!%p331_p8), 1, %s931_s12   ;;  %s777_s6 = sshll.u32 (!%p331_p8), %s939_s14, 1 }
  0x24   : > { %334 = sbr.rel (%p331_p8) target bundleno = 306 (0x132), region = 66  ;;  %s776_s4 = sshll.u32 (!%p331_p8), %s337_s28, 8 }
  0x25   : > { %s1090_s5 = scalar_lea.vmem (!%p331_p8), [#allocation2], %s776_s4  ;;  %p380_p9 = scmp.lt.s32.totalorder (!%p331_p8), %s777_s6, 3 }
  0x29   : > { %v1086_v32 = vld [vmem:[%s1148_s0] sm:$0xff]  ;;  %v859_v34 = vld [vmem:[%s1090_s5 + $0x74] ss:$8 sps:$4 sm:$0xff]   ;;  %v861_v35 = vld [vmem:[%s1090_s5 + $0x70] ss:$8 sps:$4 sm:$0xff]   ;;  %v429_v3 = vlaneseq  ;;  %s1159_s6 = smov (!%p380_p9, %s777_s6), 3 }
  0x2a   : > { %v781_v33 = vcombine.high %v1086_v32, %v1086_v32  ;;  %606 = vmatprep.subr.bf16.mxu0 %v859_v34  ;;  %v862_v36 = vld [vmem:[%s1090_s5 + $0x64] ss:$8 sps:$4 sm:$0xff]   ;;  %v864_v37 = vld [vmem:[%s1090_s5 + $0x60] ss:$8 sps:$4 sm:$0xff]   ;;  %v865_v38 = vld [vmem:[%s1090_s5 + $0x54] ss:$8 sps:$4 sm:$0xff]   ;;  %v780_v2 = vcombine.low %v1086_v32, %v1086_v32  ;;  %s382_s9 = scalar_lea.vmem %s1150_s2, %s1159_s6 }
  0x2b   : > { %607 = vmatpush1.bf16.msra.mxu0 %v861_v35  ;;  %v867_v39 = vld [vmem:[%s1090_s5 + $0x50] ss:$8 sps:$4 sm:$0xff]   ;;  %v868_v40 = vld [vmem:[%s1090_s5 + $0x44] ss:$8 sps:$4 sm:$0xff]   ;;  %v870_v41 = vld [vmem:[%s1090_s5 + $0x40] ss:$8 sps:$4 sm:$0xff]  }
  0x2c   : > { %638 = vmatprep.mubr.bf16.mxu0 %v781_v33  ;;  %608 = vmatprep.subr.bf16.mxu0 %v862_v36  ;;  %v871_v42 = vld [vmem:[%s1090_s5 + $0x34] ss:$8 sps:$4 sm:$0xff]   ;;  %v873_v43 = vld [vmem:[%s1090_s5 + $0x30] ss:$8 sps:$4 sm:$0xff]   ;;  %v874_v44 = vld [vmem:[%s1090_s5 + $0x24] ss:$8 sps:$4 sm:$0xff]  }
  0x2d   : > { %v876_v45 = vld [vmem:[%s1090_s5 + $0x20] ss:$8 sps:$4 sm:$0xff]   ;;  %v877_v46 = vld [vmem:[%s1090_s5 + $0x14] ss:$8 sps:$4 sm:$0xff]   ;;  %v879_v47 = vld [vmem:[%s1090_s5 + $0x10] ss:$8 sps:$4 sm:$0xff]  }
  0x2e   : > { %v880_v48 = vld [vmem:[%s1090_s5 + $0x4] ss:$8 sps:$4 sm:$0xff]   ;;  %v882_v49 = vld [vmem:[%s1090_s5] ss:$8 sps:$4 sm:$0xff]   ;;  %v883_v50 = vld [vmem:[%s1090_s5 + $0xf4] ss:$8 sps:$4 sm:$0xff]  }
  0x2f   : > { %609 = vmatpush1.bf16.msra.mxu0 %v864_v37  ;;  %v885_v51 = vld [vmem:[%s1090_s5 + $0xf0] ss:$8 sps:$4 sm:$0xff]   ;;  %v886_v52 = vld [vmem:[%s1090_s5 + $0xe4] ss:$8 sps:$4 sm:$0xff]   ;;  %v888_v53 = vld [vmem:[%s1090_s5 + $0xe0] ss:$8 sps:$4 sm:$0xff]  }
  0x30   : > { %610 = vmatprep.subr.bf16.mxu0 %v865_v38  ;;  %v889_v54 = vld [vmem:[%s1090_s5 + $0xd4] ss:$8 sps:$4 sm:$0xff]   ;;  %v891_v55 = vld [vmem:[%s1090_s5 + $0xd0] ss:$8 sps:$4 sm:$0xff]   ;;  %v892_v56 = vld [vmem:[%s1090_s5 + $0xc4] ss:$8 sps:$4 sm:$0xff]  }
  0x31   : > { %v894_v57 = vld [vmem:[%s1090_s5 + $0xc0] ss:$8 sps:$4 sm:$0xff]   ;;  %v895_v58 = vld [vmem:[%s1090_s5 + $0xb4] ss:$8 sps:$4 sm:$0xff]   ;;  %v897_v59 = vld [vmem:[%s1090_s5 + $0xb0] ss:$8 sps:$4 sm:$0xff]  }
  0x32   : > { %v898_v60 = vld [vmem:[%s1090_s5 + $0xa4] ss:$8 sps:$4 sm:$0xff]   ;;  %v900_v61 = vld [vmem:[%s1090_s5 + $0xa0] ss:$8 sps:$4 sm:$0xff]   ;;  %v901_v62 = vld [vmem:[%s1090_s5 + $0x94] ss:$8 sps:$4 sm:$0xff]  }
  0x33   : > { %611 = vmatpush1.bf16.msra.mxu0 %v867_v39  ;;  %v903_v63 = vld [vmem:[%s1090_s5 + $0x90] ss:$8 sps:$4 sm:$0xff]   ;;  %v904_v0 = vld [vmem:[%s1090_s5 + $0x84] ss:$8 sps:$4 sm:$0xff]   ;;  %v906_v1 = vld [vmem:[%s1090_s5 + $0x80] ss:$8 sps:$4 sm:$0xff]  }
  0x34   : > { %612 = vmatprep.subr.bf16.mxu0 %v868_v40  ;;  %v430_v4 = vshrl.u32 %v429_v3, 7  ;;  %v427_v7 = vld [vmem:[%s382_s9] sm:$0x3]  ;;  %s779_s10 = sshll.u32 %s1159_s6, 2 }
  0x35   : > { %s392_s14 = scalar_lea.vmem %s1151_s3, %s779_s10 }
  0x36   : > { %v431_v5 = vsub.s32 0, %v430_v4  ;;  %v435_v6 = vsub.s32 1, %v430_v4 }
  0x37   : > { %613 = vmatpush1.bf16.msra.mxu0 %v870_v41 }
  0x38   : > { %614 = vmatprep.subr.bf16.mxu0 %v871_v42  ;;  %v432_v8 = vrot.slane %v427_v7, %v431_v5  ;;  %v436_v9 = vrot.slane %v427_v7, %v435_v6 }
  0x3b   : > { %615 = vmatpush1.bf16.msra.mxu0 %v873_v43 }
  0x3c   : > { %616 = vmatprep.subr.bf16.mxu0 %v874_v44 }
  0x3f   : > { %617 = vmatpush1.bf16.msra.mxu0 %v876_v45 }
  0x40   : > { %618 = vmatprep.subr.bf16.mxu0 %v877_v46 }
  0x43   : > { %619 = vmatpush1.bf16.msra.mxu0 %v879_v47 }
  0x44   : > { %620 = vmatprep.subr.bf16.mxu0 %v880_v48 }
  0x47   : > { %621 = vmatpush1.bf16.msra.mxu0 %v882_v49 }
  0x48   : > { %622 = vmatprep.subr.bf16.mxu0 %v883_v50 }
  0x4b   : > { %623 = vmatpush2.bf16.msra.mxu0 %v885_v51 }
  0x4c   : > { %624 = vmatprep.subr.bf16.mxu0 %v886_v52 }
  0x4f   : > { %625 = vmatpush2.bf16.msra.mxu0 %v888_v53 }
  0x50   : > { %626 = vmatprep.subr.bf16.mxu0 %v889_v54 }
  0x53   : > { %627 = vmatpush2.bf16.msra.mxu0 %v891_v55 }
  0x54   : > { %628 = vmatprep.subr.bf16.mxu0 %v892_v56 }
  0x57   : > { %629 = vmatpush2.bf16.msra.mxu0 %v894_v57 }
  0x58   : > { %630 = vmatprep.subr.bf16.mxu0 %v895_v58 }
  0x5b   : > { %631 = vmatpush2.bf16.msra.mxu0 %v897_v59 }
  0x5c   : > { %632 = vmatprep.subr.bf16.mxu0 %v898_v60 }
  0x5f   : > { %633 = vmatpush2.bf16.msra.mxu0 %v900_v61 }
  0x60   : > { %634 = vmatprep.subr.bf16.mxu0 %v901_v62 }
  0x63   : > { %635 = vmatpush2.bf16.msra.mxu0 %v903_v63 }
  0x64   : > { %636 = vmatprep.subr.bf16.mxu0 %v904_v0 }
  0x67   : > { %637 = vmatpush2.bf16.msra.mxu0 %v906_v1 }
  0x6a   : > { %639 = vmatmul.mubr.bf16.vlgmr.msra.gmra.mxu0 %v780_v2 }
 0x12a   : > { %v640_v10 = vpop.f32.mrf.mxu0 }
 0x12b   : > { %v641_v12 = vadd.f32 %v640_v10, %v432_v8 }
 0x12c   : > { %v642_v11 = vpop.f32.mrf.mxu0 }
 0x12d   : > { %v643_v13 = vadd.f32 %v642_v11, %v436_v9 }
 0x12e   : > { %v644_v14 = vpop.f32.mrf.mxu0 }
 0x12f   : > { %v818_v15 = vpack.c.bf16 %v643_v13, %v641_v12 }
 0x130   : > { %v645_v16 = vpop.f32.mrf.mxu0 }
 0x131   : > { %655 = vst [vmem:[%s392_s14] sm:$0xff] %v818_v15 }
 0x132 PF: > { %s13_s16 = sadd.s32 1, %s947_s16   ;;  %s1152_s12 = smov %s935_s13 }
 0x133   : > { %p10_p10 = scmp.ge.s32.totalorder %s13_s16, 4   ;;  %s1153_s13 = smov %s1004_s20 }
 0x134   : > { %s1154_s14 = smov %s943_s15  ;;  %s1155_s15 = smov %s1157_s17 }
 0x135   :  { %12 = sbr.rel (!%p10_p10) target bundleno = 3 (0x3), region = 111 }

// kernel: resnet18_forward.38
= control target key start
LH: loop header
LB: loop body
LE: loop exit
PB: predicated region body
PF: predicated region fallthrough
CT: control target
= control target key end

     0   :  { %s1975_s12 = smov 0   ;;  %s1977_s13 = smov 0   ;;  %s2389_s0 = inlined_call_operand.vmem [shape: bf16[8,2304], index: 0, kind: input, shape index: {}]   ;;  %s2390_s1 = inlined_call_operand.vmem [shape: bf16[2304,512], index: 1, kind: input, shape index: {}]   ;;  %s2391_s2 = inlined_call_operand.vmem [shape: f32[1,512], index: 2, kind: input, shape index: {}]   ;;  %s2392_s3 = inlined_call_operand.vmem [shape: bf16[8,512], index: 3, kind: output, shape index: {}]  }
   0x1   :  { %s1979_s14 = smov 0   ;;  %s1981_s15 = smov 0  }
   0x2   :  { %s1983_s16 = smov 0   ;;  %s1985_s17 = smov 0  }
   0x3   :  { %s1987_s18 = smov 0  }
   0x4 LB: > { %s25_s19 = sadd.s32 1, %s1944_s16  ;;  %s28_s20 = sadd.s32 1, %s1948_s17  ;;  %s1952_s18 = sphi %s1987_s18, %s13_s18   ;;  %s1948_s17 = sphi %s1985_s17, %s2398_s17   ;;  %s1944_s16 = sphi %s1983_s16, %s2397_s16   ;;  %s1940_s15 = sphi %s1981_s15, %s2396_s15   ;;  %s1936_s14 = sphi %s1979_s14, %s2395_s14   ;;  %s1932_s13 = sphi %s1977_s13, %s2394_s13   ;;  %s1928_s12 = sphi %s1975_s12, %s2393_s12  }
   0x5   : > { %p26_p0 = scmp.ge.s32.totalorder %s25_s19, 3  ;;  %p76_p1 = scmp.ne.s32.totalorder %s1932_s13, %s1928_s12 }
   0x6   : > { %p77_p2 = scmp.eq.s32.totalorder %s1952_s18, 0  ;;  %s69_s24 = sadd.s32 1, %s1932_s13 }
   0x7   : > { %s2400_s19 = smov (%p26_p0, %s25_s19), 0  ;;  %s2402_s20 = smov (!%p26_p0, %s28_s20), %s1948_s17 }
   0x8   : > { %p78_p3 = por %p77_p2, %p76_p1  ;;  %p30_p4 = scmp.ge.s32.totalorder %s2402_s20, 2 }
   0x9   : > { %s64_s21 = ssub.s32 %s1944_s16, %s2400_s19  ;;  %p1571_p6 = scmp.ge.s32.totalorder %s1952_s18, 6 }
   0xa   : > { %s2404_s20 = smov (%p30_p4, %s2402_s20), 0 }
   0xb   : > { %s65_s22 = ssub.s32 %s1948_s17, %s2404_s20  ;;  %156 = sbr.rel (%p1571_p6) target bundleno = 72 (0x48), region = 16 }
   0xc   : > { %s66_s23 = sor.u32 %s65_s22, %s64_s21 }
   0xd   : > { %p67_p5 = scmp.eq.s32.totalorder %s66_s23, 0 }
   0xf   : > { %s2026_s25 = scalar_select %p67_p5, %s1932_s13, %s69_s24  }
  0x10   : > { %172 = sbr.rel (!%p78_p3) target bundleno = 72 (0x48), region = 24  ;;  %s174_s26 = sand.u32 (%p78_p3), 1, %s1932_s13  }
  0x11   : > { %s1689_s27 = smul.u32 (%p78_p3), 768, %s174_s26  ;;  %s1572_s28 = sshll.u32 (%p78_p3), %s1948_s17, 1 }
  0x12   : > { %s1687_s29 = smul.u32 (%p78_p3), 384, %s1944_s16 }
  0x13   : > { %s2040_s8 = scalar_lea.vmem (%p78_p3), [#allocation3], %s1689_s27 }
  0x14   : > { %s180_s30 = sadd.s32 (%p78_p3), %s1687_s29, %s1572_s28 }
  0x15   : > { %s1574_s4 = sshll.u32 %s180_s30, 2 }
  0x16   : > { %s2035_s7 = scalar_lea.vmem %s2390_s1, %s1574_s4 }
  0x17   : > { %v401_v0 = vld [vmem:[%s2035_s7] sm:$0xff]  ;;  %v403_v1 = vld [vmem:[%s2035_s7 + $0x10] sm:$0xff] }
  0x18   : > { %v405_v2 = vld [vmem:[%s2035_s7 + $0x20] sm:$0xff]  ;;  %402 = vst [vmem:[%s2040_s8] sm:$0xff] %v401_v0  ;;  %404 = vst [vmem:[%s2040_s8 + $0x8] sm:$0xff] %v403_v1  ;;  %v407_v3 = vld [vmem:[%s2035_s7 + $0x30] sm:$0xff] }
  0x19   : > { %406 = vst [vmem:[%s2040_s8 + $0x10] sm:$0xff] %v405_v2  ;;  %v409_v4 = vld [vmem:[%s2035_s7 + $0x40] sm:$0xff]  ;;  %v411_v5 = vld [vmem:[%s2035_s7 + $0x50] sm:$0xff]  ;;  %408 = vst [vmem:[%s2040_s8 + $0x18] sm:$0xff] %v407_v3 }
  0x1a   : > { %410 = vst [vmem:[%s2040_s8 + $0x20] sm:$0xff] %v409_v4  ;;  %412 = vst [vmem:[%s2040_s8 + $0x28] sm:$0xff] %v411_v5  ;;  %v413_v6 = vld [vmem:[%s2035_s7 + $0x60] sm:$0xff]  ;;  %v415_v7 = vld [vmem:[%s2035_s7 + $0x70] sm:$0xff] }
  0x1b   : > { %v417_v8 = vld [vmem:[%s2035_s7 + $0x80] sm:$0xff]  ;;  %414 = vst [vmem:[%s2040_s8 + $0x30] sm:$0xff] %v413_v6  ;;  %416 = vst [vmem:[%s2040_s8 + $0x38] sm:$0xff] %v415_v7  ;;  %v419_v9 = vld [vmem:[%s2035_s7 + $0x90] sm:$0xff] }
  0x1c   : > { %418 = vst [vmem:[%s2040_s8 + $0x40] sm:$0xff] %v417_v8  ;;  %v421_v10 = vld [vmem:[%s2035_s7 + $0xa0] sm:$0xff]  ;;  %v423_v11 = vld [vmem:[%s2035_s7 + $0xb0] sm:$0xff]  ;;  %420 = vst [vmem:[%s2040_s8 + $0x48] sm:$0xff] %v419_v9 }
  0x1d   : > { %422 = vst [vmem:[%s2040_s8 + $0x50] sm:$0xff] %v421_v10  ;;  %424 = vst [vmem:[%s2040_s8 + $0x58] sm:$0xff] %v423_v11  ;;  %v425_v12 = vld [vmem:[%s2035_s7 + $0xc0] sm:$0xff]  ;;  %v427_v13 = vld [vmem:[%s2035_s7 + $0xd0] sm:$0xff] }
  0x1e   : > { %v429_v14 = vld [vmem:[%s2035_s7 + $0xe0] sm:$0xff]  ;;  %426 = vst [vmem:[%s2040_s8 + $0x60] sm:$0xff] %v425_v12  ;;  %428 = vst [vmem:[%s2040_s8 + $0x68] sm:$0xff] %v427_v13  ;;  %v431_v15 = vld [vmem:[%s2035_s7 + $0xf0] sm:$0xff] }
  0x1f   : > { %430 = vst [vmem:[%s2040_s8 + $0x70] sm:$0xff] %v429_v14  ;;  %v433_v16 = vld [vmem:[%s2035_s7 + $0x100] sm:$0xff]  ;;  %v435_v17 = vld [vmem:[%s2035_s7 + $0x110] sm:$0xff]  ;;  %432 = vst [vmem:[%s2040_s8 + $0x78] sm:$0xff] %v431_v15 }
  0x20   : > { %434 = vst [vmem:[%s2040_s8 + $0x80] sm:$0xff] %v433_v16  ;;  %436 = vst [vmem:[%s2040_s8 + $0x88] sm:$0xff] %v435_v17  ;;  %v437_v18 = vld [vmem:[%s2035_s7 + $0x120] sm:$0xff]  ;;  %v439_v19 = vld [vmem:[%s2035_s7 + $0x130] sm:$0xff] }
  0x21   : > { %v441_v20 = vld [vmem:[%s2035_s7 + $0x140] sm:$0xff]  ;;  %438 = vst [vmem:[%s2040_s8 + $0x90] sm:$0xff] %v437_v18  ;;  %440 = vst [vmem:[%s2040_s8 + $0x98] sm:$0xff] %v439_v19  ;;  %v443_v21 = vld [vmem:[%s2035_s7 + $0x150] sm:$0xff] }
  0x22   : > { %442 = vst [vmem:[%s2040_s8 + $0xa0] sm:$0xff] %v441_v20  ;;  %v445_v22 = vld [vmem:[%s2035_s7 + $0x160] sm:$0xff]  ;;  %v447_v23 = vld [vmem:[%s2035_s7 + $0x170] sm:$0xff]  ;;  %444 = vst [vmem:[%s2040_s8 + $0xa8] sm:$0xff] %v443_v21 }
  0x23   : > { %446 = vst [vmem:[%s2040_s8 + $0xb0] sm:$0xff] %v445_v22  ;;  %448 = vst [vmem:[%s2040_s8 + $0xb8] sm:$0xff] %v447_v23  ;;  %v449_v24 = vld [vmem:[%s2035_s7 + $0x180] sm:$0xff]  ;;  %v451_v25 = vld [vmem:[%s2035_s7 + $0x190] sm:$0xff] }
  0x24   : > { %v453_v26 = vld [vmem:[%s2035_s7 + $0x1a0] sm:$0xff]  ;;  %450 = vst [vmem:[%s2040_s8 + $0xc0] sm:$0xff] %v449_v24  ;;  %452 = vst [vmem:[%s2040_s8 + $0xc8] sm:$0xff] %v451_v25  ;;  %v455_v27 = vld [vmem:[%s2035_s7 + $0x1b0] sm:$0xff] }
  0x25   : > { %454 = vst [vmem:[%s2040_s8 + $0xd0] sm:$0xff] %v453_v26  ;;  %v457_v28 = vld [vmem:[%s2035_s7 + $0x1c0] sm:$0xff]  ;;  %v459_v29 = vld [vmem:[%s2035_s7 + $0x1d0] sm:$0xff]  ;;  %456 = vst [vmem:[%s2040_s8 + $0xd8] sm:$0xff] %v455_v27 }
  0x26   : > { %458 = vst [vmem:[%s2040_s8 + $0xe0] sm:$0xff] %v457_v28  ;;  %460 = vst [vmem:[%s2040_s8 + $0xe8] sm:$0xff] %v459_v29  ;;  %v461_v30 = vld [vmem:[%s2035_s7 + $0x1e0] sm:$0xff]  ;;  %v463_v31 = vld [vmem:[%s2035_s7 + $0x1f0] sm:$0xff] }
  0x27   : > { %v465_v32 = vld [vmem:[%s2035_s7 + $0x200] sm:$0xff]  ;;  %462 = vst [vmem:[%s2040_s8 + $0xf0] sm:$0xff] %v461_v30  ;;  %464 = vst [vmem:[%s2040_s8 + $0xf8] sm:$0xff] %v463_v31  ;;  %v467_v33 = vld [vmem:[%s2035_s7 + $0x210] sm:$0xff] }
  0x28   : > { %466 = vst [vmem:[%s2040_s8 + $0x100] sm:$0xff] %v465_v32  ;;  %v469_v34 = vld [vmem:[%s2035_s7 + $0x220] sm:$0xff]  ;;  %v471_v35 = vld [vmem:[%s2035_s7 + $0x230] sm:$0xff]  ;;  %468 = vst [vmem:[%s2040_s8 + $0x108] sm:$0xff] %v467_v33 }
  0x29   : > { %470 = vst [vmem:[%s2040_s8 + $0x110] sm:$0xff] %v469_v34  ;;  %472 = vst [vmem:[%s2040_s8 + $0x118] sm:$0xff] %v471_v35  ;;  %v473_v36 = vld [vmem:[%s2035_s7 + $0x240] sm:$0xff]  ;;  %v475_v37 = vld [vmem:[%s2035_s7 + $0x250] sm:$0xff] }
  0x2a   : > { %v477_v38 = vld [vmem:[%s2035_s7 + $0x260] sm:$0xff]  ;;  %474 = vst [vmem:[%s2040_s8 + $0x120] sm:$0xff] %v473_v36  ;;  %476 = vst [vmem:[%s2040_s8 + $0x128] sm:$0xff] %v475_v37  ;;  %v479_v39 = vld [vmem:[%s2035_s7 + $0x270] sm:$0xff] }
  0x2b   : > { %478 = vst [vmem:[%s2040_s8 + $0x130] sm:$0xff] %v477_v38  ;;  %v481_v40 = vld [vmem:[%s2035_s7 + $0x280] sm:$0xff]  ;;  %v483_v41 = vld [vmem:[%s2035_s7 + $0x290] sm:$0xff]  ;;  %480 = vst [vmem:[%s2040_s8 + $0x138] sm:$0xff] %v479_v39 }
  0x2c   : > { %482 = vst [vmem:[%s2040_s8 + $0x140] sm:$0xff] %v481_v40  ;;  %484 = vst [vmem:[%s2040_s8 + $0x148] sm:$0xff] %v483_v41  ;;  %v485_v42 = vld [vmem:[%s2035_s7 + $0x2a0] sm:$0xff]  ;;  %v487_v43 = vld [vmem:[%s2035_s7 + $0x2b0] sm:$0xff] }
  0x2d   : > { %v489_v44 = vld [vmem:[%s2035_s7 + $0x2c0] sm:$0xff]  ;;  %486 = vst [vmem:[%s2040_s8 + $0x150] sm:$0xff] %v485_v42  ;;  %488 = vst [vmem:[%s2040_s8 + $0x158] sm:$0xff] %v487_v43  ;;  %v491_v45 = vld [vmem:[%s2035_s7 + $0x2d0] sm:$0xff] }
  0x2e   : > { %490 = vst [vmem:[%s2040_s8 + $0x160] sm:$0xff] %v489_v44  ;;  %v493_v46 = vld [vmem:[%s2035_s7 + $0x2e0] sm:$0xff]  ;;  %v495_v47 = vld [vmem:[%s2035_s7 + $0x2f0] sm:$0xff]  ;;  %492 = vst [vmem:[%s2040_s8 + $0x168] sm:$0xff] %v491_v45 }
  0x2f   : > { %494 = vst [vmem:[%s2040_s8 + $0x170] sm:$0xff] %v493_v46  ;;  %496 = vst [vmem:[%s2040_s8 + $0x178] sm:$0xff] %v495_v47  ;;  %v497_v48 = vld [vmem:[%s2035_s7 + $0x300] sm:$0xff]  ;;  %v499_v49 = vld [vmem:[%s2035_s7 + $0x310] sm:$0xff] }
  0x30   : > { %v501_v50 = vld [vmem:[%s2035_s7 + $0x320] sm:$0xff]  ;;  %498 = vst [vmem:[%s2040_s8 + $0x180] sm:$0xff] %v497_v48  ;;  %500 = vst [vmem:[%s2040_s8 + $0x188] sm:$0xff] %v499_v49  ;;  %v503_v51 = vld [vmem:[%s2035_s7 + $0x330] sm:$0xff] }
  0x31   : > { %502 = vst [vmem:[%s2040_s8 + $0x190] sm:$0xff] %v501_v50  ;;  %v505_v52 = vld [vmem:[%s2035_s7 + $0x340] sm:$0xff]  ;;  %v507_v53 = vld [vmem:[%s2035_s7 + $0x350] sm:$0xff]  ;;  %504 = vst [vmem:[%s2040_s8 + $0x198] sm:$0xff] %v503_v51 }
  0x32   : > { %506 = vst [vmem:[%s2040_s8 + $0x1a0] sm:$0xff] %v505_v52  ;;  %508 = vst [vmem:[%s2040_s8 + $0x1a8] sm:$0xff] %v507_v53  ;;  %v509_v54 = vld [vmem:[%s2035_s7 + $0x360] sm:$0xff]  ;;  %v511_v55 = vld [vmem:[%s2035_s7 + $0x370] sm:$0xff] }
  0x33   : > { %v513_v56 = vld [vmem:[%s2035_s7 + $0x380] sm:$0xff]  ;;  %510 = vst [vmem:[%s2040_s8 + $0x1b0] sm:$0xff] %v509_v54  ;;  %512 = vst [vmem:[%s2040_s8 + $0x1b8] sm:$0xff] %v511_v55  ;;  %v515_v57 = vld [vmem:[%s2035_s7 + $0x390] sm:$0xff] }
  0x34   : > { %514 = vst [vmem:[%s2040_s8 + $0x1c0] sm:$0xff] %v513_v56  ;;  %v517_v58 = vld [vmem:[%s2035_s7 + $0x3a0] sm:$0xff]  ;;  %v519_v59 = vld [vmem:[%s2035_s7 + $0x3b0] sm:$0xff]  ;;  %516 = vst [vmem:[%s2040_s8 + $0x1c8] sm:$0xff] %v515_v57 }
  0x35   : > { %518 = vst [vmem:[%s2040_s8 + $0x1d0] sm:$0xff] %v517_v58  ;;  %520 = vst [vmem:[%s2040_s8 + $0x1d8] sm:$0xff] %v519_v59  ;;  %v521_v60 = vld [vmem:[%s2035_s7 + $0x3c0] sm:$0xff]  ;;  %v523_v61 = vld [vmem:[%s2035_s7 + $0x3d0] sm:$0xff] }
  0x36   : > { %v525_v62 = vld [vmem:[%s2035_s7 + $0x3e0] sm:$0xff]  ;;  %522 = vst [vmem:[%s2040_s8 + $0x1e0] sm:$0xff] %v521_v60  ;;  %524 = vst [vmem:[%s2040_s8 + $0x1e8] sm:$0xff] %v523_v61  ;;  %v527_v63 = vld [vmem:[%s2035_s7 + $0x3f0] sm:$0xff] }
  0x37   : > { %526 = vst [vmem:[%s2040_s8 + $0x1f0] sm:$0xff] %v525_v62  ;;  %v529_v0 = vld [vmem:[%s2035_s7 + $0x400] sm:$0xff]  ;;  %v531_v1 = vld [vmem:[%s2035_s7 + $0x410] sm:$0xff]  ;;  %528 = vst [vmem:[%s2040_s8 + $0x1f8] sm:$0xff] %v527_v63 }
  0x38   : > { %530 = vst [vmem:[%s2040_s8 + $0x200] sm:$0xff] %v529_v0  ;;  %532 = vst [vmem:[%s2040_s8 + $0x208] sm:$0xff] %v531_v1  ;;  %v533_v2 = vld [vmem:[%s2035_s7 + $0x420] sm:$0xff]  ;;  %v535_v3 = vld [vmem:[%s2035_s7 + $0x430] sm:$0xff] }
  0x39   : > { %v537_v4 = vld [vmem:[%s2035_s7 + $0x440] sm:$0xff]  ;;  %534 = vst [vmem:[%s2040_s8 + $0x210] sm:$0xff] %v533_v2  ;;  %536 = vst [vmem:[%s2040_s8 + $0x218] sm:$0xff] %v535_v3  ;;  %v539_v5 = vld [vmem:[%s2035_s7 + $0x450] sm:$0xff] }
  0x3a   : > { %538 = vst [vmem:[%s2040_s8 + $0x220] sm:$0xff] %v537_v4  ;;  %v541_v6 = vld [vmem:[%s2035_s7 + $0x460] sm:$0xff]  ;;  %v543_v7 = vld [vmem:[%s2035_s7 + $0x470] sm:$0xff]  ;;  %540 = vst [vmem:[%s2040_s8 + $0x228] sm:$0xff] %v539_v5 }
  0x3b   : > { %542 = vst [vmem:[%s2040_s8 + $0x230] sm:$0xff] %v541_v6  ;;  %544 = vst [vmem:[%s2040_s8 + $0x238] sm:$0xff] %v543_v7  ;;  %v545_v8 = vld [vmem:[%s2035_s7 + $0x480] sm:$0xff]  ;;  %v547_v9 = vld [vmem:[%s2035_s7 + $0x490] sm:$0xff] }
  0x3c   : > { %v549_v10 = vld [vmem:[%s2035_s7 + $0x4a0] sm:$0xff]  ;;  %546 = vst [vmem:[%s2040_s8 + $0x240] sm:$0xff] %v545_v8  ;;  %548 = vst [vmem:[%s2040_s8 + $0x248] sm:$0xff] %v547_v9  ;;  %v551_v11 = vld [vmem:[%s2035_s7 + $0x4b0] sm:$0xff] }
  0x3d   : > { %550 = vst [vmem:[%s2040_s8 + $0x250] sm:$0xff] %v549_v10  ;;  %v553_v12 = vld [vmem:[%s2035_s7 + $0x4c0] sm:$0xff]  ;;  %v555_v13 = vld [vmem:[%s2035_s7 + $0x4d0] sm:$0xff]  ;;  %552 = vst [vmem:[%s2040_s8 + $0x258] sm:$0xff] %v551_v11 }
  0x3e   : > { %554 = vst [vmem:[%s2040_s8 + $0x260] sm:$0xff] %v553_v12  ;;  %556 = vst [vmem:[%s2040_s8 + $0x268] sm:$0xff] %v555_v13  ;;  %v557_v14 = vld [vmem:[%s2035_s7 + $0x4e0] sm:$0xff]  ;;  %v559_v15 = vld [vmem:[%s2035_s7 + $0x4f0] sm:$0xff] }
  0x3f   : > { %v561_v16 = vld [vmem:[%s2035_s7 + $0x500] sm:$0xff]  ;;  %558 = vst [vmem:[%s2040_s8 + $0x270] sm:$0xff] %v557_v14  ;;  %560 = vst [vmem:[%s2040_s8 + $0x278] sm:$0xff] %v559_v15  ;;  %v563_v17 = vld [vmem:[%s2035_s7 + $0x510] sm:$0xff] }
  0x40   : > { %562 = vst [vmem:[%s2040_s8 + $0x280] sm:$0xff] %v561_v16  ;;  %v565_v18 = vld [vmem:[%s2035_s7 + $0x520] sm:$0xff]  ;;  %v567_v19 = vld [vmem:[%s2035_s7 + $0x530] sm:$0xff]  ;;  %564 = vst [vmem:[%s2040_s8 + $0x288] sm:$0xff] %v563_v17 }
  0x41   : > { %566 = vst [vmem:[%s2040_s8 + $0x290] sm:$0xff] %v565_v18  ;;  %568 = vst [vmem:[%s2040_s8 + $0x298] sm:$0xff] %v567_v19  ;;  %v569_v20 = vld [vmem:[%s2035_s7 + $0x540] sm:$0xff]  ;;  %v571_v21 = vld [vmem:[%s2035_s7 + $0x550] sm:$0xff] }
  0x42   : > { %v573_v22 = vld [vmem:[%s2035_s7 + $0x560] sm:$0xff]  ;;  %570 = vst [vmem:[%s2040_s8 + $0x2a0] sm:$0xff] %v569_v20  ;;  %572 = vst [vmem:[%s2040_s8 + $0x2a8] sm:$0xff] %v571_v21  ;;  %v575_v23 = vld [vmem:[%s2035_s7 + $0x570] sm:$0xff] }
  0x43   : > { %574 = vst [vmem:[%s2040_s8 + $0x2b0] sm:$0xff] %v573_v22  ;;  %v577_v24 = vld [vmem:[%s2035_s7 + $0x580] sm:$0xff]  ;;  %v579_v25 = vld [vmem:[%s2035_s7 + $0x590] sm:$0xff]  ;;  %576 = vst [vmem:[%s2040_s8 + $0x2b8] sm:$0xff] %v575_v23 }
  0x44   : > { %578 = vst [vmem:[%s2040_s8 + $0x2c0] sm:$0xff] %v577_v24  ;;  %580 = vst [vmem:[%s2040_s8 + $0x2c8] sm:$0xff] %v579_v25  ;;  %v581_v26 = vld [vmem:[%s2035_s7 + $0x5a0] sm:$0xff]  ;;  %v583_v27 = vld [vmem:[%s2035_s7 + $0x5b0] sm:$0xff] }
  0x45   : > { %v585_v28 = vld [vmem:[%s2035_s7 + $0x5c0] sm:$0xff]  ;;  %582 = vst [vmem:[%s2040_s8 + $0x2d0] sm:$0xff] %v581_v26  ;;  %584 = vst [vmem:[%s2040_s8 + $0x2d8] sm:$0xff] %v583_v27  ;;  %v587_v29 = vld [vmem:[%s2035_s7 + $0x5d0] sm:$0xff] }
  0x46   : > { %586 = vst [vmem:[%s2040_s8 + $0x2e0] sm:$0xff] %v585_v28  ;;  %v589_v30 = vld [vmem:[%s2035_s7 + $0x5e0] sm:$0xff]  ;;  %v591_v31 = vld [vmem:[%s2035_s7 + $0x5f0] sm:$0xff]  ;;  %588 = vst [vmem:[%s2040_s8 + $0x2e8] sm:$0xff] %v587_v29 }
  0x47   : > { %590 = vst [vmem:[%s2040_s8 + $0x2f0] sm:$0xff] %v589_v30  ;;  %592 = vst [vmem:[%s2040_s8 + $0x2f8] sm:$0xff] %v591_v31 }
  0x48 PF: > { %p1575_p7 = scmp.ge.s32.totalorder %s1952_s18, 1  ;;  %p605_p8 = scmp.lt.s32.totalorder %s1952_s18, 7 }
  0x4a   : > { %p606_p9 = pnand %p1575_p7, %p605_p8 }
  0x4b   : > { %s612_s9 = sand.u32 (!%p606_p9), 1, %s1928_s12   ;;  %s652_s10 = smul.u32 (!%p606_p9), 6, %s1936_s14 }
  0x4c   : > { %609 = sbr.rel (%p606_p9) target bundleno = 435 (0x1b3), region = 66  ;;  %s1577_s21 = sshll.u32 (!%p606_p9), %s1940_s15, 1 }
  0x4d   : > { %s1690_s11 = smul.u32 (!%p606_p9), 768, %s612_s9  ;;  %p655_p10 = scmp.lt.s32.totalorder (!%p606_p9), %s652_s10, 17 }
  0x4e   : > { %p665_p11 = scmp.lt.s32.totalorder (!%p606_p9), %s1577_s21, 3  ;;  %p1580_p12 = scmp.ne.s32.totalorder (!%p606_p9), %s1936_s14, 0 }
  0x4f   : > { %s2253_s5 = scalar_lea.vmem (!%p606_p9), [#allocation3], %s1690_s11 }
  0x51   : > { %s2406_s10 = smov (!%p655_p10, %s652_s10), 17  ;;  %s2408_s21 = smov (!%p665_p11, %s1577_s21), 3 }
  0x52   : > { %s1576_s22 = sshll.u32 %s2406_s10, 2  ;;  %s667_s12 = scalar_lea.vmem %s2391_s2, %s2408_s21 }
  0x53   : > { %s2241_s26 = scalar_lea.vmem %s2389_s0, %s1576_s22  ;;  %s1579_s29 = sshll.u32 %s2408_s21, 2 }
  0x54   : > { %s2251_s4 = scalar_lea.vmem %s2392_s3, %s1579_s29  ;;  %682 = sbr.rel (%p1580_p12) target bundleno = 91 (0x5b), region = 74 }
  0x59   : > { %v1954_v32 = vmov 0.0  }
  0x5a   : > { %683 = vst [vmem:[#allocation2] sm:$0xff] %v1954_v32  ;;  %684 = vst [vmem:[#allocation2 + $0x8] sm:$0xff] %v1954_v32 }
  0x5b PF: > { %v1748_v33 = vld [vmem:[%s2253_s5 + $0x74] ss:$8 sps:$4 sm:$0xff]   ;;  %v1752_v35 = vld [vmem:[%s2253_s5 + $0x70] ss:$8 sps:$4 sm:$0xff]   ;;  %v1754_v37 = vld [vmem:[%s2253_s5 + $0x64] ss:$8 sps:$4 sm:$0xff]  }
  0x5c   : > { %v1750_v34 = vld [vmem:[%s2253_s5 + $0x174] ss:$8 sps:$4 sm:$0xff]   ;;  %1287 = vmatprep.subr.bf16.mxu0 %v1748_v33  ;;  %v1753_v36 = vld [vmem:[%s2253_s5 + $0x170] ss:$8 sps:$4 sm:$0xff]   ;;  %v1756_v38 = vld [vmem:[%s2253_s5 + $0x164] ss:$8 sps:$4 sm:$0xff]  }
  0x5d   : > { %1328 = vmatprep.subr.bf16.mxu1 %v1750_v34  ;;  %1288 = vmatpush1.bf16.msra.mxu0 %v1752_v35  ;;  %v1758_v39 = vld [vmem:[%s2253_s5 + $0x60] ss:$8 sps:$4 sm:$0xff]   ;;  %v1760_v41 = vld [vmem:[%s2253_s5 + $0x54] ss:$8 sps:$4 sm:$0xff]   ;;  %v1764_v43 = vld [vmem:[%s2253_s5 + $0x50] ss:$8 sps:$4 sm:$0xff]  }
  0x5e   : > { %1329 = vmatpush1.bf16.msra.mxu1 %v1753_v36  ;;  %1289 = vmatprep.subr.bf16.mxu0 %v1754_v37  ;;  %v1759_v40 = vld [vmem:[%s2253_s5 + $0x160] ss:$8 sps:$4 sm:$0xff]   ;;  %v1762_v42 = vld [vmem:[%s2253_s5 + $0x154] ss:$8 sps:$4 sm:$0xff]   ;;  %v1765_v44 = vld [vmem:[%s2253_s5 + $0x150] ss:$8 sps:$4 sm:$0xff]  }
  0x5f   : > { %1330 = vmatprep.subr.bf16.mxu1 %v1756_v38  ;;  %v1766_v45 = vld [vmem:[%s2253_s5 + $0x44] ss:$8 sps:$4 sm:$0xff]   ;;  %v1770_v47 = vld [vmem:[%s2253_s5 + $0x40] ss:$8 sps:$4 sm:$0xff]   ;;  %v1772_v49 = vld [vmem:[%s2253_s5 + $0x34] ss:$8 sps:$4 sm:$0xff]  }
  0x60   : > { %v1768_v46 = vld [vmem:[%s2253_s5 + $0x144] ss:$8 sps:$4 sm:$0xff]   ;;  %v1771_v48 = vld [vmem:[%s2253_s5 + $0x140] ss:$8 sps:$4 sm:$0xff]   ;;  %v1774_v50 = vld [vmem:[%s2253_s5 + $0x134] ss:$8 sps:$4 sm:$0xff]  }
  0x61   : > { %1290 = vmatpush1.bf16.msra.mxu0 %v1758_v39  ;;  %v1776_v51 = vld [vmem:[%s2253_s5 + $0x30] ss:$8 sps:$4 sm:$0xff]   ;;  %v1778_v53 = vld [vmem:[%s2253_s5 + $0x24] ss:$8 sps:$4 sm:$0xff]   ;;  %v1782_v55 = vld [vmem:[%s2253_s5 + $0x20] ss:$8 sps:$4 sm:$0xff]  }
  0x62   : > { %1331 = vmatpush1.bf16.msra.mxu1 %v1759_v40  ;;  %1291 = vmatprep.subr.bf16.mxu0 %v1760_v41  ;;  %v1777_v52 = vld [vmem:[%s2253_s5 + $0x130] ss:$8 sps:$4 sm:$0xff]   ;;  %v1780_v54 = vld [vmem:[%s2253_s5 + $0x124] ss:$8 sps:$4 sm:$0xff]   ;;  %v1783_v56 = vld [vmem:[%s2253_s5 + $0x120] ss:$8 sps:$4 sm:$0xff]  }
  0x63   : > { %1332 = vmatprep.subr.bf16.mxu1 %v1762_v42  ;;  %v1784_v57 = vld [vmem:[%s2253_s5 + $0x14] ss:$8 sps:$4 sm:$0xff]   ;;  %v1788_v59 = vld [vmem:[%s2253_s5 + $0x10] ss:$8 sps:$4 sm:$0xff]   ;;  %v1790_v61 = vld [vmem:[%s2253_s5 + $0x4] ss:$8 sps:$4 sm:$0xff]  }
  0x64   : > { %v1786_v58 = vld [vmem:[%s2253_s5 + $0x114] ss:$8 sps:$4 sm:$0xff]   ;;  %v1789_v60 = vld [vmem:[%s2253_s5 + $0x110] ss:$8 sps:$4 sm:$0xff]   ;;  %v1792_v62 = vld [vmem:[%s2253_s5 + $0x104] ss:$8 sps:$4 sm:$0xff]  }
  0x65   : > { %1292 = vmatpush1.bf16.msra.mxu0 %v1764_v43  ;;  %v1794_v63 = vld [vmem:[%s2253_s5] ss:$8 sps:$4 sm:$0xff]   ;;  %v1796_v1 = vld [vmem:[%s2253_s5 + $0xf4] ss:$8 sps:$4 sm:$0xff]   ;;  %v1800_v3 = vld [vmem:[%s2253_s5 + $0xf0] ss:$8 sps:$4 sm:$0xff]  }
  0x66   : > { %1333 = vmatpush1.bf16.msra.mxu1 %v1765_v44  ;;  %1293 = vmatprep.subr.bf16.mxu0 %v1766_v45  ;;  %v1795_v0 = vld [vmem:[%s2253_s5 + $0x100] ss:$8 sps:$4 sm:$0xff]   ;;  %v1798_v2 = vld [vmem:[%s2253_s5 + $0x1f4] ss:$8 sps:$4 sm:$0xff]   ;;  %v1801_v4 = vld [vmem:[%s2253_s5 + $0x1f0] ss:$8 sps:$4 sm:$0xff]  }
  0x67   : > { %1334 = vmatprep.subr.bf16.mxu1 %v1768_v46  ;;  %v1802_v5 = vld [vmem:[%s2253_s5 + $0xe4] ss:$8 sps:$4 sm:$0xff]   ;;  %v1806_v7 = vld [vmem:[%s2253_s5 + $0xe0] ss:$8 sps:$4 sm:$0xff]   ;;  %v1808_v9 = vld [vmem:[%s2253_s5 + $0xd4] ss:$8 sps:$4 sm:$0xff]  }
  0x68   : > { %v1804_v6 = vld [vmem:[%s2253_s5 + $0x1e4] ss:$8 sps:$4 sm:$0xff]   ;;  %v1807_v8 = vld [vmem:[%s2253_s5 + $0x1e0] ss:$8 sps:$4 sm:$0xff]   ;;  %v1810_v10 = vld [vmem:[%s2253_s5 + $0x1d4] ss:$8 sps:$4 sm:$0xff]  }
  0x69   : > { %1294 = vmatpush1.bf16.msra.mxu0 %v1770_v47  ;;  %v1812_v11 = vld [vmem:[%s2253_s5 + $0xd0] ss:$8 sps:$4 sm:$0xff]   ;;  %v1814_v13 = vld [vmem:[%s2253_s5 + $0xc4] ss:$8 sps:$4 sm:$0xff]   ;;  %v1818_v18 = vld [vmem:[%s2253_s5 + $0xc0] ss:$8 sps:$4 sm:$0xff]  }
  0x6a   : > { %1335 = vmatpush1.bf16.msra.mxu1 %v1771_v48  ;;  %1295 = vmatprep.subr.bf16.mxu0 %v1772_v49  ;;  %v1813_v12 = vld [vmem:[%s2253_s5 + $0x1d0] ss:$8 sps:$4 sm:$0xff]   ;;  %v1816_v14 = vld [vmem:[%s2253_s5 + $0x1c4] ss:$8 sps:$4 sm:$0xff]   ;;  %v1819_v19 = vld [vmem:[%s2253_s5 + $0x1c0] ss:$8 sps:$4 sm:$0xff]  }
  0x6b   : > { %1336 = vmatprep.subr.bf16.mxu1 %v1774_v50  ;;  %v687_v15 = vld [vmem:[%s2241_s26] sm:$0xff]  ;;  %v688_v17 = vld [vmem:[%s2241_s26 + $0x8] sm:$0xff]  ;;  %v1826_v25 = vld [vmem:[%s2253_s5 + $0xa4] ss:$8 sps:$4 sm:$0xff]   ;;  %p1683_p13 = scmp.ne.s32.totalorder %s1936_s14, 2 }
  0x6c   : > { %v1582_v16 = vcombine.high %v687_v15, %v687_v15  ;;  %v1584_v20 = vcombine.high %v688_v17, %v688_v17  ;;  %v1820_v21 = vld [vmem:[%s2253_s5 + $0xb4] ss:$8 sps:$4 sm:$0xff]   ;;  %v1824_v23 = vld [vmem:[%s2253_s5 + $0xb0] ss:$8 sps:$4 sm:$0xff]   ;;  %v1828_v26 = vld [vmem:[%s2253_s5 + $0x1a4] ss:$8 sps:$4 sm:$0xff]   ;;  %v1581_v38 = vcombine.low %v687_v15, %v687_v15  ;;  %v1583_v39 = vcombine.low %v688_v17, %v688_v17 }
  0x6d   : > { %1296 = vmatpush1.bf16.msra.mxu0 %v1776_v51  ;;  %v1822_v22 = vld [vmem:[%s2253_s5 + $0x1b4] ss:$8 sps:$4 sm:$0xff]   ;;  %v1825_v24 = vld [vmem:[%s2253_s5 + $0x1b0] ss:$8 sps:$4 sm:$0xff]   ;;  %v1830_v27 = vld [vmem:[%s2253_s5 + $0xa0] ss:$8 sps:$4 sm:$0xff]  }
  0x6e   : > { %1337 = vmatpush1.bf16.msra.mxu1 %v1777_v52  ;;  %1297 = vmatprep.subr.bf16.mxu0 %v1778_v53  ;;  %v1831_v28 = vld [vmem:[%s2253_s5 + $0x1a0] ss:$8 sps:$4 sm:$0xff]   ;;  %v1832_v29 = vld [vmem:[%s2253_s5 + $0x94] ss:$8 sps:$4 sm:$0xff]   ;;  %v1836_v31 = vld [vmem:[%s2253_s5 + $0x90] ss:$8 sps:$4 sm:$0xff]  }
  0x6f   : > { %1338 = vmatprep.subr.bf16.mxu1 %v1780_v54  ;;  %1319 = vmatprep.mubr.bf16.mxu0 %v1582_v16  ;;  %v1834_v30 = vld [vmem:[%s2253_s5 + $0x194] ss:$8 sps:$4 sm:$0xff]   ;;  %v1837_v32 = vld [vmem:[%s2253_s5 + $0x190] ss:$8 sps:$4 sm:$0xff]   ;;  %v1838_v33 = vld [vmem:[%s2253_s5 + $0x84] ss:$8 sps:$4 sm:$0xff]  }
  0x70   : > { %1360 = vmatprep.mubr.bf16.mxu1 %v1584_v20  ;;  %v1840_v34 = vld [vmem:[%s2253_s5 + $0x184] ss:$8 sps:$4 sm:$0xff]   ;;  %v1842_v35 = vld [vmem:[%s2253_s5 + $0x80] ss:$8 sps:$4 sm:$0xff]   ;;  %v1850_v37 = vld [vmem:[%s2253_s5 + $0x274] ss:$8 sps:$4 sm:$0xff]  }
  0x71   : > { %1298 = vmatpush1.bf16.msra.mxu0 %v1782_v55  ;;  %v1843_v36 = vld [vmem:[%s2253_s5 + $0x180] ss:$8 sps:$4 sm:$0xff]   ;;  %v1848_v40 = vld [vmem:[%s2253_s5 + $0x270] ss:$8 sps:$4 sm:$0xff]   ;;  %v1853_v42 = vld [vmem:[%s2253_s5 + $0x264] ss:$8 sps:$4 sm:$0xff]  }
  0x72   : > { %1339 = vmatpush1.bf16.msra.mxu1 %v1783_v56  ;;  %1299 = vmatprep.subr.bf16.mxu0 %v1784_v57  ;;  %v2325_v41 = vld [vmem:[%s2241_s26 + $0x10] sm:$0xff]  ;;  %v1856_v45 = vld [vmem:[%s2253_s5 + $0x254] ss:$8 sps:$4 sm:$0xff]   ;;  %v1854_v46 = vld [vmem:[%s2253_s5 + $0x250] ss:$8 sps:$4 sm:$0xff]  }
  0x73   : > { %1340 = vmatprep.subr.bf16.mxu1 %v1786_v58  ;;  %v1586_v43 = vcombine.high %v2325_v41, %v2325_v41  ;;  %v1851_v44 = vld [vmem:[%s2253_s5 + $0x260] ss:$8 sps:$4 sm:$0xff]   ;;  %v1859_v47 = vld [vmem:[%s2253_s5 + $0x244] ss:$8 sps:$4 sm:$0xff]   ;;  %v1862_v49 = vld [vmem:[%s2253_s5 + $0x234] ss:$8 sps:$4 sm:$0xff]  }
  0x74   : > { %v1857_v48 = vld [vmem:[%s2253_s5 + $0x240] ss:$8 sps:$4 sm:$0xff]   ;;  %v1860_v50 = vld [vmem:[%s2253_s5 + $0x230] ss:$8 sps:$4 sm:$0xff]   ;;  %v1865_v51 = vld [vmem:[%s2253_s5 + $0x224] ss:$8 sps:$4 sm:$0xff]  }
  0x75   : > { %1300 = vmatpush1.bf16.msra.mxu0 %v1788_v59  ;;  %v1863_v52 = vld [vmem:[%s2253_s5 + $0x220] ss:$8 sps:$4 sm:$0xff]   ;;  %v1868_v53 = vld [vmem:[%s2253_s5 + $0x214] ss:$8 sps:$4 sm:$0xff]   ;;  %v1866_v54 = vld [vmem:[%s2253_s5 + $0x210] ss:$8 sps:$4 sm:$0xff]  }
  0x76   : > { %1341 = vmatpush1.bf16.msra.mxu1 %v1789_v60  ;;  %1301 = vmatprep.subr.bf16.mxu0 %v1790_v61  ;;  %v1871_v55 = vld [vmem:[%s2253_s5 + $0x204] ss:$8 sps:$4 sm:$0xff]   ;;  %v1869_v56 = vld [vmem:[%s2253_s5 + $0x200] ss:$8 sps:$4 sm:$0xff]   ;;  %v1874_v57 = vld [vmem:[%s2253_s5 + $0x2f4] ss:$8 sps:$4 sm:$0xff]  }
  0x77   : > { %1342 = vmatprep.subr.bf16.mxu1 %v1792_v62  ;;  %v1872_v58 = vld [vmem:[%s2253_s5 + $0x2f0] ss:$8 sps:$4 sm:$0xff]   ;;  %v1877_v59 = vld [vmem:[%s2253_s5 + $0x2e4] ss:$8 sps:$4 sm:$0xff]   ;;  %v1875_v60 = vld [vmem:[%s2253_s5 + $0x2e0] ss:$8 sps:$4 sm:$0xff]  }
  0x78   : > { %v1880_v61 = vld [vmem:[%s2253_s5 + $0x2d4] ss:$8 sps:$4 sm:$0xff]   ;;  %v1878_v62 = vld [vmem:[%s2253_s5 + $0x2d0] ss:$8 sps:$4 sm:$0xff]  }
  0x79   : > { %1302 = vmatpush1.bf16.msra.mxu0 %v1794_v63  ;;  %v1883_v63 = vld [vmem:[%s2253_s5 + $0x2c4] ss:$8 sps:$4 sm:$0xff]  }
  0x7a   : > { %1343 = vmatpush1.bf16.msra.mxu1 %v1795_v0  ;;  %1303 = vmatprep.subr.bf16.mxu0 %v1796_v1  ;;  %v1881_v0 = vld [vmem:[%s2253_s5 + $0x2c0] ss:$8 sps:$4 sm:$0xff]   ;;  %v1886_v1 = vld [vmem:[%s2253_s5 + $0x2b4] ss:$8 sps:$4 sm:$0xff]  }
  0x7b   : > { %1344 = vmatprep.subr.bf16.mxu1 %v1798_v2  ;;  %v1884_v2 = vld [vmem:[%s2253_s5 + $0x2b0] ss:$8 sps:$4 sm:$0xff]  }
  0x7d   : > { %1304 = vmatpush2.bf16.msra.mxu0 %v1800_v3  ;;  %v1889_v3 = vld [vmem:[%s2253_s5 + $0x2a4] ss:$8 sps:$4 sm:$0xff]  }
  0x7e   : > { %1345 = vmatpush2.bf16.msra.mxu1 %v1801_v4  ;;  %1305 = vmatprep.subr.bf16.mxu0 %v1802_v5  ;;  %v1887_v4 = vld [vmem:[%s2253_s5 + $0x2a0] ss:$8 sps:$4 sm:$0xff]   ;;  %v1892_v5 = vld [vmem:[%s2253_s5 + $0x294] ss:$8 sps:$4 sm:$0xff]  }
  0x7f   : > { %1346 = vmatprep.subr.bf16.mxu1 %v1804_v6  ;;  %v1890_v6 = vld [vmem:[%s2253_s5 + $0x290] ss:$8 sps:$4 sm:$0xff]  }
  0x81   : > { %1306 = vmatpush2.bf16.msra.mxu0 %v1806_v7  ;;  %v1895_v7 = vld [vmem:[%s2253_s5 + $0x284] ss:$8 sps:$4 sm:$0xff]  }
  0x82   : > { %1347 = vmatpush2.bf16.msra.mxu1 %v1807_v8  ;;  %1307 = vmatprep.subr.bf16.mxu0 %v1808_v9  ;;  %v1893_v8 = vld [vmem:[%s2253_s5 + $0x280] ss:$8 sps:$4 sm:$0xff]   ;;  %v1585_v9 = vcombine.low %v2325_v41, %v2325_v41 }
  0x83   : > { %1348 = vmatprep.subr.bf16.mxu1 %v1810_v10 }
  0x85   : > { %1308 = vmatpush2.bf16.msra.mxu0 %v1812_v11 }
  0x86   : > { %1349 = vmatpush2.bf16.msra.mxu1 %v1813_v12  ;;  %1309 = vmatprep.subr.bf16.mxu0 %v1814_v13 }
  0x87   : > { %1350 = vmatprep.subr.bf16.mxu1 %v1816_v14 }
  0x89   : > { %1310 = vmatpush2.bf16.msra.mxu0 %v1818_v18 }
  0x8a   : > { %1351 = vmatpush2.bf16.msra.mxu1 %v1819_v19  ;;  %1311 = vmatprep.subr.bf16.mxu0 %v1820_v21  ;;  %v685_v19 = vld [vmem:[#allocation2] sm:$0xff] }
  0x8b   : > { %1352 = vmatprep.subr.bf16.mxu1 %v1822_v22 }
  0x8d   : > { %1312 = vmatpush2.bf16.msra.mxu0 %v1824_v23  ;;  %v686_v23 = vld [vmem:[#allocation2 + $0x8] sm:$0xff] }
  0x8e   : > { %1353 = vmatpush2.bf16.msra.mxu1 %v1825_v24  ;;  %1313 = vmatprep.subr.bf16.mxu0 %v1826_v25 }
  0x8f   : > { %1354 = vmatprep.subr.bf16.mxu1 %v1828_v26 }
  0x91   : > { %1314 = vmatpush2.bf16.msra.mxu0 %v1830_v27 }
  0x92   : > { %1355 = vmatpush2.bf16.msra.mxu1 %v1831_v28  ;;  %1315 = vmatprep.subr.bf16.mxu0 %v1832_v29 }
  0x93   : > { %1356 = vmatprep.subr.bf16.mxu1 %v1834_v30 }
  0x95   : > { %1316 = vmatpush2.bf16.msra.mxu0 %v1836_v31 }
  0x96   : > { %1357 = vmatpush2.bf16.msra.mxu1 %v1837_v32  ;;  %1317 = vmatprep.subr.bf16.mxu0 %v1838_v33 }
  0x97   : > { %1358 = vmatprep.subr.bf16.mxu1 %v1840_v34 }
  0x99   : > { %1318 = vmatpush2.bf16.msra.mxu0 %v1842_v35 }
  0x9a   : > { %1359 = vmatpush2.bf16.msra.mxu1 %v1843_v36  ;;  %1369 = vmatprep.subr.bf16.mxu0 %v1850_v37 }
  0x9c   : > { %1320 = vmatmul.mubr.bf16.vlgmr.msra.gmra.mxu0 %v1581_v38 }
  0x9d   : > { %1361 = vmatmul.mubr.bf16.vlgmr.msra.gmra.mxu1 %v1583_v39  ;;  %1370 = vmatpush1.bf16.msra.mxu0 %v1848_v40 }
  0x9e   : > { %1401 = vmatprep.mubr.bf16.mxu0 %v1586_v43  ;;  %1371 = vmatprep.subr.bf16.mxu0 %v1853_v42 }
  0xa1   : > { %1372 = vmatpush1.bf16.msra.mxu0 %v1851_v44 }
  0xa2   : > { %1373 = vmatprep.subr.bf16.mxu0 %v1856_v45 }
  0xa5   : > { %1374 = vmatpush1.bf16.msra.mxu0 %v1854_v46 }
  0xa6   : > { %1375 = vmatprep.subr.bf16.mxu0 %v1859_v47 }
  0xa9   : > { %1376 = vmatpush1.bf16.msra.mxu0 %v1857_v48 }
  0xaa   : > { %1377 = vmatprep.subr.bf16.mxu0 %v1862_v49 }
  0xad   : > { %1378 = vmatpush1.bf16.msra.mxu0 %v1860_v50 }
  0xae   : > { %1379 = vmatprep.subr.bf16.mxu0 %v1865_v51 }
  0xb1   : > { %1380 = vmatpush1.bf16.msra.mxu0 %v1863_v52 }
  0xb2   : > { %1381 = vmatprep.subr.bf16.mxu0 %v1868_v53 }
  0xb5   : > { %1382 = vmatpush1.bf16.msra.mxu0 %v1866_v54 }
  0xb6   : > { %1383 = vmatprep.subr.bf16.mxu0 %v1871_v55 }
  0xb9   : > { %1384 = vmatpush1.bf16.msra.mxu0 %v1869_v56 }
  0xba   : > { %1385 = vmatprep.subr.bf16.mxu0 %v1874_v57 }
  0xbd   : > { %1386 = vmatpush2.bf16.msra.mxu0 %v1872_v58 }
  0xbe   : > { %1387 = vmatprep.subr.bf16.mxu0 %v1877_v59 }
  0xc1   : > { %1388 = vmatpush2.bf16.msra.mxu0 %v1875_v60 }
  0xc2   : > { %1389 = vmatprep.subr.bf16.mxu0 %v1880_v61 }
  0xc5   : > { %1390 = vmatpush2.bf16.msra.mxu0 %v1878_v62 }
  0xc6   : > { %1391 = vmatprep.subr.bf16.mxu0 %v1883_v63 }
  0xc9   : > { %1392 = vmatpush2.bf16.msra.mxu0 %v1881_v0 }
  0xca   : > { %1393 = vmatprep.subr.bf16.mxu0 %v1886_v1 }
  0xcd   : > { %1394 = vmatpush2.bf16.msra.mxu0 %v1884_v2 }
  0xce   : > { %1395 = vmatprep.subr.bf16.mxu0 %v1889_v3 }
  0xd1   : > { %1396 = vmatpush2.bf16.msra.mxu0 %v1887_v4 }
  0xd2   : > { %1397 = vmatprep.subr.bf16.mxu0 %v1892_v5 }
  0xd5   : > { %1398 = vmatpush2.bf16.msra.mxu0 %v1890_v6 }
  0xd6   : > { %1399 = vmatprep.subr.bf16.mxu0 %v1895_v7 }
  0xd9   : > { %1400 = vmatpush2.bf16.msra.mxu0 %v1893_v8 }
  0xdc   : > { %1402 = vmatmul.mubr.bf16.vlgmr.msra.gmra.mxu0 %v1585_v9 }
 0x15c   : > { %v1321_v10 = vpop.f32.mrf.mxu0 }
 0x15d   : > { %v1362_v11 = vpop.f32.mrf.mxu1 }
 0x15e   : > { %v1323_v12 = vpop.f32.mrf.mxu0  ;;  %v1363_v18 = vadd.f32 %v1362_v11, %v1321_v10 }
 0x15f   : > { %v1364_v13 = vpop.f32.mrf.mxu1 }
 0x160   : > { %v1325_v14 = vpop.f32.mrf.mxu0  ;;  %v1365_v21 = vadd.f32 %v1364_v13, %v1323_v12 }
 0x161   : > { %v1366_v15 = vpop.f32.mrf.mxu1 }
 0x162   : > { %v1326_v16 = vpop.f32.mrf.mxu0 }
 0x163   : > { %v1367_v17 = vpop.f32.mrf.mxu1 }
 0x19c   : > { %v1403_v20 = vpop.f32.mrf.mxu0 }
 0x19d   : > { %v1404_v22 = vadd.f32 %v1403_v20, %v1363_v18 }
 0x19e   : > { %v1405_v24 = vpop.f32.mrf.mxu0 }
 0x19f   : > { %v1410_v25 = vadd.f32 %v1404_v22, %v685_v19  ;;  %v1406_v26 = vadd.f32 %v1405_v24, %v1365_v21  ;;  %1417 = sbr.rel (%p1683_p13) target bundleno = 435 (0x1b3), region = 78 }
 0x1a0   : > { %v1407_v27 = vpop.f32.mrf.mxu0 }
 0x1a1   : > { %1412 = vst [vmem:[#allocation2] sm:$0xff] %v1410_v25  ;;  %v1411_v28 = vadd.f32 %v1406_v26, %v686_v23 }
 0x1a2   : > { %v1408_v29 = vpop.f32.mrf.mxu0 }
 0x1a3   : > { %1413 = vst [vmem:[#allocation2 + $0x8] sm:$0xff] %v1411_v28 }
 0x1a4   : > { %v1422_v30 = vlaneseq  ;;  %v1420_v32 = vld [vmem:[%s667_s12] sm:$0x3] }
 0x1a6   : > { %v1423_v31 = vshrl.u32 %v1422_v30, 7 }
 0x1a8   : > { %v1424_v33 = vsub.s32 0, %v1423_v31  ;;  %v1428_v34 = vsub.s32 1, %v1423_v31  ;;  %v1418_v35 = vld [vmem:[#allocation2] sm:$0xff] }
 0x1aa   : > { %v1419_v36 = vld [vmem:[#allocation2 + $0x8] sm:$0xff]  ;;  %v1425_v37 = vrot.slane %v1420_v32, %v1424_v33  ;;  %v1429_v38 = vrot.slane %v1420_v32, %v1428_v34 }
 0x1ac   : > { %v1432_v39 = vadd.f32 %v1425_v37, %v1418_v35  ;;  %v1433_v40 = vadd.f32 %v1429_v38, %v1419_v36 }
 0x1ae   : > { %v1434_v41 = vmax.f32 %v1432_v39, 0.0  ;;  %v1435_v42 = vmax.f32 %v1433_v40, 0.0 }
 0x1b0   : > { %v1688_v43 = vpack.c.bf16 %v1435_v42, %v1434_v41 }
 0x1b2   : > { %1444 = vst [vmem:[%s2251_s4] sm:$0xff] %v1688_v43 }
 0x1b3 PF: > { %s13_s18 = sadd.s32 1, %s1952_s18   ;;  %s2393_s12 = smov %s1932_s13 }
 0x1b4   : > { %p10_p0 = scmp.ge.s32.totalorder %s13_s18, 8   ;;  %s2394_s13 = smov %s2026_s25 }
 0x1b5   : > { %s2395_s14 = smov %s1944_s16  ;;  %s2396_s15 = smov %s1948_s17 }
 0x1b6   : > { %s2397_s16 = smov %s2400_s19  ;;  %s2398_s17 = smov %s2404_s20 }
 0x1b7   :  { %12 = sbr.rel (!%p10_p0) target bundleno = 4 (0x4), region = 119 }

// kernel: resnet18_forward.40
= control target key start
LH: loop header
LB: loop body
LE: loop exit
PB: predicated region body
PF: predicated region fallthrough
CT: control target
= control target key end

     0   :  { %s2068_s15 = smov 0   ;;  %s2070_s16 = smov 0   ;;  %s2488_s0 = inlined_call_operand.vmem [shape: bf16[8,4608], index: 0, kind: input, shape index: {}]   ;;  %s2489_s1 = inlined_call_operand.vmem [shape: bf16[4608,512], index: 1, kind: input, shape index: {}]   ;;  %s2490_s2 = inlined_call_operand.vmem [shape: f32[1,512], index: 2, kind: input, shape index: {}]   ;;  %s2491_s3 = inlined_call_operand.vmem [shape: bf16[8,512], index: 3, kind: input, shape index: {}]   ;;  %s2492_s4 = inlined_call_operand.vmem [shape: bf16[8,512], index: 4, kind: output, shape index: {}]  }
   0x1   :  { %s2072_s17 = smov 0   ;;  %s2074_s18 = smov 0  }
   0x2   :  { %s2076_s19 = smov 0   ;;  %s2078_s20 = smov 0  }
   0x3   :  { %s2080_s21 = smov 0  }
   0x4 LB: > { %s26_s22 = sadd.s32 1, %s2032_s19  ;;  %s29_s23 = sadd.s32 1, %s2036_s20  ;;  %s2040_s21 = sphi %s2080_s21, %s14_s21   ;;  %s2036_s20 = sphi %s2078_s20, %s2498_s20   ;;  %s2032_s19 = sphi %s2076_s19, %s2497_s19   ;;  %s2028_s18 = sphi %s2074_s18, %s2496_s18   ;;  %s2024_s17 = sphi %s2072_s17, %s2495_s17   ;;  %s2020_s16 = sphi %s2070_s16, %s2494_s16   ;;  %s2016_s15 = sphi %s2068_s15, %s2493_s15  }
   0x5   : > { %p27_p0 = scmp.ge.s32.totalorder %s26_s22, 6  ;;  %p77_p1 = scmp.ne.s32.totalorder %s2020_s16, %s2016_s15 }
   0x6   : > { %p78_p2 = scmp.eq.s32.totalorder %s2040_s21, 0  ;;  %s70_s27 = sadd.s32 1, %s2020_s16 }
   0x7   : > { %s2500_s22 = smov (%p27_p0, %s26_s22), 0  ;;  %s2502_s23 = smov (!%p27_p0, %s29_s23), %s2036_s20 }
   0x8   : > { %p79_p3 = por %p78_p2, %p77_p1  ;;  %p31_p4 = scmp.ge.s32.totalorder %s2502_s23, 2 }
   0x9   : > { %s65_s24 = ssub.s32 %s2032_s19, %s2500_s22  ;;  %p1657_p6 = scmp.ge.s32.totalorder %s2040_s21, 12 }
   0xa   : > { %s2504_s23 = smov (%p31_p4, %s2502_s23), 0 }
   0xb   : > { %s66_s25 = ssub.s32 %s2036_s20, %s2504_s23  ;;  %185 = sbr.rel (%p1657_p6) target bundleno = 72 (0x48), region = 16 }
   0xc   : > { %s67_s26 = sor.u32 %s66_s25, %s65_s24 }
   0xd   : > { %p68_p5 = scmp.eq.s32.totalorder %s67_s26, 0 }
   0xf   : > { %s2119_s28 = scalar_select %p68_p5, %s2020_s16, %s70_s27  }
  0x10   : > { %201 = sbr.rel (!%p79_p3) target bundleno = 72 (0x48), region = 24  ;;  %s203_s29 = sand.u32 (%p79_p3), 1, %s2020_s16  }
  0x11   : > { %s1777_s30 = smul.u32 (%p79_p3), 768, %s203_s29  ;;  %s1658_s5 = sshll.u32 (%p79_p3), %s2036_s20, 1 }
  0x12   : > { %s1775_s6 = smul.u32 (%p79_p3), 384, %s2032_s19 }
  0x13   : > { %s2133_s12 = scalar_lea.vmem (%p79_p3), [#allocation3], %s1777_s30 }
  0x14   : > { %s209_s7 = sadd.s32 (%p79_p3), %s1775_s6, %s1658_s5 }
  0x15   : > { %s1660_s8 = sshll.u32 %s209_s7, 2 }
  0x16   : > { %s2128_s11 = scalar_lea.vmem %s2489_s1, %s1660_s8 }
  0x17   : > { %v430_v0 = vld [vmem:[%s2128_s11] sm:$0xff]  ;;  %v432_v1 = vld [vmem:[%s2128_s11 + $0x10] sm:$0xff] }
  0x18   : > { %v434_v2 = vld [vmem:[%s2128_s11 + $0x20] sm:$0xff]  ;;  %431 = vst [vmem:[%s2133_s12] sm:$0xff] %v430_v0  ;;  %433 = vst [vmem:[%s2133_s12 + $0x8] sm:$0xff] %v432_v1  ;;  %v436_v3 = vld [vmem:[%s2128_s11 + $0x30] sm:$0xff] }
  0x19   : > { %435 = vst [vmem:[%s2133_s12 + $0x10] sm:$0xff] %v434_v2  ;;  %v438_v4 = vld [vmem:[%s2128_s11 + $0x40] sm:$0xff]  ;;  %v440_v5 = vld [vmem:[%s2128_s11 + $0x50] sm:$0xff]  ;;  %437 = vst [vmem:[%s2133_s12 + $0x18] sm:$0xff] %v436_v3 }
  0x1a   : > { %439 = vst [vmem:[%s2133_s12 + $0x20] sm:$0xff] %v438_v4  ;;  %441 = vst [vmem:[%s2133_s12 + $0x28] sm:$0xff] %v440_v5  ;;  %v442_v6 = vld [vmem:[%s2128_s11 + $0x60] sm:$0xff]  ;;  %v444_v7 = vld [vmem:[%s2128_s11 + $0x70] sm:$0xff] }
  0x1b   : > { %v446_v8 = vld [vmem:[%s2128_s11 + $0x80] sm:$0xff]  ;;  %443 = vst [vmem:[%s2133_s12 + $0x30] sm:$0xff] %v442_v6  ;;  %445 = vst [vmem:[%s2133_s12 + $0x38] sm:$0xff] %v444_v7  ;;  %v448_v9 = vld [vmem:[%s2128_s11 + $0x90] sm:$0xff] }
  0x1c   : > { %447 = vst [vmem:[%s2133_s12 + $0x40] sm:$0xff] %v446_v8  ;;  %v450_v10 = vld [vmem:[%s2128_s11 + $0xa0] sm:$0xff]  ;;  %v452_v11 = vld [vmem:[%s2128_s11 + $0xb0] sm:$0xff]  ;;  %449 = vst [vmem:[%s2133_s12 + $0x48] sm:$0xff] %v448_v9 }
  0x1d   : > { %451 = vst [vmem:[%s2133_s12 + $0x50] sm:$0xff] %v450_v10  ;;  %453 = vst [vmem:[%s2133_s12 + $0x58] sm:$0xff] %v452_v11  ;;  %v454_v12 = vld [vmem:[%s2128_s11 + $0xc0] sm:$0xff]  ;;  %v456_v13 = vld [vmem:[%s2128_s11 + $0xd0] sm:$0xff] }
  0x1e   : > { %v458_v14 = vld [vmem:[%s2128_s11 + $0xe0] sm:$0xff]  ;;  %455 = vst [vmem:[%s2133_s12 + $0x60] sm:$0xff] %v454_v12  ;;  %457 = vst [vmem:[%s2133_s12 + $0x68] sm:$0xff] %v456_v13  ;;  %v460_v15 = vld [vmem:[%s2128_s11 + $0xf0] sm:$0xff] }
  0x1f   : > { %459 = vst [vmem:[%s2133_s12 + $0x70] sm:$0xff] %v458_v14  ;;  %v462_v16 = vld [vmem:[%s2128_s11 + $0x100] sm:$0xff]  ;;  %v464_v17 = vld [vmem:[%s2128_s11 + $0x110] sm:$0xff]  ;;  %461 = vst [vmem:[%s2133_s12 + $0x78] sm:$0xff] %v460_v15 }
  0x20   : > { %463 = vst [vmem:[%s2133_s12 + $0x80] sm:$0xff] %v462_v16  ;;  %465 = vst [vmem:[%s2133_s12 + $0x88] sm:$0xff] %v464_v17  ;;  %v466_v18 = vld [vmem:[%s2128_s11 + $0x120] sm:$0xff]  ;;  %v468_v19 = vld [vmem:[%s2128_s11 + $0x130] sm:$0xff] }
  0x21   : > { %v470_v20 = vld [vmem:[%s2128_s11 + $0x140] sm:$0xff]  ;;  %467 = vst [vmem:[%s2133_s12 + $0x90] sm:$0xff] %v466_v18  ;;  %469 = vst [vmem:[%s2133_s12 + $0x98] sm:$0xff] %v468_v19  ;;  %v472_v21 = vld [vmem:[%s2128_s11 + $0x150] sm:$0xff] }
  0x22   : > { %471 = vst [vmem:[%s2133_s12 + $0xa0] sm:$0xff] %v470_v20  ;;  %v474_v22 = vld [vmem:[%s2128_s11 + $0x160] sm:$0xff]  ;;  %v476_v23 = vld [vmem:[%s2128_s11 + $0x170] sm:$0xff]  ;;  %473 = vst [vmem:[%s2133_s12 + $0xa8] sm:$0xff] %v472_v21 }
  0x23   : > { %475 = vst [vmem:[%s2133_s12 + $0xb0] sm:$0xff] %v474_v22  ;;  %477 = vst [vmem:[%s2133_s12 + $0xb8] sm:$0xff] %v476_v23  ;;  %v478_v24 = vld [vmem:[%s2128_s11 + $0x180] sm:$0xff]  ;;  %v480_v25 = vld [vmem:[%s2128_s11 + $0x190] sm:$0xff] }
  0x24   : > { %v482_v26 = vld [vmem:[%s2128_s11 + $0x1a0] sm:$0xff]  ;;  %479 = vst [vmem:[%s2133_s12 + $0xc0] sm:$0xff] %v478_v24  ;;  %481 = vst [vmem:[%s2133_s12 + $0xc8] sm:$0xff] %v480_v25  ;;  %v484_v27 = vld [vmem:[%s2128_s11 + $0x1b0] sm:$0xff] }
  0x25   : > { %483 = vst [vmem:[%s2133_s12 + $0xd0] sm:$0xff] %v482_v26  ;;  %v486_v28 = vld [vmem:[%s2128_s11 + $0x1c0] sm:$0xff]  ;;  %v488_v29 = vld [vmem:[%s2128_s11 + $0x1d0] sm:$0xff]  ;;  %485 = vst [vmem:[%s2133_s12 + $0xd8] sm:$0xff] %v484_v27 }
  0x26   : > { %487 = vst [vmem:[%s2133_s12 + $0xe0] sm:$0xff] %v486_v28  ;;  %489 = vst [vmem:[%s2133_s12 + $0xe8] sm:$0xff] %v488_v29  ;;  %v490_v30 = vld [vmem:[%s2128_s11 + $0x1e0] sm:$0xff]  ;;  %v492_v31 = vld [vmem:[%s2128_s11 + $0x1f0] sm:$0xff] }
  0x27   : > { %v494_v32 = vld [vmem:[%s2128_s11 + $0x200] sm:$0xff]  ;;  %491 = vst [vmem:[%s2133_s12 + $0xf0] sm:$0xff] %v490_v30  ;;  %493 = vst [vmem:[%s2133_s12 + $0xf8] sm:$0xff] %v492_v31  ;;  %v496_v33 = vld [vmem:[%s2128_s11 + $0x210] sm:$0xff] }
  0x28   : > { %495 = vst [vmem:[%s2133_s12 + $0x100] sm:$0xff] %v494_v32  ;;  %v498_v34 = vld [vmem:[%s2128_s11 + $0x220] sm:$0xff]  ;;  %v500_v35 = vld [vmem:[%s2128_s11 + $0x230] sm:$0xff]  ;;  %497 = vst [vmem:[%s2133_s12 + $0x108] sm:$0xff] %v496_v33 }
  0x29   : > { %499 = vst [vmem:[%s2133_s12 + $0x110] sm:$0xff] %v498_v34  ;;  %501 = vst [vmem:[%s2133_s12 + $0x118] sm:$0xff] %v500_v35  ;;  %v502_v36 = vld [vmem:[%s2128_s11 + $0x240] sm:$0xff]  ;;  %v504_v37 = vld [vmem:[%s2128_s11 + $0x250] sm:$0xff] }
  0x2a   : > { %v506_v38 = vld [vmem:[%s2128_s11 + $0x260] sm:$0xff]  ;;  %503 = vst [vmem:[%s2133_s12 + $0x120] sm:$0xff] %v502_v36  ;;  %505 = vst [vmem:[%s2133_s12 + $0x128] sm:$0xff] %v504_v37  ;;  %v508_v39 = vld [vmem:[%s2128_s11 + $0x270] sm:$0xff] }
  0x2b   : > { %507 = vst [vmem:[%s2133_s12 + $0x130] sm:$0xff] %v506_v38  ;;  %v510_v40 = vld [vmem:[%s2128_s11 + $0x280] sm:$0xff]  ;;  %v512_v41 = vld [vmem:[%s2128_s11 + $0x290] sm:$0xff]  ;;  %509 = vst [vmem:[%s2133_s12 + $0x138] sm:$0xff] %v508_v39 }
  0x2c   : > { %511 = vst [vmem:[%s2133_s12 + $0x140] sm:$0xff] %v510_v40  ;;  %513 = vst [vmem:[%s2133_s12 + $0x148] sm:$0xff] %v512_v41  ;;  %v514_v42 = vld [vmem:[%s2128_s11 + $0x2a0] sm:$0xff]  ;;  %v516_v43 = vld [vmem:[%s2128_s11 + $0x2b0] sm:$0xff] }
  0x2d   : > { %v518_v44 = vld [vmem:[%s2128_s11 + $0x2c0] sm:$0xff]  ;;  %515 = vst [vmem:[%s2133_s12 + $0x150] sm:$0xff] %v514_v42  ;;  %517 = vst [vmem:[%s2133_s12 + $0x158] sm:$0xff] %v516_v43  ;;  %v520_v45 = vld [vmem:[%s2128_s11 + $0x2d0] sm:$0xff] }
  0x2e   : > { %519 = vst [vmem:[%s2133_s12 + $0x160] sm:$0xff] %v518_v44  ;;  %v522_v46 = vld [vmem:[%s2128_s11 + $0x2e0] sm:$0xff]  ;;  %v524_v47 = vld [vmem:[%s2128_s11 + $0x2f0] sm:$0xff]  ;;  %521 = vst [vmem:[%s2133_s12 + $0x168] sm:$0xff] %v520_v45 }
  0x2f   : > { %523 = vst [vmem:[%s2133_s12 + $0x170] sm:$0xff] %v522_v46  ;;  %525 = vst [vmem:[%s2133_s12 + $0x178] sm:$0xff] %v524_v47  ;;  %v526_v48 = vld [vmem:[%s2128_s11 + $0x300] sm:$0xff]  ;;  %v528_v49 = vld [vmem:[%s2128_s11 + $0x310] sm:$0xff] }
  0x30   : > { %v530_v50 = vld [vmem:[%s2128_s11 + $0x320] sm:$0xff]  ;;  %527 = vst [vmem:[%s2133_s12 + $0x180] sm:$0xff] %v526_v48  ;;  %529 = vst [vmem:[%s2133_s12 + $0x188] sm:$0xff] %v528_v49  ;;  %v532_v51 = vld [vmem:[%s2128_s11 + $0x330] sm:$0xff] }
  0x31   : > { %531 = vst [vmem:[%s2133_s12 + $0x190] sm:$0xff] %v530_v50  ;;  %v534_v52 = vld [vmem:[%s2128_s11 + $0x340] sm:$0xff]  ;;  %v536_v53 = vld [vmem:[%s2128_s11 + $0x350] sm:$0xff]  ;;  %533 = vst [vmem:[%s2133_s12 + $0x198] sm:$0xff] %v532_v51 }
  0x32   : > { %535 = vst [vmem:[%s2133_s12 + $0x1a0] sm:$0xff] %v534_v52  ;;  %537 = vst [vmem:[%s2133_s12 + $0x1a8] sm:$0xff] %v536_v53  ;;  %v538_v54 = vld [vmem:[%s2128_s11 + $0x360] sm:$0xff]  ;;  %v540_v55 = vld [vmem:[%s2128_s11 + $0x370] sm:$0xff] }
  0x33   : > { %v542_v56 = vld [vmem:[%s2128_s11 + $0x380] sm:$0xff]  ;;  %539 = vst [vmem:[%s2133_s12 + $0x1b0] sm:$0xff] %v538_v54  ;;  %541 = vst [vmem:[%s2133_s12 + $0x1b8] sm:$0xff] %v540_v55  ;;  %v544_v57 = vld [vmem:[%s2128_s11 + $0x390] sm:$0xff] }
  0x34   : > { %543 = vst [vmem:[%s2133_s12 + $0x1c0] sm:$0xff] %v542_v56  ;;  %v546_v58 = vld [vmem:[%s2128_s11 + $0x3a0] sm:$0xff]  ;;  %v548_v59 = vld [vmem:[%s2128_s11 + $0x3b0] sm:$0xff]  ;;  %545 = vst [vmem:[%s2133_s12 + $0x1c8] sm:$0xff] %v544_v57 }
  0x35   : > { %547 = vst [vmem:[%s2133_s12 + $0x1d0] sm:$0xff] %v546_v58  ;;  %549 = vst [vmem:[%s2133_s12 + $0x1d8] sm:$0xff] %v548_v59  ;;  %v550_v60 = vld [vmem:[%s2128_s11 + $0x3c0] sm:$0xff]  ;;  %v552_v61 = vld [vmem:[%s2128_s11 + $0x3d0] sm:$0xff] }
  0x36   : > { %v554_v62 = vld [vmem:[%s2128_s11 + $0x3e0] sm:$0xff]  ;;  %551 = vst [vmem:[%s2133_s12 + $0x1e0] sm:$0xff] %v550_v60  ;;  %553 = vst [vmem:[%s2133_s12 + $0x1e8] sm:$0xff] %v552_v61  ;;  %v556_v63 = vld [vmem:[%s2128_s11 + $0x3f0] sm:$0xff] }
  0x37   : > { %555 = vst [vmem:[%s2133_s12 + $0x1f0] sm:$0xff] %v554_v62  ;;  %v558_v0 = vld [vmem:[%s2128_s11 + $0x400] sm:$0xff]  ;;  %v560_v1 = vld [vmem:[%s2128_s11 + $0x410] sm:$0xff]  ;;  %557 = vst [vmem:[%s2133_s12 + $0x1f8] sm:$0xff] %v556_v63 }
  0x38   : > { %559 = vst [vmem:[%s2133_s12 + $0x200] sm:$0xff] %v558_v0  ;;  %561 = vst [vmem:[%s2133_s12 + $0x208] sm:$0xff] %v560_v1  ;;  %v562_v2 = vld [vmem:[%s2128_s11 + $0x420] sm:$0xff]  ;;  %v564_v3 = vld [vmem:[%s2128_s11 + $0x430] sm:$0xff] }
  0x39   : > { %v566_v4 = vld [vmem:[%s2128_s11 + $0x440] sm:$0xff]  ;;  %563 = vst [vmem:[%s2133_s12 + $0x210] sm:$0xff] %v562_v2  ;;  %565 = vst [vmem:[%s2133_s12 + $0x218] sm:$0xff] %v564_v3  ;;  %v568_v5 = vld [vmem:[%s2128_s11 + $0x450] sm:$0xff] }
  0x3a   : > { %567 = vst [vmem:[%s2133_s12 + $0x220] sm:$0xff] %v566_v4  ;;  %v570_v6 = vld [vmem:[%s2128_s11 + $0x460] sm:$0xff]  ;;  %v572_v7 = vld [vmem:[%s2128_s11 + $0x470] sm:$0xff]  ;;  %569 = vst [vmem:[%s2133_s12 + $0x228] sm:$0xff] %v568_v5 }
  0x3b   : > { %571 = vst [vmem:[%s2133_s12 + $0x230] sm:$0xff] %v570_v6  ;;  %573 = vst [vmem:[%s2133_s12 + $0x238] sm:$0xff] %v572_v7  ;;  %v574_v8 = vld [vmem:[%s2128_s11 + $0x480] sm:$0xff]  ;;  %v576_v9 = vld [vmem:[%s2128_s11 + $0x490] sm:$0xff] }
  0x3c   : > { %v578_v10 = vld [vmem:[%s2128_s11 + $0x4a0] sm:$0xff]  ;;  %575 = vst [vmem:[%s2133_s12 + $0x240] sm:$0xff] %v574_v8  ;;  %577 = vst [vmem:[%s2133_s12 + $0x248] sm:$0xff] %v576_v9  ;;  %v580_v11 = vld [vmem:[%s2128_s11 + $0x4b0] sm:$0xff] }
  0x3d   : > { %579 = vst [vmem:[%s2133_s12 + $0x250] sm:$0xff] %v578_v10  ;;  %v582_v12 = vld [vmem:[%s2128_s11 + $0x4c0] sm:$0xff]  ;;  %v584_v13 = vld [vmem:[%s2128_s11 + $0x4d0] sm:$0xff]  ;;  %581 = vst [vmem:[%s2133_s12 + $0x258] sm:$0xff] %v580_v11 }
  0x3e   : > { %583 = vst [vmem:[%s2133_s12 + $0x260] sm:$0xff] %v582_v12  ;;  %585 = vst [vmem:[%s2133_s12 + $0x268] sm:$0xff] %v584_v13  ;;  %v586_v14 = vld [vmem:[%s2128_s11 + $0x4e0] sm:$0xff]  ;;  %v588_v15 = vld [vmem:[%s2128_s11 + $0x4f0] sm:$0xff] }
  0x3f   : > { %v590_v16 = vld [vmem:[%s2128_s11 + $0x500] sm:$0xff]  ;;  %587 = vst [vmem:[%s2133_s12 + $0x270] sm:$0xff] %v586_v14  ;;  %589 = vst [vmem:[%s2133_s12 + $0x278] sm:$0xff] %v588_v15  ;;  %v592_v17 = vld [vmem:[%s2128_s11 + $0x510] sm:$0xff] }
  0x40   : > { %591 = vst [vmem:[%s2133_s12 + $0x280] sm:$0xff] %v590_v16  ;;  %v594_v18 = vld [vmem:[%s2128_s11 + $0x520] sm:$0xff]  ;;  %v596_v19 = vld [vmem:[%s2128_s11 + $0x530] sm:$0xff]  ;;  %593 = vst [vmem:[%s2133_s12 + $0x288] sm:$0xff] %v592_v17 }
  0x41   : > { %595 = vst [vmem:[%s2133_s12 + $0x290] sm:$0xff] %v594_v18  ;;  %597 = vst [vmem:[%s2133_s12 + $0x298] sm:$0xff] %v596_v19  ;;  %v598_v20 = vld [vmem:[%s2128_s11 + $0x540] sm:$0xff]  ;;  %v600_v21 = vld [vmem:[%s2128_s11 + $0x550] sm:$0xff] }
  0x42   : > { %v602_v22 = vld [vmem:[%s2128_s11 + $0x560] sm:$0xff]  ;;  %599 = vst [vmem:[%s2133_s12 + $0x2a0] sm:$0xff] %v598_v20  ;;  %601 = vst [vmem:[%s2133_s12 + $0x2a8] sm:$0xff] %v600_v21  ;;  %v604_v23 = vld [vmem:[%s2128_s11 + $0x570] sm:$0xff] }
  0x43   : > { %603 = vst [vmem:[%s2133_s12 + $0x2b0] sm:$0xff] %v602_v22  ;;  %v606_v24 = vld [vmem:[%s2128_s11 + $0x580] sm:$0xff]  ;;  %v608_v25 = vld [vmem:[%s2128_s11 + $0x590] sm:$0xff]  ;;  %605 = vst [vmem:[%s2133_s12 + $0x2b8] sm:$0xff] %v604_v23 }
  0x44   : > { %607 = vst [vmem:[%s2133_s12 + $0x2c0] sm:$0xff] %v606_v24  ;;  %609 = vst [vmem:[%s2133_s12 + $0x2c8] sm:$0xff] %v608_v25  ;;  %v610_v26 = vld [vmem:[%s2128_s11 + $0x5a0] sm:$0xff]  ;;  %v612_v27 = vld [vmem:[%s2128_s11 + $0x5b0] sm:$0xff] }
  0x45   : > { %v614_v28 = vld [vmem:[%s2128_s11 + $0x5c0] sm:$0xff]  ;;  %611 = vst [vmem:[%s2133_s12 + $0x2d0] sm:$0xff] %v610_v26  ;;  %613 = vst [vmem:[%s2133_s12 + $0x2d8] sm:$0xff] %v612_v27  ;;  %v616_v29 = vld [vmem:[%s2128_s11 + $0x5d0] sm:$0xff] }
  0x46   : > { %615 = vst [vmem:[%s2133_s12 + $0x2e0] sm:$0xff] %v614_v28  ;;  %v618_v30 = vld [vmem:[%s2128_s11 + $0x5e0] sm:$0xff]  ;;  %v620_v31 = vld [vmem:[%s2128_s11 + $0x5f0] sm:$0xff]  ;;  %617 = vst [vmem:[%s2133_s12 + $0x2e8] sm:$0xff] %v616_v29 }
  0x47   : > { %619 = vst [vmem:[%s2133_s12 + $0x2f0] sm:$0xff] %v618_v30  ;;  %621 = vst [vmem:[%s2133_s12 + $0x2f8] sm:$0xff] %v620_v31 }
  0x48 PF: > { %p1661_p7 = scmp.ge.s32.totalorder %s2040_s21, 1  ;;  %p647_p8 = scmp.lt.s32.totalorder %s2040_s21, 13 }
  0x4a   : > { %p648_p9 = pnand %p1661_p7, %p647_p8 }
  0x4b   : > { %s654_s13 = sand.u32 (!%p648_p9), 1, %s2016_s15   ;;  %s705_s14 = smul.u32 (!%p648_p9), 6, %s2024_s17 }
  0x4c   : > { %651 = sbr.rel (%p648_p9) target bundleno = 438 (0x1b6), region = 70  ;;  %s1663_s25 = sshll.u32 (!%p648_p9), %s2028_s18, 1 }
  0x4d   : > { %s1778_s24 = smul.u32 (!%p648_p9), 768, %s654_s13  ;;  %p708_p10 = scmp.lt.s32.totalorder (!%p648_p9), %s705_s14, 35 }
  0x4e   : > { %p718_p11 = scmp.lt.s32.totalorder (!%p648_p9), %s1663_s25, 3  ;;  %p1668_p12 = scmp.ne.s32.totalorder (!%p648_p9), %s2024_s17, 0 }
  0x4f   : > { %s2351_s13 = scalar_lea.vmem (!%p648_p9), [#allocation3], %s1778_s24 }
  0x51   : > { %s2506_s14 = smov (!%p708_p10, %s705_s14), 35  ;;  %s2508_s25 = smov (!%p718_p11, %s1663_s25), 3 }
  0x52   : > { %s1662_s26 = sshll.u32 %s2506_s14, 2  ;;  %s720_s15 = scalar_lea.vmem %s2490_s2, %s2508_s25 }
  0x53   : > { %s2334_s30 = scalar_lea.vmem %s2488_s0, %s1662_s26  ;;  %s1665_s7 = sshll.u32 %s2508_s25, 2 }
  0x54   : > { %s2344_s9 = scalar_lea.vmem %s2491_s3, %s1665_s7  ;;  %s2349_s12 = scalar_lea.vmem %s2492_s4, %s1665_s7 }
  0x55   : > { %745 = sbr.rel (%p1668_p12) target bundleno = 92 (0x5c), region = 78 }
  0x5a   : > { %v2042_v32 = vmov 0.0  }
  0x5b   : > { %746 = vst [vmem:[#allocation2] sm:$0xff] %v2042_v32  ;;  %747 = vst [vmem:[#allocation2 + $0x8] sm:$0xff] %v2042_v32 }
  0x5c PF: > { %v1836_v33 = vld [vmem:[%s2351_s13 + $0x74] ss:$8 sps:$4 sm:$0xff]   ;;  %v1840_v35 = vld [vmem:[%s2351_s13 + $0x70] ss:$8 sps:$4 sm:$0xff]   ;;  %v1842_v37 = vld [vmem:[%s2351_s13 + $0x64] ss:$8 sps:$4 sm:$0xff]  }
  0x5d   : > { %v1838_v34 = vld [vmem:[%s2351_s13 + $0x174] ss:$8 sps:$4 sm:$0xff]   ;;  %1350 = vmatprep.subr.bf16.mxu0 %v1836_v33  ;;  %v1841_v36 = vld [vmem:[%s2351_s13 + $0x170] ss:$8 sps:$4 sm:$0xff]   ;;  %v1844_v38 = vld [vmem:[%s2351_s13 + $0x164] ss:$8 sps:$4 sm:$0xff]  }
  0x5e   : > { %1391 = vmatprep.subr.bf16.mxu1 %v1838_v34  ;;  %1351 = vmatpush1.bf16.msra.mxu0 %v1840_v35  ;;  %v1846_v39 = vld [vmem:[%s2351_s13 + $0x60] ss:$8 sps:$4 sm:$0xff]   ;;  %v1848_v41 = vld [vmem:[%s2351_s13 + $0x54] ss:$8 sps:$4 sm:$0xff]   ;;  %v1852_v43 = vld [vmem:[%s2351_s13 + $0x50] ss:$8 sps:$4 sm:$0xff]  }
  0x5f   : > { %1392 = vmatpush1.bf16.msra.mxu1 %v1841_v36  ;;  %1352 = vmatprep.subr.bf16.mxu0 %v1842_v37  ;;  %v1847_v40 = vld [vmem:[%s2351_s13 + $0x160] ss:$8 sps:$4 sm:$0xff]   ;;  %v1850_v42 = vld [vmem:[%s2351_s13 + $0x154] ss:$8 sps:$4 sm:$0xff]   ;;  %v1853_v44 = vld [vmem:[%s2351_s13 + $0x150] ss:$8 sps:$4 sm:$0xff]  }
  0x60   : > { %1393 = vmatprep.subr.bf16.mxu1 %v1844_v38  ;;  %v1854_v45 = vld [vmem:[%s2351_s13 + $0x44] ss:$8 sps:$4 sm:$0xff]   ;;  %v1858_v47 = vld [vmem:[%s2351_s13 + $0x40] ss:$8 sps:$4 sm:$0xff]   ;;  %v1860_v49 = vld [vmem:[%s2351_s13 + $0x34] ss:$8 sps:$4 sm:$0xff]  }
  0x61   : > { %v1856_v46 = vld [vmem:[%s2351_s13 + $0x144] ss:$8 sps:$4 sm:$0xff]   ;;  %v1859_v48 = vld [vmem:[%s2351_s13 + $0x140] ss:$8 sps:$4 sm:$0xff]   ;;  %v1862_v50 = vld [vmem:[%s2351_s13 + $0x134] ss:$8 sps:$4 sm:$0xff]  }
  0x62   : > { %1353 = vmatpush1.bf16.msra.mxu0 %v1846_v39  ;;  %v1864_v51 = vld [vmem:[%s2351_s13 + $0x30] ss:$8 sps:$4 sm:$0xff]   ;;  %v1866_v53 = vld [vmem:[%s2351_s13 + $0x24] ss:$8 sps:$4 sm:$0xff]   ;;  %v1870_v55 = vld [vmem:[%s2351_s13 + $0x20] ss:$8 sps:$4 sm:$0xff]  }
  0x63   : > { %1394 = vmatpush1.bf16.msra.mxu1 %v1847_v40  ;;  %1354 = vmatprep.subr.bf16.mxu0 %v1848_v41  ;;  %v1865_v52 = vld [vmem:[%s2351_s13 + $0x130] ss:$8 sps:$4 sm:$0xff]   ;;  %v1868_v54 = vld [vmem:[%s2351_s13 + $0x124] ss:$8 sps:$4 sm:$0xff]   ;;  %v1871_v56 = vld [vmem:[%s2351_s13 + $0x120] ss:$8 sps:$4 sm:$0xff]  }
  0x64   : > { %1395 = vmatprep.subr.bf16.mxu1 %v1850_v42  ;;  %v1872_v57 = vld [vmem:[%s2351_s13 + $0x14] ss:$8 sps:$4 sm:$0xff]   ;;  %v1876_v59 = vld [vmem:[%s2351_s13 + $0x10] ss:$8 sps:$4 sm:$0xff]   ;;  %v1878_v61 = vld [vmem:[%s2351_s13 + $0x4] ss:$8 sps:$4 sm:$0xff]  }
  0x65   : > { %v1874_v58 = vld [vmem:[%s2351_s13 + $0x114] ss:$8 sps:$4 sm:$0xff]   ;;  %v1877_v60 = vld [vmem:[%s2351_s13 + $0x110] ss:$8 sps:$4 sm:$0xff]   ;;  %v1880_v62 = vld [vmem:[%s2351_s13 + $0x104] ss:$8 sps:$4 sm:$0xff]  }
  0x66   : > { %1355 = vmatpush1.bf16.msra.mxu0 %v1852_v43  ;;  %v1882_v63 = vld [vmem:[%s2351_s13] ss:$8 sps:$4 sm:$0xff]   ;;  %v1884_v1 = vld [vmem:[%s2351_s13 + $0xf4] ss:$8 sps:$4 sm:$0xff]   ;;  %v1888_v3 = vld [vmem:[%s2351_s13 + $0xf0] ss:$8 sps:$4 sm:$0xff]  }
  0x67   : > { %1396 = vmatpush1.bf16.msra.mxu1 %v1853_v44  ;;  %1356 = vmatprep.subr.bf16.mxu0 %v1854_v45  ;;  %v1883_v0 = vld [vmem:[%s2351_s13 + $0x100] ss:$8 sps:$4 sm:$0xff]   ;;  %v1886_v2 = vld [vmem:[%s2351_s13 + $0x1f4] ss:$8 sps:$4 sm:$0xff]   ;;  %v1889_v4 = vld [vmem:[%s2351_s13 + $0x1f0] ss:$8 sps:$4 sm:$0xff]  }
  0x68   : > { %1397 = vmatprep.subr.bf16.mxu1 %v1856_v46  ;;  %v1890_v5 = vld [vmem:[%s2351_s13 + $0xe4] ss:$8 sps:$4 sm:$0xff]   ;;  %v1894_v7 = vld [vmem:[%s2351_s13 + $0xe0] ss:$8 sps:$4 sm:$0xff]   ;;  %v1896_v9 = vld [vmem:[%s2351_s13 + $0xd4] ss:$8 sps:$4 sm:$0xff]  }
  0x69   : > { %v1892_v6 = vld [vmem:[%s2351_s13 + $0x1e4] ss:$8 sps:$4 sm:$0xff]   ;;  %v1895_v8 = vld [vmem:[%s2351_s13 + $0x1e0] ss:$8 sps:$4 sm:$0xff]   ;;  %v1898_v10 = vld [vmem:[%s2351_s13 + $0x1d4] ss:$8 sps:$4 sm:$0xff]  }
  0x6a   : > { %1357 = vmatpush1.bf16.msra.mxu0 %v1858_v47  ;;  %v1900_v11 = vld [vmem:[%s2351_s13 + $0xd0] ss:$8 sps:$4 sm:$0xff]   ;;  %v1902_v13 = vld [vmem:[%s2351_s13 + $0xc4] ss:$8 sps:$4 sm:$0xff]   ;;  %v1906_v18 = vld [vmem:[%s2351_s13 + $0xc0] ss:$8 sps:$4 sm:$0xff]  }
  0x6b   : > { %1398 = vmatpush1.bf16.msra.mxu1 %v1859_v48  ;;  %1358 = vmatprep.subr.bf16.mxu0 %v1860_v49  ;;  %v1901_v12 = vld [vmem:[%s2351_s13 + $0x1d0] ss:$8 sps:$4 sm:$0xff]   ;;  %v1904_v14 = vld [vmem:[%s2351_s13 + $0x1c4] ss:$8 sps:$4 sm:$0xff]   ;;  %v1907_v19 = vld [vmem:[%s2351_s13 + $0x1c0] ss:$8 sps:$4 sm:$0xff]  }
  0x6c   : > { %1399 = vmatprep.subr.bf16.mxu1 %v1862_v50  ;;  %v750_v15 = vld [vmem:[%s2334_s30] sm:$0xff]  ;;  %v751_v17 = vld [vmem:[%s2334_s30 + $0x8] sm:$0xff]  ;;  %v1914_v25 = vld [vmem:[%s2351_s13 + $0xa4] ss:$8 sps:$4 sm:$0xff]   ;;  %p1771_p13 = scmp.ne.s32.totalorder %s2024_s17, 5 }
  0x6d   : > { %v1670_v16 = vcombine.high %v750_v15, %v750_v15  ;;  %v1672_v20 = vcombine.high %v751_v17, %v751_v17  ;;  %v1908_v21 = vld [vmem:[%s2351_s13 + $0xb4] ss:$8 sps:$4 sm:$0xff]   ;;  %v1912_v23 = vld [vmem:[%s2351_s13 + $0xb0] ss:$8 sps:$4 sm:$0xff]   ;;  %v1916_v26 = vld [vmem:[%s2351_s13 + $0x1a4] ss:$8 sps:$4 sm:$0xff]   ;;  %v1669_v38 = vcombine.low %v750_v15, %v750_v15  ;;  %v1671_v39 = vcombine.low %v751_v17, %v751_v17 }
  0x6e   : > { %1359 = vmatpush1.bf16.msra.mxu0 %v1864_v51  ;;  %v1910_v22 = vld [vmem:[%s2351_s13 + $0x1b4] ss:$8 sps:$4 sm:$0xff]   ;;  %v1913_v24 = vld [vmem:[%s2351_s13 + $0x1b0] ss:$8 sps:$4 sm:$0xff]   ;;  %v1918_v27 = vld [vmem:[%s2351_s13 + $0xa0] ss:$8 sps:$4 sm:$0xff]  }
  0x6f   : > { %1400 = vmatpush1.bf16.msra.mxu1 %v1865_v52  ;;  %1360 = vmatprep.subr.bf16.mxu0 %v1866_v53  ;;  %v1919_v28 = vld [vmem:[%s2351_s13 + $0x1a0] ss:$8 sps:$4 sm:$0xff]   ;;  %v1920_v29 = vld [vmem:[%s2351_s13 + $0x94] ss:$8 sps:$4 sm:$0xff]   ;;  %v1924_v31 = vld [vmem:[%s2351_s13 + $0x90] ss:$8 sps:$4 sm:$0xff]  }
  0x70   : > { %1401 = vmatprep.subr.bf16.mxu1 %v1868_v54  ;;  %1382 = vmatprep.mubr.bf16.mxu0 %v1670_v16  ;;  %v1922_v30 = vld [vmem:[%s2351_s13 + $0x194] ss:$8 sps:$4 sm:$0xff]   ;;  %v1925_v32 = vld [vmem:[%s2351_s13 + $0x190] ss:$8 sps:$4 sm:$0xff]   ;;  %v1926_v33 = vld [vmem:[%s2351_s13 + $0x84] ss:$8 sps:$4 sm:$0xff]  }
  0x71   : > { %1423 = vmatprep.mubr.bf16.mxu1 %v1672_v20  ;;  %v1928_v34 = vld [vmem:[%s2351_s13 + $0x184] ss:$8 sps:$4 sm:$0xff]   ;;  %v1930_v35 = vld [vmem:[%s2351_s13 + $0x80] ss:$8 sps:$4 sm:$0xff]   ;;  %v1938_v37 = vld [vmem:[%s2351_s13 + $0x274] ss:$8 sps:$4 sm:$0xff]  }
  0x72   : > { %1361 = vmatpush1.bf16.msra.mxu0 %v1870_v55  ;;  %v1931_v36 = vld [vmem:[%s2351_s13 + $0x180] ss:$8 sps:$4 sm:$0xff]   ;;  %v1936_v40 = vld [vmem:[%s2351_s13 + $0x270] ss:$8 sps:$4 sm:$0xff]   ;;  %v1941_v42 = vld [vmem:[%s2351_s13 + $0x264] ss:$8 sps:$4 sm:$0xff]  }
  0x73   : > { %1402 = vmatpush1.bf16.msra.mxu1 %v1871_v56  ;;  %1362 = vmatprep.subr.bf16.mxu0 %v1872_v57  ;;  %v2423_v41 = vld [vmem:[%s2334_s30 + $0x10] sm:$0xff]  ;;  %v1944_v45 = vld [vmem:[%s2351_s13 + $0x254] ss:$8 sps:$4 sm:$0xff]   ;;  %v1942_v46 = vld [vmem:[%s2351_s13 + $0x250] ss:$8 sps:$4 sm:$0xff]  }
  0x74   : > { %1403 = vmatprep.subr.bf16.mxu1 %v1874_v58  ;;  %v1674_v43 = vcombine.high %v2423_v41, %v2423_v41  ;;  %v1939_v44 = vld [vmem:[%s2351_s13 + $0x260] ss:$8 sps:$4 sm:$0xff]   ;;  %v1947_v47 = vld [vmem:[%s2351_s13 + $0x244] ss:$8 sps:$4 sm:$0xff]   ;;  %v1950_v49 = vld [vmem:[%s2351_s13 + $0x234] ss:$8 sps:$4 sm:$0xff]  }
  0x75   : > { %v1945_v48 = vld [vmem:[%s2351_s13 + $0x240] ss:$8 sps:$4 sm:$0xff]   ;;  %v1948_v50 = vld [vmem:[%s2351_s13 + $0x230] ss:$8 sps:$4 sm:$0xff]   ;;  %v1953_v51 = vld [vmem:[%s2351_s13 + $0x224] ss:$8 sps:$4 sm:$0xff]  }
  0x76   : > { %1363 = vmatpush1.bf16.msra.mxu0 %v1876_v59  ;;  %v1951_v52 = vld [vmem:[%s2351_s13 + $0x220] ss:$8 sps:$4 sm:$0xff]   ;;  %v1956_v53 = vld [vmem:[%s2351_s13 + $0x214] ss:$8 sps:$4 sm:$0xff]   ;;  %v1954_v54 = vld [vmem:[%s2351_s13 + $0x210] ss:$8 sps:$4 sm:$0xff]  }
  0x77   : > { %1404 = vmatpush1.bf16.msra.mxu1 %v1877_v60  ;;  %1364 = vmatprep.subr.bf16.mxu0 %v1878_v61  ;;  %v1959_v55 = vld [vmem:[%s2351_s13 + $0x204] ss:$8 sps:$4 sm:$0xff]   ;;  %v1957_v56 = vld [vmem:[%s2351_s13 + $0x200] ss:$8 sps:$4 sm:$0xff]   ;;  %v1962_v57 = vld [vmem:[%s2351_s13 + $0x2f4] ss:$8 sps:$4 sm:$0xff]  }
  0x78   : > { %1405 = vmatprep.subr.bf16.mxu1 %v1880_v62  ;;  %v1960_v58 = vld [vmem:[%s2351_s13 + $0x2f0] ss:$8 sps:$4 sm:$0xff]   ;;  %v1965_v59 = vld [vmem:[%s2351_s13 + $0x2e4] ss:$8 sps:$4 sm:$0xff]   ;;  %v1963_v60 = vld [vmem:[%s2351_s13 + $0x2e0] ss:$8 sps:$4 sm:$0xff]  }
  0x79   : > { %v1968_v61 = vld [vmem:[%s2351_s13 + $0x2d4] ss:$8 sps:$4 sm:$0xff]   ;;  %v1966_v62 = vld [vmem:[%s2351_s13 + $0x2d0] ss:$8 sps:$4 sm:$0xff]  }
  0x7a   : > { %1365 = vmatpush1.bf16.msra.mxu0 %v1882_v63  ;;  %v1971_v63 = vld [vmem:[%s2351_s13 + $0x2c4] ss:$8 sps:$4 sm:$0xff]  }
  0x7b   : > { %1406 = vmatpush1.bf16.msra.mxu1 %v1883_v0  ;;  %1366 = vmatprep.subr.bf16.mxu0 %v1884_v1  ;;  %v1969_v0 = vld [vmem:[%s2351_s13 + $0x2c0] ss:$8 sps:$4 sm:$0xff]   ;;  %v1974_v1 = vld [vmem:[%s2351_s13 + $0x2b4] ss:$8 sps:$4 sm:$0xff]  }
  0x7c   : > { %1407 = vmatprep.subr.bf16.mxu1 %v1886_v2  ;;  %v1972_v2 = vld [vmem:[%s2351_s13 + $0x2b0] ss:$8 sps:$4 sm:$0xff]  }
  0x7e   : > { %1367 = vmatpush2.bf16.msra.mxu0 %v1888_v3  ;;  %v1977_v3 = vld [vmem:[%s2351_s13 + $0x2a4] ss:$8 sps:$4 sm:$0xff]  }
  0x7f   : > { %1408 = vmatpush2.bf16.msra.mxu1 %v1889_v4  ;;  %1368 = vmatprep.subr.bf16.mxu0 %v1890_v5  ;;  %v1975_v4 = vld [vmem:[%s2351_s13 + $0x2a0] ss:$8 sps:$4 sm:$0xff]   ;;  %v1980_v5 = vld [vmem:[%s2351_s13 + $0x294] ss:$8 sps:$4 sm:$0xff]  }
  0x80   : > { %1409 = vmatprep.subr.bf16.mxu1 %v1892_v6  ;;  %v1978_v6 = vld [vmem:[%s2351_s13 + $0x290] ss:$8 sps:$4 sm:$0xff]  }
  0x82   : > { %1369 = vmatpush2.bf16.msra.mxu0 %v1894_v7  ;;  %v1983_v7 = vld [vmem:[%s2351_s13 + $0x284] ss:$8 sps:$4 sm:$0xff]  }
  0x83   : > { %1410 = vmatpush2.bf16.msra.mxu1 %v1895_v8  ;;  %1370 = vmatprep.subr.bf16.mxu0 %v1896_v9  ;;  %v1981_v8 = vld [vmem:[%s2351_s13 + $0x280] ss:$8 sps:$4 sm:$0xff]   ;;  %v1673_v9 = vcombine.low %v2423_v41, %v2423_v41 }
  0x84   : > { %1411 = vmatprep.subr.bf16.mxu1 %v1898_v10 }
  0x86   : > { %1371 = vmatpush2.bf16.msra.mxu0 %v1900_v11 }
  0x87   : > { %1412 = vmatpush2.bf16.msra.mxu1 %v1901_v12  ;;  %1372 = vmatprep.subr.bf16.mxu0 %v1902_v13 }
  0x88   : > { %1413 = vmatprep.subr.bf16.mxu1 %v1904_v14 }
  0x8a   : > { %1373 = vmatpush2.bf16.msra.mxu0 %v1906_v18 }
  0x8b   : > { %1414 = vmatpush2.bf16.msra.mxu1 %v1907_v19  ;;  %1374 = vmatprep.subr.bf16.mxu0 %v1908_v21  ;;  %v748_v19 = vld [vmem:[#allocation2] sm:$0xff] }
  0x8c   : > { %1415 = vmatprep.subr.bf16.mxu1 %v1910_v22 }
  0x8e   : > { %1375 = vmatpush2.bf16.msra.mxu0 %v1912_v23  ;;  %v749_v23 = vld [vmem:[#allocation2 + $0x8] sm:$0xff] }
  0x8f   : > { %1416 = vmatpush2.bf16.msra.mxu1 %v1913_v24  ;;  %1376 = vmatprep.subr.bf16.mxu0 %v1914_v25 }
  0x90   : > { %1417 = vmatprep.subr.bf16.mxu1 %v1916_v26 }
  0x92   : > { %1377 = vmatpush2.bf16.msra.mxu0 %v1918_v27 }
  0x93   : > { %1418 = vmatpush2.bf16.msra.mxu1 %v1919_v28  ;;  %1378 = vmatprep.subr.bf16.mxu0 %v1920_v29 }
  0x94   : > { %1419 = vmatprep.subr.bf16.mxu1 %v1922_v30 }
  0x96   : > { %1379 = vmatpush2.bf16.msra.mxu0 %v1924_v31 }
  0x97   : > { %1420 = vmatpush2.bf16.msra.mxu1 %v1925_v32  ;;  %1380 = vmatprep.subr.bf16.mxu0 %v1926_v33 }
  0x98   : > { %1421 = vmatprep.subr.bf16.mxu1 %v1928_v34 }
  0x9a   : > { %1381 = vmatpush2.bf16.msra.mxu0 %v1930_v35 }
  0x9b   : > { %1422 = vmatpush2.bf16.msra.mxu1 %v1931_v36  ;;  %1432 = vmatprep.subr.bf16.mxu0 %v1938_v37 }
  0x9d   : > { %1383 = vmatmul.mubr.bf16.vlgmr.msra.gmra.mxu0 %v1669_v38 }
  0x9e   : > { %1424 = vmatmul.mubr.bf16.vlgmr.msra.gmra.mxu1 %v1671_v39  ;;  %1433 = vmatpush1.bf16.msra.mxu0 %v1936_v40 }
  0x9f   : > { %1464 = vmatprep.mubr.bf16.mxu0 %v1674_v43  ;;  %1434 = vmatprep.subr.bf16.mxu0 %v1941_v42 }
  0xa2   : > { %1435 = vmatpush1.bf16.msra.mxu0 %v1939_v44 }
  0xa3   : > { %1436 = vmatprep.subr.bf16.mxu0 %v1944_v45 }
  0xa6   : > { %1437 = vmatpush1.bf16.msra.mxu0 %v1942_v46 }
  0xa7   : > { %1438 = vmatprep.subr.bf16.mxu0 %v1947_v47 }
  0xaa   : > { %1439 = vmatpush1.bf16.msra.mxu0 %v1945_v48 }
  0xab   : > { %1440 = vmatprep.subr.bf16.mxu0 %v1950_v49 }
  0xae   : > { %1441 = vmatpush1.bf16.msra.mxu0 %v1948_v50 }
  0xaf   : > { %1442 = vmatprep.subr.bf16.mxu0 %v1953_v51 }
  0xb2   : > { %1443 = vmatpush1.bf16.msra.mxu0 %v1951_v52 }
  0xb3   : > { %1444 = vmatprep.subr.bf16.mxu0 %v1956_v53 }
  0xb6   : > { %1445 = vmatpush1.bf16.msra.mxu0 %v1954_v54 }
  0xb7   : > { %1446 = vmatprep.subr.bf16.mxu0 %v1959_v55 }
  0xba   : > { %1447 = vmatpush1.bf16.msra.mxu0 %v1957_v56 }
  0xbb   : > { %1448 = vmatprep.subr.bf16.mxu0 %v1962_v57 }
  0xbe   : > { %1449 = vmatpush2.bf16.msra.mxu0 %v1960_v58 }
  0xbf   : > { %1450 = vmatprep.subr.bf16.mxu0 %v1965_v59 }
  0xc2   : > { %1451 = vmatpush2.bf16.msra.mxu0 %v1963_v60 }
  0xc3   : > { %1452 = vmatprep.subr.bf16.mxu0 %v1968_v61 }
  0xc6   : > { %1453 = vmatpush2.bf16.msra.mxu0 %v1966_v62 }
  0xc7   : > { %1454 = vmatprep.subr.bf16.mxu0 %v1971_v63 }
  0xca   : > { %1455 = vmatpush2.bf16.msra.mxu0 %v1969_v0 }
  0xcb   : > { %1456 = vmatprep.subr.bf16.mxu0 %v1974_v1 }
  0xce   : > { %1457 = vmatpush2.bf16.msra.mxu0 %v1972_v2 }
  0xcf   : > { %1458 = vmatprep.subr.bf16.mxu0 %v1977_v3 }
  0xd2   : > { %1459 = vmatpush2.bf16.msra.mxu0 %v1975_v4 }
  0xd3   : > { %1460 = vmatprep.subr.bf16.mxu0 %v1980_v5 }
  0xd6   : > { %1461 = vmatpush2.bf16.msra.mxu0 %v1978_v6 }
  0xd7   : > { %1462 = vmatprep.subr.bf16.mxu0 %v1983_v7 }
  0xda   : > { %1463 = vmatpush2.bf16.msra.mxu0 %v1981_v8 }
  0xdd   : > { %1465 = vmatmul.mubr.bf16.vlgmr.msra.gmra.mxu0 %v1673_v9 }
 0x15d   : > { %v1384_v10 = vpop.f32.mrf.mxu0 }
 0x15e   : > { %v1425_v11 = vpop.f32.mrf.mxu1 }
 0x15f   : > { %v1386_v12 = vpop.f32.mrf.mxu0  ;;  %v1426_v18 = vadd.f32 %v1425_v11, %v1384_v10 }
 0x160   : > { %v1427_v13 = vpop.f32.mrf.mxu1 }
 0x161   : > { %v1388_v14 = vpop.f32.mrf.mxu0  ;;  %v1428_v21 = vadd.f32 %v1427_v13, %v1386_v12 }
 0x162   : > { %v1429_v15 = vpop.f32.mrf.mxu1 }
 0x163   : > { %v1389_v16 = vpop.f32.mrf.mxu0 }
 0x164   : > { %v1430_v17 = vpop.f32.mrf.mxu1 }
 0x19d   : > { %v1466_v20 = vpop.f32.mrf.mxu0 }
 0x19e   : > { %v1467_v22 = vadd.f32 %v1466_v20, %v1426_v18 }
 0x19f   : > { %v1468_v24 = vpop.f32.mrf.mxu0 }
 0x1a0   : > { %v1473_v25 = vadd.f32 %v1467_v22, %v748_v19  ;;  %v1469_v26 = vadd.f32 %v1468_v24, %v1428_v21  ;;  %1480 = sbr.rel (%p1771_p13) target bundleno = 438 (0x1b6), region = 82 }
 0x1a1   : > { %v1470_v27 = vpop.f32.mrf.mxu0 }
 0x1a2   : > { %1475 = vst [vmem:[#allocation2] sm:$0xff] %v1473_v25  ;;  %v1474_v28 = vadd.f32 %v1469_v26, %v749_v23 }
 0x1a3   : > { %v1471_v29 = vpop.f32.mrf.mxu0 }
 0x1a4   : > { %1476 = vst [vmem:[#allocation2 + $0x8] sm:$0xff] %v1474_v28 }
 0x1a5   : > { %v1485_v30 = vlaneseq  ;;  %v1483_v32 = vld [vmem:[%s720_s15] sm:$0x3] }
 0x1a6   : > { %v1497_v33 = vld [vmem:[%s2344_s9] sm:$0xff] }
 0x1a7   : > { %v1486_v31 = vshrl.u32 %v1485_v30, 7  ;;  %v1498_v40 = vunpack.c.l.bf16 %v1497_v33  ;;  %v1499_v41 = vunpack.c.h.bf16 %v1497_v33 }
 0x1a9   : > { %v1487_v34 = vsub.s32 0, %v1486_v31  ;;  %v1491_v35 = vsub.s32 1, %v1486_v31  ;;  %v1481_v36 = vld [vmem:[#allocation2] sm:$0xff] }
 0x1ab   : > { %v1482_v37 = vld [vmem:[#allocation2 + $0x8] sm:$0xff]  ;;  %v1488_v38 = vrot.slane %v1483_v32, %v1487_v34  ;;  %v1492_v39 = vrot.slane %v1483_v32, %v1491_v35 }
 0x1ad   : > { %v1495_v42 = vadd.f32 %v1488_v38, %v1481_v36  ;;  %v1496_v43 = vadd.f32 %v1492_v39, %v1482_v37 }
 0x1af   : > { %v1500_v44 = vadd.f32 %v1498_v40, %v1495_v42  ;;  %v1501_v45 = vadd.f32 %v1499_v41, %v1496_v43 }
 0x1b1   : > { %v1502_v46 = vmax.f32 %v1500_v44, 0.0  ;;  %v1503_v47 = vmax.f32 %v1501_v45, 0.0 }
 0x1b3   : > { %v1776_v48 = vpack.c.bf16 %v1503_v47, %v1502_v46 }
 0x1b5   : > { %1512 = vst [vmem:[%s2349_s12] sm:$0xff] %v1776_v48 }
 0x1b6 PF: > { %s14_s21 = sadd.s32 1, %s2040_s21   ;;  %s2493_s15 = smov %s2020_s16 }
 0x1b7   : > { %p11_p0 = scmp.ge.s32.totalorder %s14_s21, 14   ;;  %s2494_s16 = smov %s2119_s28 }
 0x1b8   : > { %s2495_s17 = smov %s2032_s19  ;;  %s2496_s18 = smov %s2036_s20 }
 0x1b9   : > { %s2497_s19 = smov %s2500_s22  ;;  %s2498_s20 = smov %s2504_s23 }
 0x1ba   :  { %13 = sbr.rel (!%p11_p0) target bundleno = 4 (0x4), region = 126 }

// kernel: resnet18_forward.41
= control target key start
LH: loop header
LB: loop body
LE: loop exit
PB: predicated region body
PF: predicated region fallthrough
CT: control target
= control target key end

     0   :  { %s1975_s12 = smov 0   ;;  %s1977_s13 = smov 0   ;;  %s2389_s0 = inlined_call_operand.vmem [shape: bf16[8,4608], index: 0, kind: input, shape index: {}]   ;;  %s2390_s1 = inlined_call_operand.vmem [shape: bf16[4608,512], index: 1, kind: input, shape index: {}]   ;;  %s2391_s2 = inlined_call_operand.vmem [shape: f32[1,512], index: 2, kind: input, shape index: {}]   ;;  %s2392_s3 = inlined_call_operand.vmem [shape: bf16[8,512], index: 3, kind: output, shape index: {}]  }
   0x1   :  { %s1979_s14 = smov 0   ;;  %s1981_s15 = smov 0  }
   0x2   :  { %s1983_s16 = smov 0   ;;  %s1985_s17 = smov 0  }
   0x3   :  { %s1987_s18 = smov 0  }
   0x4 LB: > { %s25_s19 = sadd.s32 1, %s1944_s16  ;;  %s28_s20 = sadd.s32 1, %s1948_s17  ;;  %s1952_s18 = sphi %s1987_s18, %s13_s18   ;;  %s1948_s17 = sphi %s1985_s17, %s2398_s17   ;;  %s1944_s16 = sphi %s1983_s16, %s2397_s16   ;;  %s1940_s15 = sphi %s1981_s15, %s2396_s15   ;;  %s1936_s14 = sphi %s1979_s14, %s2395_s14   ;;  %s1932_s13 = sphi %s1977_s13, %s2394_s13   ;;  %s1928_s12 = sphi %s1975_s12, %s2393_s12  }
   0x5   : > { %p26_p0 = scmp.ge.s32.totalorder %s25_s19, 6  ;;  %p76_p1 = scmp.ne.s32.totalorder %s1932_s13, %s1928_s12 }
   0x6   : > { %p77_p2 = scmp.eq.s32.totalorder %s1952_s18, 0  ;;  %s69_s24 = sadd.s32 1, %s1932_s13 }
   0x7   : > { %s2400_s19 = smov (%p26_p0, %s25_s19), 0  ;;  %s2402_s20 = smov (!%p26_p0, %s28_s20), %s1948_s17 }
   0x8   : > { %p78_p3 = por %p77_p2, %p76_p1  ;;  %p30_p4 = scmp.ge.s32.totalorder %s2402_s20, 2 }
   0x9   : > { %s64_s21 = ssub.s32 %s1944_s16, %s2400_s19  ;;  %p1571_p6 = scmp.ge.s32.totalorder %s1952_s18, 12 }
   0xa   : > { %s2404_s20 = smov (%p30_p4, %s2402_s20), 0 }
   0xb   : > { %s65_s22 = ssub.s32 %s1948_s17, %s2404_s20  ;;  %156 = sbr.rel (%p1571_p6) target bundleno = 72 (0x48), region = 16 }
   0xc   : > { %s66_s23 = sor.u32 %s65_s22, %s64_s21 }
   0xd   : > { %p67_p5 = scmp.eq.s32.totalorder %s66_s23, 0 }
   0xf   : > { %s2026_s25 = scalar_select %p67_p5, %s1932_s13, %s69_s24  }
  0x10   : > { %172 = sbr.rel (!%p78_p3) target bundleno = 72 (0x48), region = 24  ;;  %s174_s26 = sand.u32 (%p78_p3), 1, %s1932_s13  }
  0x11   : > { %s1689_s27 = smul.u32 (%p78_p3), 768, %s174_s26  ;;  %s1572_s28 = sshll.u32 (%p78_p3), %s1948_s17, 1 }
  0x12   : > { %s1687_s29 = smul.u32 (%p78_p3), 384, %s1944_s16 }
  0x13   : > { %s2040_s8 = scalar_lea.vmem (%p78_p3), [#allocation3], %s1689_s27 }
  0x14   : > { %s180_s30 = sadd.s32 (%p78_p3), %s1687_s29, %s1572_s28 }
  0x15   : > { %s1574_s4 = sshll.u32 %s180_s30, 2 }
  0x16   : > { %s2035_s7 = scalar_lea.vmem %s2390_s1, %s1574_s4 }
  0x17   : > { %v401_v0 = vld [vmem:[%s2035_s7] sm:$0xff]  ;;  %v403_v1 = vld [vmem:[%s2035_s7 + $0x10] sm:$0xff] }
  0x18   : > { %v405_v2 = vld [vmem:[%s2035_s7 + $0x20] sm:$0xff]  ;;  %402 = vst [vmem:[%s2040_s8] sm:$0xff] %v401_v0  ;;  %404 = vst [vmem:[%s2040_s8 + $0x8] sm:$0xff] %v403_v1  ;;  %v407_v3 = vld [vmem:[%s2035_s7 + $0x30] sm:$0xff] }
  0x19   : > { %406 = vst [vmem:[%s2040_s8 + $0x10] sm:$0xff] %v405_v2  ;;  %v409_v4 = vld [vmem:[%s2035_s7 + $0x40] sm:$0xff]  ;;  %v411_v5 = vld [vmem:[%s2035_s7 + $0x50] sm:$0xff]  ;;  %408 = vst [vmem:[%s2040_s8 + $0x18] sm:$0xff] %v407_v3 }
  0x1a   : > { %410 = vst [vmem:[%s2040_s8 + $0x20] sm:$0xff] %v409_v4  ;;  %412 = vst [vmem:[%s2040_s8 + $0x28] sm:$0xff] %v411_v5  ;;  %v413_v6 = vld [vmem:[%s2035_s7 + $0x60] sm:$0xff]  ;;  %v415_v7 = vld [vmem:[%s2035_s7 + $0x70] sm:$0xff] }
  0x1b   : > { %v417_v8 = vld [vmem:[%s2035_s7 + $0x80] sm:$0xff]  ;;  %414 = vst [vmem:[%s2040_s8 + $0x30] sm:$0xff] %v413_v6  ;;  %416 = vst [vmem:[%s2040_s8 + $0x38] sm:$0xff] %v415_v7  ;;  %v419_v9 = vld [vmem:[%s2035_s7 + $0x90] sm:$0xff] }
  0x1c   : > { %418 = vst [vmem:[%s2040_s8 + $0x40] sm:$0xff] %v417_v8  ;;  %v421_v10 = vld [vmem:[%s2035_s7 + $0xa0] sm:$0xff]  ;;  %v423_v11 = vld [vmem:[%s2035_s7 + $0xb0] sm:$0xff]  ;;  %420 = vst [vmem:[%s2040_s8 + $0x48] sm:$0xff] %v419_v9 }
  0x1d   : > { %422 = vst [vmem:[%s2040_s8 + $0x50] sm:$0xff] %v421_v10  ;;  %424 = vst [vmem:[%s2040_s8 + $0x58] sm:$0xff] %v423_v11  ;;  %v425_v12 = vld [vmem:[%s2035_s7 + $0xc0] sm:$0xff]  ;;  %v427_v13 = vld [vmem:[%s2035_s7 + $0xd0] sm:$0xff] }
  0x1e   : > { %v429_v14 = vld [vmem:[%s2035_s7 + $0xe0] sm:$0xff]  ;;  %426 = vst [vmem:[%s2040_s8 + $0x60] sm:$0xff] %v425_v12  ;;  %428 = vst [vmem:[%s2040_s8 + $0x68] sm:$0xff] %v427_v13  ;;  %v431_v15 = vld [vmem:[%s2035_s7 + $0xf0] sm:$0xff] }
  0x1f   : > { %430 = vst [vmem:[%s2040_s8 + $0x70] sm:$0xff] %v429_v14  ;;  %v433_v16 = vld [vmem:[%s2035_s7 + $0x100] sm:$0xff]  ;;  %v435_v17 = vld [vmem:[%s2035_s7 + $0x110] sm:$0xff]  ;;  %432 = vst [vmem:[%s2040_s8 + $0x78] sm:$0xff] %v431_v15 }
  0x20   : > { %434 = vst [vmem:[%s2040_s8 + $0x80] sm:$0xff] %v433_v16  ;;  %436 = vst [vmem:[%s2040_s8 + $0x88] sm:$0xff] %v435_v17  ;;  %v437_v18 = vld [vmem:[%s2035_s7 + $0x120] sm:$0xff]  ;;  %v439_v19 = vld [vmem:[%s2035_s7 + $0x130] sm:$0xff] }
  0x21   : > { %v441_v20 = vld [vmem:[%s2035_s7 + $0x140] sm:$0xff]  ;;  %438 = vst [vmem:[%s2040_s8 + $0x90] sm:$0xff] %v437_v18  ;;  %440 = vst [vmem:[%s2040_s8 + $0x98] sm:$0xff] %v439_v19  ;;  %v443_v21 = vld [vmem:[%s2035_s7 + $0x150] sm:$0xff] }
  0x22   : > { %442 = vst [vmem:[%s2040_s8 + $0xa0] sm:$0xff] %v441_v20  ;;  %v445_v22 = vld [vmem:[%s2035_s7 + $0x160] sm:$0xff]  ;;  %v447_v23 = vld [vmem:[%s2035_s7 + $0x170] sm:$0xff]  ;;  %444 = vst [vmem:[%s2040_s8 + $0xa8] sm:$0xff] %v443_v21 }
  0x23   : > { %446 = vst [vmem:[%s2040_s8 + $0xb0] sm:$0xff] %v445_v22  ;;  %448 = vst [vmem:[%s2040_s8 + $0xb8] sm:$0xff] %v447_v23  ;;  %v449_v24 = vld [vmem:[%s2035_s7 + $0x180] sm:$0xff]  ;;  %v451_v25 = vld [vmem:[%s2035_s7 + $0x190] sm:$0xff] }
  0x24   : > { %v453_v26 = vld [vmem:[%s2035_s7 + $0x1a0] sm:$0xff]  ;;  %450 = vst [vmem:[%s2040_s8 + $0xc0] sm:$0xff] %v449_v24  ;;  %452 = vst [vmem:[%s2040_s8 + $0xc8] sm:$0xff] %v451_v25  ;;  %v455_v27 = vld [vmem:[%s2035_s7 + $0x1b0] sm:$0xff] }
  0x25   : > { %454 = vst [vmem:[%s2040_s8 + $0xd0] sm:$0xff] %v453_v26  ;;  %v457_v28 = vld [vmem:[%s2035_s7 + $0x1c0] sm:$0xff]  ;;  %v459_v29 = vld [vmem:[%s2035_s7 + $0x1d0] sm:$0xff]  ;;  %456 = vst [vmem:[%s2040_s8 + $0xd8] sm:$0xff] %v455_v27 }
  0x26   : > { %458 = vst [vmem:[%s2040_s8 + $0xe0] sm:$0xff] %v457_v28  ;;  %460 = vst [vmem:[%s2040_s8 + $0xe8] sm:$0xff] %v459_v29  ;;  %v461_v30 = vld [vmem:[%s2035_s7 + $0x1e0] sm:$0xff]  ;;  %v463_v31 = vld [vmem:[%s2035_s7 + $0x1f0] sm:$0xff] }
  0x27   : > { %v465_v32 = vld [vmem:[%s2035_s7 + $0x200] sm:$0xff]  ;;  %462 = vst [vmem:[%s2040_s8 + $0xf0] sm:$0xff] %v461_v30  ;;  %464 = vst [vmem:[%s2040_s8 + $0xf8] sm:$0xff] %v463_v31  ;;  %v467_v33 = vld [vmem:[%s2035_s7 + $0x210] sm:$0xff] }
  0x28   : > { %466 = vst [vmem:[%s2040_s8 + $0x100] sm:$0xff] %v465_v32  ;;  %v469_v34 = vld [vmem:[%s2035_s7 + $0x220] sm:$0xff]  ;;  %v471_v35 = vld [vmem:[%s2035_s7 + $0x230] sm:$0xff]  ;;  %468 = vst [vmem:[%s2040_s8 + $0x108] sm:$0xff] %v467_v33 }
  0x29   : > { %470 = vst [vmem:[%s2040_s8 + $0x110] sm:$0xff] %v469_v34  ;;  %472 = vst [vmem:[%s2040_s8 + $0x118] sm:$0xff] %v471_v35  ;;  %v473_v36 = vld [vmem:[%s2035_s7 + $0x240] sm:$0xff]  ;;  %v475_v37 = vld [vmem:[%s2035_s7 + $0x250] sm:$0xff] }
  0x2a   : > { %v477_v38 = vld [vmem:[%s2035_s7 + $0x260] sm:$0xff]  ;;  %474 = vst [vmem:[%s2040_s8 + $0x120] sm:$0xff] %v473_v36  ;;  %476 = vst [vmem:[%s2040_s8 + $0x128] sm:$0xff] %v475_v37  ;;  %v479_v39 = vld [vmem:[%s2035_s7 + $0x270] sm:$0xff] }
  0x2b   : > { %478 = vst [vmem:[%s2040_s8 + $0x130] sm:$0xff] %v477_v38  ;;  %v481_v40 = vld [vmem:[%s2035_s7 + $0x280] sm:$0xff]  ;;  %v483_v41 = vld [vmem:[%s2035_s7 + $0x290] sm:$0xff]  ;;  %480 = vst [vmem:[%s2040_s8 + $0x138] sm:$0xff] %v479_v39 }
  0x2c   : > { %482 = vst [vmem:[%s2040_s8 + $0x140] sm:$0xff] %v481_v40  ;;  %484 = vst [vmem:[%s2040_s8 + $0x148] sm:$0xff] %v483_v41  ;;  %v485_v42 = vld [vmem:[%s2035_s7 + $0x2a0] sm:$0xff]  ;;  %v487_v43 = vld [vmem:[%s2035_s7 + $0x2b0] sm:$0xff] }
  0x2d   : > { %v489_v44 = vld [vmem:[%s2035_s7 + $0x2c0] sm:$0xff]  ;;  %486 = vst [vmem:[%s2040_s8 + $0x150] sm:$0xff] %v485_v42  ;;  %488 = vst [vmem:[%s2040_s8 + $0x158] sm:$0xff] %v487_v43  ;;  %v491_v45 = vld [vmem:[%s2035_s7 + $0x2d0] sm:$0xff] }
  0x2e   : > { %490 = vst [vmem:[%s2040_s8 + $0x160] sm:$0xff] %v489_v44  ;;  %v493_v46 = vld [vmem:[%s2035_s7 + $0x2e0] sm:$0xff]  ;;  %v495_v47 = vld [vmem:[%s2035_s7 + $0x2f0] sm:$0xff]  ;;  %492 = vst [vmem:[%s2040_s8 + $0x168] sm:$0xff] %v491_v45 }
  0x2f   : > { %494 = vst [vmem:[%s2040_s8 + $0x170] sm:$0xff] %v493_v46  ;;  %496 = vst [vmem:[%s2040_s8 + $0x178] sm:$0xff] %v495_v47  ;;  %v497_v48 = vld [vmem:[%s2035_s7 + $0x300] sm:$0xff]  ;;  %v499_v49 = vld [vmem:[%s2035_s7 + $0x310] sm:$0xff] }
  0x30   : > { %v501_v50 = vld [vmem:[%s2035_s7 + $0x320] sm:$0xff]  ;;  %498 = vst [vmem:[%s2040_s8 + $0x180] sm:$0xff] %v497_v48  ;;  %500 = vst [vmem:[%s2040_s8 + $0x188] sm:$0xff] %v499_v49  ;;  %v503_v51 = vld [vmem:[%s2035_s7 + $0x330] sm:$0xff] }
  0x31   : > { %502 = vst [vmem:[%s2040_s8 + $0x190] sm:$0xff] %v501_v50  ;;  %v505_v52 = vld [vmem:[%s2035_s7 + $0x340] sm:$0xff]  ;;  %v507_v53 = vld [vmem:[%s2035_s7 + $0x350] sm:$0xff]  ;;  %504 = vst [vmem:[%s2040_s8 + $0x198] sm:$0xff] %v503_v51 }
  0x32   : > { %506 = vst [vmem:[%s2040_s8 + $0x1a0] sm:$0xff] %v505_v52  ;;  %508 = vst [vmem:[%s2040_s8 + $0x1a8] sm:$0xff] %v507_v53  ;;  %v509_v54 = vld [vmem:[%s2035_s7 + $0x360] sm:$0xff]  ;;  %v511_v55 = vld [vmem:[%s2035_s7 + $0x370] sm:$0xff] }
  0x33   : > { %v513_v56 = vld [vmem:[%s2035_s7 + $0x380] sm:$0xff]  ;;  %510 = vst [vmem:[%s2040_s8 + $0x1b0] sm:$0xff] %v509_v54  ;;  %512 = vst [vmem:[%s2040_s8 + $0x1b8] sm:$0xff] %v511_v55  ;;  %v515_v57 = vld [vmem:[%s2035_s7 + $0x390] sm:$0xff] }
  0x34   : > { %514 = vst [vmem:[%s2040_s8 + $0x1c0] sm:$0xff] %v513_v56  ;;  %v517_v58 = vld [vmem:[%s2035_s7 + $0x3a0] sm:$0xff]  ;;  %v519_v59 = vld [vmem:[%s2035_s7 + $0x3b0] sm:$0xff]  ;;  %516 = vst [vmem:[%s2040_s8 + $0x1c8] sm:$0xff] %v515_v57 }
  0x35   : > { %518 = vst [vmem:[%s2040_s8 + $0x1d0] sm:$0xff] %v517_v58  ;;  %520 = vst [vmem:[%s2040_s8 + $0x1d8] sm:$0xff] %v519_v59  ;;  %v521_v60 = vld [vmem:[%s2035_s7 + $0x3c0] sm:$0xff]  ;;  %v523_v61 = vld [vmem:[%s2035_s7 + $0x3d0] sm:$0xff] }
  0x36   : > { %v525_v62 = vld [vmem:[%s2035_s7 + $0x3e0] sm:$0xff]  ;;  %522 = vst [vmem:[%s2040_s8 + $0x1e0] sm:$0xff] %v521_v60  ;;  %524 = vst [vmem:[%s2040_s8 + $0x1e8] sm:$0xff] %v523_v61  ;;  %v527_v63 = vld [vmem:[%s2035_s7 + $0x3f0] sm:$0xff] }
  0x37   : > { %526 = vst [vmem:[%s2040_s8 + $0x1f0] sm:$0xff] %v525_v62  ;;  %v529_v0 = vld [vmem:[%s2035_s7 + $0x400] sm:$0xff]  ;;  %v531_v1 = vld [vmem:[%s2035_s7 + $0x410] sm:$0xff]  ;;  %528 = vst [vmem:[%s2040_s8 + $0x1f8] sm:$0xff] %v527_v63 }
  0x38   : > { %530 = vst [vmem:[%s2040_s8 + $0x200] sm:$0xff] %v529_v0  ;;  %532 = vst [vmem:[%s2040_s8 + $0x208] sm:$0xff] %v531_v1  ;;  %v533_v2 = vld [vmem:[%s2035_s7 + $0x420] sm:$0xff]  ;;  %v535_v3 = vld [vmem:[%s2035_s7 + $0x430] sm:$0xff] }
  0x39   : > { %v537_v4 = vld [vmem:[%s2035_s7 + $0x440] sm:$0xff]  ;;  %534 = vst [vmem:[%s2040_s8 + $0x210] sm:$0xff] %v533_v2  ;;  %536 = vst [vmem:[%s2040_s8 + $0x218] sm:$0xff] %v535_v3  ;;  %v539_v5 = vld [vmem:[%s2035_s7 + $0x450] sm:$0xff] }
  0x3a   : > { %538 = vst [vmem:[%s2040_s8 + $0x220] sm:$0xff] %v537_v4  ;;  %v541_v6 = vld [vmem:[%s2035_s7 + $0x460] sm:$0xff]  ;;  %v543_v7 = vld [vmem:[%s2035_s7 + $0x470] sm:$0xff]  ;;  %540 = vst [vmem:[%s2040_s8 + $0x228] sm:$0xff] %v539_v5 }
  0x3b   : > { %542 = vst [vmem:[%s2040_s8 + $0x230] sm:$0xff] %v541_v6  ;;  %544 = vst [vmem:[%s2040_s8 + $0x238] sm:$0xff] %v543_v7  ;;  %v545_v8 = vld [vmem:[%s2035_s7 + $0x480] sm:$0xff]  ;;  %v547_v9 = vld [vmem:[%s2035_s7 + $0x490] sm:$0xff] }
  0x3c   : > { %v549_v10 = vld [vmem:[%s2035_s7 + $0x4a0] sm:$0xff]  ;;  %546 = vst [vmem:[%s2040_s8 + $0x240] sm:$0xff] %v545_v8  ;;  %548 = vst [vmem:[%s2040_s8 + $0x248] sm:$0xff] %v547_v9  ;;  %v551_v11 = vld [vmem:[%s2035_s7 + $0x4b0] sm:$0xff] }
  0x3d   : > { %550 = vst [vmem:[%s2040_s8 + $0x250] sm:$0xff] %v549_v10  ;;  %v553_v12 = vld [vmem:[%s2035_s7 + $0x4c0] sm:$0xff]  ;;  %v555_v13 = vld [vmem:[%s2035_s7 + $0x4d0] sm:$0xff]  ;;  %552 = vst [vmem:[%s2040_s8 + $0x258] sm:$0xff] %v551_v11 }
  0x3e   : > { %554 = vst [vmem:[%s2040_s8 + $0x260] sm:$0xff] %v553_v12  ;;  %556 = vst [vmem:[%s2040_s8 + $0x268] sm:$0xff] %v555_v13  ;;  %v557_v14 = vld [vmem:[%s2035_s7 + $0x4e0] sm:$0xff]  ;;  %v559_v15 = vld [vmem:[%s2035_s7 + $0x4f0] sm:$0xff] }
  0x3f   : > { %v561_v16 = vld [vmem:[%s2035_s7 + $0x500] sm:$0xff]  ;;  %558 = vst [vmem:[%s2040_s8 + $0x270] sm:$0xff] %v557_v14  ;;  %560 = vst [vmem:[%s2040_s8 + $0x278] sm:$0xff] %v559_v15  ;;  %v563_v17 = vld [vmem:[%s2035_s7 + $0x510] sm:$0xff] }
  0x40   : > { %562 = vst [vmem:[%s2040_s8 + $0x280] sm:$0xff] %v561_v16  ;;  %v565_v18 = vld [vmem:[%s2035_s7 + $0x520] sm:$0xff]  ;;  %v567_v19 = vld [vmem:[%s2035_s7 + $0x530] sm:$0xff]  ;;  %564 = vst [vmem:[%s2040_s8 + $0x288] sm:$0xff] %v563_v17 }
  0x41   : > { %566 = vst [vmem:[%s2040_s8 + $0x290] sm:$0xff] %v565_v18  ;;  %568 = vst [vmem:[%s2040_s8 + $0x298] sm:$0xff] %v567_v19  ;;  %v569_v20 = vld [vmem:[%s2035_s7 + $0x540] sm:$0xff]  ;;  %v571_v21 = vld [vmem:[%s2035_s7 + $0x550] sm:$0xff] }
  0x42   : > { %v573_v22 = vld [vmem:[%s2035_s7 + $0x560] sm:$0xff]  ;;  %570 = vst [vmem:[%s2040_s8 + $0x2a0] sm:$0xff] %v569_v20  ;;  %572 = vst [vmem:[%s2040_s8 + $0x2a8] sm:$0xff] %v571_v21  ;;  %v575_v23 = vld [vmem:[%s2035_s7 + $0x570] sm:$0xff] }
  0x43   : > { %574 = vst [vmem:[%s2040_s8 + $0x2b0] sm:$0xff] %v573_v22  ;;  %v577_v24 = vld [vmem:[%s2035_s7 + $0x580] sm:$0xff]  ;;  %v579_v25 = vld [vmem:[%s2035_s7 + $0x590] sm:$0xff]  ;;  %576 = vst [vmem:[%s2040_s8 + $0x2b8] sm:$0xff] %v575_v23 }
  0x44   : > { %578 = vst [vmem:[%s2040_s8 + $0x2c0] sm:$0xff] %v577_v24  ;;  %580 = vst [vmem:[%s2040_s8 + $0x2c8] sm:$0xff] %v579_v25  ;;  %v581_v26 = vld [vmem:[%s2035_s7 + $0x5a0] sm:$0xff]  ;;  %v583_v27 = vld [vmem:[%s2035_s7 + $0x5b0] sm:$0xff] }
  0x45   : > { %v585_v28 = vld [vmem:[%s2035_s7 + $0x5c0] sm:$0xff]  ;;  %582 = vst [vmem:[%s2040_s8 + $0x2d0] sm:$0xff] %v581_v26  ;;  %584 = vst [vmem:[%s2040_s8 + $0x2d8] sm:$0xff] %v583_v27  ;;  %v587_v29 = vld [vmem:[%s2035_s7 + $0x5d0] sm:$0xff] }
  0x46   : > { %586 = vst [vmem:[%s2040_s8 + $0x2e0] sm:$0xff] %v585_v28  ;;  %v589_v30 = vld [vmem:[%s2035_s7 + $0x5e0] sm:$0xff]  ;;  %v591_v31 = vld [vmem:[%s2035_s7 + $0x5f0] sm:$0xff]  ;;  %588 = vst [vmem:[%s2040_s8 + $0x2e8] sm:$0xff] %v587_v29 }
  0x47   : > { %590 = vst [vmem:[%s2040_s8 + $0x2f0] sm:$0xff] %v589_v30  ;;  %592 = vst [vmem:[%s2040_s8 + $0x2f8] sm:$0xff] %v591_v31 }
  0x48 PF: > { %p1575_p7 = scmp.ge.s32.totalorder %s1952_s18, 1  ;;  %p605_p8 = scmp.lt.s32.totalorder %s1952_s18, 13 }
  0x4a   : > { %p606_p9 = pnand %p1575_p7, %p605_p8 }
  0x4b   : > { %s612_s9 = sand.u32 (!%p606_p9), 1, %s1928_s12   ;;  %s652_s10 = smul.u32 (!%p606_p9), 6, %s1936_s14 }
  0x4c   : > { %609 = sbr.rel (%p606_p9) target bundleno = 435 (0x1b3), region = 66  ;;  %s1577_s21 = sshll.u32 (!%p606_p9), %s1940_s15, 1 }
  0x4d   : > { %s1690_s11 = smul.u32 (!%p606_p9), 768, %s612_s9  ;;  %p655_p10 = scmp.lt.s32.totalorder (!%p606_p9), %s652_s10, 35 }
  0x4e   : > { %p665_p11 = scmp.lt.s32.totalorder (!%p606_p9), %s1577_s21, 3  ;;  %p1580_p12 = scmp.ne.s32.totalorder (!%p606_p9), %s1936_s14, 0 }
  0x4f   : > { %s2253_s5 = scalar_lea.vmem (!%p606_p9), [#allocation3], %s1690_s11 }
  0x51   : > { %s2406_s10 = smov (!%p655_p10, %s652_s10), 35  ;;  %s2408_s21 = smov (!%p665_p11, %s1577_s21), 3 }
  0x52   : > { %s1576_s22 = sshll.u32 %s2406_s10, 2  ;;  %s667_s12 = scalar_lea.vmem %s2391_s2, %s2408_s21 }
  0x53   : > { %s2241_s26 = scalar_lea.vmem %s2389_s0, %s1576_s22  ;;  %s1579_s29 = sshll.u32 %s2408_s21, 2 }
  0x54   : > { %s2251_s4 = scalar_lea.vmem %s2392_s3, %s1579_s29  ;;  %682 = sbr.rel (%p1580_p12) target bundleno = 91 (0x5b), region = 74 }
  0x59   : > { %v1954_v32 = vmov 0.0  }
  0x5a   : > { %683 = vst [vmem:[#allocation2] sm:$0xff] %v1954_v32  ;;  %684 = vst [vmem:[#allocation2 + $0x8] sm:$0xff] %v1954_v32 }
  0x5b PF: > { %v1748_v33 = vld [vmem:[%s2253_s5 + $0x74] ss:$8 sps:$4 sm:$0xff]   ;;  %v1752_v35 = vld [vmem:[%s2253_s5 + $0x70] ss:$8 sps:$4 sm:$0xff]   ;;  %v1754_v37 = vld [vmem:[%s2253_s5 + $0x64] ss:$8 sps:$4 sm:$0xff]  }
  0x5c   : > { %v1750_v34 = vld [vmem:[%s2253_s5 + $0x174] ss:$8 sps:$4 sm:$0xff]   ;;  %1287 = vmatprep.subr.bf16.mxu0 %v1748_v33  ;;  %v1753_v36 = vld [vmem:[%s2253_s5 + $0x170] ss:$8 sps:$4 sm:$0xff]   ;;  %v1756_v38 = vld [vmem:[%s2253_s5 + $0x164] ss:$8 sps:$4 sm:$0xff]  }
  0x5d   : > { %1328 = vmatprep.subr.bf16.mxu1 %v1750_v34  ;;  %1288 = vmatpush1.bf16.msra.mxu0 %v1752_v35  ;;  %v1758_v39 = vld [vmem:[%s2253_s5 + $0x60] ss:$8 sps:$4 sm:$0xff]   ;;  %v1760_v41 = vld [vmem:[%s2253_s5 + $0x54] ss:$8 sps:$4 sm:$0xff]   ;;  %v1764_v43 = vld [vmem:[%s2253_s5 + $0x50] ss:$8 sps:$4 sm:$0xff]  }
  0x5e   : > { %1329 = vmatpush1.bf16.msra.mxu1 %v1753_v36  ;;  %1289 = vmatprep.subr.bf16.mxu0 %v1754_v37  ;;  %v1759_v40 = vld [vmem:[%s2253_s5 + $0x160] ss:$8 sps:$4 sm:$0xff]   ;;  %v1762_v42 = vld [vmem:[%s2253_s5 + $0x154] ss:$8 sps:$4 sm:$0xff]   ;;  %v1765_v44 = vld [vmem:[%s2253_s5 + $0x150] ss:$8 sps:$4 sm:$0xff]  }
  0x5f   : > { %1330 = vmatprep.subr.bf16.mxu1 %v1756_v38  ;;  %v1766_v45 = vld [vmem:[%s2253_s5 + $0x44] ss:$8 sps:$4 sm:$0xff]   ;;  %v1770_v47 = vld [vmem:[%s2253_s5 + $0x40] ss:$8 sps:$4 sm:$0xff]   ;;  %v1772_v49 = vld [vmem:[%s2253_s5 + $0x34] ss:$8 sps:$4 sm:$0xff]  }
  0x60   : > { %v1768_v46 = vld [vmem:[%s2253_s5 + $0x144] ss:$8 sps:$4 sm:$0xff]   ;;  %v1771_v48 = vld [vmem:[%s2253_s5 + $0x140] ss:$8 sps:$4 sm:$0xff]   ;;  %v1774_v50 = vld [vmem:[%s2253_s5 + $0x134] ss:$8 sps:$4 sm:$0xff]  }
  0x61   : > { %1290 = vmatpush1.bf16.msra.mxu0 %v1758_v39  ;;  %v1776_v51 = vld [vmem:[%s2253_s5 + $0x30] ss:$8 sps:$4 sm:$0xff]   ;;  %v1778_v53 = vld [vmem:[%s2253_s5 + $0x24] ss:$8 sps:$4 sm:$0xff]   ;;  %v1782_v55 = vld [vmem:[%s2253_s5 + $0x20] ss:$8 sps:$4 sm:$0xff]  }
  0x62   : > { %1331 = vmatpush1.bf16.msra.mxu1 %v1759_v40  ;;  %1291 = vmatprep.subr.bf16.mxu0 %v1760_v41  ;;  %v1777_v52 = vld [vmem:[%s2253_s5 + $0x130] ss:$8 sps:$4 sm:$0xff]   ;;  %v1780_v54 = vld [vmem:[%s2253_s5 + $0x124] ss:$8 sps:$4 sm:$0xff]   ;;  %v1783_v56 = vld [vmem:[%s2253_s5 + $0x120] ss:$8 sps:$4 sm:$0xff]  }
  0x63   : > { %1332 = vmatprep.subr.bf16.mxu1 %v1762_v42  ;;  %v1784_v57 = vld [vmem:[%s2253_s5 + $0x14] ss:$8 sps:$4 sm:$0xff]   ;;  %v1788_v59 = vld [vmem:[%s2253_s5 + $0x10] ss:$8 sps:$4 sm:$0xff]   ;;  %v1790_v61 = vld [vmem:[%s2253_s5 + $0x4] ss:$8 sps:$4 sm:$0xff]  }
  0x64   : > { %v1786_v58 = vld [vmem:[%s2253_s5 + $0x114] ss:$8 sps:$4 sm:$0xff]   ;;  %v1789_v60 = vld [vmem:[%s2253_s5 + $0x110] ss:$8 sps:$4 sm:$0xff]   ;;  %v1792_v62 = vld [vmem:[%s2253_s5 + $0x104] ss:$8 sps:$4 sm:$0xff]  }
  0x65   : > { %1292 = vmatpush1.bf16.msra.mxu0 %v1764_v43  ;;  %v1794_v63 = vld [vmem:[%s2253_s5] ss:$8 sps:$4 sm:$0xff]   ;;  %v1796_v1 = vld [vmem:[%s2253_s5 + $0xf4] ss:$8 sps:$4 sm:$0xff]   ;;  %v1800_v3 = vld [vmem:[%s2253_s5 + $0xf0] ss:$8 sps:$4 sm:$0xff]  }
  0x66   : > { %1333 = vmatpush1.bf16.msra.mxu1 %v1765_v44  ;;  %1293 = vmatprep.subr.bf16.mxu0 %v1766_v45  ;;  %v1795_v0 = vld [vmem:[%s2253_s5 + $0x100] ss:$8 sps:$4 sm:$0xff]   ;;  %v1798_v2 = vld [vmem:[%s2253_s5 + $0x1f4] ss:$8 sps:$4 sm:$0xff]   ;;  %v1801_v4 = vld [vmem:[%s2253_s5 + $0x1f0] ss:$8 sps:$4 sm:$0xff]  }
  0x67   : > { %1334 = vmatprep.subr.bf16.mxu1 %v1768_v46  ;;  %v1802_v5 = vld [vmem:[%s2253_s5 + $0xe4] ss:$8 sps:$4 sm:$0xff]   ;;  %v1806_v7 = vld [vmem:[%s2253_s5 + $0xe0] ss:$8 sps:$4 sm:$0xff]   ;;  %v1808_v9 = vld [vmem:[%s2253_s5 + $0xd4] ss:$8 sps:$4 sm:$0xff]  }
  0x68   : > { %v1804_v6 = vld [vmem:[%s2253_s5 + $0x1e4] ss:$8 sps:$4 sm:$0xff]   ;;  %v1807_v8 = vld [vmem:[%s2253_s5 + $0x1e0] ss:$8 sps:$4 sm:$0xff]   ;;  %v1810_v10 = vld [vmem:[%s2253_s5 + $0x1d4] ss:$8 sps:$4 sm:$0xff]  }
  0x69   : > { %1294 = vmatpush1.bf16.msra.mxu0 %v1770_v47  ;;  %v1812_v11 = vld [vmem:[%s2253_s5 + $0xd0] ss:$8 sps:$4 sm:$0xff]   ;;  %v1814_v13 = vld [vmem:[%s2253_s5 + $0xc4] ss:$8 sps:$4 sm:$0xff]   ;;  %v1818_v18 = vld [vmem:[%s2253_s5 + $0xc0] ss:$8 sps:$4 sm:$0xff]  }
  0x6a   : > { %1335 = vmatpush1.bf16.msra.mxu1 %v1771_v48  ;;  %1295 = vmatprep.subr.bf16.mxu0 %v1772_v49  ;;  %v1813_v12 = vld [vmem:[%s2253_s5 + $0x1d0] ss:$8 sps:$4 sm:$0xff]   ;;  %v1816_v14 = vld [vmem:[%s2253_s5 + $0x1c4] ss:$8 sps:$4 sm:$0xff]   ;;  %v1819_v19 = vld [vmem:[%s2253_s5 + $0x1c0] ss:$8 sps:$4 sm:$0xff]  }
  0x6b   : > { %1336 = vmatprep.subr.bf16.mxu1 %v1774_v50  ;;  %v687_v15 = vld [vmem:[%s2241_s26] sm:$0xff]  ;;  %v688_v17 = vld [vmem:[%s2241_s26 + $0x8] sm:$0xff]  ;;  %v1826_v25 = vld [vmem:[%s2253_s5 + $0xa4] ss:$8 sps:$4 sm:$0xff]   ;;  %p1683_p13 = scmp.ne.s32.totalorder %s1936_s14, 5 }
  0x6c   : > { %v1582_v16 = vcombine.high %v687_v15, %v687_v15  ;;  %v1584_v20 = vcombine.high %v688_v17, %v688_v17  ;;  %v1820_v21 = vld [vmem:[%s2253_s5 + $0xb4] ss:$8 sps:$4 sm:$0xff]   ;;  %v1824_v23 = vld [vmem:[%s2253_s5 + $0xb0] ss:$8 sps:$4 sm:$0xff]   ;;  %v1828_v26 = vld [vmem:[%s2253_s5 + $0x1a4] ss:$8 sps:$4 sm:$0xff]   ;;  %v1581_v38 = vcombine.low %v687_v15, %v687_v15  ;;  %v1583_v39 = vcombine.low %v688_v17, %v688_v17 }
  0x6d   : > { %1296 = vmatpush1.bf16.msra.mxu0 %v1776_v51  ;;  %v1822_v22 = vld [vmem:[%s2253_s5 + $0x1b4] ss:$8 sps:$4 sm:$0xff]   ;;  %v1825_v24 = vld [vmem:[%s2253_s5 + $0x1b0] ss:$8 sps:$4 sm:$0xff]   ;;  %v1830_v27 = vld [vmem:[%s2253_s5 + $0xa0] ss:$8 sps:$4 sm:$0xff]  }
  0x6e   : > { %1337 = vmatpush1.bf16.msra.mxu1 %v1777_v52  ;;  %1297 = vmatprep.subr.bf16.mxu0 %v1778_v53  ;;  %v1831_v28 = vld [vmem:[%s2253_s5 + $0x1a0] ss:$8 sps:$4 sm:$0xff]   ;;  %v1832_v29 = vld [vmem:[%s2253_s5 + $0x94] ss:$8 sps:$4 sm:$0xff]   ;;  %v1836_v31 = vld [vmem:[%s2253_s5 + $0x90] ss:$8 sps:$4 sm:$0xff]  }
  0x6f   : > { %1338 = vmatprep.subr.bf16.mxu1 %v1780_v54  ;;  %1319 = vmatprep.mubr.bf16.mxu0 %v1582_v16  ;;  %v1834_v30 = vld [vmem:[%s2253_s5 + $0x194] ss:$8 sps:$4 sm:$0xff]   ;;  %v1837_v32 = vld [vmem:[%s2253_s5 + $0x190] ss:$8 sps:$4 sm:$0xff]   ;;  %v1838_v33 = vld [vmem:[%s2253_s5 + $0x84] ss:$8 sps:$4 sm:$0xff]  }
  0x70   : > { %1360 = vmatprep.mubr.bf16.mxu1 %v1584_v20  ;;  %v1840_v34 = vld [vmem:[%s2253_s5 + $0x184] ss:$8 sps:$4 sm:$0xff]   ;;  %v1842_v35 = vld [vmem:[%s2253_s5 + $0x80] ss:$8 sps:$4 sm:$0xff]   ;;  %v1850_v37 = vld [vmem:[%s2253_s5 + $0x274] ss:$8 sps:$4 sm:$0xff]  }
  0x71   : > { %1298 = vmatpush1.bf16.msra.mxu0 %v1782_v55  ;;  %v1843_v36 = vld [vmem:[%s2253_s5 + $0x180] ss:$8 sps:$4 sm:$0xff]   ;;  %v1848_v40 = vld [vmem:[%s2253_s5 + $0x270] ss:$8 sps:$4 sm:$0xff]   ;;  %v1853_v42 = vld [vmem:[%s2253_s5 + $0x264] ss:$8 sps:$4 sm:$0xff]  }
  0x72   : > { %1339 = vmatpush1.bf16.msra.mxu1 %v1783_v56  ;;  %1299 = vmatprep.subr.bf16.mxu0 %v1784_v57  ;;  %v2325_v41 = vld [vmem:[%s2241_s26 + $0x10] sm:$0xff]  ;;  %v1856_v45 = vld [vmem:[%s2253_s5 + $0x254] ss:$8 sps:$4 sm:$0xff]   ;;  %v1854_v46 = vld [vmem:[%s2253_s5 + $0x250] ss:$8 sps:$4 sm:$0xff]  }
  0x73   : > { %1340 = vmatprep.subr.bf16.mxu1 %v1786_v58  ;;  %v1586_v43 = vcombine.high %v2325_v41, %v2325_v41  ;;  %v1851_v44 = vld [vmem:[%s2253_s5 + $0x260] ss:$8 sps:$4 sm:$0xff]   ;;  %v1859_v47 = vld [vmem:[%s2253_s5 + $0x244] ss:$8 sps:$4 sm:$0xff]   ;;  %v1862_v49 = vld [vmem:[%s2253_s5 + $0x234] ss:$8 sps:$4 sm:$0xff]  }
  0x74   : > { %v1857_v48 = vld [vmem:[%s2253_s5 + $0x240] ss:$8 sps:$4 sm:$0xff]   ;;  %v1860_v50 = vld [vmem:[%s2253_s5 + $0x230] ss:$8 sps:$4 sm:$0xff]   ;;  %v1865_v51 = vld [vmem:[%s2253_s5 + $0x224] ss:$8 sps:$4 sm:$0xff]  }
  0x75   : > { %1300 = vmatpush1.bf16.msra.mxu0 %v1788_v59  ;;  %v1863_v52 = vld [vmem:[%s2253_s5 + $0x220] ss:$8 sps:$4 sm:$0xff]   ;;  %v1868_v53 = vld [vmem:[%s2253_s5 + $0x214] ss:$8 sps:$4 sm:$0xff]   ;;  %v1866_v54 = vld [vmem:[%s2253_s5 + $0x210] ss:$8 sps:$4 sm:$0xff]  }
  0x76   : > { %1341 = vmatpush1.bf16.msra.mxu1 %v1789_v60  ;;  %1301 = vmatprep.subr.bf16.mxu0 %v1790_v61  ;;  %v1871_v55 = vld [vmem:[%s2253_s5 + $0x204] ss:$8 sps:$4 sm:$0xff]   ;;  %v1869_v56 = vld [vmem:[%s2253_s5 + $0x200] ss:$8 sps:$4 sm:$0xff]   ;;  %v1874_v57 = vld [vmem:[%s2253_s5 + $0x2f4] ss:$8 sps:$4 sm:$0xff]  }
  0x77   : > { %1342 = vmatprep.subr.bf16.mxu1 %v1792_v62  ;;  %v1872_v58 = vld [vmem:[%s2253_s5 + $0x2f0] ss:$8 sps:$4 sm:$0xff]   ;;  %v1877_v59 = vld [vmem:[%s2253_s5 + $0x2e4] ss:$8 sps:$4 sm:$0xff]   ;;  %v1875_v60 = vld [vmem:[%s2253_s5 + $0x2e0] ss:$8 sps:$4 sm:$0xff]  }
  0x78   : > { %v1880_v61 = vld [vmem:[%s2253_s5 + $0x2d4] ss:$8 sps:$4 sm:$0xff]   ;;  %v1878_v62 = vld [vmem:[%s2253_s5 + $0x2d0] ss:$8 sps:$4 sm:$0xff]  }
  0x79   : > { %1302 = vmatpush1.bf16.msra.mxu0 %v1794_v63  ;;  %v1883_v63 = vld [vmem:[%s2253_s5 + $0x2c4] ss:$8 sps:$4 sm:$0xff]  }
  0x7a   : > { %1343 = vmatpush1.bf16.msra.mxu1 %v1795_v0  ;;  %1303 = vmatprep.subr.bf16.mxu0 %v1796_v1  ;;  %v1881_v0 = vld [vmem:[%s2253_s5 + $0x2c0] ss:$8 sps:$4 sm:$0xff]   ;;  %v1886_v1 = vld [vmem:[%s2253_s5 + $0x2b4] ss:$8 sps:$4 sm:$0xff]  }
  0x7b   : > { %1344 = vmatprep.subr.bf16.mxu1 %v1798_v2  ;;  %v1884_v2 = vld [vmem:[%s2253_s5 + $0x2b0] ss:$8 sps:$4 sm:$0xff]  }
  0x7d   : > { %1304 = vmatpush2.bf16.msra.mxu0 %v1800_v3  ;;  %v1889_v3 = vld [vmem:[%s2253_s5 + $0x2a4] ss:$8 sps:$4 sm:$0xff]  }
  0x7e   : > { %1345 = vmatpush2.bf16.msra.mxu1 %v1801_v4  ;;  %1305 = vmatprep.subr.bf16.mxu0 %v1802_v5  ;;  %v1887_v4 = vld [vmem:[%s2253_s5 + $0x2a0] ss:$8 sps:$4 sm:$0xff]   ;;  %v1892_v5 = vld [vmem:[%s2253_s5 + $0x294] ss:$8 sps:$4 sm:$0xff]  }
  0x7f   : > { %1346 = vmatprep.subr.bf16.mxu1 %v1804_v6  ;;  %v1890_v6 = vld [vmem:[%s2253_s5 + $0x290] ss:$8 sps:$4 sm:$0xff]  }
  0x81   : > { %1306 = vmatpush2.bf16.msra.mxu0 %v1806_v7  ;;  %v1895_v7 = vld [vmem:[%s2253_s5 + $0x284] ss:$8 sps:$4 sm:$0xff]  }
  0x82   : > { %1347 = vmatpush2.bf16.msra.mxu1 %v1807_v8  ;;  %1307 = vmatprep.subr.bf16.mxu0 %v1808_v9  ;;  %v1893_v8 = vld [vmem:[%s2253_s5 + $0x280] ss:$8 sps:$4 sm:$0xff]   ;;  %v1585_v9 = vcombine.low %v2325_v41, %v2325_v41 }
  0x83   : > { %1348 = vmatprep.subr.bf16.mxu1 %v1810_v10 }
  0x85   : > { %1308 = vmatpush2.bf16.msra.mxu0 %v1812_v11 }
  0x86   : > { %1349 = vmatpush2.bf16.msra.mxu1 %v1813_v12  ;;  %1309 = vmatprep.subr.bf16.mxu0 %v1814_v13 }
  0x87   : > { %1350 = vmatprep.subr.bf16.mxu1 %v1816_v14 }
  0x89   : > { %1310 = vmatpush2.bf16.msra.mxu0 %v1818_v18 }
  0x8a   : > { %1351 = vmatpush2.bf16.msra.mxu1 %v1819_v19  ;;  %1311 = vmatprep.subr.bf16.mxu0 %v1820_v21  ;;  %v685_v19 = vld [vmem:[#allocation2] sm:$0xff] }
  0x8b   : > { %1352 = vmatprep.subr.bf16.mxu1 %v1822_v22 }
  0x8d   : > { %1312 = vmatpush2.bf16.msra.mxu0 %v1824_v23  ;;  %v686_v23 = vld [vmem:[#allocation2 + $0x8] sm:$0xff] }
  0x8e   : > { %1353 = vmatpush2.bf16.msra.mxu1 %v1825_v24  ;;  %1313 = vmatprep.subr.bf16.mxu0 %v1826_v25 }
  0x8f   : > { %1354 = vmatprep.subr.bf16.mxu1 %v1828_v26 }
  0x91   : > { %1314 = vmatpush2.bf16.msra.mxu0 %v1830_v27 }
  0x92   : > { %1355 = vmatpush2.bf16.msra.mxu1 %v1831_v28  ;;  %1315 = vmatprep.subr.bf16.mxu0 %v1832_v29 }
  0x93   : > { %1356 = vmatprep.subr.bf16.mxu1 %v1834_v30 }
  0x95   : > { %1316 = vmatpush2.bf16.msra.mxu0 %v1836_v31 }
  0x96   : > { %1357 = vmatpush2.bf16.msra.mxu1 %v1837_v32  ;;  %1317 = vmatprep.subr.bf16.mxu0 %v1838_v33 }
  0x97   : > { %1358 = vmatprep.subr.bf16.mxu1 %v1840_v34 }
  0x99   : > { %1318 = vmatpush2.bf16.msra.mxu0 %v1842_v35 }
  0x9a   : > { %1359 = vmatpush2.bf16.msra.mxu1 %v1843_v36  ;;  %1369 = vmatprep.subr.bf16.mxu0 %v1850_v37 }
  0x9c   : > { %1320 = vmatmul.mubr.bf16.vlgmr.msra.gmra.mxu0 %v1581_v38 }
  0x9d   : > { %1361 = vmatmul.mubr.bf16.vlgmr.msra.gmra.mxu1 %v1583_v39  ;;  %1370 = vmatpush1.bf16.msra.mxu0 %v1848_v40 }
  0x9e   : > { %1401 = vmatprep.mubr.bf16.mxu0 %v1586_v43  ;;  %1371 = vmatprep.subr.bf16.mxu0 %v1853_v42 }
  0xa1   : > { %1372 = vmatpush1.bf16.msra.mxu0 %v1851_v44 }
  0xa2   : > { %1373 = vmatprep.subr.bf16.mxu0 %v1856_v45 }
  0xa5   : > { %1374 = vmatpush1.bf16.msra.mxu0 %v1854_v46 }
  0xa6   : > { %1375 = vmatprep.subr.bf16.mxu0 %v1859_v47 }
  0xa9   : > { %1376 = vmatpush1.bf16.msra.mxu0 %v1857_v48 }
  0xaa   : > { %1377 = vmatprep.subr.bf16.mxu0 %v1862_v49 }
  0xad   : > { %1378 = vmatpush1.bf16.msra.mxu0 %v1860_v50 }
  0xae   : > { %1379 = vmatprep.subr.bf16.mxu0 %v1865_v51 }
  0xb1   : > { %1380 = vmatpush1.bf16.msra.mxu0 %v1863_v52 }
  0xb2   : > { %1381 = vmatprep.subr.bf16.mxu0 %v1868_v53 }
  0xb5   : > { %1382 = vmatpush1.bf16.msra.mxu0 %v1866_v54 }
  0xb6   : > { %1383 = vmatprep.subr.bf16.mxu0 %v1871_v55 }
  0xb9   : > { %1384 = vmatpush1.bf16.msra.mxu0 %v1869_v56 }
  0xba   : > { %1385 = vmatprep.subr.bf16.mxu0 %v1874_v57 }
  0xbd   : > { %1386 = vmatpush2.bf16.msra.mxu0 %v1872_v58 }
  0xbe   : > { %1387 = vmatprep.subr.bf16.mxu0 %v1877_v59 }
  0xc1   : > { %1388 = vmatpush2.bf16.msra.mxu0 %v1875_v60 }
  0xc2   : > { %1389 = vmatprep.subr.bf16.mxu0 %v1880_v61 }
  0xc5   : > { %1390 = vmatpush2.bf16.msra.mxu0 %v1878_v62 }
  0xc6   : > { %1391 = vmatprep.subr.bf16.mxu0 %v1883_v63 }
  0xc9   : > { %1392 = vmatpush2.bf16.msra.mxu0 %v1881_v0 }
  0xca   : > { %1393 = vmatprep.subr.bf16.mxu0 %v1886_v1 }
  0xcd   : > { %1394 = vmatpush2.bf16.msra.mxu0 %v1884_v2 }
  0xce   : > { %1395 = vmatprep.subr.bf16.mxu0 %v1889_v3 }
  0xd1   : > { %1396 = vmatpush2.bf16.msra.mxu0 %v1887_v4 }
  0xd2   : > { %1397 = vmatprep.subr.bf16.mxu0 %v1892_v5 }
  0xd5   : > { %1398 = vmatpush2.bf16.msra.mxu0 %v1890_v6 }
  0xd6   : > { %1399 = vmatprep.subr.bf16.mxu0 %v1895_v7 }
  0xd9   : > { %1400 = vmatpush2.bf16.msra.mxu0 %v1893_v8 }
  0xdc   : > { %1402 = vmatmul.mubr.bf16.vlgmr.msra.gmra.mxu0 %v1585_v9 }
 0x15c   : > { %v1321_v10 = vpop.f32.mrf.mxu0 }
 0x15d   : > { %v1362_v11 = vpop.f32.mrf.mxu1 }
 0x15e   : > { %v1323_v12 = vpop.f32.mrf.mxu0  ;;  %v1363_v18 = vadd.f32 %v1362_v11, %v1321_v10 }
 0x15f   : > { %v1364_v13 = vpop.f32.mrf.mxu1 }
 0x160   : > { %v1325_v14 = vpop.f32.mrf.mxu0  ;;  %v1365_v21 = vadd.f32 %v1364_v13, %v1323_v12 }
 0x161   : > { %v1366_v15 = vpop.f32.mrf.mxu1 }
 0x162   : > { %v1326_v16 = vpop.f32.mrf.mxu0 }
 0x163   : > { %v1367_v17 = vpop.f32.mrf.mxu1 }
 0x19c   : > { %v1403_v20 = vpop.f32.mrf.mxu0 }
 0x19d   : > { %v1404_v22 = vadd.f32 %v1403_v20, %v1363_v18 }
 0x19e   : > { %v1405_v24 = vpop.f32.mrf.mxu0 }
 0x19f   : > { %v1410_v25 = vadd.f32 %v1404_v22, %v685_v19  ;;  %v1406_v26 = vadd.f32 %v1405_v24, %v1365_v21  ;;  %1417 = sbr.rel (%p1683_p13) target bundleno = 435 (0x1b3), region = 78 }
 0x1a0   : > { %v1407_v27 = vpop.f32.mrf.mxu0 }
 0x1a1   : > { %1412 = vst [vmem:[#allocation2] sm:$0xff] %v1410_v25  ;;  %v1411_v28 = vadd.f32 %v1406_v26, %v686_v23 }
 0x1a2   : > { %v1408_v29 = vpop.f32.mrf.mxu0 }
 0x1a3   : > { %1413 = vst [vmem:[#allocation2 + $0x8] sm:$0xff] %v1411_v28 }
 0x1a4   : > { %v1422_v30 = vlaneseq  ;;  %v1420_v32 = vld [vmem:[%s667_s12] sm:$0x3] }
 0x1a6   : > { %v1423_v31 = vshrl.u32 %v1422_v30, 7 }
 0x1a8   : > { %v1424_v33 = vsub.s32 0, %v1423_v31  ;;  %v1428_v34 = vsub.s32 1, %v1423_v31  ;;  %v1418_v35 = vld [vmem:[#allocation2] sm:$0xff] }
 0x1aa   : > { %v1419_v36 = vld [vmem:[#allocation2 + $0x8] sm:$0xff]  ;;  %v1425_v37 = vrot.slane %v1420_v32, %v1424_v33  ;;  %v1429_v38 = vrot.slane %v1420_v32, %v1428_v34 }
 0x1ac   : > { %v1432_v39 = vadd.f32 %v1425_v37, %v1418_v35  ;;  %v1433_v40 = vadd.f32 %v1429_v38, %v1419_v36 }
 0x1ae   : > { %v1434_v41 = vmax.f32 %v1432_v39, 0.0  ;;  %v1435_v42 = vmax.f32 %v1433_v40, 0.0 }
 0x1b0   : > { %v1688_v43 = vpack.c.bf16 %v1435_v42, %v1434_v41 }
 0x1b2   : > { %1444 = vst [vmem:[%s2251_s4] sm:$0xff] %v1688_v43 }
 0x1b3 PF: > { %s13_s18 = sadd.s32 1, %s1952_s18   ;;  %s2393_s12 = smov %s1932_s13 }
 0x1b4   : > { %p10_p0 = scmp.ge.s32.totalorder %s13_s18, 14   ;;  %s2394_s13 = smov %s2026_s25 }
 0x1b5   : > { %s2395_s14 = smov %s1944_s16  ;;  %s2396_s15 = smov %s1948_s17 }
 0x1b6   : > { %s2397_s16 = smov %s2400_s19  ;;  %s2398_s17 = smov %s2404_s20 }
 0x1b7   :  { %12 = sbr.rel (!%p10_p0) target bundleno = 4 (0x4), region = 119 }

// kernel: resnet18_forward.43
= control target key start
LH: loop header
LB: loop body
LE: loop exit
PB: predicated region body
PF: predicated region fallthrough
CT: control target
= control target key end

     0   :  { %v94_v32 = vlaneseq  ;;  %s614_s0 = inlined_call_operand.vmem [shape: bf16[2,1,512], index: 0, kind: input, shape index: {}]   ;;  %s615_s1 = inlined_call_operand.vmem [shape: f32[512,128], index: 1, kind: input, shape index: {}]   ;;  %s616_s2 = inlined_call_operand.vmem [shape: f32[1,128], index: 2, kind: input, shape index: {}]   ;;  %s617_s3 = inlined_call_operand.hbm [shape: f32[2,128], index: 3, kind: output, shape index: {}]  }
   0x1   :  { %v52_v0 = vld [vmem:[%s615_s1 + $0xf8] sm:$0xff]  ;;  %v51_v4 = vld [vmem:[%s615_s1 + $0xf0] sm:$0xff]  ;;  %v50_v8 = vld [vmem:[%s615_s1 + $0xe8] sm:$0xff] }
   0x2   :  { %v84_v1 = vld [vmem:[%s615_s1 + $0x1f8] sm:$0xff]  ;;  %295 = vmatprep.subr.mxu0 %v52_v0  ;;  %v83_v5 = vld [vmem:[%s615_s1 + $0x1f0] sm:$0xff]  ;;  %v82_v9 = vld [vmem:[%s615_s1 + $0x1e8] sm:$0xff]  ;;  %v95_v41 = vshrl.u32 %v94_v32, 7 }
   0x3   :  { %v36_v2 = vld [vmem:[%s615_s1 + $0x78] sm:$0xff]  ;;  %330 = vmatprep.subr.mxu1 %v84_v1  ;;  %v35_v6 = vld [vmem:[%s615_s1 + $0x70] sm:$0xff]  ;;  %v34_v10 = vld [vmem:[%s615_s1 + $0x68] sm:$0xff] }
   0x4   :  { %v68_v3 = vld [vmem:[%s615_s1 + $0x178] sm:$0xff]  ;;  %296 = vmatpush3.msra.mxu0 %v36_v2  ;;  %v67_v7 = vld [vmem:[%s615_s1 + $0x170] sm:$0xff]  ;;  %v66_v11 = vld [vmem:[%s615_s1 + $0x168] sm:$0xff]  ;;  %v100_v51 = vsub.s32 2, %v95_v41 }
   0x5   :  { %331 = vmatpush3.msra.mxu1 %v68_v3  ;;  %297 = vmatprep.subr.mxu0 %v51_v4  ;;  %v49_v12 = vld [vmem:[%s615_s1 + $0xe0] sm:$0xff]  ;;  %v48_v16 = vld [vmem:[%s615_s1 + $0xd8] sm:$0xff]  ;;  %v47_v20 = vld [vmem:[%s615_s1 + $0xd0] sm:$0xff] }
   0x6   :  { %332 = vmatprep.subr.mxu1 %v83_v5  ;;  %298 = vmatpush3.msra.mxu0 %v35_v6  ;;  %v81_v13 = vld [vmem:[%s615_s1 + $0x1e0] sm:$0xff]  ;;  %v80_v17 = vld [vmem:[%s615_s1 + $0x1d8] sm:$0xff]  ;;  %v79_v21 = vld [vmem:[%s615_s1 + $0x1d0] sm:$0xff] }
   0x7   :  { %333 = vmatpush3.msra.mxu1 %v67_v7  ;;  %299 = vmatprep.subr.mxu0 %v50_v8  ;;  %v33_v14 = vld [vmem:[%s615_s1 + $0x60] sm:$0xff]  ;;  %v32_v18 = vld [vmem:[%s615_s1 + $0x58] sm:$0xff]  ;;  %v31_v22 = vld [vmem:[%s615_s1 + $0x50] sm:$0xff] }
   0x8   :  { %334 = vmatprep.subr.mxu1 %v82_v9  ;;  %v65_v15 = vld [vmem:[%s615_s1 + $0x160] sm:$0xff]  ;;  %300 = vmatpush3.msra.mxu0 %v34_v10  ;;  %v64_v19 = vld [vmem:[%s615_s1 + $0x158] sm:$0xff]  ;;  %v63_v23 = vld [vmem:[%s615_s1 + $0x150] sm:$0xff] }
   0x9   :  { %335 = vmatpush3.msra.mxu1 %v66_v11  ;;  %301 = vmatprep.subr.mxu0 %v49_v12  ;;  %v46_v24 = vld [vmem:[%s615_s1 + $0xc8] sm:$0xff]  ;;  %v45_v28 = vld [vmem:[%s615_s1 + $0xc0] sm:$0xff]  ;;  %v44_v33 = vld [vmem:[%s615_s1 + $0xb8] sm:$0xff] }
   0xa   :  { %336 = vmatprep.subr.mxu1 %v81_v13  ;;  %302 = vmatpush3.msra.mxu0 %v33_v14  ;;  %v78_v25 = vld [vmem:[%s615_s1 + $0x1c8] sm:$0xff]  ;;  %v77_v29 = vld [vmem:[%s615_s1 + $0x1c0] sm:$0xff]  ;;  %v76_v34 = vld [vmem:[%s615_s1 + $0x1b8] sm:$0xff] }
   0xb   :  { %337 = vmatpush3.msra.mxu1 %v65_v15  ;;  %303 = vmatprep.subr.mxu0 %v48_v16  ;;  %v30_v26 = vld [vmem:[%s615_s1 + $0x48] sm:$0xff]  ;;  %v29_v30 = vld [vmem:[%s615_s1 + $0x40] sm:$0xff]  ;;  %v28_v35 = vld [vmem:[%s615_s1 + $0x38] sm:$0xff] }
   0xc   :  { %338 = vmatprep.subr.mxu1 %v80_v17  ;;  %304 = vmatpush3.msra.mxu0 %v32_v18  ;;  %v62_v27 = vld [vmem:[%s615_s1 + $0x148] sm:$0xff]  ;;  %v61_v31 = vld [vmem:[%s615_s1 + $0x140] sm:$0xff]  ;;  %v60_v36 = vld [vmem:[%s615_s1 + $0x138] sm:$0xff] }
   0xd   :  { %339 = vmatpush3.msra.mxu1 %v64_v19  ;;  %305 = vmatprep.subr.mxu0 %v47_v20  ;;  %v43_v37 = vld [vmem:[%s615_s1 + $0xb0] sm:$0xff]  ;;  %v42_v42 = vld [vmem:[%s615_s1 + $0xa8] sm:$0xff]  ;;  %v41_v46 = vld [vmem:[%s615_s1 + $0xa0] sm:$0xff] }
   0xe   :  { %340 = vmatprep.subr.mxu1 %v79_v21  ;;  %306 = vmatpush3.msra.mxu0 %v31_v22  ;;  %v75_v38 = vld [vmem:[%s615_s1 + $0x1b0] sm:$0xff]  ;;  %v74_v43 = vld [vmem:[%s615_s1 + $0x1a8] sm:$0xff]  ;;  %v73_v47 = vld [vmem:[%s615_s1 + $0x1a0] sm:$0xff] }
   0xf   :  { %341 = vmatpush3.msra.mxu1 %v63_v23  ;;  %307 = vmatprep.subr.mxu0 %v46_v24  ;;  %v27_v39 = vld [vmem:[%s615_s1 + $0x30] sm:$0xff]  ;;  %v26_v44 = vld [vmem:[%s615_s1 + $0x28] sm:$0xff]  ;;  %v25_v48 = vld [vmem:[%s615_s1 + $0x20] sm:$0xff] }
  0x10   :  { %342 = vmatprep.subr.mxu1 %v78_v25  ;;  %308 = vmatpush3.msra.mxu0 %v30_v26  ;;  %v59_v40 = vld [vmem:[%s615_s1 + $0x130] sm:$0xff]  ;;  %v58_v45 = vld [vmem:[%s615_s1 + $0x128] sm:$0xff]  ;;  %v57_v49 = vld [vmem:[%s615_s1 + $0x120] sm:$0xff] }
  0x11   :  { %343 = vmatpush3.msra.mxu1 %v62_v27  ;;  %309 = vmatprep.subr.mxu0 %v45_v28  ;;  %v292_v50 = vld [vmem:[%s614_s0] sm:$0xff]  }
  0x12   :  { %344 = vmatprep.subr.mxu1 %v77_v29  ;;  %310 = vmatpush3.msra.mxu0 %v29_v30 }
  0x13   :  { %345 = vmatpush3.msra.mxu1 %v61_v31  ;;  %311 = vmatprep.subr.mxu0 %v44_v33 }
  0x14   :  { %346 = vmatprep.subr.mxu1 %v76_v34  ;;  %312 = vmatpush3.msra.mxu0 %v28_v35 }
  0x15   :  { %347 = vmatpush3.msra.mxu1 %v60_v36  ;;  %313 = vmatprep.subr.mxu0 %v43_v37 }
  0x16   :  { %348 = vmatprep.subr.mxu1 %v75_v38  ;;  %314 = vmatpush3.msra.mxu0 %v27_v39 }
  0x17   :  { %349 = vmatpush3.msra.mxu1 %v59_v40  ;;  %315 = vmatprep.subr.mxu0 %v42_v42 }
  0x18   :  { %350 = vmatprep.subr.mxu1 %v74_v43 }
  0x19   :  { %8 = vsyncpa [#allocation3], 0  ;;  %316 = vmatpush3.msra.mxu0 %v26_v44  ;;  %351 = vmatpush3.msra.mxu1 %v58_v45  ;;  %v40_v52 = vld [vmem:[%s615_s1 + $0x98] sm:$0xff]  ;;  %v293_v54 = vunpack.c.l.bf16 %v292_v50  ;;  %v294_v55 = vunpack.c.h.bf16 %v292_v50  ;;  %v108_v56 = vsub.s32 6, %v95_v41  ;;  %v96_v57 = vsub.s32 0, %v95_v41  ;;  %v39_v61 = vld [vmem:[%s615_s1 + $0x90] sm:$0xff] }
  0x1a   :  { %v72_v53 = vld [vmem:[%s615_s1 + $0x198] sm:$0xff]  ;;  %317 = vmatprep.subr.mxu0 %v41_v46  ;;  %352 = vmatprep.subr.mxu1 %v73_v47  ;;  %v104_v60 = vsub.s32 4, %v95_v41  ;;  %v71_v62 = vld [vmem:[%s615_s1 + $0x190] sm:$0xff]  ;;  %v38_v3 = vld [vmem:[%s615_s1 + $0x88] sm:$0xff]  ;;  %vm126_vm0 = vcmask 1041409  }
  0x1b   :  { %v24_v58 = vld [vmem:[%s615_s1 + $0x18] sm:$0xff]  ;;  %318 = vmatpush3.msra.mxu0 %v25_v48  ;;  %353 = vmatpush3.msra.mxu1 %v57_v49  ;;  %v23_v63 = vld [vmem:[%s615_s1 + $0x10] sm:$0xff]  ;;  %v101_v1 = vrot.slane %v293_v54, %v100_v51  ;;  %v117_v2 = vrot.slane %v294_v55, %v100_v51  ;;  %v70_v4 = vld [vmem:[%s615_s1 + $0x188] sm:$0xff]  ;;  %v109_v5 = vrot.slane %v293_v54, %v108_v56 }
  0x1c   :  { %v56_v59 = vld [vmem:[%s615_s1 + $0x118] sm:$0xff]  ;;  %319 = vmatprep.subr.mxu0 %v40_v52  ;;  %354 = vmatprep.subr.mxu1 %v72_v53  ;;  %v55_v0 = vld [vmem:[%s615_s1 + $0x110] sm:$0xff]  ;;  %v125_v6 = vrot.slane %v294_v55, %v108_v56  ;;  %v97_v7 = vrot.slane %v293_v54, %v96_v57  ;;  %v22_v8 = vld [vmem:[%s615_s1 + $0x8] sm:$0xff]  ;;  %v113_v10 = vrot.slane %v294_v55, %v96_v57 }
  0x1d   :  { %320 = vmatpush3.msra.mxu0 %v24_v58  ;;  %355 = vmatpush3.msra.mxu1 %v56_v59  ;;  %v54_v9 = vld [vmem:[%s615_s1 + $0x108] sm:$0xff]  ;;  %v105_v11 = vrot.slane %v293_v54, %v104_v60  ;;  %v121_v12 = vrot.slane %v294_v55, %v104_v60  ;;  %v37_v13 = vld [vmem:[%s615_s1 + $0x80] sm:$0xff]  ;;  %v128_v16 = vsel %vm126_vm0, %v117_v2, %v101_v1 }
  0x1e   :  { %321 = vmatprep.subr.mxu0 %v39_v61  ;;  %356 = vmatprep.subr.mxu1 %v71_v62  ;;  %v69_v14 = vld [vmem:[%s615_s1 + $0x180] sm:$0xff]  ;;  %v130_v18 = vsel %vm126_vm0, %v125_v6, %v109_v5  ;;  %v127_v19 = vsel %vm126_vm0, %v113_v10, %v97_v7 }
  0x1f   :  { %322 = vmatpush3.msra.mxu0 %v23_v63  ;;  %357 = vmatpush3.msra.mxu1 %v55_v0  ;;  %v21_v15 = vld [vmem:[%s615_s1] sm:$0xff]  ;;  %v129_v20 = vsel %vm126_vm0, %v121_v12, %v105_v11 }
  0x20   :  { %323 = vmatprep.subr.mxu0 %v38_v3  ;;  %358 = vmatprep.subr.mxu1 %v70_v4  ;;  %v53_v17 = vld [vmem:[%s615_s1 + $0x100] sm:$0xff]  ;;  %s388_s1 = smov [#allocation2]  }
  0x21   :  { %324 = vmatpush3.msra.mxu0 %v22_v8  ;;  %359 = vmatpush3.msra.mxu1 %v54_v9  ;;  %v290_v23 = vld [vmem:[%s616_s2] ss:$0 sm:$0xff]  ;;  %s282_s7 = sshll.u32 %s388_s1, 4  ;;  %s283_s7 = int_to_ptr.vmem [resolvable:$true] %s282_s7 }
  0x22   :  { %325 = vmatprep.subr.mxu0 %v37_v13  ;;  %360 = vmatprep.subr.mxu1 %v69_v14  ;;  %s366_s8 = scalar_lea.vmem %s283_s7, 32  ;;  %p371_p1 = scmp.lt.s32.totalorder %s283_s7, %s283_s7 }
  0x23   :  { %326 = vmatpush3.msra.mxu0 %v21_v15  ;;  %199 = vmatprep.mubr.f32.mxu0 %v128_v16  ;;  %p367_p0 = scmp.ne.s32.totalorder %s283_s7, %s366_s8  ;;  %p372_p2 = scmp.lt.s32.totalorder %s366_s8, %s366_s8 }
  0x24   :  { %361 = vmatpush3.msra.mxu1 %v53_v17  ;;  %269 = vmatprep.mubr.f32.mxu1 %v130_v18 }
  0x25   :  { %200 = vmatmul.mubr.f32.vlgmr.msra.gmra.mxu0 %v127_v19  ;;  %270 = vmatmul.mubr.f32.vlgmr.msra.gmra.mxu1 %v129_v20  ;;  %p373_p3 = por %p372_p2, %p371_p1 }
  0x27   :  { %p374_p4 = pnand %p373_p3, %p367_p0 }
  0xe5   :  { %v327_v21 = vpop.f32.mrf.mxu0  ;;  %v362_v22 = vpop.f32.mrf.mxu1 }
  0xe7   :  { %v328_v24 = vpop.f32.mrf.mxu0  ;;  %v363_v25 = vpop.f32.mrf.mxu1 }
  0xe8   :  { %v329_v26 = vadd.f32 %v328_v24, %v327_v21  ;;  %v364_v28 = vadd.f32 %v363_v25, %v362_v22 }
  0xea   :  { %v202_v27 = vadd.f32 %v329_v26, %v290_v23 }
  0xec   :  { %v272_v29 = vadd.f32 %v364_v28, %v202_v27 }
  0xee   :  { %275 = vst [vmem:[#allocation2] sm:$0x3] %v272_v29 }
  0xef   :  { %377 = shalt.err (!%p374_p4)
}
  0xf0   :  { %285 = dma.vmem_to_hbm [thread:$0]  %s283_s7, 32, %s617_s3, [#allocation3]  }
  0xf1   :  { %386 = dma.done.wait [#allocation3], 32  }
  0xf2   :  { %387 = vsyncadd [#allocation3], 4294967264 }
  0xf3   :  { %289 = vsyncpa [#allocation3], 1 }

</bundles_post_ra>
